<compile_context>
chip_gen: v5e
topology: v5e:2x2
jax: 0.10.0
libtpu: 0.0.40
codegen_flags: <defaults>
</compile_context>

<pallas_src>
import functools

import jax
import jax.numpy as jnp
from jax import lax
from jax.experimental import pallas as pl
from jax.experimental.pallas import tpu as pltpu


_BN_EPS = 1e-5
_LEAKY_SLOPE = 0.2
_LANE = 128                       # lane-dense channel padding
_TM_MAX = 256                     # M-tile cap
_TN_MAX = 256                     # Cout-tile cap
_VMEM_LIMIT = 48 * 1024 * 1024    # stay well under the 64 MiB physical VMEM on v7x


def _round_up(x, m):
    return (x + m - 1) // m * m


def _phase_taps(k, s, p):
    """Sub-pixel decomposition of a 1-D transposed conv (kernel k, stride s, pad p).

    For output phase ph (= oy % s) returns the list of (kh, d) pairs such that
        y[s*oy2 + ph] += x[oy2 + d] * w[kh]
    (out-of-range input rows are handled by zero padding)."""
    taps = []
    for ph in range(s):
        t = [(kh, (ph + p - kh) // s) for kh in range(k) if (ph + p - kh) % s == 0]
        t.sort(key=lambda e: e[1])
        taps.append(t)
    return taps


# ----------------------------------------------------------------------------
# Pallas kernels
# ----------------------------------------------------------------------------
def _conv_stats_kernel(x_ref, w_ref, b_ref, y_ref, st_ref):
    # x_ref: (1, TM, K) bf16   w_ref: (1, K, TN) bf16   b_ref: (1, TN) f32
    # y_ref: (1, TM, TN)       st_ref: (1, 2, TN) f32 (per-tile sum / sumsq)
    acc = jnp.dot(x_ref[0], w_ref[0], preferred_element_type=jnp.float32)
    acc = acc + b_ref[...]
    y_ref[0] = acc.astype(y_ref.dtype)
    # BatchNorm partial statistics from the f32 accumulator (pre-downcast).
    s = jnp.sum(acc, axis=0, keepdims=True)
    ss = jnp.sum(acc * acc, axis=0, keepdims=True)
    st_ref[0] = jnp.concatenate([s, ss], axis=0)


def _bn_act_kernel(y_ref, sc_ref, sh_ref, o_ref, *, use_act, use_sigmoid):
    # y_ref: (1, TM, TN)   sc_ref/sh_ref: (1, TN) f32   o_ref: (1, TM, TN)
    z = y_ref[0] * sc_ref[...] + sh_ref[...]
    if use_act:
        z = jnp.where(z >= 0.0, z, _LEAKY_SLOPE * z)
    if use_sigmoid:
        z = 1.0 / (1.0 + jnp.exp(-z))
    o_ref[0] = z.astype(o_ref.dtype)


# ----------------------------------------------------------------------------
# One UpConv block
# ----------------------------------------------------------------------------
def upconv_block(x_nhwc, lp, *, use_sigmoid, out_dtype):
    n, h, w_sp, cin = x_nhwc.shape
    k, s, p = lp["k"], lp["stride"], lp["padding"]
    cout, cp, kcol = lp["cout"], lp["cp"], lp["kcol"]
    taps = lp["taps"]
    tpd = len(taps[0])
    nph = s * s
    assert kcol == tpd * tpd * cin

    hout = (h - 1) * s - 2 * p + k
    wout = (w_sp - 1) * s - 2 * p + k
    assert hout % s == 0 and wout % s == 0
    ho, wo = hout // s, wout // s                  # per-phase output spatial dims
    m = n * ho * wo

    # pad the (undilated) input so every tap is an in-bounds slice
    d_all = [d for ph in taps for (_, d) in ph]
    pad_lo = max(0, -min(d_all))
    pad_hi_h = max(0, ho - 1 + max(d_all) - (h - 1))
    pad_hi_w = max(0, wo - 1 + max(d_all) - (w_sp - 1))
    xp = jnp.pad(x_nhwc, ((0, 0), (pad_lo, pad_hi_h), (pad_lo, pad_hi_w), (0, 0)))

    # sub-pixel im2col: (P, M, tpd^2*Cin) -- no zero-dilated rows
    cols = []
    for py in range(s):
        for px in range(s):
            parts = [xp[:, dy + pad_lo:dy + pad_lo + ho,
                        dx + pad_lo:dx + pad_lo + wo, :]
                     for (_, dy) in taps[py] for (_, dx) in taps[px]]
            col = jnp.concatenate(parts, axis=-1)              # (N, Ho, Wo, K)
            cols.append(col.reshape(1, m, kcol))
    x_cols = jnp.concatenate(cols, axis=0).astype(jnp.bfloat16)

    # tiling (tile sizes divide exactly; blocks are full-dim or (8,128) aligned)
    tm = min(m, _TM_MAX)
    tn = min(cp, _TN_MAX)
    mpb = m // tm
    nnb = cp // tn
    assert m % tm == 0 and cp % tn == 0
    grid = (nph, mpb, nnb)

    # ---- pass 1: conv matmul + bias + per-tile channel stats -----------------
    y, stats = pl.pallas_call(
        _conv_stats_kernel,
        out_shape=(jax.ShapeDtypeStruct((nph, m, cp), jnp.bfloat16),
                   jax.ShapeDtypeStruct((nph * mpb, 2, cp), jnp.float32)),
        grid=grid,
        in_specs=[
            pl.BlockSpec((1, tm, kcol), lambda ph, mi, ni: (ph, mi, 0)),
            pl.BlockSpec((1, kcol, tn), lambda ph, mi, ni: (ph, 0, ni)),
            pl.BlockSpec((1, tn), lambda ph, mi, ni: (0, ni)),
        ],
        out_specs=(
            pl.BlockSpec((1, tm, tn), lambda ph, mi, ni: (ph, mi, ni)),
            pl.BlockSpec((1, 2, tn), lambda ph, mi, ni: (ph * mpb + mi, 0, ni)),
        ),
        compiler_params=pltpu.CompilerParams(
            dimension_semantics=("parallel", "parallel", "parallel"),
            vmem_limit_bytes=_VMEM_LIMIT),
    )(x_cols, lp["w_cols"], lp["bias"])

    # ---- finish BN stats (tiny (2, Cp) reduction) and build affine -----------
    if lp["use_bn"]:
        ch = jnp.sum(stats, axis=0)                            # (2, Cp)
        inv_cnt = 1.0 / float(nph * m)
        mean = ch[0] * inv_cnt
        var = jnp.maximum(ch[1] * inv_cnt - mean * mean, 0.0)
        scale = lp["gamma"] * lax.rsqrt(var + _BN_EPS)[None, :]
        shift = lp["beta"] - mean[None, :] * scale
    else:
        scale = jnp.ones((1, cp), jnp.float32)
        shift = jnp.zeros((1, cp), jnp.float32)

    # ---- pass 2: normalize + activation ---------------------------------------
    kern2 = functools.partial(_bn_act_kernel,
                              use_act=lp["use_act"], use_sigmoid=use_sigmoid)
    z = pl.pallas_call(
        kern2,
        out_shape=jax.ShapeDtypeStruct((nph, m, cp), out_dtype),
        grid=grid,
        in_specs=[
            pl.BlockSpec((1, tm, tn), lambda ph, mi, ni: (ph, mi, ni)),
            pl.BlockSpec((1, tn), lambda ph, mi, ni: (0, ni)),
            pl.BlockSpec((1, tn), lambda ph, mi, ni: (0, ni)),
        ],
        out_specs=pl.BlockSpec((1, tm, tn), lambda ph, mi, ni: (ph, mi, ni)),
        compiler_params=pltpu.CompilerParams(
            dimension_semantics=("parallel", "parallel", "parallel"),
            vmem_limit_bytes=_VMEM_LIMIT),
    )(y, scale, shift)

    # drop channel padding, pixel-shuffle the s*s phase planes back to NHWC
    z = z[:, :, :cout].reshape(s, s, n, ho, wo, cout)
    z = z.transpose(2, 3, 0, 4, 1, 5).reshape(n, ho * s, wo * s, cout)
    return z


# ----------------------------------------------------------------------------
# Parameters (shapes from Generator.__init__)
# ----------------------------------------------------------------------------
def _layer_cfg(latent_dim):
    # (cin, cout, k, s, p, use_bn, use_act)
    return [
        (latent_dim, 512, 4, 2, 1, True, True),
        (512,        256, 4, 2, 1, True, True),
        (256,        128, 4, 2, 1, True, True),
        (128,         64, 4, 2, 1, True, True),
        (64,          32, 4, 2, 1, True, True),
        (32,           3, 3, 1, 1, True, False),   # no LeakyReLU; Sigmoid follows
    ]


def init_generator_params(key, latent_dim):
    params = []
    for (cin, cout, k, s, p, use_bn, use_act) in _layer_cfg(latent_dim):
        key, k_w, k_b = jax.random.split(key, 3)
        # PyTorch ConvTranspose2d weight layout: (Cin, Cout, KH, KW).
        w_t = 0.05 * jax.random.normal(k_w, (cin, cout, k, k), jnp.float32)
        bias = 0.05 * jax.random.normal(k_b, (cout,), jnp.float32)

        taps = _phase_taps(k, s, p)
        assert all(len(t) == len(taps[0]) for t in taps)
        tpd = len(taps[0])
        cp = _round_up(cout, _LANE)

        # Pack the phase-decomposed weight matrices: (P, tpd^2*Cin, Cp).
        phase_w = []
        for py in range(s):
            for px in range(s):
                rows = [w_t[:, :, kh, kw]                           # (Cin, Cout)
                        for (kh, _) in taps[py] for (kw, _) in taps[px]]
                phase_w.append(jnp.concatenate(rows, axis=0))
        w_cols = jnp.stack(phase_w, axis=0)
        w_cols = jnp.pad(w_cols, ((0, 0), (0, 0), (0, cp - cout)))

        params.append(dict(
            w_cols=w_cols.astype(jnp.bfloat16),                     # bf16-native MXU
            bias=jnp.pad(bias, (0, cp - cout)).reshape(1, cp),
            gamma=jnp.pad(jnp.ones((cout,), jnp.float32),
                          (0, cp - cout)).reshape(1, cp),
            beta=jnp.zeros((1, cp), jnp.float32),
            taps=taps, kcol=tpd * tpd * cin,
            cout=cout, cp=cp, k=k, stride=s, padding=p,
            use_bn=use_bn, use_act=use_act))
    return params


# ----------------------------------------------------------------------------
# Generator forward (matches Generator.forward / nn.Sequential of UpConvs)
# ----------------------------------------------------------------------------
def generator_forward(latent_vector, params):
    if latent_vector.ndim == 1:
        latent_vector = latent_vector[None, :]
    n = latent_vector.shape[0]
    # view(N, -1, 1, 1) in NCHW == (N, 1, 1, latent_dim) in NHWC.
    x = latent_vector.reshape(n, 1, 1, -1).astype(jnp.float32)
    last = len(params) - 1
    for i, lp in enumerate(params):
        x = upconv_block(
            x, lp,
            use_sigmoid=(i == last),
            out_dtype=jnp.float32 if i == last else jnp.bfloat16)
    # Return NCHW to match the PyTorch module's output convention.
    return jnp.transpose(x, (0, 3, 1, 2))


def sample_latent_vectors(key, n_samples, latent_dim, mean, log_var):
    # N(loc=0, scale=0.5) epsilon; latent = mean + exp(log_var/2) * eps
    eps = 0.5 * jax.random.normal(key, (n_samples, latent_dim), jnp.float32)
    sigma = jnp.exp(log_var / 2.0)
    return mean + sigma * eps


# ----------------------------------------------------------------------------
if __name__ == "__main__":
    latent_dim = 100     # module default
    batch = 2            # small batch

    key = jax.random.PRNGKey(0)
    k_params, k_noise = jax.random.split(key)

    params = init_generator_params(k_params, latent_dim)
    mean = jnp.zeros((1, latent_dim), jnp.float32)       # self.mean
    log_var = jnp.ones((1, latent_dim), jnp.float32)     # self.log_var

    z = sample_latent_vectors(k_noise, batch, latent_dim, mean, log_var)

    fwd = jax.jit(lambda latent: generator_forward(latent, params))
    out = jax.block_until_ready(fwd(z))

    assert out.shape == (batch, 3, 32, 32), out.shape
    assert bool(jnp.all(jnp.isfinite(out)))
    assert bool(jnp.all((out >= 0.0) & (out <= 1.0)))    # post-sigmoid range
    print("KERNEL_OK")
</pallas_src>

<mosaic_0001>
module attributes {stable_mosaic.version = 11 : i64} {
  func.func @_bn_act_kernel(%arg0: i32, %arg1: i32, %arg2: i32, %arg3: memref<1x2x256xbf16, #tpu.memory_space<vmem>>, %arg4: memref<1x256xf32, #tpu.memory_space<vmem>>, %arg5: memref<1x256xf32, #tpu.memory_space<vmem>>, %arg6: memref<1x2x256xbf16, #tpu.memory_space<vmem>>) attributes {dimension_semantics = [#tpu.dimension_semantics<parallel>, #tpu.dimension_semantics<parallel>, #tpu.dimension_semantics<parallel>], iteration_bounds = array<i64: 4, 1, 2>, scalar_prefetch = 0 : i64, scratch_operands = 0 : i64, tpu.core_type = #tpu.core_type<tc>, window_params = [{transform_indices = @transform_0, window_bounds = array<i64: 1, 2, 256>}, {transform_indices = @transform_1, window_bounds = array<i64: 1, 256>}, {transform_indices = @transform_2, window_bounds = array<i64: 1, 256>}, {transform_indices = @transform_3, window_bounds = array<i64: 1, 2, 256>}]} {
    %c0 = arith.constant 0 : index
    %c0_0 = arith.constant 0 : index
    %c0_1 = arith.constant 0 : index
    %0 = vector.load %arg3[%c0, %c0_0, %c0_1] : memref<1x2x256xbf16, #tpu.memory_space<vmem>>, vector<1x2x256xbf16>
    %1 = vector.shape_cast %0 : vector<1x2x256xbf16> to vector<2x256xbf16>
    %c0_2 = arith.constant 0 : index
    %c0_3 = arith.constant 0 : index
    %2 = vector.load %arg4[%c0_2, %c0_3] : memref<1x256xf32, #tpu.memory_space<vmem>>, vector<1x256xf32>
    %3 = arith.extf %1 : vector<2x256xbf16> to vector<2x256xf32>
    %4 = vector.broadcast %2 : vector<1x256xf32> to vector<2x256xf32>
    %5 = arith.mulf %3, %4 : vector<2x256xf32>
    %c0_4 = arith.constant 0 : index
    %c0_5 = arith.constant 0 : index
    %6 = vector.load %arg5[%c0_4, %c0_5] : memref<1x256xf32, #tpu.memory_space<vmem>>, vector<1x256xf32>
    %7 = vector.broadcast %6 : vector<1x256xf32> to vector<2x256xf32>
    %8 = arith.addf %5, %7 : vector<2x256xf32>
    %cst = arith.constant 0.000000e+00 : f32
    %9 = vector.broadcast %cst : f32 to vector<2x256xf32>
    %10 = arith.cmpf oge, %8, %9 : vector<2x256xf32>
    %cst_6 = arith.constant 2.000000e-01 : f32
    %11 = vector.broadcast %cst_6 : f32 to vector<2x256xf32>
    %12 = arith.mulf %11, %8 : vector<2x256xf32>
    %13 = arith.select %10, %8, %12 : vector<2x256xi1>, vector<2x256xf32>
    %14 = arith.truncf %13 : vector<2x256xf32> to vector<2x256xbf16>
    %c0_7 = arith.constant 0 : index
    %c0_8 = arith.constant 0 : index
    %c0_9 = arith.constant 0 : index
    %15 = vector.load %arg6[%c0_7, %c0_8, %c0_9] : memref<1x2x256xbf16, #tpu.memory_space<vmem>>, vector<1x2x256xbf16>
    %16 = vector.shape_cast %15 : vector<1x2x256xbf16> to vector<2x256xbf16>
    %17 = vector.shape_cast %14 : vector<2x256xbf16> to vector<1x2x256xbf16>
    tpu.vector_store %arg6[%c0_7, %c0_8, %c0_9], %17 {strides = array<i32>} : memref<1x2x256xbf16, #tpu.memory_space<vmem>>, vector<1x2x256xbf16>,
    return
  }
  func.func @transform_0(%arg0: i32, %arg1: i32, %arg2: i32) -> (i32, i32, i32) {
    %c0_i32 = arith.constant 0 : i32
    return %arg0, %arg1, %arg2 : i32, i32, i32
  }
  func.func @transform_1(%arg0: i32, %arg1: i32, %arg2: i32) -> (i32, i32) {
    %c0_i32 = arith.constant 0 : i32
    %c0_i32_0 = arith.constant 0 : i32
    return %c0_i32, %arg2 : i32, i32
  }
  func.func @transform_2(%arg0: i32, %arg1: i32, %arg2: i32) -> (i32, i32) {
    %c0_i32 = arith.constant 0 : i32
    %c0_i32_0 = arith.constant 0 : i32
    return %c0_i32, %arg2 : i32, i32
  }
  func.func @transform_3(%arg0: i32, %arg1: i32, %arg2: i32) -> (i32, i32, i32) {
    %c0_i32 = arith.constant 0 : i32
    return %arg0, %arg1, %arg2 : i32, i32, i32
  }
}

module attributes {stable_mosaic.version = 11 : i64} {
  func.func @_conv_stats_kernel(%arg0: i32, %arg1: i32, %arg2: i32, %arg3: memref<1x2x400xbf16, #tpu.memory_space<vmem>>, %arg4: memref<1x400x256xbf16, #tpu.memory_space<vmem>>, %arg5: memref<1x256xf32, #tpu.memory_space<vmem>>, %arg6: memref<1x2x256xbf16, #tpu.memory_space<vmem>>, %arg7: memref<1x2x256xf32, #tpu.memory_space<vmem>>) attributes {dimension_semantics = [#tpu.dimension_semantics<parallel>, #tpu.dimension_semantics<parallel>, #tpu.dimension_semantics<parallel>], iteration_bounds = array<i64: 4, 1, 2>, scalar_prefetch = 0 : i64, scratch_operands = 0 : i64, tpu.core_type = #tpu.core_type<tc>, window_params = [{transform_indices = @transform_0, window_bounds = array<i64: 1, 2, 400>}, {transform_indices = @transform_1, window_bounds = array<i64: 1, 400, 256>}, {transform_indices = @transform_2, window_bounds = array<i64: 1, 256>}, {transform_indices = @transform_3, window_bounds = array<i64: 1, 2, 256>}, {transform_indices = @transform_4, window_bounds = array<i64: 1, 2, 256>}]} {
    %c0 = arith.constant 0 : index
    %c0_0 = arith.constant 0 : index
    %c0_1 = arith.constant 0 : index
    %0 = vector.load %arg3[%c0, %c0_0, %c0_1] : memref<1x2x400xbf16, #tpu.memory_space<vmem>>, vector<1x2x400xbf16>
    %1 = vector.shape_cast %0 : vector<1x2x400xbf16> to vector<2x400xbf16>
    %c0_2 = arith.constant 0 : index
    %c0_3 = arith.constant 0 : index
    %c0_4 = arith.constant 0 : index
    %2 = vector.load %arg4[%c0_2, %c0_3, %c0_4] : memref<1x400x256xbf16, #tpu.memory_space<vmem>>, vector<1x400x256xbf16>
    %3 = vector.shape_cast %2 : vector<1x400x256xbf16> to vector<400x256xbf16>
    %cst = arith.constant dense<0.000000e+00> : vector<2x256xf32>
    %4 = tpu.matmul %1, %3, %cst {dimension_numbers = #tpu.dot_dimension_numbers<[1], [0], [0], [1], [0, 0, 1, 1], [], []>} : vector<2x400xbf16>, vector<400x256xbf16>, vector<2x256xf32> -> vector<2x256xf32>
    %c0_5 = arith.constant 0 : index
    %c0_6 = arith.constant 0 : index
    %5 = vector.load %arg5[%c0_5, %c0_6] : memref<1x256xf32, #tpu.memory_space<vmem>>, vector<1x256xf32>
    %6 = vector.broadcast %5 : vector<1x256xf32> to vector<2x256xf32>
    %7 = arith.addf %4, %6 : vector<2x256xf32>
    %8 = arith.truncf %7 : vector<2x256xf32> to vector<2x256xbf16>
    %c0_7 = arith.constant 0 : index
    %c0_8 = arith.constant 0 : index
    %c0_9 = arith.constant 0 : index
    %9 = vector.load %arg6[%c0_7, %c0_8, %c0_9] : memref<1x2x256xbf16, #tpu.memory_space<vmem>>, vector<1x2x256xbf16>
    %10 = vector.shape_cast %9 : vector<1x2x256xbf16> to vector<2x256xbf16>
    %11 = vector.shape_cast %8 : vector<2x256xbf16> to vector<1x2x256xbf16>
    tpu.vector_store %arg6[%c0_7, %c0_8, %c0_9], %11 {strides = array<i32>} : memref<1x2x256xbf16, #tpu.memory_space<vmem>>, vector<1x2x256xbf16>,
    %cst_10 = arith.constant dense<0.000000e+00> : vector<256xf32>
    %12 = vector.multi_reduction <add>, %7, %cst_10 [0] : vector<2x256xf32> to vector<256xf32>
    %13 = vector.shape_cast %12 : vector<256xf32> to vector<1x256xf32>
    %14 = arith.mulf %7, %7 : vector<2x256xf32>
    %cst_11 = arith.constant dense<0.000000e+00> : vector<256xf32>
    %15 = vector.multi_reduction <add>, %14, %cst_11 [0] : vector<2x256xf32> to vector<256xf32>
    %16 = vector.shape_cast %15 : vector<256xf32> to vector<1x256xf32>
    %17 = tpu.concatenate %13, %16 in 0 : vector<1x256xf32>, vector<1x256xf32> -> vector<2x256xf32>
    %c0_12 = arith.constant 0 : index
    %c0_13 = arith.constant 0 : index
    %c0_14 = arith.constant 0 : index
    %18 = vector.load %arg7[%c0_12, %c0_13, %c0_14] : memref<1x2x256xf32, #tpu.memory_space<vmem>>, vector<1x2x256xf32>
    %19 = vector.shape_cast %18 : vector<1x2x256xf32> to vector<2x256xf32>
    %20 = vector.shape_cast %17 : vector<2x256xf32> to vector<1x2x256xf32>
    tpu.vector_store %arg7[%c0_12, %c0_13, %c0_14], %20 {strides = array<i32>} : memref<1x2x256xf32, #tpu.memory_space<vmem>>, vector<1x2x256xf32>,
    return
  }
  func.func @transform_0(%arg0: i32, %arg1: i32, %arg2: i32) -> (i32, i32, i32) {
    %c0_i32 = arith.constant 0 : i32
    %c0_i32_0 = arith.constant 0 : i32
    return %arg0, %arg1, %c0_i32 : i32, i32, i32
  }
  func.func @transform_1(%arg0: i32, %arg1: i32, %arg2: i32) -> (i32, i32, i32) {
    %c0_i32 = arith.constant 0 : i32
    %c0_i32_0 = arith.constant 0 : i32
    return %arg0, %c0_i32, %arg2 : i32, i32, i32
  }
  func.func @transform_2(%arg0: i32, %arg1: i32, %arg2: i32) -> (i32, i32) {
    %c0_i32 = arith.constant 0 : i32
    %c0_i32_0 = arith.constant 0 : i32
    return %c0_i32, %arg2 : i32, i32
  }
  func.func @transform_3(%arg0: i32, %arg1: i32, %arg2: i32) -> (i32, i32, i32) {
    %c0_i32 = arith.constant 0 : i32
    return %arg0, %arg1, %arg2 : i32, i32, i32
  }
  func.func @transform_4(%arg0: i32, %arg1: i32, %arg2: i32) -> (i32, i32, i32) {
    %c1_i32 = arith.constant 1 : i32
    %0 = arith.muli %arg0, %c1_i32 : i32
    %1 = arith.addi %0, %arg1 : i32
    %c0_i32 = arith.constant 0 : i32
    %c0_i32_0 = arith.constant 0 : i32
    return %1, %c0_i32, %arg2 : i32, i32, i32
  }
}

module attributes {stable_mosaic.version = 11 : i64} {
  func.func @_conv_stats_kernel(%arg0: i32, %arg1: i32, %arg2: i32, %arg3: memref<1x8x2048xbf16, #tpu.memory_space<vmem>>, %arg4: memref<1x2048x256xbf16, #tpu.memory_space<vmem>>, %arg5: memref<1x256xf32, #tpu.memory_space<vmem>>, %arg6: memref<1x8x256xbf16, #tpu.memory_space<vmem>>, %arg7: memref<1x2x256xf32, #tpu.memory_space<vmem>>) attributes {dimension_semantics = [#tpu.dimension_semantics<parallel>, #tpu.dimension_semantics<parallel>, #tpu.dimension_semantics<parallel>], iteration_bounds = array<i64: 4, 1, 1>, scalar_prefetch = 0 : i64, scratch_operands = 0 : i64, tpu.core_type = #tpu.core_type<tc>, window_params = [{transform_indices = @transform_0, window_bounds = array<i64: 1, 8, 2048>}, {transform_indices = @transform_1, window_bounds = array<i64: 1, 2048, 256>}, {transform_indices = @transform_2, window_bounds = array<i64: 1, 256>}, {transform_indices = @transform_3, window_bounds = array<i64: 1, 8, 256>}, {transform_indices = @transform_4, window_bounds = array<i64: 1, 2, 256>}]} {
    %c0 = arith.constant 0 : index
    %c0_0 = arith.constant 0 : index
    %c0_1 = arith.constant 0 : index
    %0 = vector.load %arg3[%c0, %c0_0, %c0_1] : memref<1x8x2048xbf16, #tpu.memory_space<vmem>>, vector<1x8x2048xbf16>
    %1 = vector.shape_cast %0 : vector<1x8x2048xbf16> to vector<8x2048xbf16>
    %c0_2 = arith.constant 0 : index
    %c0_3 = arith.constant 0 : index
    %c0_4 = arith.constant 0 : index
    %2 = vector.load %arg4[%c0_2, %c0_3, %c0_4] : memref<1x2048x256xbf16, #tpu.memory_space<vmem>>, vector<1x2048x256xbf16>
    %3 = vector.shape_cast %2 : vector<1x2048x256xbf16> to vector<2048x256xbf16>
    %cst = arith.constant dense<0.000000e+00> : vector<8x256xf32>
    %4 = tpu.matmul %1, %3, %cst {dimension_numbers = #tpu.dot_dimension_numbers<[1], [0], [0], [1], [0, 0, 1, 1], [], []>} : vector<8x2048xbf16>, vector<2048x256xbf16>, vector<8x256xf32> -> vector<8x256xf32>
    %c0_5 = arith.constant 0 : index
    %c0_6 = arith.constant 0 : index
    %5 = vector.load %arg5[%c0_5, %c0_6] : memref<1x256xf32, #tpu.memory_space<vmem>>, vector<1x256xf32>
    %6 = vector.broadcast %5 : vector<1x256xf32> to vector<8x256xf32>
    %7 = arith.addf %4, %6 : vector<8x256xf32>
    %8 = arith.truncf %7 : vector<8x256xf32> to vector<8x256xbf16>
    %c0_7 = arith.constant 0 : index
    %c0_8 = arith.constant 0 : index
    %c0_9 = arith.constant 0 : index
    %9 = vector.load %arg6[%c0_7, %c0_8, %c0_9] : memref<1x8x256xbf16, #tpu.memory_space<vmem>>, vector<1x8x256xbf16>
    %10 = vector.shape_cast %9 : vector<1x8x256xbf16> to vector<8x256xbf16>
    %11 = vector.shape_cast %8 : vector<8x256xbf16> to vector<1x8x256xbf16>
    tpu.vector_store %arg6[%c0_7, %c0_8, %c0_9], %11 {strides = array<i32>} : memref<1x8x256xbf16, #tpu.memory_space<vmem>>, vector<1x8x256xbf16>,
    %cst_10 = arith.constant dense<0.000000e+00> : vector<256xf32>
    %12 = vector.multi_reduction <add>, %7, %cst_10 [0] : vector<8x256xf32> to vector<256xf32>
    %13 = vector.shape_cast %12 : vector<256xf32> to vector<1x256xf32>
    %14 = arith.mulf %7, %7 : vector<8x256xf32>
    %cst_11 = arith.constant dense<0.000000e+00> : vector<256xf32>
    %15 = vector.multi_reduction <add>, %14, %cst_11 [0] : vector<8x256xf32> to vector<256xf32>
    %16 = vector.shape_cast %15 : vector<256xf32> to vector<1x256xf32>
    %17 = tpu.concatenate %13, %16 in 0 : vector<1x256xf32>, vector<1x256xf32> -> vector<2x256xf32>
    %c0_12 = arith.constant 0 : index
    %c0_13 = arith.constant 0 : index
    %c0_14 = arith.constant 0 : index
    %18 = vector.load %arg7[%c0_12, %c0_13, %c0_14] : memref<1x2x256xf32, #tpu.memory_space<vmem>>, vector<1x2x256xf32>
    %19 = vector.shape_cast %18 : vector<1x2x256xf32> to vector<2x256xf32>
    %20 = vector.shape_cast %17 : vector<2x256xf32> to vector<1x2x256xf32>
    tpu.vector_store %arg7[%c0_12, %c0_13, %c0_14], %20 {strides = array<i32>} : memref<1x2x256xf32, #tpu.memory_space<vmem>>, vector<1x2x256xf32>,
    return
  }
  func.func @transform_0(%arg0: i32, %arg1: i32, %arg2: i32) -> (i32, i32, i32) {
    %c0_i32 = arith.constant 0 : i32
    %c0_i32_0 = arith.constant 0 : i32
    return %arg0, %arg1, %c0_i32 : i32, i32, i32
  }
  func.func @transform_1(%arg0: i32, %arg1: i32, %arg2: i32) -> (i32, i32, i32) {
    %c0_i32 = arith.constant 0 : i32
    %c0_i32_0 = arith.constant 0 : i32
    return %arg0, %c0_i32, %arg2 : i32, i32, i32
  }
  func.func @transform_2(%arg0: i32, %arg1: i32, %arg2: i32) -> (i32, i32) {
    %c0_i32 = arith.constant 0 : i32
    %c0_i32_0 = arith.constant 0 : i32
    return %c0_i32, %arg2 : i32, i32
  }
  func.func @transform_3(%arg0: i32, %arg1: i32, %arg2: i32) -> (i32, i32, i32) {
    %c0_i32 = arith.constant 0 : i32
    return %arg0, %arg1, %arg2 : i32, i32, i32
  }
  func.func @transform_4(%arg0: i32, %arg1: i32, %arg2: i32) -> (i32, i32, i32) {
    %c1_i32 = arith.constant 1 : i32
    %0 = arith.muli %arg0, %c1_i32 : i32
    %1 = arith.addi %0, %arg1 : i32
    %c0_i32 = arith.constant 0 : i32
    %c0_i32_0 = arith.constant 0 : i32
    return %1, %c0_i32, %arg2 : i32, i32, i32
  }
}

module attributes {stable_mosaic.version = 11 : i64} {
  func.func @_bn_act_kernel(%arg0: i32, %arg1: i32, %arg2: i32, %arg3: memref<1x8x256xbf16, #tpu.memory_space<vmem>>, %arg4: memref<1x256xf32, #tpu.memory_space<vmem>>, %arg5: memref<1x256xf32, #tpu.memory_space<vmem>>, %arg6: memref<1x8x256xbf16, #tpu.memory_space<vmem>>) attributes {dimension_semantics = [#tpu.dimension_semantics<parallel>, #tpu.dimension_semantics<parallel>, #tpu.dimension_semantics<parallel>], iteration_bounds = array<i64: 4, 1, 1>, scalar_prefetch = 0 : i64, scratch_operands = 0 : i64, tpu.core_type = #tpu.core_type<tc>, window_params = [{transform_indices = @transform_0, window_bounds = array<i64: 1, 8, 256>}, {transform_indices = @transform_1, window_bounds = array<i64: 1, 256>}, {transform_indices = @transform_2, window_bounds = array<i64: 1, 256>}, {transform_indices = @transform_3, window_bounds = array<i64: 1, 8, 256>}]} {
    %c0 = arith.constant 0 : index
    %c0_0 = arith.constant 0 : index
    %c0_1 = arith.constant 0 : index
    %0 = vector.load %arg3[%c0, %c0_0, %c0_1] : memref<1x8x256xbf16, #tpu.memory_space<vmem>>, vector<1x8x256xbf16>
    %1 = vector.shape_cast %0 : vector<1x8x256xbf16> to vector<8x256xbf16>
    %c0_2 = arith.constant 0 : index
    %c0_3 = arith.constant 0 : index
    %2 = vector.load %arg4[%c0_2, %c0_3] : memref<1x256xf32, #tpu.memory_space<vmem>>, vector<1x256xf32>
    %3 = arith.extf %1 : vector<8x256xbf16> to vector<8x256xf32>
    %4 = vector.broadcast %2 : vector<1x256xf32> to vector<8x256xf32>
    %5 = arith.mulf %3, %4 : vector<8x256xf32>
    %c0_4 = arith.constant 0 : index
    %c0_5 = arith.constant 0 : index
    %6 = vector.load %arg5[%c0_4, %c0_5] : memref<1x256xf32, #tpu.memory_space<vmem>>, vector<1x256xf32>
    %7 = vector.broadcast %6 : vector<1x256xf32> to vector<8x256xf32>
    %8 = arith.addf %5, %7 : vector<8x256xf32>
    %cst = arith.constant 0.000000e+00 : f32
    %9 = vector.broadcast %cst : f32 to vector<8x256xf32>
    %10 = arith.cmpf oge, %8, %9 : vector<8x256xf32>
    %cst_6 = arith.constant 2.000000e-01 : f32
    %11 = vector.broadcast %cst_6 : f32 to vector<8x256xf32>
    %12 = arith.mulf %11, %8 : vector<8x256xf32>
    %13 = arith.select %10, %8, %12 : vector<8x256xi1>, vector<8x256xf32>
    %14 = arith.truncf %13 : vector<8x256xf32> to vector<8x256xbf16>
    %c0_7 = arith.constant 0 : index
    %c0_8 = arith.constant 0 : index
    %c0_9 = arith.constant 0 : index
    %15 = vector.load %arg6[%c0_7, %c0_8, %c0_9] : memref<1x8x256xbf16, #tpu.memory_space<vmem>>, vector<1x8x256xbf16>
    %16 = vector.shape_cast %15 : vector<1x8x256xbf16> to vector<8x256xbf16>
    %17 = vector.shape_cast %14 : vector<8x256xbf16> to vector<1x8x256xbf16>
    tpu.vector_store %arg6[%c0_7, %c0_8, %c0_9], %17 {strides = array<i32>} : memref<1x8x256xbf16, #tpu.memory_space<vmem>>, vector<1x8x256xbf16>,
    return
  }
  func.func @transform_0(%arg0: i32, %arg1: i32, %arg2: i32) -> (i32, i32, i32) {
    %c0_i32 = arith.constant 0 : i32
    return %arg0, %arg1, %arg2 : i32, i32, i32
  }
  func.func @transform_1(%arg0: i32, %arg1: i32, %arg2: i32) -> (i32, i32) {
    %c0_i32 = arith.constant 0 : i32
    %c0_i32_0 = arith.constant 0 : i32
    return %c0_i32, %arg2 : i32, i32
  }
  func.func @transform_2(%arg0: i32, %arg1: i32, %arg2: i32) -> (i32, i32) {
    %c0_i32 = arith.constant 0 : i32
    %c0_i32_0 = arith.constant 0 : i32
    return %c0_i32, %arg2 : i32, i32
  }
  func.func @transform_3(%arg0: i32, %arg1: i32, %arg2: i32) -> (i32, i32, i32) {
    %c0_i32 = arith.constant 0 : i32
    return %arg0, %arg1, %arg2 : i32, i32, i32
  }
}

module attributes {stable_mosaic.version = 11 : i64} {
  func.func @_conv_stats_kernel(%arg0: i32, %arg1: i32, %arg2: i32, %arg3: memref<1x32x1024xbf16, #tpu.memory_space<vmem>>, %arg4: memref<1x1024x128xbf16, #tpu.memory_space<vmem>>, %arg5: memref<1x128xf32, #tpu.memory_space<vmem>>, %arg6: memref<1x32x128xbf16, #tpu.memory_space<vmem>>, %arg7: memref<1x2x128xf32, #tpu.memory_space<vmem>>) attributes {dimension_semantics = [#tpu.dimension_semantics<parallel>, #tpu.dimension_semantics<parallel>, #tpu.dimension_semantics<parallel>], iteration_bounds = array<i64: 4, 1, 1>, scalar_prefetch = 0 : i64, scratch_operands = 0 : i64, tpu.core_type = #tpu.core_type<tc>, window_params = [{transform_indices = @transform_0, window_bounds = array<i64: 1, 32, 1024>}, {transform_indices = @transform_1, window_bounds = array<i64: 1, 1024, 128>}, {transform_indices = @transform_2, window_bounds = array<i64: 1, 128>}, {transform_indices = @transform_3, window_bounds = array<i64: 1, 32, 128>}, {transform_indices = @transform_4, window_bounds = array<i64: 1, 2, 128>}]} {
    %c0 = arith.constant 0 : index
    %c0_0 = arith.constant 0 : index
    %c0_1 = arith.constant 0 : index
    %0 = vector.load %arg3[%c0, %c0_0, %c0_1] : memref<1x32x1024xbf16, #tpu.memory_space<vmem>>, vector<1x32x1024xbf16>
    %1 = vector.shape_cast %0 : vector<1x32x1024xbf16> to vector<32x1024xbf16>
    %c0_2 = arith.constant 0 : index
    %c0_3 = arith.constant 0 : index
    %c0_4 = arith.constant 0 : index
    %2 = vector.load %arg4[%c0_2, %c0_3, %c0_4] : memref<1x1024x128xbf16, #tpu.memory_space<vmem>>, vector<1x1024x128xbf16>
    %3 = vector.shape_cast %2 : vector<1x1024x128xbf16> to vector<1024x128xbf16>
    %cst = arith.constant dense<0.000000e+00> : vector<32x128xf32>
    %4 = tpu.matmul %1, %3, %cst {dimension_numbers = #tpu.dot_dimension_numbers<[1], [0], [0], [1], [0, 0, 1, 1], [], []>} : vector<32x1024xbf16>, vector<1024x128xbf16>, vector<32x128xf32> -> vector<32x128xf32>
    %c0_5 = arith.constant 0 : index
    %c0_6 = arith.constant 0 : index
    %5 = vector.load %arg5[%c0_5, %c0_6] : memref<1x128xf32, #tpu.memory_space<vmem>>, vector<1x128xf32>
    %6 = vector.broadcast %5 : vector<1x128xf32> to vector<32x128xf32>
    %7 = arith.addf %4, %6 : vector<32x128xf32>
    %8 = arith.truncf %7 : vector<32x128xf32> to vector<32x128xbf16>
    %c0_7 = arith.constant 0 : index
    %c0_8 = arith.constant 0 : index
    %c0_9 = arith.constant 0 : index
    %9 = vector.load %arg6[%c0_7, %c0_8, %c0_9] : memref<1x32x128xbf16, #tpu.memory_space<vmem>>, vector<1x32x128xbf16>
    %10 = vector.shape_cast %9 : vector<1x32x128xbf16> to vector<32x128xbf16>
    %11 = vector.shape_cast %8 : vector<32x128xbf16> to vector<1x32x128xbf16>
    tpu.vector_store %arg6[%c0_7, %c0_8, %c0_9], %11 {strides = array<i32>} : memref<1x32x128xbf16, #tpu.memory_space<vmem>>, vector<1x32x128xbf16>,
    %cst_10 = arith.constant dense<0.000000e+00> : vector<128xf32>
    %12 = vector.multi_reduction <add>, %7, %cst_10 [0] : vector<32x128xf32> to vector<128xf32>
    %13 = vector.shape_cast %12 : vector<128xf32> to vector<1x128xf32>
    %14 = arith.mulf %7, %7 : vector<32x128xf32>
    %cst_11 = arith.constant dense<0.000000e+00> : vector<128xf32>
    %15 = vector.multi_reduction <add>, %14, %cst_11 [0] : vector<32x128xf32> to vector<128xf32>
    %16 = vector.shape_cast %15 : vector<128xf32> to vector<1x128xf32>
    %17 = tpu.concatenate %13, %16 in 0 : vector<1x128xf32>, vector<1x128xf32> -> vector<2x128xf32>
    %c0_12 = arith.constant 0 : index
    %c0_13 = arith.constant 0 : index
    %c0_14 = arith.constant 0 : index
    %18 = vector.load %arg7[%c0_12, %c0_13, %c0_14] : memref<1x2x128xf32, #tpu.memory_space<vmem>>, vector<1x2x128xf32>
    %19 = vector.shape_cast %18 : vector<1x2x128xf32> to vector<2x128xf32>
    %20 = vector.shape_cast %17 : vector<2x128xf32> to vector<1x2x128xf32>
    tpu.vector_store %arg7[%c0_12, %c0_13, %c0_14], %20 {strides = array<i32>} : memref<1x2x128xf32, #tpu.memory_space<vmem>>, vector<1x2x128xf32>,
    return
  }
  func.func @transform_0(%arg0: i32, %arg1: i32, %arg2: i32) -> (i32, i32, i32) {
    %c0_i32 = arith.constant 0 : i32
    %c0_i32_0 = arith.constant 0 : i32
    return %arg0, %arg1, %c0_i32 : i32, i32, i32
  }
  func.func @transform_1(%arg0: i32, %arg1: i32, %arg2: i32) -> (i32, i32, i32) {
    %c0_i32 = arith.constant 0 : i32
    %c0_i32_0 = arith.constant 0 : i32
    return %arg0, %c0_i32, %arg2 : i32, i32, i32
  }
  func.func @transform_2(%arg0: i32, %arg1: i32, %arg2: i32) -> (i32, i32) {
    %c0_i32 = arith.constant 0 : i32
    %c0_i32_0 = arith.constant 0 : i32
    return %c0_i32, %arg2 : i32, i32
  }
  func.func @transform_3(%arg0: i32, %arg1: i32, %arg2: i32) -> (i32, i32, i32) {
    %c0_i32 = arith.constant 0 : i32
    return %arg0, %arg1, %arg2 : i32, i32, i32
  }
  func.func @transform_4(%arg0: i32, %arg1: i32, %arg2: i32) -> (i32, i32, i32) {
    %c1_i32 = arith.constant 1 : i32
    %0 = arith.muli %arg0, %c1_i32 : i32
    %1 = arith.addi %0, %arg1 : i32
    %c0_i32 = arith.constant 0 : i32
    %c0_i32_0 = arith.constant 0 : i32
    return %1, %c0_i32, %arg2 : i32, i32, i32
  }
}

module attributes {stable_mosaic.version = 11 : i64} {
  func.func @_bn_act_kernel(%arg0: i32, %arg1: i32, %arg2: i32, %arg3: memref<1x32x128xbf16, #tpu.memory_space<vmem>>, %arg4: memref<1x128xf32, #tpu.memory_space<vmem>>, %arg5: memref<1x128xf32, #tpu.memory_space<vmem>>, %arg6: memref<1x32x128xbf16, #tpu.memory_space<vmem>>) attributes {dimension_semantics = [#tpu.dimension_semantics<parallel>, #tpu.dimension_semantics<parallel>, #tpu.dimension_semantics<parallel>], iteration_bounds = array<i64: 4, 1, 1>, scalar_prefetch = 0 : i64, scratch_operands = 0 : i64, tpu.core_type = #tpu.core_type<tc>, window_params = [{transform_indices = @transform_0, window_bounds = array<i64: 1, 32, 128>}, {transform_indices = @transform_1, window_bounds = array<i64: 1, 128>}, {transform_indices = @transform_2, window_bounds = array<i64: 1, 128>}, {transform_indices = @transform_3, window_bounds = array<i64: 1, 32, 128>}]} {
    %c0 = arith.constant 0 : index
    %c0_0 = arith.constant 0 : index
    %c0_1 = arith.constant 0 : index
    %0 = vector.load %arg3[%c0, %c0_0, %c0_1] : memref<1x32x128xbf16, #tpu.memory_space<vmem>>, vector<1x32x128xbf16>
    %1 = vector.shape_cast %0 : vector<1x32x128xbf16> to vector<32x128xbf16>
    %c0_2 = arith.constant 0 : index
    %c0_3 = arith.constant 0 : index
    %2 = vector.load %arg4[%c0_2, %c0_3] : memref<1x128xf32, #tpu.memory_space<vmem>>, vector<1x128xf32>
    %3 = arith.extf %1 : vector<32x128xbf16> to vector<32x128xf32>
    %4 = vector.broadcast %2 : vector<1x128xf32> to vector<32x128xf32>
    %5 = arith.mulf %3, %4 : vector<32x128xf32>
    %c0_4 = arith.constant 0 : index
    %c0_5 = arith.constant 0 : index
    %6 = vector.load %arg5[%c0_4, %c0_5] : memref<1x128xf32, #tpu.memory_space<vmem>>, vector<1x128xf32>
    %7 = vector.broadcast %6 : vector<1x128xf32> to vector<32x128xf32>
    %8 = arith.addf %5, %7 : vector<32x128xf32>
    %cst = arith.constant 0.000000e+00 : f32
    %9 = vector.broadcast %cst : f32 to vector<32x128xf32>
    %10 = arith.cmpf oge, %8, %9 : vector<32x128xf32>
    %cst_6 = arith.constant 2.000000e-01 : f32
    %11 = vector.broadcast %cst_6 : f32 to vector<32x128xf32>
    %12 = arith.mulf %11, %8 : vector<32x128xf32>
    %13 = arith.select %10, %8, %12 : vector<32x128xi1>, vector<32x128xf32>
    %14 = arith.truncf %13 : vector<32x128xf32> to vector<32x128xbf16>
    %c0_7 = arith.constant 0 : index
    %c0_8 = arith.constant 0 : index
    %c0_9 = arith.constant 0 : index
    %15 = vector.load %arg6[%c0_7, %c0_8, %c0_9] : memref<1x32x128xbf16, #tpu.memory_space<vmem>>, vector<1x32x128xbf16>
    %16 = vector.shape_cast %15 : vector<1x32x128xbf16> to vector<32x128xbf16>
    %17 = vector.shape_cast %14 : vector<32x128xbf16> to vector<1x32x128xbf16>
    tpu.vector_store %arg6[%c0_7, %c0_8, %c0_9], %17 {strides = array<i32>} : memref<1x32x128xbf16, #tpu.memory_space<vmem>>, vector<1x32x128xbf16>,
    return
  }
  func.func @transform_0(%arg0: i32, %arg1: i32, %arg2: i32) -> (i32, i32, i32) {
    %c0_i32 = arith.constant 0 : i32
    return %arg0, %arg1, %arg2 : i32, i32, i32
  }
  func.func @transform_1(%arg0: i32, %arg1: i32, %arg2: i32) -> (i32, i32) {
    %c0_i32 = arith.constant 0 : i32
    %c0_i32_0 = arith.constant 0 : i32
    return %c0_i32, %arg2 : i32, i32
  }
  func.func @transform_2(%arg0: i32, %arg1: i32, %arg2: i32) -> (i32, i32) {
    %c0_i32 = arith.constant 0 : i32
    %c0_i32_0 = arith.constant 0 : i32
    return %c0_i32, %arg2 : i32, i32
  }
  func.func @transform_3(%arg0: i32, %arg1: i32, %arg2: i32) -> (i32, i32, i32) {
    %c0_i32 = arith.constant 0 : i32
    return %arg0, %arg1, %arg2 : i32, i32, i32
  }
}

module attributes {stable_mosaic.version = 11 : i64} {
  func.func @_conv_stats_kernel(%arg0: i32, %arg1: i32, %arg2: i32, %arg3: memref<1x128x512xbf16, #tpu.memory_space<vmem>>, %arg4: memref<1x512x128xbf16, #tpu.memory_space<vmem>>, %arg5: memref<1x128xf32, #tpu.memory_space<vmem>>, %arg6: memref<1x128x128xbf16, #tpu.memory_space<vmem>>, %arg7: memref<1x2x128xf32, #tpu.memory_space<vmem>>) attributes {dimension_semantics = [#tpu.dimension_semantics<parallel>, #tpu.dimension_semantics<parallel>, #tpu.dimension_semantics<parallel>], iteration_bounds = array<i64: 4, 1, 1>, scalar_prefetch = 0 : i64, scratch_operands = 0 : i64, tpu.core_type = #tpu.core_type<tc>, window_params = [{transform_indices = @transform_0, window_bounds = array<i64: 1, 128, 512>}, {transform_indices = @transform_1, window_bounds = array<i64: 1, 512, 128>}, {transform_indices = @transform_2, window_bounds = array<i64: 1, 128>}, {transform_indices = @transform_3, window_bounds = array<i64: 1, 128, 128>}, {transform_indices = @transform_4, window_bounds = array<i64: 1, 2, 128>}]} {
    %c0 = arith.constant 0 : index
    %c0_0 = arith.constant 0 : index
    %c0_1 = arith.constant 0 : index
    %0 = vector.load %arg3[%c0, %c0_0, %c0_1] : memref<1x128x512xbf16, #tpu.memory_space<vmem>>, vector<1x128x512xbf16>
    %1 = vector.shape_cast %0 : vector<1x128x512xbf16> to vector<128x512xbf16>
    %c0_2 = arith.constant 0 : index
    %c0_3 = arith.constant 0 : index
    %c0_4 = arith.constant 0 : index
    %2 = vector.load %arg4[%c0_2, %c0_3, %c0_4] : memref<1x512x128xbf16, #tpu.memory_space<vmem>>, vector<1x512x128xbf16>
    %3 = vector.shape_cast %2 : vector<1x512x128xbf16> to vector<512x128xbf16>
    %cst = arith.constant dense<0.000000e+00> : vector<128x128xf32>
    %4 = tpu.matmul %1, %3, %cst {dimension_numbers = #tpu.dot_dimension_numbers<[1], [0], [0], [1], [0, 0, 1, 1], [], []>} : vector<128x512xbf16>, vector<512x128xbf16>, vector<128x128xf32> -> vector<128x128xf32>
    %c0_5 = arith.constant 0 : index
    %c0_6 = arith.constant 0 : index
    %5 = vector.load %arg5[%c0_5, %c0_6] : memref<1x128xf32, #tpu.memory_space<vmem>>, vector<1x128xf32>
    %6 = vector.broadcast %5 : vector<1x128xf32> to vector<128x128xf32>
    %7 = arith.addf %4, %6 : vector<128x128xf32>
    %8 = arith.truncf %7 : vector<128x128xf32> to vector<128x128xbf16>
    %c0_7 = arith.constant 0 : index
    %c0_8 = arith.constant 0 : index
    %c0_9 = arith.constant 0 : index
    %9 = vector.load %arg6[%c0_7, %c0_8, %c0_9] : memref<1x128x128xbf16, #tpu.memory_space<vmem>>, vector<1x128x128xbf16>
    %10 = vector.shape_cast %9 : vector<1x128x128xbf16> to vector<128x128xbf16>
    %11 = vector.shape_cast %8 : vector<128x128xbf16> to vector<1x128x128xbf16>
    tpu.vector_store %arg6[%c0_7, %c0_8, %c0_9], %11 {strides = array<i32>} : memref<1x128x128xbf16, #tpu.memory_space<vmem>>, vector<1x128x128xbf16>,
    %cst_10 = arith.constant dense<0.000000e+00> : vector<128xf32>
    %12 = vector.multi_reduction <add>, %7, %cst_10 [0] : vector<128x128xf32> to vector<128xf32>
    %13 = vector.shape_cast %12 : vector<128xf32> to vector<1x128xf32>
    %14 = arith.mulf %7, %7 : vector<128x128xf32>
    %cst_11 = arith.constant dense<0.000000e+00> : vector<128xf32>
    %15 = vector.multi_reduction <add>, %14, %cst_11 [0] : vector<128x128xf32> to vector<128xf32>
    %16 = vector.shape_cast %15 : vector<128xf32> to vector<1x128xf32>
    %17 = tpu.concatenate %13, %16 in 0 : vector<1x128xf32>, vector<1x128xf32> -> vector<2x128xf32>
    %c0_12 = arith.constant 0 : index
    %c0_13 = arith.constant 0 : index
    %c0_14 = arith.constant 0 : index
    %18 = vector.load %arg7[%c0_12, %c0_13, %c0_14] : memref<1x2x128xf32, #tpu.memory_space<vmem>>, vector<1x2x128xf32>
    %19 = vector.shape_cast %18 : vector<1x2x128xf32> to vector<2x128xf32>
    %20 = vector.shape_cast %17 : vector<2x128xf32> to vector<1x2x128xf32>
    tpu.vector_store %arg7[%c0_12, %c0_13, %c0_14], %20 {strides = array<i32>} : memref<1x2x128xf32, #tpu.memory_space<vmem>>, vector<1x2x128xf32>,
    return
  }
  func.func @transform_0(%arg0: i32, %arg1: i32, %arg2: i32) -> (i32, i32, i32) {
    %c0_i32 = arith.constant 0 : i32
    %c0_i32_0 = arith.constant 0 : i32
    return %arg0, %arg1, %c0_i32 : i32, i32, i32
  }
  func.func @transform_1(%arg0: i32, %arg1: i32, %arg2: i32) -> (i32, i32, i32) {
    %c0_i32 = arith.constant 0 : i32
    %c0_i32_0 = arith.constant 0 : i32
    return %arg0, %c0_i32, %arg2 : i32, i32, i32
  }
  func.func @transform_2(%arg0: i32, %arg1: i32, %arg2: i32) -> (i32, i32) {
    %c0_i32 = arith.constant 0 : i32
    %c0_i32_0 = arith.constant 0 : i32
    return %c0_i32, %arg2 : i32, i32
  }
  func.func @transform_3(%arg0: i32, %arg1: i32, %arg2: i32) -> (i32, i32, i32) {
    %c0_i32 = arith.constant 0 : i32
    return %arg0, %arg1, %arg2 : i32, i32, i32
  }
  func.func @transform_4(%arg0: i32, %arg1: i32, %arg2: i32) -> (i32, i32, i32) {
    %c1_i32 = arith.constant 1 : i32
    %0 = arith.muli %arg0, %c1_i32 : i32
    %1 = arith.addi %0, %arg1 : i32
    %c0_i32 = arith.constant 0 : i32
    %c0_i32_0 = arith.constant 0 : i32
    return %1, %c0_i32, %arg2 : i32, i32, i32
  }
}

module attributes {stable_mosaic.version = 11 : i64} {
  func.func @_bn_act_kernel(%arg0: i32, %arg1: i32, %arg2: i32, %arg3: memref<1x128x128xbf16, #tpu.memory_space<vmem>>, %arg4: memref<1x128xf32, #tpu.memory_space<vmem>>, %arg5: memref<1x128xf32, #tpu.memory_space<vmem>>, %arg6: memref<1x128x128xbf16, #tpu.memory_space<vmem>>) attributes {dimension_semantics = [#tpu.dimension_semantics<parallel>, #tpu.dimension_semantics<parallel>, #tpu.dimension_semantics<parallel>], iteration_bounds = array<i64: 4, 1, 1>, scalar_prefetch = 0 : i64, scratch_operands = 0 : i64, tpu.core_type = #tpu.core_type<tc>, window_params = [{transform_indices = @transform_0, window_bounds = array<i64: 1, 128, 128>}, {transform_indices = @transform_1, window_bounds = array<i64: 1, 128>}, {transform_indices = @transform_2, window_bounds = array<i64: 1, 128>}, {transform_indices = @transform_3, window_bounds = array<i64: 1, 128, 128>}]} {
    %c0 = arith.constant 0 : index
    %c0_0 = arith.constant 0 : index
    %c0_1 = arith.constant 0 : index
    %0 = vector.load %arg3[%c0, %c0_0, %c0_1] : memref<1x128x128xbf16, #tpu.memory_space<vmem>>, vector<1x128x128xbf16>
    %1 = vector.shape_cast %0 : vector<1x128x128xbf16> to vector<128x128xbf16>
    %c0_2 = arith.constant 0 : index
    %c0_3 = arith.constant 0 : index
    %2 = vector.load %arg4[%c0_2, %c0_3] : memref<1x128xf32, #tpu.memory_space<vmem>>, vector<1x128xf32>
    %3 = arith.extf %1 : vector<128x128xbf16> to vector<128x128xf32>
    %4 = vector.broadcast %2 : vector<1x128xf32> to vector<128x128xf32>
    %5 = arith.mulf %3, %4 : vector<128x128xf32>
    %c0_4 = arith.constant 0 : index
    %c0_5 = arith.constant 0 : index
    %6 = vector.load %arg5[%c0_4, %c0_5] : memref<1x128xf32, #tpu.memory_space<vmem>>, vector<1x128xf32>
    %7 = vector.broadcast %6 : vector<1x128xf32> to vector<128x128xf32>
    %8 = arith.addf %5, %7 : vector<128x128xf32>
    %cst = arith.constant 0.000000e+00 : f32
    %9 = vector.broadcast %cst : f32 to vector<128x128xf32>
    %10 = arith.cmpf oge, %8, %9 : vector<128x128xf32>
    %cst_6 = arith.constant 2.000000e-01 : f32
    %11 = vector.broadcast %cst_6 : f32 to vector<128x128xf32>
    %12 = arith.mulf %11, %8 : vector<128x128xf32>
    %13 = arith.select %10, %8, %12 : vector<128x128xi1>, vector<128x128xf32>
    %14 = arith.truncf %13 : vector<128x128xf32> to vector<128x128xbf16>
    %c0_7 = arith.constant 0 : index
    %c0_8 = arith.constant 0 : index
    %c0_9 = arith.constant 0 : index
    %15 = vector.load %arg6[%c0_7, %c0_8, %c0_9] : memref<1x128x128xbf16, #tpu.memory_space<vmem>>, vector<1x128x128xbf16>
    %16 = vector.shape_cast %15 : vector<1x128x128xbf16> to vector<128x128xbf16>
    %17 = vector.shape_cast %14 : vector<128x128xbf16> to vector<1x128x128xbf16>
    tpu.vector_store %arg6[%c0_7, %c0_8, %c0_9], %17 {strides = array<i32>} : memref<1x128x128xbf16, #tpu.memory_space<vmem>>, vector<1x128x128xbf16>,
    return
  }
  func.func @transform_0(%arg0: i32, %arg1: i32, %arg2: i32) -> (i32, i32, i32) {
    %c0_i32 = arith.constant 0 : i32
    return %arg0, %arg1, %arg2 : i32, i32, i32
  }
  func.func @transform_1(%arg0: i32, %arg1: i32, %arg2: i32) -> (i32, i32) {
    %c0_i32 = arith.constant 0 : i32
    %c0_i32_0 = arith.constant 0 : i32
    return %c0_i32, %arg2 : i32, i32
  }
  func.func @transform_2(%arg0: i32, %arg1: i32, %arg2: i32) -> (i32, i32) {
    %c0_i32 = arith.constant 0 : i32
    %c0_i32_0 = arith.constant 0 : i32
    return %c0_i32, %arg2 : i32, i32
  }
  func.func @transform_3(%arg0: i32, %arg1: i32, %arg2: i32) -> (i32, i32, i32) {
    %c0_i32 = arith.constant 0 : i32
    return %arg0, %arg1, %arg2 : i32, i32, i32
  }
}

module attributes {stable_mosaic.version = 11 : i64} {
  func.func @_conv_stats_kernel(%arg0: i32, %arg1: i32, %arg2: i32, %arg3: memref<1x256x256xbf16, #tpu.memory_space<vmem>>, %arg4: memref<1x256x128xbf16, #tpu.memory_space<vmem>>, %arg5: memref<1x128xf32, #tpu.memory_space<vmem>>, %arg6: memref<1x256x128xbf16, #tpu.memory_space<vmem>>, %arg7: memref<1x2x128xf32, #tpu.memory_space<vmem>>) attributes {dimension_semantics = [#tpu.dimension_semantics<parallel>, #tpu.dimension_semantics<parallel>, #tpu.dimension_semantics<parallel>], iteration_bounds = array<i64: 4, 2, 1>, scalar_prefetch = 0 : i64, scratch_operands = 0 : i64, tpu.core_type = #tpu.core_type<tc>, window_params = [{transform_indices = @transform_0, window_bounds = array<i64: 1, 256, 256>}, {transform_indices = @transform_1, window_bounds = array<i64: 1, 256, 128>}, {transform_indices = @transform_2, window_bounds = array<i64: 1, 128>}, {transform_indices = @transform_3, window_bounds = array<i64: 1, 256, 128>}, {transform_indices = @transform_4, window_bounds = array<i64: 1, 2, 128>}]} {
    %c0 = arith.constant 0 : index
    %c0_0 = arith.constant 0 : index
    %c0_1 = arith.constant 0 : index
    %0 = vector.load %arg3[%c0, %c0_0, %c0_1] : memref<1x256x256xbf16, #tpu.memory_space<vmem>>, vector<1x256x256xbf16>
    %1 = vector.shape_cast %0 : vector<1x256x256xbf16> to vector<256x256xbf16>
    %c0_2 = arith.constant 0 : index
    %c0_3 = arith.constant 0 : index
    %c0_4 = arith.constant 0 : index
    %2 = vector.load %arg4[%c0_2, %c0_3, %c0_4] : memref<1x256x128xbf16, #tpu.memory_space<vmem>>, vector<1x256x128xbf16>
    %3 = vector.shape_cast %2 : vector<1x256x128xbf16> to vector<256x128xbf16>
    %cst = arith.constant dense<0.000000e+00> : vector<256x128xf32>
    %4 = tpu.matmul %1, %3, %cst {dimension_numbers = #tpu.dot_dimension_numbers<[1], [0], [0], [1], [0, 0, 1, 1], [], []>} : vector<256x256xbf16>, vector<256x128xbf16>, vector<256x128xf32> -> vector<256x128xf32>
    %c0_5 = arith.constant 0 : index
    %c0_6 = arith.constant 0 : index
    %5 = vector.load %arg5[%c0_5, %c0_6] : memref<1x128xf32, #tpu.memory_space<vmem>>, vector<1x128xf32>
    %6 = vector.broadcast %5 : vector<1x128xf32> to vector<256x128xf32>
    %7 = arith.addf %4, %6 : vector<256x128xf32>
    %8 = arith.truncf %7 : vector<256x128xf32> to vector<256x128xbf16>
    %c0_7 = arith.constant 0 : index
    %c0_8 = arith.constant 0 : index
    %c0_9 = arith.constant 0 : index
    %9 = vector.load %arg6[%c0_7, %c0_8, %c0_9] : memref<1x256x128xbf16, #tpu.memory_space<vmem>>, vector<1x256x128xbf16>
    %10 = vector.shape_cast %9 : vector<1x256x128xbf16> to vector<256x128xbf16>
    %11 = vector.shape_cast %8 : vector<256x128xbf16> to vector<1x256x128xbf16>
    tpu.vector_store %arg6[%c0_7, %c0_8, %c0_9], %11 {strides = array<i32>} : memref<1x256x128xbf16, #tpu.memory_space<vmem>>, vector<1x256x128xbf16>,
    %cst_10 = arith.constant dense<0.000000e+00> : vector<128xf32>
    %12 = vector.multi_reduction <add>, %7, %cst_10 [0] : vector<256x128xf32> to vector<128xf32>
    %13 = vector.shape_cast %12 : vector<128xf32> to vector<1x128xf32>
    %14 = arith.mulf %7, %7 : vector<256x128xf32>
    %cst_11 = arith.constant dense<0.000000e+00> : vector<128xf32>
    %15 = vector.multi_reduction <add>, %14, %cst_11 [0] : vector<256x128xf32> to vector<128xf32>
    %16 = vector.shape_cast %15 : vector<128xf32> to vector<1x128xf32>
    %17 = tpu.concatenate %13, %16 in 0 : vector<1x128xf32>, vector<1x128xf32> -> vector<2x128xf32>
    %c0_12 = arith.constant 0 : index
    %c0_13 = arith.constant 0 : index
    %c0_14 = arith.constant 0 : index
    %18 = vector.load %arg7[%c0_12, %c0_13, %c0_14] : memref<1x2x128xf32, #tpu.memory_space<vmem>>, vector<1x2x128xf32>
    %19 = vector.shape_cast %18 : vector<1x2x128xf32> to vector<2x128xf32>
    %20 = vector.shape_cast %17 : vector<2x128xf32> to vector<1x2x128xf32>
    tpu.vector_store %arg7[%c0_12, %c0_13, %c0_14], %20 {strides = array<i32>} : memref<1x2x128xf32, #tpu.memory_space<vmem>>, vector<1x2x128xf32>,
    return
  }
  func.func @transform_0(%arg0: i32, %arg1: i32, %arg2: i32) -> (i32, i32, i32) {
    %c0_i32 = arith.constant 0 : i32
    %c0_i32_0 = arith.constant 0 : i32
    return %arg0, %arg1, %c0_i32 : i32, i32, i32
  }
  func.func @transform_1(%arg0: i32, %arg1: i32, %arg2: i32) -> (i32, i32, i32) {
    %c0_i32 = arith.constant 0 : i32
    %c0_i32_0 = arith.constant 0 : i32
    return %arg0, %c0_i32, %arg2 : i32, i32, i32
  }
  func.func @transform_2(%arg0: i32, %arg1: i32, %arg2: i32) -> (i32, i32) {
    %c0_i32 = arith.constant 0 : i32
    %c0_i32_0 = arith.constant 0 : i32
    return %c0_i32, %arg2 : i32, i32
  }
  func.func @transform_3(%arg0: i32, %arg1: i32, %arg2: i32) -> (i32, i32, i32) {
    %c0_i32 = arith.constant 0 : i32
    return %arg0, %arg1, %arg2 : i32, i32, i32
  }
  func.func @transform_4(%arg0: i32, %arg1: i32, %arg2: i32) -> (i32, i32, i32) {
    %c2_i32 = arith.constant 2 : i32
    %0 = arith.muli %arg0, %c2_i32 : i32
    %1 = arith.addi %0, %arg1 : i32
    %c0_i32 = arith.constant 0 : i32
    %c0_i32_0 = arith.constant 0 : i32
    return %1, %c0_i32, %arg2 : i32, i32, i32
  }
}

module attributes {stable_mosaic.version = 11 : i64} {
  func.func @_bn_act_kernel(%arg0: i32, %arg1: i32, %arg2: i32, %arg3: memref<1x256x128xbf16, #tpu.memory_space<vmem>>, %arg4: memref<1x128xf32, #tpu.memory_space<vmem>>, %arg5: memref<1x128xf32, #tpu.memory_space<vmem>>, %arg6: memref<1x256x128xbf16, #tpu.memory_space<vmem>>) attributes {dimension_semantics = [#tpu.dimension_semantics<parallel>, #tpu.dimension_semantics<parallel>, #tpu.dimension_semantics<parallel>], iteration_bounds = array<i64: 4, 2, 1>, scalar_prefetch = 0 : i64, scratch_operands = 0 : i64, tpu.core_type = #tpu.core_type<tc>, window_params = [{transform_indices = @transform_0, window_bounds = array<i64: 1, 256, 128>}, {transform_indices = @transform_1, window_bounds = array<i64: 1, 128>}, {transform_indices = @transform_2, window_bounds = array<i64: 1, 128>}, {transform_indices = @transform_3, window_bounds = array<i64: 1, 256, 128>}]} {
    %c0 = arith.constant 0 : index
    %c0_0 = arith.constant 0 : index
    %c0_1 = arith.constant 0 : index
    %0 = vector.load %arg3[%c0, %c0_0, %c0_1] : memref<1x256x128xbf16, #tpu.memory_space<vmem>>, vector<1x256x128xbf16>
    %1 = vector.shape_cast %0 : vector<1x256x128xbf16> to vector<256x128xbf16>
    %c0_2 = arith.constant 0 : index
    %c0_3 = arith.constant 0 : index
    %2 = vector.load %arg4[%c0_2, %c0_3] : memref<1x128xf32, #tpu.memory_space<vmem>>, vector<1x128xf32>
    %3 = arith.extf %1 : vector<256x128xbf16> to vector<256x128xf32>
    %4 = vector.broadcast %2 : vector<1x128xf32> to vector<256x128xf32>
    %5 = arith.mulf %3, %4 : vector<256x128xf32>
    %c0_4 = arith.constant 0 : index
    %c0_5 = arith.constant 0 : index
    %6 = vector.load %arg5[%c0_4, %c0_5] : memref<1x128xf32, #tpu.memory_space<vmem>>, vector<1x128xf32>
    %7 = vector.broadcast %6 : vector<1x128xf32> to vector<256x128xf32>
    %8 = arith.addf %5, %7 : vector<256x128xf32>
    %cst = arith.constant 0.000000e+00 : f32
    %9 = vector.broadcast %cst : f32 to vector<256x128xf32>
    %10 = arith.cmpf oge, %8, %9 : vector<256x128xf32>
    %cst_6 = arith.constant 2.000000e-01 : f32
    %11 = vector.broadcast %cst_6 : f32 to vector<256x128xf32>
    %12 = arith.mulf %11, %8 : vector<256x128xf32>
    %13 = arith.select %10, %8, %12 : vector<256x128xi1>, vector<256x128xf32>
    %14 = arith.truncf %13 : vector<256x128xf32> to vector<256x128xbf16>
    %c0_7 = arith.constant 0 : index
    %c0_8 = arith.constant 0 : index
    %c0_9 = arith.constant 0 : index
    %15 = vector.load %arg6[%c0_7, %c0_8, %c0_9] : memref<1x256x128xbf16, #tpu.memory_space<vmem>>, vector<1x256x128xbf16>
    %16 = vector.shape_cast %15 : vector<1x256x128xbf16> to vector<256x128xbf16>
    %17 = vector.shape_cast %14 : vector<256x128xbf16> to vector<1x256x128xbf16>
    tpu.vector_store %arg6[%c0_7, %c0_8, %c0_9], %17 {strides = array<i32>} : memref<1x256x128xbf16, #tpu.memory_space<vmem>>, vector<1x256x128xbf16>,
    return
  }
  func.func @transform_0(%arg0: i32, %arg1: i32, %arg2: i32) -> (i32, i32, i32) {
    %c0_i32 = arith.constant 0 : i32
    return %arg0, %arg1, %arg2 : i32, i32, i32
  }
  func.func @transform_1(%arg0: i32, %arg1: i32, %arg2: i32) -> (i32, i32) {
    %c0_i32 = arith.constant 0 : i32
    %c0_i32_0 = arith.constant 0 : i32
    return %c0_i32, %arg2 : i32, i32
  }
  func.func @transform_2(%arg0: i32, %arg1: i32, %arg2: i32) -> (i32, i32) {
    %c0_i32 = arith.constant 0 : i32
    %c0_i32_0 = arith.constant 0 : i32
    return %c0_i32, %arg2 : i32, i32
  }
  func.func @transform_3(%arg0: i32, %arg1: i32, %arg2: i32) -> (i32, i32, i32) {
    %c0_i32 = arith.constant 0 : i32
    return %arg0, %arg1, %arg2 : i32, i32, i32
  }
}

module attributes {stable_mosaic.version = 11 : i64} {
  func.func @_conv_stats_kernel(%arg0: i32, %arg1: i32, %arg2: i32, %arg3: memref<1x256x288xbf16, #tpu.memory_space<vmem>>, %arg4: memref<1x288x128xbf16, #tpu.memory_space<vmem>>, %arg5: memref<1x128xf32, #tpu.memory_space<vmem>>, %arg6: memref<1x256x128xbf16, #tpu.memory_space<vmem>>, %arg7: memref<1x2x128xf32, #tpu.memory_space<vmem>>) attributes {dimension_semantics = [#tpu.dimension_semantics<parallel>, #tpu.dimension_semantics<parallel>, #tpu.dimension_semantics<parallel>], iteration_bounds = array<i64: 1, 8, 1>, scalar_prefetch = 0 : i64, scratch_operands = 0 : i64, tpu.core_type = #tpu.core_type<tc>, window_params = [{transform_indices = @transform_0, window_bounds = array<i64: 1, 256, 288>}, {transform_indices = @transform_1, window_bounds = array<i64: 1, 288, 128>}, {transform_indices = @transform_2, window_bounds = array<i64: 1, 128>}, {transform_indices = @transform_3, window_bounds = array<i64: 1, 256, 128>}, {transform_indices = @transform_4, window_bounds = array<i64: 1, 2, 128>}]} {
    %c0 = arith.constant 0 : index
    %c0_0 = arith.constant 0 : index
    %c0_1 = arith.constant 0 : index
    %0 = vector.load %arg3[%c0, %c0_0, %c0_1] : memref<1x256x288xbf16, #tpu.memory_space<vmem>>, vector<1x256x288xbf16>
    %1 = vector.shape_cast %0 : vector<1x256x288xbf16> to vector<256x288xbf16>
    %c0_2 = arith.constant 0 : index
    %c0_3 = arith.constant 0 : index
    %c0_4 = arith.constant 0 : index
    %2 = vector.load %arg4[%c0_2, %c0_3, %c0_4] : memref<1x288x128xbf16, #tpu.memory_space<vmem>>, vector<1x288x128xbf16>
    %3 = vector.shape_cast %2 : vector<1x288x128xbf16> to vector<288x128xbf16>
    %cst = arith.constant dense<0.000000e+00> : vector<256x128xf32>
    %4 = tpu.matmul %1, %3, %cst {dimension_numbers = #tpu.dot_dimension_numbers<[1], [0], [0], [1], [0, 0, 1, 1], [], []>} : vector<256x288xbf16>, vector<288x128xbf16>, vector<256x128xf32> -> vector<256x128xf32>
    %c0_5 = arith.constant 0 : index
    %c0_6 = arith.constant 0 : index
    %5 = vector.load %arg5[%c0_5, %c0_6] : memref<1x128xf32, #tpu.memory_space<vmem>>, vector<1x128xf32>
    %6 = vector.broadcast %5 : vector<1x128xf32> to vector<256x128xf32>
    %7 = arith.addf %4, %6 : vector<256x128xf32>
    %8 = arith.truncf %7 : vector<256x128xf32> to vector<256x128xbf16>
    %c0_7 = arith.constant 0 : index
    %c0_8 = arith.constant 0 : index
    %c0_9 = arith.constant 0 : index
    %9 = vector.load %arg6[%c0_7, %c0_8, %c0_9] : memref<1x256x128xbf16, #tpu.memory_space<vmem>>, vector<1x256x128xbf16>
    %10 = vector.shape_cast %9 : vector<1x256x128xbf16> to vector<256x128xbf16>
    %11 = vector.shape_cast %8 : vector<256x128xbf16> to vector<1x256x128xbf16>
    tpu.vector_store %arg6[%c0_7, %c0_8, %c0_9], %11 {strides = array<i32>} : memref<1x256x128xbf16, #tpu.memory_space<vmem>>, vector<1x256x128xbf16>,
    %cst_10 = arith.constant dense<0.000000e+00> : vector<128xf32>
    %12 = vector.multi_reduction <add>, %7, %cst_10 [0] : vector<256x128xf32> to vector<128xf32>
    %13 = vector.shape_cast %12 : vector<128xf32> to vector<1x128xf32>
    %14 = arith.mulf %7, %7 : vector<256x128xf32>
    %cst_11 = arith.constant dense<0.000000e+00> : vector<128xf32>
    %15 = vector.multi_reduction <add>, %14, %cst_11 [0] : vector<256x128xf32> to vector<128xf32>
    %16 = vector.shape_cast %15 : vector<128xf32> to vector<1x128xf32>
    %17 = tpu.concatenate %13, %16 in 0 : vector<1x128xf32>, vector<1x128xf32> -> vector<2x128xf32>
    %c0_12 = arith.constant 0 : index
    %c0_13 = arith.constant 0 : index
    %c0_14 = arith.constant 0 : index
    %18 = vector.load %arg7[%c0_12, %c0_13, %c0_14] : memref<1x2x128xf32, #tpu.memory_space<vmem>>, vector<1x2x128xf32>
    %19 = vector.shape_cast %18 : vector<1x2x128xf32> to vector<2x128xf32>
    %20 = vector.shape_cast %17 : vector<2x128xf32> to vector<1x2x128xf32>
    tpu.vector_store %arg7[%c0_12, %c0_13, %c0_14], %20 {strides = array<i32>} : memref<1x2x128xf32, #tpu.memory_space<vmem>>, vector<1x2x128xf32>,
    return
  }
  func.func @transform_0(%arg0: i32, %arg1: i32, %arg2: i32) -> (i32, i32, i32) {
    %c0_i32 = arith.constant 0 : i32
    %c0_i32_0 = arith.constant 0 : i32
    return %arg0, %arg1, %c0_i32 : i32, i32, i32
  }
  func.func @transform_1(%arg0: i32, %arg1: i32, %arg2: i32) -> (i32, i32, i32) {
    %c0_i32 = arith.constant 0 : i32
    %c0_i32_0 = arith.constant 0 : i32
    return %arg0, %c0_i32, %arg2 : i32, i32, i32
  }
  func.func @transform_2(%arg0: i32, %arg1: i32, %arg2: i32) -> (i32, i32) {
    %c0_i32 = arith.constant 0 : i32
    %c0_i32_0 = arith.constant 0 : i32
    return %c0_i32, %arg2 : i32, i32
  }
  func.func @transform_3(%arg0: i32, %arg1: i32, %arg2: i32) -> (i32, i32, i32) {
    %c0_i32 = arith.constant 0 : i32
    return %arg0, %arg1, %arg2 : i32, i32, i32
  }
  func.func @transform_4(%arg0: i32, %arg1: i32, %arg2: i32) -> (i32, i32, i32) {
    %c8_i32 = arith.constant 8 : i32
    %0 = arith.muli %arg0, %c8_i32 : i32
    %1 = arith.addi %0, %arg1 : i32
    %c0_i32 = arith.constant 0 : i32
    %c0_i32_0 = arith.constant 0 : i32
    return %1, %c0_i32, %arg2 : i32, i32, i32
  }
}

module attributes {stable_mosaic.version = 11 : i64} {
  func.func @_bn_act_kernel(%arg0: i32, %arg1: i32, %arg2: i32, %arg3: memref<1x256x128xbf16, #tpu.memory_space<vmem>>, %arg4: memref<1x128xf32, #tpu.memory_space<vmem>>, %arg5: memref<1x128xf32, #tpu.memory_space<vmem>>, %arg6: memref<1x256x128xf32, #tpu.memory_space<vmem>>) attributes {dimension_semantics = [#tpu.dimension_semantics<parallel>, #tpu.dimension_semantics<parallel>, #tpu.dimension_semantics<parallel>], iteration_bounds = array<i64: 1, 8, 1>, scalar_prefetch = 0 : i64, scratch_operands = 0 : i64, tpu.core_type = #tpu.core_type<tc>, window_params = [{transform_indices = @transform_0, window_bounds = array<i64: 1, 256, 128>}, {transform_indices = @transform_1, window_bounds = array<i64: 1, 128>}, {transform_indices = @transform_2, window_bounds = array<i64: 1, 128>}, {transform_indices = @transform_3, window_bounds = array<i64: 1, 256, 128>}]} {
    %c0 = arith.constant 0 : index
    %c0_0 = arith.constant 0 : index
    %c0_1 = arith.constant 0 : index
    %0 = vector.load %arg3[%c0, %c0_0, %c0_1] : memref<1x256x128xbf16, #tpu.memory_space<vmem>>, vector<1x256x128xbf16>
    %1 = vector.shape_cast %0 : vector<1x256x128xbf16> to vector<256x128xbf16>
    %c0_2 = arith.constant 0 : index
    %c0_3 = arith.constant 0 : index
    %2 = vector.load %arg4[%c0_2, %c0_3] : memref<1x128xf32, #tpu.memory_space<vmem>>, vector<1x128xf32>
    %3 = arith.extf %1 : vector<256x128xbf16> to vector<256x128xf32>
    %4 = vector.broadcast %2 : vector<1x128xf32> to vector<256x128xf32>
    %5 = arith.mulf %3, %4 : vector<256x128xf32>
    %c0_4 = arith.constant 0 : index
    %c0_5 = arith.constant 0 : index
    %6 = vector.load %arg5[%c0_4, %c0_5] : memref<1x128xf32, #tpu.memory_space<vmem>>, vector<1x128xf32>
    %7 = vector.broadcast %6 : vector<1x128xf32> to vector<256x128xf32>
    %8 = arith.addf %5, %7 : vector<256x128xf32>
    %cst = arith.constant 0.000000e+00 : f32
    %9 = vector.broadcast %cst : f32 to vector<256x128xf32>
    %10 = arith.subf %9, %8 : vector<256x128xf32>
    %11 = math.exp %10 : vector<256x128xf32>
    %cst_6 = arith.constant 1.000000e+00 : f32
    %12 = vector.broadcast %cst_6 : f32 to vector<256x128xf32>
    %13 = arith.addf %12, %11 : vector<256x128xf32>
    %cst_7 = arith.constant 1.000000e+00 : f32
    %14 = vector.broadcast %cst_7 : f32 to vector<256x128xf32>
    %15 = arith.divf %14, %13 : vector<256x128xf32>
    %c0_8 = arith.constant 0 : index
    %c0_9 = arith.constant 0 : index
    %c0_10 = arith.constant 0 : index
    %16 = vector.load %arg6[%c0_8, %c0_9, %c0_10] : memref<1x256x128xf32, #tpu.memory_space<vmem>>, vector<1x256x128xf32>
    %17 = vector.shape_cast %16 : vector<1x256x128xf32> to vector<256x128xf32>
    %18 = vector.shape_cast %15 : vector<256x128xf32> to vector<1x256x128xf32>
    tpu.vector_store %arg6[%c0_8, %c0_9, %c0_10], %18 {strides = array<i32>} : memref<1x256x128xf32, #tpu.memory_space<vmem>>, vector<1x256x128xf32>,
    return
  }
  func.func @transform_0(%arg0: i32, %arg1: i32, %arg2: i32) -> (i32, i32, i32) {
    %c0_i32 = arith.constant 0 : i32
    return %arg0, %arg1, %arg2 : i32, i32, i32
  }
  func.func @transform_1(%arg0: i32, %arg1: i32, %arg2: i32) -> (i32, i32) {
    %c0_i32 = arith.constant 0 : i32
    %c0_i32_0 = arith.constant 0 : i32
    return %c0_i32, %arg2 : i32, i32
  }
  func.func @transform_2(%arg0: i32, %arg1: i32, %arg2: i32) -> (i32, i32) {
    %c0_i32 = arith.constant 0 : i32
    %c0_i32_0 = arith.constant 0 : i32
    return %c0_i32, %arg2 : i32, i32
  }
  func.func @transform_3(%arg0: i32, %arg1: i32, %arg2: i32) -> (i32, i32, i32) {
    %c0_i32 = arith.constant 0 : i32
    return %arg0, %arg1, %arg2 : i32, i32, i32
  }
}

</mosaic_0001>

<bundles_post_ra>
// kernel: _lambda_.13
= control target key start
LH: loop header
LB: loop body
LE: loop exit
PB: predicated region body
PF: predicated region fallthrough
CT: control target
= control target key end

     0   :  { %s548_s12 = smov 0   ;;  %s550_s13 = smov 0   ;;  %s609_s0 = inlined_call_operand.vmem [shape: bf16[4,2,512], index: 0, kind: input, shape index: {}]   ;;  %s610_s1 = inlined_call_operand.vmem [shape: f32[1,512], index: 1, kind: input, shape index: {}]   ;;  %s611_s2 = inlined_call_operand.vmem [shape: f32[1,512], index: 2, kind: input, shape index: {}]   ;;  %s612_s3 = inlined_call_operand.vmem [shape: bf16[4,2,512], index: 3, kind: output, shape index: {}]  }
   0x1   :  { %s552_s14 = smov 0   ;;  %s554_s15 = smov 0  }
   0x2   :  { %s556_s16 = smov 0  }
   0x3 LB: > { %s25_s17 = sadd.s32 1, %s518_s14  ;;  %s32_s18 = sadd.s32 1, %s522_s15  ;;  %s526_s16 = sphi %s556_s16, %s13_s16   ;;  %s522_s15 = sphi %s554_s15, %s616_s15   ;;  %s518_s14 = sphi %s552_s14, %s615_s14   ;;  %s514_s13 = sphi %s550_s13, %s614_s13   ;;  %s510_s12 = sphi %s548_s12, %s613_s12  }
   0x4   : > { %p26_p0 = scmp.ge.s32.totalorder %s25_s17, 2  ;;  %p439_p1 = scmp.ge.s32.totalorder %s526_s16, 1 }
   0x5   : > { %p192_p2 = scmp.lt.s32.totalorder %s526_s16, 9 }
   0x6   : > { %s618_s17 = smov (%p26_p0, %s25_s17), 0  ;;  %s620_s18 = smov (!%p26_p0, %s32_s18), %s522_s15 }
   0x7   : > { %p193_p3 = pnand %p439_p1, %p192_p2  ;;  %p34_p4 = scmp.ge.s32.totalorder %s620_s18, 4 }
   0x8   : > { %s440_s19 = sshll.u32 (!%p193_p3), %s510_s12, 1  ;;  %p239_p5 = scmp.lt.s32.totalorder (!%p193_p3), %s514_s13, 3 }
   0x9   : > { %s622_s18 = smov (%p34_p4, %s620_s18), 0  ;;  %196 = sbr.rel (%p193_p3) target bundleno = 43 (0x2b), region = 32 }
   0xa   : > { %p243_p6 = scmp.lt.s32.totalorder (!%p193_p3), %s440_s19, 3 }
   0xe   : > { %s624_s13 = smov (!%p239_p5, %s514_s13), 3  ;;  %s626_s19 = smov (!%p243_p6, %s440_s19), 3  ;;  %vm281_vm0 = vcmask 1041408   ;;  %vm305_vm2 = vcmask 1040384  }
   0xf   : > { %s441_s20 = sshll.u32 %s624_s13, 2  ;;  %s254_s24 = scalar_lea.vmem %s610_s1, %s626_s19 }
  0x10   : > { %s578_s21 = sadd.s32 %s441_s20, %s626_s19  ;;  %s259_s30 = scalar_lea.vmem %s611_s2, %s626_s19  ;;  %v275_v0 = vld [vmem:[%s254_s24] sm:$0x3] }
  0x11   : > { %s249_s27 = scalar_lea.vmem %s609_s0, %s578_s21  ;;  %v278_v2 = vperm.slane %v275_v0, 0  ;;  %v279_v3 = vperm.slane %v275_v0, 1  ;;  %v285_v4 = vld [vmem:[%s259_s30] sm:$0x3]  ;;  %s272_s6 = scalar_lea.vmem %s612_s3, %s578_s21 }
  0x12   : > { %v274_v1 = vld [vmem:[%s249_s27] sm:$0x3]  ;;  %v287_v6 = vperm.slane %v285_v4, 0  ;;  %v288_v7 = vperm.slane %v285_v4, 1 }
  0x13   : > { %v276_v5 = vunpack.c.l.bf16 %v274_v1  ;;  %v280_v8 = vrot.slane %v279_v3, 6 }
  0x14   : > { %v289_v9 = vrot.slane %v288_v7, 6 }
  0x15   : > { %v282_v10 = vsel %vm281_vm0, %v278_v2, %v280_v8 }
  0x16   : > { %v284_v11 = vmul.f32 %v282_v10, %v276_v5  ;;  %v290_v12 = vsel %vm281_vm0, %v287_v6, %v289_v9 }
  0x18   : > { %v292_v13 = vadd.f32 %v290_v12, %v284_v11 }
  0x1a   : > { %vm293_vm1 = vcmp.ge.f32.partialorder %v292_v13, 0.0  ;;  %v294_v14 = vmul.f32 0.2, %v292_v13 }
  0x1c   : > { %v295_v15 = vsel %vm293_vm1, %v292_v13, %v294_v14 }
  0x1d   : > { %297 = vst [vmem:[#allocation1] ss:$4 sm:$0xff] %v295_v15 }
  0x24   : > { %v298_v16 = vld.sshfl [vmem:[#allocation1] sm:$0xff pattern:$0x73625140]  ;;  %v299_v17 = vld.sshfl [vmem:[#allocation1 + $0x8] sm:$0xff pattern:$0x73625140] }
  0x25   : > { %v302_v18 = vpack.c.bf16 %v299_v17, %v298_v16 }
  0x27   : > { %v304_v19 = vrot.slane %v302_v18, 3 }
  0x29   : > { %v308_v20 = vsel %vm305_vm2, %v302_v18, %v304_v19 }
  0x2a   : > { %310 = vst [vmem:[%s272_s6] sm:$0x3] %v308_v20 }
  0x2b PF: > { %s13_s16 = sadd.s32 1, %s526_s16   ;;  %s613_s12 = smov %s518_s14 }
  0x2c   : > { %p10_p7 = scmp.ge.s32.totalorder %s13_s16, 10   ;;  %s614_s13 = smov %s522_s15 }
  0x2d   : > { %s615_s14 = smov %s618_s17  ;;  %s616_s15 = smov %s622_s18 }
  0x2e   :  { %12 = sbr.rel (!%p10_p7) target bundleno = 3 (0x3), region = 68 }

// kernel: _lambda_.12
= control target key start
LH: loop header
LB: loop body
LE: loop exit
PB: predicated region body
PF: predicated region fallthrough
CT: control target
= control target key end

     0   :  { %s1936_s0 = inlined_call_operand.vmem [shape: bf16[4,2,400], index: 0, kind: input, shape index: {}]   ;;  %s1937_s1 = inlined_call_operand.hbm [shape: bf16[4,400,512], index: 1, kind: input, shape index: {}]   ;;  %s1938_s2 = inlined_call_operand.hbm [shape: f32[1,512], index: 2, kind: input, shape index: {}]   ;;  %s1939_s3 = inlined_call_operand.vmem [shape: bf16[4,2,512], index: 3, kind: output, shape index: {0}]   ;;  %s1940_s4 = inlined_call_operand.vmem [shape: f32[4,2,512], index: 4, kind: output, shape index: {1}]  }
   0x1   :  { %1942 = sst [smem:[#allocation8_spill]] %s1940_s4 }
   0x2   :  { %10 = vsyncpa [#allocation3], 0 }
   0x3   :  { %12 = vsyncpa [#allocation3 + $0x1], 0 }
   0x4   :  { %13 = vsyncpa [#allocation5], 0 }
   0x5   :  { %15 = vsyncpa [#allocation5 + $0x1], 0  ;;  %s1600_s15 = smov 0   ;;  %s1602_s16 = smov 0  }
   0x6   :  { %s1604_s17 = smov 0   ;;  %s1606_s18 = smov 0  }
   0x7   :  { %s1608_s19 = smov 0   ;;  %s1610_s20 = smov 0  }
   0x8   :  { %s1612_s21 = smov 0   ;;  %s1614_s22 = smov 0  }
   0x9   :  { %s1616_s23 = smov 0   ;;  %s1618_s24 = smov 0  }
   0xa   :  { %s1620_s25 = smov 0  }
   0xb LB: > { %s33_s26 = sadd.s32 1, %s1562_s23  ;;  %s40_s27 = sadd.s32 1, %s1566_s24  ;;  %s1570_s25 = sphi %s1620_s25, %s21_s25   ;;  %s1566_s24 = sphi %s1618_s24, %s1960_s24   ;;  %s1562_s23 = sphi %s1616_s23, %s1959_s23   ;;  %s1558_s22 = sphi %s1614_s22, %s1958_s22   ;;  %s1554_s21 = sphi %s1612_s21, %s1957_s21   ;;  %s1550_s20 = sphi %s1610_s20, %s1956_s20   ;;  %s1546_s19 = sphi %s1608_s19, %s1955_s19   ;;  %s1542_s18 = sphi %s1606_s18, %s1954_s18   ;;  %s1538_s17 = sphi %s1604_s17, %s1953_s17   ;;  %s1534_s16 = sphi %s1602_s16, %s1952_s16   ;;  %s1530_s15 = sphi %s1600_s15, %s1951_s15  }
   0xc   : > { %p34_p0 = scmp.ge.s32.totalorder %s33_s26, 2  ;;  %p84_p1 = scmp.ne.s32.totalorder %s1550_s20, %s1546_s19 }
   0xd   : > { %p85_p2 = scmp.eq.s32.totalorder %s1570_s25, 0  ;;  %p1324_p4 = scmp.lt.s32.totalorder %s1570_s25, 8 }
   0xe   : > { %s1962_s26 = smov (%p34_p0, %s33_s26), 0  ;;  %s1964_s27 = smov (!%p34_p0, %s40_s27), %s1566_s24 }
   0xf   : > { %p86_p3 = por %p85_p2, %p84_p1  ;;  %s211_s29 = sand.u32 1, %s1550_s20  }
  0x10   : > { %s1310_s30 = smul.u32 400, %s211_s29  ;;  %s1941_s5 = sshll.u32 %s1562_s23, 1 }
  0x11   : > { %s1311_s6 = smul.u32 200, %s1566_s24  ;;  %p1672_p5 = pnand %p1324_p4, %p86_p3 }
  0x12   : > { %s215_s9 = scalar_lea.vmem [#allocation2], %s1310_s30  ;;  %p1048_p6 = scmp.ge.s32.totalorder %s1570_s25, 1 }
  0x13   : > { %s220_s8 = sadd.s32 %s1311_s6, %s1941_s5  ;;  %s225_s10 = sshll.u32 %s215_s9, 4  ;;  %s226_s10 = int_to_ptr.vmem [resolvable:$true] %s225_s10 }
  0x14   : > { %s1045_s11 = sshll.u32 %s220_s8, 2  ;;  %s212_s4 = scalar_lea.sflag [#allocation3], %s211_s29 }
  0x15   : > { %s222_s14 = scalar_lea.hbm %s1937_s1, %s1045_s11  ;;  %s1572_s6 = smov 256  }
  0x16   : > { %s223_s28 = sshll.u32 %s222_s14, 4  ;;  %s1573_s5 = smov 128   ;;  %s224_s28 = int_to_ptr.hbm [resolvable:$true] %s223_s28 }
  0x17   : > { %s1574_s30 = smov 8   ;;  %p252_p7 = scmp.lt.s32.totalorder %s1570_s25, 9 }
  0x18   : > { %1320 = dma.hbm_to_vmem [thread:$0]  (!%p1672_p5), %s224_s28, 6400, %s226_s10, %s212_s4, %s1572_s6, %s1573_s5, %s1574_s30  }
  0x19   : > { %p1685_p8 = pnand %p1048_p6, %p252_p7  ;;  %s1040_s9 = sadd.s32 4294967295, %s1570_s25  }
  0x1a   : > { %p42_p9 = scmp.ge.s32.totalorder %s1964_s27, 4  ;;  %s73_s29 = ssub.s32 %s1562_s23, %s1962_s26 }
  0x1b   : > { %p90_p10 = scmp.ne.s32.totalorder %s1546_s19, %s1542_s18  ;;  %p1696_p11 = scmp.eq.s32.totalorder %s1040_s9, 0 }
  0x1c   : > { %s1966_s27 = smov (%p42_p9, %s1964_s27), 0  ;;  %p101_p12 = scmp.eq.s32.totalorder %s73_s29, 0 }
  0x1d   : > { %s72_s28 = ssub.s32 %s1566_s24, %s1966_s27  ;;  %s103_s5 = sadd.s32 1, %s1538_s17 }
  0x1e   : > { %s74_s7 = sor.u32 %s73_s29, %s72_s28  ;;  %p1705_p13 = por %p1696_p11, %p90_p10 }
  0x1f   : > { %p75_p0 = scmp.eq.s32.totalorder %s74_s7, 0  ;;  %p110_p1 = scmp.ne.s32.totalorder %s1538_s17, %s1534_s16 }
  0x20   : > { %s1712_s18 = scalar_select %p101_p12, %s1538_s17, %s103_s5  }
  0x21   : > { %s1947_s11 = sadd.s32 1, %s1550_s20  ;;  %p112_p3 = por %p110_p1, %p85_p2 }
  0x22   : > { %s1717_s12 = scalar_select %p75_p0, %s1550_s20, %s1947_s11  }
  0x23   : > { %p116_p5 = scmp.ne.s32.totalorder %s1534_s16, %s1530_s15  ;;  %s235_s13 = sand.u32 1, %s1538_s17  }
  0x24   : > { %s1948_s14 = sshll.u32 %s1562_s23, 1  ;;  %s1046_s28 = sshll.u32 %s235_s13, 1 }
  0x25   : > { %s243_s9 = scalar_lea.hbm %s1938_s2, %s1948_s14  ;;  %p1731_p6 = por %p116_p5, %p1696_p11 }
  0x26   : > { %s245_s5 = sshll.u32 %s243_s9, 4  ;;  %s239_s7 = scalar_lea.vmem [#allocation4], %s1046_s28  ;;  %s246_s5 = int_to_ptr.hbm [resolvable:$true] %s245_s5 }
  0x27   : > { %s247_s11 = sshll.u32 %s239_s7, 4  ;;  %p1321_p7 = pnand %p1324_p4, %p112_p3  ;;  %s248_s11 = int_to_ptr.vmem [resolvable:$true] %s247_s11 }
  0x28   : > { %s236_s15 = scalar_lea.sflag [#allocation5], %s235_s13  ;;  %256 = sbr.rel (%p1685_p8) target bundleno = 269 (0x10d), region = 32 }
  0x29   : > { %1323 = dma.hbm_to_vmem [thread:$0]  (!%p1321_p7), %s246_s5, 32, %s248_s11, %s236_s15  }
  0x2a   : > { %s258_s4 = sand.u32 (!%p1685_p8), 1, %s1546_s19  }
  0x2b   : > { %s1312_s14 = smul.u32 (!%p1685_p8), 400, %s258_s4  ;;  %s259_s6 = scalar_lea.sflag (!%p1685_p8), [#allocation3], %s258_s4 }
  0x2d   : > { %s1740_s30 = scalar_lea.vmem [#allocation2], %s1312_s14 }
  0x2e   : > { %1521 = dma.done.wait (%p1705_p13), %s259_s6, 6400  }
  0x2f   : > { %1523 = vsyncadd (%p1705_p13), %s259_s6, 4294960896  ;;  %s268_s9 = sand.u32 1, %s1534_s16  }
  0x30   : > { %s1747_s13 = sshll.u32 %s268_s9, 1  ;;  %s269_s8 = scalar_lea.sflag [#allocation5], %s268_s9 }
  0x31   : > { %s272_s28 = scalar_lea.vmem [#allocation4], %s1747_s13 }
  0x32   : > { %1525 = dma.done.wait (%p1731_p6), %s269_s8, 32  }
  0x33   : > { %1527 = vsyncadd (%p1731_p6), %s269_s8, 4294967264  ;;  %p328_p2 = scmp.lt.s32.totalorder %s1558_s22, 3  ;;  %v1114_v0 = vld [vmem:[%s1740_s30 + $0x70] sm:$0xf]  ;;  %v1275_v1 = vld [vmem:[%s1740_s30 + $0x74] sm:$0xf0] }
  0x34   : > { %v1178_v2 = vld [vmem:[%s1740_s30 + $0xf0] sm:$0xf]  ;;  %v1115_v3 = vor.u32 %v1275_v1, %v1114_v0  ;;  %v1291_v4 = vld [vmem:[%s1740_s30 + $0xf4] sm:$0xf0]  ;;  %v1106_v9 = vld [vmem:[%s1740_s30 + $0x60] sm:$0xf] }
  0x35   : > { %v1242_v5 = vld [vmem:[%s1740_s30 + $0x170] sm:$0xf]  ;;  %v1307_v6 = vld [vmem:[%s1740_s30 + $0x174] sm:$0xf0]  ;;  %v1179_v7 = vor.u32 %v1291_v4, %v1178_v2  ;;  %v1273_v10 = vld [vmem:[%s1740_s30 + $0x64] sm:$0xf0] }
  0x36   : > { %v1243_v8 = vor.u32 %v1307_v6, %v1242_v5  ;;  %v1170_v11 = vld [vmem:[%s1740_s30 + $0xe0] sm:$0xf]  ;;  %683 = vmatpush.bf16.msra.mxu0 %v1115_v3  ;;  %v1107_v12 = vor.u32 %v1273_v10, %v1106_v9  ;;  %v1289_v13 = vld [vmem:[%s1740_s30 + $0xe4] sm:$0xf0]  ;;  %v1098_v18 = vld [vmem:[%s1740_s30 + $0x50] sm:$0xf] }
  0x37   : > { %v1234_v14 = vld [vmem:[%s1740_s30 + $0x160] sm:$0xf]  ;;  %v1305_v15 = vld [vmem:[%s1740_s30 + $0x164] sm:$0xf0]  ;;  %696 = vmatpush.bf16.msra.mxu1 %v1179_v7  ;;  %v1171_v16 = vor.u32 %v1289_v13, %v1170_v11  ;;  %v1271_v19 = vld [vmem:[%s1740_s30 + $0x54] sm:$0xf0] }
  0x38   : > { %709 = vmatpush.bf16.msra.mxu2 %v1243_v8  ;;  %v1235_v17 = vor.u32 %v1305_v15, %v1234_v14  ;;  %v1162_v20 = vld [vmem:[%s1740_s30 + $0xd0] sm:$0xf]  ;;  %v1287_v21 = vld [vmem:[%s1740_s30 + $0xd4] sm:$0xf0]  ;;  %v1090_v24 = vld [vmem:[%s1740_s30 + $0x40] sm:$0xf]  ;;  %v1099_v25 = vor.u32 %v1271_v19, %v1098_v18 }
  0x39   : > { %v1226_v22 = vld [vmem:[%s1740_s30 + $0x150] sm:$0xf]  ;;  %v1303_v23 = vld [vmem:[%s1740_s30 + $0x154] sm:$0xf0]  ;;  %s1968_s22 = smov (!%p328_p2, %s1558_s22), 3  ;;  %v1163_v29 = vor.u32 %v1287_v21, %v1162_v20  ;;  %vm680_vm0 = vcmask 130048  }
  0x3a   : > { %684 = vmatpush.bf16.msra.mxu0 %v1107_v12  ;;  %v1269_v26 = vld [vmem:[%s1740_s30 + $0x44] sm:$0xf0]  ;;  %v1154_v27 = vld [vmem:[%s1740_s30 + $0xc0] sm:$0xf]  ;;  %v1227_v30 = vor.u32 %v1303_v23, %v1226_v22  ;;  %v1274_v33 = vld [vmem:[%s1740_s30 + $0x74] sm:$0xf] }
  0x3b   : > { %v1285_v28 = vld [vmem:[%s1740_s30 + $0xc4] sm:$0xf0]  ;;  %697 = vmatpush.bf16.msra.mxu1 %v1171_v16  ;;  %v1250_v31 = vld [vmem:[%s1740_s30 + $0x180] sm:$0xf]  ;;  %v1116_v37 = vld [vmem:[%s1740_s30 + $0x78] sm:$0xf0]  ;;  %v1091_v39 = vor.u32 %v1269_v26, %v1090_v24 }
  0x3c   : > { %710 = vmatpush.bf16.msra.mxu2 %v1235_v17  ;;  %v1309_v32 = vld [vmem:[%s1740_s30 + $0x184] sm:$0xf0]  ;;  %v1218_v34 = vld [vmem:[%s1740_s30 + $0x140] sm:$0xf]  ;;  %v1119_v38 = vor.u32 %v1274_v33, %v1116_v37  ;;  %v1272_v40 = vld [vmem:[%s1740_s30 + $0x64] sm:$0xf]  ;;  %v1155_v42 = vor.u32 %v1285_v28, %v1154_v27 }
  0x3d   : > { %v1301_v35 = vld [vmem:[%s1740_s30 + $0x144] sm:$0xf0]  ;;  %v1251_v36 = vor.u32 %v1309_v32, %v1250_v31  ;;  %v1108_v41 = vld [vmem:[%s1740_s30 + $0x68] sm:$0xf0]  ;;  %s1050_s10 = sshll.u32 %s1968_s22, 2  ;;  %s1051_s11 = sshll.u32 %s1554_s21, 1 }
  0x3e   : > { %685 = vmatpush.bf16.msra.mxu0 %v1099_v25  ;;  %v1219_v43 = vor.u32 %v1301_v35, %v1218_v34  ;;  %v1082_v44 = vld [vmem:[%s1740_s30 + $0x30] sm:$0xf]  ;;  %v1267_v45 = vld [vmem:[%s1740_s30 + $0x34] sm:$0xf0]  ;;  %v1111_v50 = vor.u32 %v1272_v40, %v1108_v41  ;;  %v1270_v51 = vld [vmem:[%s1740_s30 + $0x54] sm:$0xf]  ;;  %s335_s7 = scalar_lea.vmem %s1936_s0, %s1050_s10 }
  0x3f   : > { %729 = vmatpush.bf16.msra.mxu3 %v1251_v36  ;;  %698 = vmatpush.bf16.msra.mxu1 %v1163_v29  ;;  %v1146_v46 = vld [vmem:[%s1740_s30 + $0xb0] sm:$0xf]  ;;  %v1283_v47 = vld [vmem:[%s1740_s30 + $0xb4] sm:$0xf0]  ;;  %v1100_v52 = vld [vmem:[%s1740_s30 + $0x58] sm:$0xf0]  ;;  %v1083_v53 = vor.u32 %v1267_v45, %v1082_v44 }
  0x40   : > { %711 = vmatpush.bf16.msra.mxu2 %v1227_v30  ;;  %v1210_v48 = vld [vmem:[%s1740_s30 + $0x130] sm:$0xf]  ;;  %v1299_v49 = vld [vmem:[%s1740_s30 + $0x134] sm:$0xf0]  ;;  %v1147_v54 = vor.u32 %v1283_v47, %v1146_v46  ;;  %v1074_v56 = vld [vmem:[%s1740_s30 + $0x20] sm:$0xf]  ;;  %v1103_v62 = vor.u32 %v1270_v51, %v1100_v52 }
  0x41   : > { %v1211_v55 = vor.u32 %v1299_v49, %v1210_v48  ;;  %v1265_v57 = vld [vmem:[%s1740_s30 + $0x24] sm:$0xf0]  ;;  %v1138_v58 = vld [vmem:[%s1740_s30 + $0xa0] sm:$0xf]  ;;  %v1268_v63 = vld [vmem:[%s1740_s30 + $0x44] sm:$0xf] }
  0x42   : > { %686 = vmatpush.bf16.msra.mxu0 %v1091_v39  ;;  %v1281_v59 = vld [vmem:[%s1740_s30 + $0xa4] sm:$0xf0]  ;;  %v1202_v60 = vld [vmem:[%s1740_s30 + $0x120] sm:$0xf]  ;;  %v1092_v0 = vld [vmem:[%s1740_s30 + $0x48] sm:$0xf0]  ;;  %v1075_v1 = vor.u32 %v1265_v57, %v1074_v56 }
  0x43   : > { %735 = vmatpush.bf16.msrb.mxu3 %v1119_v38  ;;  %699 = vmatpush.bf16.msra.mxu1 %v1155_v42  ;;  %v1297_v61 = vld [vmem:[%s1740_s30 + $0x124] sm:$0xf0]  ;;  %v1066_v2 = vld [vmem:[%s1740_s30 + $0x10] sm:$0xf]  ;;  %v1139_v4 = vor.u32 %v1281_v59, %v1138_v58  ;;  %v1263_v6 = vld [vmem:[%s1740_s30 + $0x14] sm:$0xf0]  ;;  %v1095_v11 = vor.u32 %v1268_v63, %v1092_v0 }
  0x44   : > { %712 = vmatpush.bf16.msra.mxu2 %v1219_v43  ;;  %v364_v3 = vld [vmem:[%s335_s7] sm:$0xf]  ;;  %v1203_v5 = vor.u32 %v1297_v61, %v1202_v60  ;;  %v1130_v7 = vld [vmem:[%s1740_s30 + $0x90] sm:$0xf]  ;;  %v1067_v12 = vor.u32 %v1263_v6, %v1066_v2  ;;  %v1058_v13 = vld [vmem:[%s1740_s30] sm:$0xf] }
  0x45   : > { %422 = vst [vmem:[#allocation1] ss:$9 sm:$0xff] %v364_v3  ;;  %v1279_v8 = vld [vmem:[%s1740_s30 + $0x94] sm:$0xf0]  ;;  %v1194_v9 = vld [vmem:[%s1740_s30 + $0x110] sm:$0xf] }
  0x46   : > { %687 = vmatpush.bf16.msra.mxu0 %v1083_v53  ;;  %v1295_v10 = vld [vmem:[%s1740_s30 + $0x114] sm:$0xf0]  ;;  %v1266_v14 = vld [vmem:[%s1740_s30 + $0x34] sm:$0xf]  ;;  %v1084_v15 = vld [vmem:[%s1740_s30 + $0x38] sm:$0xf0]  ;;  %v1131_v16 = vor.u32 %v1279_v8, %v1130_v7 }
  0x47   : > { %736 = vmatpush.bf16.msrb.mxu3 %v1111_v50  ;;  %700 = vmatpush.bf16.msra.mxu1 %v1147_v54  ;;  %v1195_v17 = vor.u32 %v1295_v10, %v1194_v9  ;;  %v1261_v18 = vld [vmem:[%s1740_s30 + $0x4] sm:$0xf0]  ;;  %v1122_v19 = vld [vmem:[%s1740_s30 + $0x80] sm:$0xf]  ;;  %v1290_v23 = vld [vmem:[%s1740_s30 + $0xf4] sm:$0xf]  ;;  %v1087_v24 = vor.u32 %v1266_v14, %v1084_v15 }
  0x48   : > { %713 = vmatpush.bf16.msra.mxu2 %v1211_v55  ;;  %v1277_v20 = vld [vmem:[%s1740_s30 + $0x84] sm:$0xf0]  ;;  %v1186_v21 = vld [vmem:[%s1740_s30 + $0x100] sm:$0xf]  ;;  %v1180_v25 = vld [vmem:[%s1740_s30 + $0xf8] sm:$0xf0]  ;;  %v1059_v28 = vor.u32 %v1261_v18, %v1058_v13 }
  0x49   : > { %v1293_v22 = vld [vmem:[%s1740_s30 + $0x104] sm:$0xf0]  ;;  %v1306_v26 = vld [vmem:[%s1740_s30 + $0x174] sm:$0xf]  ;;  %v1244_v27 = vld [vmem:[%s1740_s30 + $0x178] sm:$0xf0]  ;;  %v1123_v32 = vor.u32 %v1277_v20, %v1122_v19  ;;  %v1183_v34 = vor.u32 %v1290_v23, %v1180_v25 }
  0x4a   : > { %688 = vmatpush.bf16.msra.mxu0 %v1075_v1  ;;  %v1264_v30 = vld [vmem:[%s1740_s30 + $0x24] sm:$0xf]  ;;  %v1076_v31 = vld [vmem:[%s1740_s30 + $0x28] sm:$0xf0]  ;;  %v1187_v33 = vor.u32 %v1293_v22, %v1186_v21  ;;  %v1247_v35 = vor.u32 %v1306_v26, %v1244_v27  ;;  %v1262_v44 = vld [vmem:[%s1740_s30 + $0x14] sm:$0xf] }
  0x4b   : > { %737 = vmatpush.bf16.msrb.mxu3 %v1103_v62  ;;  %701 = vmatpush.bf16.msra.mxu1 %v1139_v4  ;;  %v1288_v36 = vld [vmem:[%s1740_s30 + $0xe4] sm:$0xf]  ;;  %v1252_v38 = vld [vmem:[%s1740_s30 + $0x188] sm:$0xf0]  ;;  %v1079_v39 = vor.u32 %v1264_v30, %v1076_v31  ;;  %v1068_v45 = vld [vmem:[%s1740_s30 + $0x18] sm:$0xf0] }
  0x4c   : > { %714 = vmatpush.bf16.msra.mxu2 %v1203_v5  ;;  %v1830_v29 = vld [vmem:[#allocation1 + $0x1b] sm:$0xff]  ;;  %v1172_v40 = vld [vmem:[%s1740_s30 + $0xe8] sm:$0xf0]  ;;  %v1846_v47 = vld [vmem:[#allocation1 + $0x9] sm:$0xff]  ;;  %v1071_v52 = vor.u32 %v1262_v44, %v1068_v45  ;;  %vm796_vm1 = vcmask 1041408   ;;  %p343_p4 = scmp.lt.s32.totalorder %s1051_s11, 3 }
  0x4d   : > { %1256 = vmatmul.msk.bf16.vlgmr.msra.gmra.mxu3 %vm680_vm0, %v1830_v29  ;;  %v1308_v37 = vld [vmem:[%s1740_s30 + $0x184] sm:$0xf]  ;;  %v1236_v42 = vld [vmem:[%s1740_s30 + $0x168] sm:$0xf0]  ;;  %v1175_v49 = vor.u32 %v1288_v36, %v1172_v40  ;;  %v1286_v51 = vld [vmem:[%s1740_s30 + $0xd4] sm:$0xf] }
  0x4e   : > { %689 = vmatpush.bf16.msra.mxu0 %v1067_v12  ;;  %v1304_v41 = vld [vmem:[%s1740_s30 + $0x164] sm:$0xf]  ;;  %v423_v43 = vld [vmem:[#allocation1] sm:$0xff]  ;;  %v1844_v46 = vld [vmem:[#allocation1 + $0x12] sm:$0xff]  ;;  %v1255_v48 = vor.u32 %v1308_v37, %v1252_v38  ;;  %s1970_s11 = smov (!%p343_p4, %s1051_s11), 3  ;;  %vm790_vm2 = vcmask 1040384  }
  0x4f   : > { %738 = vmatpush.bf16.msrb.mxu3 %v1095_v11  ;;  %702 = vmatpush.bf16.msra.mxu1 %v1131_v16  ;;  %v1239_v50 = vor.u32 %v1304_v41, %v1236_v42  ;;  %v1164_v53 = vld [vmem:[%s1740_s30 + $0xd8] sm:$0xf0]  ;;  %v1302_v54 = vld [vmem:[%s1740_s30 + $0x154] sm:$0xf]  ;;  %v1260_v56 = vld [vmem:[%s1740_s30 + $0x4] sm:$0xf]  ;;  %s1887_s21 = sadd.s32 %s1050_s10, %s1970_s11 }
  0x50   : > { %715 = vmatpush.bf16.msra.mxu2 %v1195_v17  ;;  %v1228_v55 = vld [vmem:[%s1740_s30 + $0x158] sm:$0xf0]  ;;  %v1060_v57 = vld [vmem:[%s1740_s30 + $0x8] sm:$0xf0]  ;;  %v1167_v58 = vor.u32 %v1286_v51, %v1164_v53  ;;  %v1284_v60 = vld [vmem:[%s1740_s30 + $0xc4] sm:$0xf]  ;;  %s349_s14 = scalar_lea.vmem %s1939_s3, %s1887_s21 }
  0x51   : > { %v1231_v59 = vor.u32 %v1302_v54, %v1228_v55  ;;  %v1063_v61 = vor.u32 %v1260_v56, %v1060_v57  ;;  %v1156_v62 = vld [vmem:[%s1740_s30 + $0xc8] sm:$0xf0]  ;;  %v1300_v63 = vld [vmem:[%s1740_s30 + $0x144] sm:$0xf]  ;;  %v1282_v3 = vld [vmem:[%s1740_s30 + $0xb4] sm:$0xf] }
  0x52   : > { %690 = vmatpush.bf16.msra.mxu0 %v1059_v28  ;;  %v1220_v0 = vld [vmem:[%s1740_s30 + $0x148] sm:$0xf0]  ;;  %v1159_v1 = vor.u32 %v1284_v60, %v1156_v62  ;;  %v1148_v4 = vld [vmem:[%s1740_s30 + $0xb8] sm:$0xf0]  ;;  %v1298_v5 = vld [vmem:[%s1740_s30 + $0x134] sm:$0xf] }
  0x53   : > { %739 = vmatpush.bf16.msrb.mxu3 %v1087_v24  ;;  %703 = vmatpush.bf16.msra.mxu1 %v1123_v32  ;;  %v1223_v2 = vor.u32 %v1300_v63, %v1220_v0  ;;  %v1212_v6 = vld [vmem:[%s1740_s30 + $0x138] sm:$0xf0]  ;;  %v1151_v7 = vor.u32 %v1282_v3, %v1148_v4  ;;  %v1280_v9 = vld [vmem:[%s1740_s30 + $0xa4] sm:$0xf]  ;;  %v1140_v10 = vld [vmem:[%s1740_s30 + $0xa8] sm:$0xf0] }
  0x54   : > { %716 = vmatpush.bf16.msra.mxu2 %v1187_v33  ;;  %v1215_v8 = vor.u32 %v1298_v5, %v1212_v6  ;;  %v1296_v11 = vld [vmem:[%s1740_s30 + $0x124] sm:$0xf]  ;;  %v1204_v12 = vld [vmem:[%s1740_s30 + $0x128] sm:$0xf0]  ;;  %v1143_v13 = vor.u32 %v1280_v9, %v1140_v10  ;;  %v1278_v15 = vld [vmem:[%s1740_s30 + $0x94] sm:$0xf] }
  0x55   : > { %691 = vmatmul.bf16.vlgmr.msra.gmra.mxu0 %v423_v43  ;;  %v1207_v14 = vor.u32 %v1296_v11, %v1204_v12  ;;  %v1132_v16 = vld [vmem:[%s1740_s30 + $0x98] sm:$0xf0]  ;;  %v1294_v17 = vld [vmem:[%s1740_s30 + $0x114] sm:$0xf]  ;;  %v1276_v21 = vld [vmem:[%s1740_s30 + $0x84] sm:$0xf] }
  0x56   : > { %748 = vmatpush.bf16.msrb.mxu0 %v1183_v34  ;;  %704 = vmatmul.bf16.vlgmr.msra.gmra.mxu1 %v1846_v47  ;;  %v1196_v18 = vld [vmem:[%s1740_s30 + $0x118] sm:$0xf0]  ;;  %v1135_v19 = vor.u32 %v1278_v15, %v1132_v16  ;;  %v1124_v22 = vld [vmem:[%s1740_s30 + $0x88] sm:$0xf0]  ;;  %v1292_v23 = vld [vmem:[%s1740_s30 + $0x104] sm:$0xf] }
  0x57   : > { %761 = vmatpush.bf16.msrb.mxu1 %v1247_v35  ;;  %740 = vmatpush.bf16.msrb.mxu3 %v1079_v39  ;;  %v1199_v20 = vor.u32 %v1294_v17, %v1196_v18  ;;  %v1188_v24 = vld [vmem:[%s1740_s30 + $0x108] sm:$0xf0]  ;;  %v1127_v25 = vor.u32 %v1276_v21, %v1124_v22  ;;  %v415_v27 = vld [vmem:[%s272_s28] sm:$0x3]  ;;  %s1055_s22 = sshll.u32 %s1887_s21, 1  ;;  %s1950_s9 = sld [smem:[#allocation8_spill]] }
  0x58   : > { %717 = vmatmul.bf16.vlgmr.msra.gmra.mxu2 %v1844_v46  ;;  %v1191_v26 = vor.u32 %v1292_v23, %v1188_v24  ;;  %v417_v31 = vperm.slane %v415_v27, 0 }
  0x59   : > { %781 = vmatpush.bf16.msrb.mxu2 %v1255_v48 }
  0x5a   : > { %749 = vmatpush.bf16.msrb.mxu0 %v1175_v49 }
  0x5b   : > { %762 = vmatpush.bf16.msrb.mxu1 %v1239_v50  ;;  %741 = vmatpush.bf16.msrb.mxu3 %v1071_v52 }
  0x5d   : > { %s360_s13 = scalar_lea.vmem %s1950_s9, %s1055_s22 }
  0x5e   : > { %750 = vmatpush.bf16.msrb.mxu0 %v1167_v58 }
  0x5f   : > { %763 = vmatpush.bf16.msrb.mxu1 %v1231_v59  ;;  %742 = vmatpush.bf16.msrb.mxu3 %v1063_v61 }
  0x62   : > { %751 = vmatpush.bf16.msrb.mxu0 %v1159_v1  ;;  %743 = vmatmul.bf16.vlgmr.msrb.gmra.mxu3 %v423_v43  ;;  %v418_v43 = vperm.slane %v415_v27, 1 }
  0x63   : > { %764 = vmatpush.bf16.msrb.mxu1 %v1223_v2 }
  0x66   : > { %752 = vmatpush.bf16.msrb.mxu0 %v1151_v7 }
  0x67   : > { %765 = vmatpush.bf16.msrb.mxu1 %v1215_v8 }
  0x68   : > { %1257 = vmatmul.msk.bf16.vlgmr.msrb.gmra.mxu2 %vm680_vm0, %v1830_v29 }
  0x6a   : > { %753 = vmatpush.bf16.msrb.mxu0 %v1143_v13 }
  0x6b   : > { %766 = vmatpush.bf16.msrb.mxu1 %v1207_v14 }
  0x6e   : > { %754 = vmatpush.bf16.msrb.mxu0 %v1135_v19 }
  0x6f   : > { %767 = vmatpush.bf16.msrb.mxu1 %v1199_v20 }
  0x72   : > { %755 = vmatpush.bf16.msrb.mxu0 %v1127_v25 }
  0x73   : > { %768 = vmatpush.bf16.msrb.mxu1 %v1191_v26 }
  0x75   : > { %756 = vmatmul.bf16.vlgmr.msrb.gmra.mxu0 %v1846_v47 }
  0x76   : > { %769 = vmatmul.bf16.vlgmr.msrb.gmra.mxu1 %v1844_v46 }
  0xd0   : > { %v731_v29 = vpop.f32.mrf.mxu3 }
  0xd2   : > { %v692_v28 = vpop.f32.mrf.mxu0 }
  0xd3   : > { %v705_v30 = vpop.f32.mrf.mxu1  ;;  %v693_v32 = vadd.f32 %v692_v28, %v417_v31 }
  0xd5   : > { %v706_v37 = vadd.f32 %v705_v30, %v693_v32 }
  0xd8   : > { %v733_v35 = vpop.f32.mrf.mxu3 }
  0xda   : > { %v694_v34 = vpop.f32.mrf.mxu0 }
  0xdb   : > { %v718_v33 = vpop.f32.mrf.mxu2  ;;  %v707_v36 = vpop.f32.mrf.mxu1 }
  0xdc   : > { %v719_v38 = vadd.f32 %v718_v33, %v706_v37 }
  0xde   : > { %v732_v41 = vadd.f32 %v731_v29, %v719_v38 }
  0xe0   : > { %v811_v42 = vmul.f32 %v732_v41, %v732_v41  ;;  %v797_v48 = vsel %vm796_vm1, %v732_v41, 0.0 }
  0xe1   : > { %v798_v54 = vrot.slane %v797_v48, 4 }
  0xe2   : > { %v813_v46 = vsel %vm796_vm1, %v811_v42, 0.0 }
  0xe3   : > { %v720_v39 = vpop.f32.mrf.mxu2  ;;  %v814_v49 = vrot.slane %v813_v46, 4  ;;  %v799_v58 = vadd.f32 %v798_v54, %v797_v48 }
  0xe5   : > { %v744_v40 = vpop.f32.mrf.mxu3  ;;  %v815_v56 = vadd.f32 %v814_v49, %v813_v46  ;;  %v800_v4 = vrot.slane %v799_v58, 2 }
  0xe6   : > { %v745_v47 = vadd.f32 %v744_v40, %v418_v43 }
  0xe7   : > { %v816_v62 = vrot.slane %v815_v56, 2  ;;  %v801_v11 = vadd.f32 %v800_v4, %v799_v58 }
  0xe9   : > { %v817_v8 = vadd.f32 %v816_v62, %v815_v56  ;;  %v802_v17 = vrot.slane %v801_v11, 1 }
  0xeb   : > { %v783_v44 = vpop.f32.mrf.mxu2  ;;  %v818_v14 = vrot.slane %v817_v8, 1  ;;  %v803_v22 = vadd.f32 %v802_v17, %v801_v11 }
  0xed   : > { %v746_v45 = vpop.f32.mrf.mxu3  ;;  %v819_v19 = vadd.f32 %v818_v14, %v817_v8 }
  0xef   : > { %v827_v25 = vsel %vm790_vm2, %v803_v22, %v819_v19 }
  0xf2   : > { %v757_v50 = vpop.f32.mrf.mxu0 }
  0xf3   : > { %v770_v51 = vpop.f32.mrf.mxu1  ;;  %v758_v52 = vadd.f32 %v757_v50, %v745_v47  ;;  %v785_v53 = vpop.f32.mrf.mxu2 }
  0xf5   : > { %v771_v55 = vadd.f32 %v770_v51, %v758_v52 }
  0xf7   : > { %v784_v57 = vadd.f32 %v783_v44, %v771_v55 }
  0xf9   : > { %v787_v59 = vpack.c.bf16 %v784_v57, %v732_v41  ;;  %v804_v60 = vsel %vm796_vm1, %v784_v57, 0.0  ;;  %v812_v61 = vmul.f32 %v784_v57, %v784_v57 }
  0xfa   : > { %v805_v63 = vrot.slane %v804_v60, 4  ;;  %v759_v0 = vpop.f32.mrf.mxu0 }
  0xfb   : > { %v772_v1 = vpop.f32.mrf.mxu1  ;;  %v789_v2 = vrot.slane %v787_v59, 3  ;;  %v820_v3 = vsel %vm796_vm1, %v812_v61, 0.0 }
  0xfc   : > { %v806_v5 = vadd.f32 %v805_v63, %v804_v60  ;;  %v821_v6 = vrot.slane %v820_v3, 4 }
  0xfd   : > { %v793_v7 = vsel %vm790_vm2, %v787_v59, %v789_v2 }
  0xfe   : > { %795 = vst [vmem:[%s349_s14] sm:$0x3] %v793_v7  ;;  %v807_v9 = vrot.slane %v806_v5, 2  ;;  %v822_v10 = vadd.f32 %v821_v6, %v820_v3 }
 0x100   : > { %v808_v12 = vadd.f32 %v807_v9, %v806_v5  ;;  %v823_v13 = vrot.slane %v822_v10, 2 }
 0x102   : > { %v809_v15 = vrot.slane %v808_v12, 1  ;;  %v824_v16 = vadd.f32 %v823_v13, %v822_v10 }
 0x104   : > { %v825_v18 = vrot.slane %v824_v16, 1  ;;  %v810_v20 = vadd.f32 %v809_v15, %v808_v12 }
 0x106   : > { %v826_v21 = vadd.f32 %v825_v18, %v824_v16 }
 0x108   : > { %v828_v23 = vsel %vm790_vm2, %v810_v20, %v826_v21 }
 0x109   : > { %v831_v24 = vrot.slane %v828_v23, 6 }
 0x10b   : > { %v832_v26 = vsel %vm796_vm1, %v827_v25, %v831_v24 }
 0x10c   : > { %834 = vst [vmem:[%s360_s13] sm:$0xf] %v832_v26 }
 0x10d PF: > { %s21_s25 = sadd.s32 1, %s1570_s25   ;;  %s1951_s15 = smov %s1534_s16 }
 0x10e   : > { %p18_p8 = scmp.ge.s32.totalorder %s21_s25, 10   ;;  %s1952_s16 = smov %s1538_s17 }
 0x10f   : > { %s1953_s17 = smov %s1712_s18  ;;  %s1954_s18 = smov %s1546_s19 }
 0x110   : > { %s1955_s19 = smov %s1550_s20  ;;  %s1956_s20 = smov %s1717_s12 }
 0x111   : > { %s1957_s21 = smov %s1562_s23  ;;  %s1958_s22 = smov %s1566_s24 }
 0x112   : > { %s1959_s23 = smov %s1962_s26  ;;  %s1960_s24 = smov %s1966_s27 }
 0x113   :  { %20 = sbr.rel (!%p18_p8) target bundleno = 11 (0xb), region = 100 }
 0x118   :  { %899 = vsyncpa [#allocation3], 1 }
 0x119   :  { %901 = vsyncpa [#allocation3 + $0x1], 1 }
 0x11a   :  { %902 = vsyncpa [#allocation5], 1 }
 0x11b   :  { %904 = vsyncpa [#allocation5 + $0x1], 1 }

// kernel: _lambda_.15
= control target key start
LH: loop header
LB: loop body
LE: loop exit
PB: predicated region body
PF: predicated region fallthrough
CT: control target
= control target key end

     0   :  { %s525_s12 = smov 0   ;;  %s527_s13 = smov 0   ;;  %s564_s0 = inlined_call_operand.vmem [shape: bf16[4,8,256], index: 0, kind: input, shape index: {}]   ;;  %s565_s1 = inlined_call_operand.vmem [shape: f32[1,256], index: 1, kind: input, shape index: {}]   ;;  %s566_s2 = inlined_call_operand.vmem [shape: f32[1,256], index: 2, kind: input, shape index: {}]   ;;  %s567_s3 = inlined_call_operand.vmem [shape: bf16[4,8,256], index: 3, kind: output, shape index: {}]  }
   0x1   :  { %s529_s14 = smov 0  }
   0x2 LB: > { %s32_s15 = sadd.s32 1, %s499_s13  ;;  %p448_p0 = scmp.ge.s32.totalorder %s503_s14, 1  ;;  %s503_s14 = sphi %s529_s14, %s13_s14   ;;  %s499_s13 = sphi %s527_s13, %s569_s13   ;;  %s495_s12 = sphi %s525_s12, %s568_s12  }
   0x3   : > { %p34_p1 = scmp.ge.s32.totalorder %s32_s15, 4  ;;  %p193_p2 = scmp.lt.s32.totalorder %s503_s14, 5 }
   0x5   : > { %s571_s15 = smov (%p34_p1, %s32_s15), 0  ;;  %p194_p3 = pnand %p448_p0, %p193_p2 }
   0x6   : > { %p242_p4 = scmp.lt.s32.totalorder (!%p194_p3), %s495_s12, 3 }
   0x7   : > { %197 = sbr.rel (%p194_p3) target bundleno = 28 (0x1c), region = 32 }
   0xc   : > { %s573_s12 = smov (!%p242_p4, %s495_s12), 3  ;;  %v280_v0 = vld [vmem:[%s565_s1] sm:$0x3] }
   0xd   : > { %s455_s18 = sshll.u32 %s573_s12, 3  ;;  %v290_v1 = vld [vmem:[%s566_s2] sm:$0x3]  ;;  %v284_v2 = vperm.slane %v280_v0, 0  ;;  %v285_v3 = vperm.slane %v280_v0, 1 }
   0xe   : > { %s253_s23 = scalar_lea.vmem %s564_s0, %s455_s18  ;;  %v292_v7 = vperm.slane %v290_v1, 0  ;;  %v293_v8 = vperm.slane %v290_v1, 1  ;;  %s277_s26 = scalar_lea.vmem %s567_s3, %s455_s18 }
   0xf   : > { %v279_v4 = vld [vmem:[%s253_s23] sm:$0xff] }
  0x10   : > { %v281_v5 = vunpack.c.l.bf16 %v279_v4  ;;  %v282_v6 = vunpack.c.h.bf16 %v279_v4 }
  0x12   : > { %v288_v9 = vmul.f32 %v284_v2, %v281_v5  ;;  %v289_v10 = vmul.f32 %v285_v3, %v282_v6 }
  0x14   : > { %v296_v11 = vadd.f32 %v292_v7, %v288_v9  ;;  %v297_v12 = vadd.f32 %v293_v8, %v289_v10 }
  0x16   : > { %vm298_vm0 = vcmp.ge.f32.partialorder %v296_v11, 0.0  ;;  %vm299_vm1 = vcmp.ge.f32.partialorder %v297_v12, 0.0  ;;  %v300_v13 = vmul.f32 0.2, %v296_v11  ;;  %v301_v14 = vmul.f32 0.2, %v297_v12 }
  0x18   : > { %v302_v15 = vsel %vm298_vm0, %v296_v11, %v300_v13  ;;  %v303_v16 = vsel %vm299_vm1, %v297_v12, %v301_v14 }
  0x19   : > { %v304_v17 = vpack.c.bf16 %v303_v16, %v302_v15 }
  0x1b   : > { %305 = vst [vmem:[%s277_s26] sm:$0xff] %v304_v17 }
  0x1c PF: > { %s13_s14 = sadd.s32 1, %s503_s14   ;;  %s568_s12 = smov %s499_s13 }
  0x1d   : > { %p10_p5 = scmp.ge.s32.totalorder %s13_s14, 6   ;;  %s569_s13 = smov %s571_s15 }
  0x1f   :  { %12 = sbr.rel (!%p10_p5) target bundleno = 2 (0x2), region = 68 }

// kernel: _lambda_.14
= control target key start
LH: loop header
LB: loop body
LE: loop exit
PB: predicated region body
PF: predicated region fallthrough
CT: control target
= control target key end

     0   :  { %10 = vsyncpa [#allocation3], 0  ;;  %s4856_s0 = inlined_call_operand.vmem [shape: bf16[4,8,2048], index: 0, kind: input, shape index: {}]   ;;  %s4857_s1 = inlined_call_operand.hbm [shape: bf16[4,2048,256], index: 1, kind: input, shape index: {}]   ;;  %s4858_s2 = inlined_call_operand.hbm [shape: f32[1,256], index: 2, kind: input, shape index: {}]   ;;  %s4859_s3 = inlined_call_operand.vmem [shape: bf16[4,8,256], index: 3, kind: output, shape index: {0}]   ;;  %s4860_s4 = inlined_call_operand.vmem [shape: f32[4,2,256], index: 4, kind: output, shape index: {1}]  }
   0x1   :  { %12 = vsyncpa [#allocation3 + $0x1], 0 }
   0x2   :  { %13 = vsyncpa [#allocation5], 0  ;;  %s4126_s15 = smov 0   ;;  %s4128_s16 = smov 0  }
   0x3   :  { %s4130_s17 = smov 0   ;;  %s4132_s18 = smov 0  }
   0x4   :  { %s4134_s19 = smov 0   ;;  %s4136_s20 = smov 0  }
   0x5 LB: > { %s2611_s21 = sadd.s32 4294967295, %s4096_s20   ;;  %s75_s22 = sadd.s32 1, %s4084_s17  ;;  %s4096_s20 = sphi %s4136_s20, %s19_s20   ;;  %s4092_s19 = sphi %s4134_s19, %s4870_s19   ;;  %s4088_s18 = sphi %s4132_s18, %s4869_s18   ;;  %s4084_s17 = sphi %s4130_s17, %s4868_s17   ;;  %s4080_s16 = sphi %s4128_s16, %s4867_s16   ;;  %s4076_s15 = sphi %s4126_s15, %s4866_s15  }
   0x6   : > { %p82_p0 = scmp.ne.s32.totalorder %s4084_s17, %s4080_s16  ;;  %p83_p1 = scmp.eq.s32.totalorder %s4096_s20, 0 }
   0x7   : > { %p88_p2 = scmp.ne.s32.totalorder %s4080_s16, %s4076_s15  ;;  %p4160_p3 = scmp.eq.s32.totalorder %s2611_s21, 0 }
   0x8   : > { %p4164_p4 = por %p83_p1, %p82_p0  ;;  %p2613_p5 = scmp.ge.s32.totalorder %s4096_s20, 1 }
   0x9   : > { %p4171_p6 = por %p4160_p3, %p88_p2  ;;  %p185_p7 = scmp.lt.s32.totalorder %s4096_s20, 5 }
   0xa   : > { %s199_s28 = sshll.u32 %s4858_s2, 4  ;;  %s4098_s30 = smov [#allocation4]   ;;  %s200_s28 = int_to_ptr.hbm [resolvable:$true] %s199_s28 }
   0xb   : > { %p4179_p8 = pnand %p2613_p5, %p185_p7  ;;  %s201_s5 = sshll.u32 %s4098_s30, 4  ;;  %s202_s5 = int_to_ptr.vmem [resolvable:$true] %s201_s5 }
   0xc   : > { %p3929_p10 = scmp.lt.s32.totalorder %s4096_s20, 4  ;;  %s38_s7 = sadd.s32 1, %s4092_s19 }
   0xd   : > { %p3920_p9 = pneg %p4179_p8  ;;  %p40_p13 = scmp.ge.s32.totalorder %s38_s7, 4 }
   0xe   : > { %p4190_p12 = pnand %p3929_p10, %p4164_p4  ;;  %s224_s8 = sand.u32 1, %s4084_s17  }
   0xf   : > { %p3921_p11 = pnand %p3920_p9, %p4160_p3  ;;  %s3654_s9 = sshll.u32 %s4092_s19, 11 }
  0x10   : > { %s4872_s7 = smov (%p40_p13, %s38_s7), 0  ;;  %s2616_s10 = sshll.u32 %s224_s8, 11 }
  0x11   : > { %3923 = dma.hbm_to_vmem [thread:$0]  (!%p3921_p11), %s200_s28, 32, %s202_s5, [#allocation5]  }
  0x12   : > { %s70_s11 = ssub.s32 %s4092_s19, %s4872_s7  ;;  %s235_s14 = scalar_lea.hbm %s4857_s1, %s3654_s9 }
  0x13   : > { %p73_p0 = scmp.eq.s32.totalorder %s70_s11, 0  ;;  %s236_s15 = sshll.u32 %s235_s14, 4  ;;  %s237_s15 = int_to_ptr.hbm [resolvable:$true] %s236_s15 }
  0x14   : > { %s228_s21 = scalar_lea.vmem [#allocation2], %s2616_s10  ;;  %s225_s27 = scalar_lea.sflag [#allocation3], %s224_s8 }
  0x15   : > { %s238_s24 = sshll.u32 %s228_s21, 4  ;;  %s4099_s28 = smov 128   ;;  %s239_s24 = int_to_ptr.vmem [resolvable:$true] %s238_s24 }
  0x16   : > { %s4207_s26 = scalar_select %p73_p0, %s4084_s17, %s75_s22  }
  0x17   : > { %s4100_s30 = smov 8   ;;  %250 = sbr.rel (%p4179_p8) target bundleno = 446 (0x1be), region = 32 }
  0x18   : > { %3927 = dma.hbm_to_vmem [thread:$0]  (!%p4190_p12), %s237_s15, 32768, %s239_s24, %s225_s27, %s4099_s28, %s4099_s28, %s4100_s30  }
  0x19   : > { %s252_s5 = sand.u32 (!%p4179_p8), 1, %s4080_s16  }
  0x1a   : > { %s2620_s9 = sshll.u32 (!%p4179_p8), %s252_s5, 11  ;;  %s253_s11 = scalar_lea.sflag (!%p4179_p8), [#allocation3], %s252_s5 }
  0x1b   : > { %s4214_s10 = scalar_lea.vmem (!%p4179_p8), [#allocation2], %s2620_s9 }
  0x1c   : > { %4067 = dma.done.wait (%p4171_p6), %s253_s11, 32768  }
  0x1d   : > { %4069 = vsyncadd (%p4171_p6), %s253_s11, 4294934528 }
  0x1e   : > { %4071 = dma.done.wait (%p4160_p3), [#allocation5], 32  }
  0x1f   : > { %4073 = vsyncadd (%p4160_p3), [#allocation5], 4294967264  ;;  %v2686_v0 = vld [vmem:[%s4214_s10 + $0x70] sm:$0xf]  ;;  %v3673_v1 = vld [vmem:[%s4214_s10 + $0x74] sm:$0xf0] }
  0x20   : > { %v2750_v2 = vld [vmem:[%s4214_s10 + $0xf0] sm:$0xf]  ;;  %v2687_v3 = vor.u32 %v3673_v1, %v2686_v0  ;;  %v3689_v4 = vld [vmem:[%s4214_s10 + $0xf4] sm:$0xf0]  ;;  %v2678_v11 = vld [vmem:[%s4214_s10 + $0x60] sm:$0xf] }
  0x21   : > { %v2814_v5 = vld [vmem:[%s4214_s10 + $0x170] sm:$0xf]  ;;  %v3705_v6 = vld [vmem:[%s4214_s10 + $0x174] sm:$0xf0]  ;;  %v2751_v7 = vor.u32 %v3689_v4, %v2750_v2  ;;  %v3671_v13 = vld [vmem:[%s4214_s10 + $0x64] sm:$0xf0] }
  0x22   : > { %v2815_v8 = vor.u32 %v3705_v6, %v2814_v5  ;;  %v2878_v9 = vld [vmem:[%s4214_s10 + $0x1f0] sm:$0xf]  ;;  %v3721_v10 = vld [vmem:[%s4214_s10 + $0x1f4] sm:$0xf0]  ;;  %1957 = vmatpush.bf16.msra.mxu0 %v2687_v3  ;;  %v2742_v14 = vld [vmem:[%s4214_s10 + $0xe0] sm:$0xf]  ;;  %v2679_v16 = vor.u32 %v3671_v13, %v2678_v11 }
  0x23   : > { %v2879_v12 = vor.u32 %v3721_v10, %v2878_v9  ;;  %v3687_v15 = vld [vmem:[%s4214_s10 + $0xe4] sm:$0xf0]  ;;  %1970 = vmatpush.bf16.msra.mxu1 %v2751_v7  ;;  %v2806_v18 = vld [vmem:[%s4214_s10 + $0x160] sm:$0xf]  ;;  %v2670_v23 = vld [vmem:[%s4214_s10 + $0x50] sm:$0xf] }
  0x24   : > { %1983 = vmatpush.bf16.msra.mxu2 %v2815_v8  ;;  %v2743_v17 = vor.u32 %v3687_v15, %v2742_v14  ;;  %v3703_v19 = vld [vmem:[%s4214_s10 + $0x164] sm:$0xf0]  ;;  %v2870_v20 = vld [vmem:[%s4214_s10 + $0x1e0] sm:$0xf]  ;;  %v3669_v24 = vld [vmem:[%s4214_s10 + $0x54] sm:$0xf0] }
  0x25   : > { %1996 = vmatpush.bf16.msra.mxu3 %v2879_v12  ;;  %v2807_v21 = vor.u32 %v3703_v19, %v2806_v18  ;;  %v3719_v22 = vld [vmem:[%s4214_s10 + $0x1e4] sm:$0xf0]  ;;  %v2734_v26 = vld [vmem:[%s4214_s10 + $0xd0] sm:$0xf]  ;;  %v3685_v27 = vld [vmem:[%s4214_s10 + $0xd4] sm:$0xf0]  ;;  %v2671_v29 = vor.u32 %v3669_v24, %v2670_v23 }
  0x26   : > { %v2871_v25 = vor.u32 %v3719_v22, %v2870_v20  ;;  %v2798_v28 = vld [vmem:[%s4214_s10 + $0x150] sm:$0xf]  ;;  %1958 = vmatpush.bf16.msra.mxu0 %v2679_v16  ;;  %v3701_v30 = vld [vmem:[%s4214_s10 + $0x154] sm:$0xf0]  ;;  %v2735_v33 = vor.u32 %v3685_v27, %v2734_v26  ;;  %v2662_v35 = vld [vmem:[%s4214_s10 + $0x40] sm:$0xf] }
  0x27   : > { %v2862_v31 = vld [vmem:[%s4214_s10 + $0x1d0] sm:$0xf]  ;;  %v3717_v32 = vld [vmem:[%s4214_s10 + $0x1d4] sm:$0xf0]  ;;  %1971 = vmatpush.bf16.msra.mxu1 %v2743_v17  ;;  %v2799_v34 = vor.u32 %v3701_v30, %v2798_v28  ;;  %v3667_v36 = vld [vmem:[%s4214_s10 + $0x44] sm:$0xf0] }
  0x28   : > { %1984 = vmatpush.bf16.msra.mxu2 %v2807_v21  ;;  %v2726_v37 = vld [vmem:[%s4214_s10 + $0xc0] sm:$0xf]  ;;  %v2863_v38 = vor.u32 %v3717_v32, %v2862_v31  ;;  %v3683_v39 = vld [vmem:[%s4214_s10 + $0xc4] sm:$0xf0]  ;;  %v2663_v44 = vor.u32 %v3667_v36, %v2662_v35  ;;  %v2654_v47 = vld [vmem:[%s4214_s10 + $0x30] sm:$0xf] }
  0x29   : > { %1997 = vmatpush.bf16.msra.mxu3 %v2871_v25  ;;  %v2790_v40 = vld [vmem:[%s4214_s10 + $0x140] sm:$0xf]  ;;  %v3699_v41 = vld [vmem:[%s4214_s10 + $0x144] sm:$0xf0]  ;;  %v2727_v45 = vor.u32 %v3683_v39, %v2726_v37  ;;  %v3665_v48 = vld [vmem:[%s4214_s10 + $0x34] sm:$0xf0] }
  0x2a   : > { %v2854_v42 = vld [vmem:[%s4214_s10 + $0x1c0] sm:$0xf]  ;;  %v3715_v43 = vld [vmem:[%s4214_s10 + $0x1c4] sm:$0xf0]  ;;  %1959 = vmatpush.bf16.msra.mxu0 %v2671_v29  ;;  %v2791_v46 = vor.u32 %v3699_v41, %v2790_v40  ;;  %v2718_v49 = vld [vmem:[%s4214_s10 + $0xb0] sm:$0xf]  ;;  %v2655_v56 = vor.u32 %v3665_v48, %v2654_v47 }
  0x2b   : > { %1972 = vmatpush.bf16.msra.mxu1 %v2735_v33  ;;  %v2855_v50 = vor.u32 %v3715_v43, %v2854_v42  ;;  %v3681_v51 = vld [vmem:[%s4214_s10 + $0xb4] sm:$0xf0]  ;;  %v2782_v52 = vld [vmem:[%s4214_s10 + $0x130] sm:$0xf]  ;;  %v2646_v59 = vld [vmem:[%s4214_s10 + $0x20] sm:$0xf] }
  0x2c   : > { %1985 = vmatpush.bf16.msra.mxu2 %v2799_v34  ;;  %v3697_v53 = vld [vmem:[%s4214_s10 + $0x134] sm:$0xf0]  ;;  %v2846_v54 = vld [vmem:[%s4214_s10 + $0x1b0] sm:$0xf]  ;;  %v2719_v57 = vor.u32 %v3681_v51, %v2718_v49  ;;  %v3663_v60 = vld [vmem:[%s4214_s10 + $0x24] sm:$0xf0] }
  0x2d   : > { %1998 = vmatpush.bf16.msra.mxu3 %v2863_v38  ;;  %v3713_v55 = vld [vmem:[%s4214_s10 + $0x1b4] sm:$0xf0]  ;;  %v2783_v58 = vor.u32 %v3697_v53, %v2782_v52  ;;  %v2710_v61 = vld [vmem:[%s4214_s10 + $0xa0] sm:$0xf]  ;;  %v3679_v63 = vld [vmem:[%s4214_s10 + $0xa4] sm:$0xf0]  ;;  %v2647_v4 = vor.u32 %v3663_v60, %v2646_v59 }
  0x2e   : > { %1960 = vmatpush.bf16.msra.mxu0 %v2663_v44  ;;  %v2847_v62 = vor.u32 %v3713_v55, %v2846_v54  ;;  %v2774_v0 = vld [vmem:[%s4214_s10 + $0x120] sm:$0xf]  ;;  %v3695_v1 = vld [vmem:[%s4214_s10 + $0x124] sm:$0xf0]  ;;  %p314_p1 = scmp.lt.s32.totalorder %s4088_s18, 3  ;;  %v2711_v5 = vor.u32 %v3679_v63, %v2710_v61  ;;  %vm2401_vm0 = vcmask 1040384  }
  0x2f   : > { %1973 = vmatpush.bf16.msra.mxu1 %v2727_v45  ;;  %v2838_v2 = vld [vmem:[%s4214_s10 + $0x1a0] sm:$0xf]  ;;  %v3711_v3 = vld [vmem:[%s4214_s10 + $0x1a4] sm:$0xf0]  ;;  %v2775_v6 = vor.u32 %v3695_v1, %v2774_v0  ;;  %v2638_v7 = vld [vmem:[%s4214_s10 + $0x10] sm:$0xf] }
  0x30   : > { %1986 = vmatpush.bf16.msra.mxu2 %v2791_v46  ;;  %v3661_v8 = vld [vmem:[%s4214_s10 + $0x14] sm:$0xf0]  ;;  %v2702_v9 = vld [vmem:[%s4214_s10 + $0x90] sm:$0xf]  ;;  %v2839_v10 = vor.u32 %v3711_v3, %v2838_v2  ;;  %v2630_v17 = vld [vmem:[%s4214_s10] sm:$0xf] }
  0x31   : > { %1999 = vmatpush.bf16.msra.mxu3 %v2855_v50  ;;  %v3677_v11 = vld [vmem:[%s4214_s10 + $0x94] sm:$0xf0]  ;;  %v2766_v12 = vld [vmem:[%s4214_s10 + $0x110] sm:$0xf]  ;;  %v2639_v16 = vor.u32 %v3661_v8, %v2638_v7  ;;  %v3659_v18 = vld [vmem:[%s4214_s10 + $0x4] sm:$0xf0] }
  0x32   : > { %1961 = vmatpush.bf16.msra.mxu0 %v2655_v56  ;;  %v3693_v13 = vld [vmem:[%s4214_s10 + $0x114] sm:$0xf0]  ;;  %v2830_v14 = vld [vmem:[%s4214_s10 + $0x190] sm:$0xf]  ;;  %s4874_s18 = smov (!%p314_p1, %s4088_s18), 3  ;;  %v2703_v19 = vor.u32 %v3677_v11, %v2702_v9  ;;  %v2631_v31 = vor.u32 %v3659_v18, %v2630_v17  ;;  %vm2407_vm1 = vcmask 1041408  }
  0x33   : > { %1974 = vmatpush.bf16.msra.mxu1 %v2719_v57  ;;  %v3709_v15 = vld [vmem:[%s4214_s10 + $0x194] sm:$0xf0]  ;;  %v2767_v20 = vor.u32 %v3693_v13, %v2766_v12  ;;  %v2694_v21 = vld [vmem:[%s4214_s10 + $0x80] sm:$0xf]  ;;  %v3675_v22 = vld [vmem:[%s4214_s10 + $0x84] sm:$0xf0] }
  0x34   : > { %1987 = vmatpush.bf16.msra.mxu2 %v2783_v58  ;;  %v2758_v23 = vld [vmem:[%s4214_s10 + $0x100] sm:$0xf]  ;;  %v2831_v24 = vor.u32 %v3709_v15, %v2830_v14  ;;  %v3691_v25 = vld [vmem:[%s4214_s10 + $0x104] sm:$0xf0]  ;;  %v2942_v28 = vld [vmem:[%s4214_s10 + $0x270] sm:$0xf]  ;;  %v2695_v35 = vor.u32 %v3675_v22, %v2694_v21 }
  0x35   : > { %2000 = vmatpush.bf16.msra.mxu3 %v2847_v62  ;;  %v2822_v26 = vld [vmem:[%s4214_s10 + $0x180] sm:$0xf]  ;;  %v3707_v27 = vld [vmem:[%s4214_s10 + $0x184] sm:$0xf0]  ;;  %v3737_v29 = vld [vmem:[%s4214_s10 + $0x274] sm:$0xf0]  ;;  %v2759_v36 = vor.u32 %v3691_v25, %v2758_v23 }
  0x36   : > { %1962 = vmatpush.bf16.msra.mxu0 %v2647_v4  ;;  %v3006_v30 = vld [vmem:[%s4214_s10 + $0x2f0] sm:$0xf]  ;;  %v3753_v32 = vld [vmem:[%s4214_s10 + $0x2f4] sm:$0xf0]  ;;  %v2823_v39 = vor.u32 %v3707_v27, %v2822_v26  ;;  %v2943_v40 = vor.u32 %v3737_v29, %v2942_v28  ;;  %s3655_s22 = sshll.u32 %s4874_s18, 6  ;;  %s3656_s6 = sshll.u32 %s4874_s18, 3 }
  0x37   : > { %1975 = vmatpush.bf16.msra.mxu1 %v2711_v5  ;;  %v3070_v33 = vld [vmem:[%s4214_s10 + $0x370] sm:$0xf]  ;;  %v3769_v34 = vld [vmem:[%s4214_s10 + $0x374] sm:$0xf0]  ;;  %v3007_v41 = vor.u32 %v3753_v32, %v3006_v30  ;;  %v2934_v43 = vld [vmem:[%s4214_s10 + $0x260] sm:$0xf]  ;;  %s4318_s29 = scalar_lea.vmem %s4856_s0, %s3655_s22  ;;  %s337_s13 = scalar_lea.vmem %s4859_s3, %s3656_s6 }
  0x38   : > { %1988 = vmatpush.bf16.msra.mxu2 %v2775_v6  ;;  %v3134_v37 = vld [vmem:[%s4214_s10 + $0x3f0] sm:$0xf]  ;;  %v3785_v38 = vld [vmem:[%s4214_s10 + $0x3f4] sm:$0xf0]  ;;  %v3071_v42 = vor.u32 %v3769_v34, %v3070_v33  ;;  %v3735_v44 = vld [vmem:[%s4214_s10 + $0x264] sm:$0xf0] }
  0x39   : > { %2001 = vmatpush.bf16.msra.mxu3 %v2839_v10  ;;  %v2998_v45 = vld [vmem:[%s4214_s10 + $0x2e0] sm:$0xf]  ;;  %v3135_v46 = vor.u32 %v3785_v38, %v3134_v37  ;;  %v3751_v47 = vld [vmem:[%s4214_s10 + $0x2e4] sm:$0xf0]  ;;  %v2935_v52 = vor.u32 %v3735_v44, %v2934_v43  ;;  %v2926_v53 = vld [vmem:[%s4214_s10 + $0x250] sm:$0xf] }
  0x3a   : > { %1963 = vmatpush.bf16.msra.mxu0 %v2639_v16  ;;  %v3062_v48 = vld [vmem:[%s4214_s10 + $0x360] sm:$0xf]  ;;  %v3767_v49 = vld [vmem:[%s4214_s10 + $0x364] sm:$0xf0]  ;;  %v2999_v54 = vor.u32 %v3751_v47, %v2998_v45  ;;  %v3733_v56 = vld [vmem:[%s4214_s10 + $0x254] sm:$0xf0] }
  0x3b   : > { %1976 = vmatpush.bf16.msra.mxu1 %v2703_v19  ;;  %v3126_v50 = vld [vmem:[%s4214_s10 + $0x3e0] sm:$0xf]  ;;  %v3783_v51 = vld [vmem:[%s4214_s10 + $0x3e4] sm:$0xf0]  ;;  %v3063_v55 = vor.u32 %v3767_v49, %v3062_v48  ;;  %v2990_v57 = vld [vmem:[%s4214_s10 + $0x2d0] sm:$0xf]  ;;  %v2927_v0 = vor.u32 %v3733_v56, %v2926_v53 }
  0x3c   : > { %1989 = vmatpush.bf16.msra.mxu2 %v2767_v20  ;;  %v3749_v58 = vld [vmem:[%s4214_s10 + $0x2d4] sm:$0xf0]  ;;  %v3127_v59 = vor.u32 %v3783_v51, %v3126_v50  ;;  %v3054_v60 = vld [vmem:[%s4214_s10 + $0x350] sm:$0xf]  ;;  %v352_v2 = vld [vmem:[%s4318_s29 + $0x8] sm:$0xff]  ;;  %s3657_s14 = sshll.u32 %s4874_s18, 2 }
  0x3d   : > { %2002 = vmatpush.bf16.msra.mxu3 %v2831_v24  ;;  %v3765_v61 = vld [vmem:[%s4214_s10 + $0x354] sm:$0xf0]  ;;  %v3118_v62 = vld [vmem:[%s4214_s10 + $0x3d0] sm:$0xf]  ;;  %v2991_v1 = vor.u32 %v3749_v58, %v2990_v57  ;;  %v351_v3 = vld [vmem:[%s4318_s29] sm:$0xff]  ;;  %v631_v8 = vunpack.c.l.b16 %v352_v2  ;;  %v632_v10 = vunpack.c.h.b16 %v352_v2  ;;  %s348_s24 = scalar_lea.vmem %s4860_s4, %s3657_s14 }
  0x3e   : > { %1964 = vmatpush.bf16.msra.mxu0 %v2631_v31  ;;  %v3781_v63 = vld [vmem:[%s4214_s10 + $0x3d4] sm:$0xf0]  ;;  %v3055_v4 = vor.u32 %v3765_v61, %v3054_v60  ;;  %v2918_v5 = vld [vmem:[%s4214_s10 + $0x240] sm:$0xf]  ;;  %v3731_v6 = vld [vmem:[%s4214_s10 + $0x244] sm:$0xf0]  ;;  %v629_v9 = vunpack.c.l.b16 %v351_v3  ;;  %v630_v15 = vunpack.c.h.b16 %v351_v3 }
  0x3f   : > { %1977 = vmatpush.bf16.msra.mxu1 %v2695_v35  ;;  %v2982_v7 = vld [vmem:[%s4214_s10 + $0x2c0] sm:$0xf]  ;;  %v3119_v11 = vor.u32 %v3781_v63, %v3118_v62  ;;  %v3747_v12 = vld [vmem:[%s4214_s10 + $0x2c4] sm:$0xf0]  ;;  %v4334_v18 = vpack.c.b16 %v631_v8, %v631_v8  ;;  %v4338_v20 = vpack.c.b16 %v632_v10, %v632_v10  ;;  %v2919_v21 = vor.u32 %v3731_v6, %v2918_v5  ;;  %v2910_v25 = vld [vmem:[%s4214_s10 + $0x230] sm:$0xf] }
  0x40   : > { %1990 = vmatpush.bf16.msra.mxu2 %v2759_v36  ;;  %v3046_v13 = vld [vmem:[%s4214_s10 + $0x340] sm:$0xf]  ;;  %v3763_v14 = vld [vmem:[%s4214_s10 + $0x344] sm:$0xf0]  ;;  %v4336_v19 = vpack.c.b16 %v629_v9, %v629_v9  ;;  %v4340_v22 = vpack.c.b16 %v630_v15, %v630_v15  ;;  %v2983_v23 = vor.u32 %v3747_v12, %v2982_v7  ;;  %v3729_v26 = vld [vmem:[%s4214_s10 + $0x234] sm:$0xf0] }
  0x41   : > { %2003 = vmatpush.bf16.msra.mxu3 %v2823_v39  ;;  %v3110_v16 = vld [vmem:[%s4214_s10 + $0x3c0] sm:$0xf]  ;;  %v3779_v17 = vld [vmem:[%s4214_s10 + $0x3c4] sm:$0xf0]  ;;  %v3047_v24 = vor.u32 %v3763_v14, %v3046_v13  ;;  %v2974_v27 = vld [vmem:[%s4214_s10 + $0x2b0] sm:$0xf]  ;;  %v2911_v34 = vor.u32 %v3729_v26, %v2910_v25 }
  0x42   : > { %2009 = vmatpush.bf16.msrb.mxu0 %v2943_v40  ;;  %v3111_v28 = vor.u32 %v3779_v17, %v3110_v16  ;;  %v3745_v29 = vld [vmem:[%s4214_s10 + $0x2b4] sm:$0xf0]  ;;  %v3038_v30 = vld [vmem:[%s4214_s10 + $0x330] sm:$0xf]  ;;  %1978 = vmatmul.bf16.vlgmr.msra.gmra.mxu1 %v4340_v22  ;;  %v2902_v37 = vld [vmem:[%s4214_s10 + $0x220] sm:$0xf] }
  0x43   : > { %2022 = vmatpush.bf16.msrb.mxu1 %v3007_v41  ;;  %v3761_v31 = vld [vmem:[%s4214_s10 + $0x334] sm:$0xf0]  ;;  %1991 = vmatmul.bf16.vlgmr.msra.gmra.mxu2 %v4334_v18  ;;  %v3102_v32 = vld [vmem:[%s4214_s10 + $0x3b0] sm:$0xf]  ;;  %v2975_v35 = vor.u32 %v3745_v29, %v2974_v27  ;;  %v3727_v38 = vld [vmem:[%s4214_s10 + $0x224] sm:$0xf0] }
  0x44   : > { %2035 = vmatpush.bf16.msrb.mxu2 %v3071_v42  ;;  %v3777_v33 = vld [vmem:[%s4214_s10 + $0x3b4] sm:$0xf0]  ;;  %1965 = vmatmul.bf16.vlgmr.msra.gmra.mxu0 %v4336_v19  ;;  %v3039_v36 = vor.u32 %v3761_v31, %v3038_v30  ;;  %v2966_v39 = vld [vmem:[%s4214_s10 + $0x2a0] sm:$0xf]  ;;  %v3743_v41 = vld [vmem:[%s4214_s10 + $0x2a4] sm:$0xf0] }
  0x45   : > { %2048 = vmatpush.bf16.msrb.mxu3 %v3135_v46  ;;  %v3103_v40 = vor.u32 %v3777_v33, %v3102_v32  ;;  %v3030_v42 = vld [vmem:[%s4214_s10 + $0x320] sm:$0xf]  ;;  %v3759_v43 = vld [vmem:[%s4214_s10 + $0x324] sm:$0xf0]  ;;  %v2903_v46 = vor.u32 %v3727_v38, %v2902_v37  ;;  %v2967_v47 = vor.u32 %v3743_v41, %v2966_v39  ;;  %v2894_v49 = vld [vmem:[%s4214_s10 + $0x210] sm:$0xf] }
  0x46   : > { %2010 = vmatpush.bf16.msrb.mxu0 %v2935_v52  ;;  %2004 = vmatmul.bf16.vlgmr.msra.gmra.mxu3 %v4338_v20  ;;  %v3094_v44 = vld [vmem:[%s4214_s10 + $0x3a0] sm:$0xf]  ;;  %v3775_v45 = vld [vmem:[%s4214_s10 + $0x3a4] sm:$0xf0]  ;;  %v3031_v48 = vor.u32 %v3759_v43, %v3030_v42  ;;  %v3725_v50 = vld [vmem:[%s4214_s10 + $0x214] sm:$0xf0] }
  0x47   : > { %2023 = vmatpush.bf16.msrb.mxu1 %v2999_v54  ;;  %v2958_v51 = vld [vmem:[%s4214_s10 + $0x290] sm:$0xf]  ;;  %v3095_v52 = vor.u32 %v3775_v45, %v3094_v44  ;;  %v3741_v53 = vld [vmem:[%s4214_s10 + $0x294] sm:$0xf0]  ;;  %v2886_v58 = vld [vmem:[%s4214_s10 + $0x200] sm:$0xf] }
  0x48   : > { %2036 = vmatpush.bf16.msrb.mxu2 %v3063_v55  ;;  %v3022_v54 = vld [vmem:[%s4214_s10 + $0x310] sm:$0xf]  ;;  %v3757_v55 = vld [vmem:[%s4214_s10 + $0x314] sm:$0xf0]  ;;  %v3723_v60 = vld [vmem:[%s4214_s10 + $0x204] sm:$0xf0]  ;;  %v2959_v63 = vor.u32 %v3741_v53, %v2958_v51 }
  0x49   : > { %2049 = vmatpush.bf16.msrb.mxu3 %v3127_v59  ;;  %v3086_v56 = vld [vmem:[%s4214_s10 + $0x390] sm:$0xf]  ;;  %v3773_v57 = vld [vmem:[%s4214_s10 + $0x394] sm:$0xf0]  ;;  %v2895_v59 = vor.u32 %v3725_v50, %v2894_v49  ;;  %v2950_v61 = vld [vmem:[%s4214_s10 + $0x280] sm:$0xf] }
  0x4a   : > { %2011 = vmatpush.bf16.msrb.mxu0 %v2927_v0  ;;  %v3739_v62 = vld [vmem:[%s4214_s10 + $0x284] sm:$0xf0]  ;;  %v3023_v0 = vor.u32 %v3757_v55, %v3022_v54  ;;  %v354_v3 = vld [vmem:[%s4318_s29 + $0x18] sm:$0xff]  ;;  %v3078_v5 = vld [vmem:[%s4214_s10 + $0x380] sm:$0xf] }
  0x4b   : > { %2024 = vmatpush.bf16.msrb.mxu1 %v2991_v1  ;;  %v3014_v1 = vld [vmem:[%s4214_s10 + $0x300] sm:$0xf]  ;;  %v3755_v2 = vld [vmem:[%s4214_s10 + $0x304] sm:$0xf0]  ;;  %v353_v7 = vld [vmem:[%s4318_s29 + $0x10] sm:$0xff]  ;;  %v635_v15 = vunpack.c.l.b16 %v354_v3  ;;  %v2951_v16 = vor.u32 %v3739_v62, %v2950_v61  ;;  %v636_v25 = vunpack.c.h.b16 %v354_v3 }
  0x4c   : > { %2037 = vmatpush.bf16.msrb.mxu2 %v3055_v4  ;;  %v3087_v4 = vor.u32 %v3773_v57, %v3086_v56  ;;  %v3771_v6 = vld [vmem:[%s4214_s10 + $0x384] sm:$0xf0]  ;;  %v3198_v8 = vld [vmem:[%s4214_s10 + $0x470] sm:$0xf]  ;;  %v3801_v9 = vld [vmem:[%s4214_s10 + $0x474] sm:$0xf0]  ;;  %v3015_v17 = vor.u32 %v3755_v2, %v3014_v1 }
  0x4d   : > { %2050 = vmatpush.bf16.msrb.mxu3 %v3119_v11  ;;  %v3262_v10 = vld [vmem:[%s4214_s10 + $0x4f0] sm:$0xf]  ;;  %v2887_v11 = vor.u32 %v3723_v60, %v2886_v58  ;;  %v3817_v12 = vld [vmem:[%s4214_s10 + $0x4f4] sm:$0xf0]  ;;  %v3079_v26 = vor.u32 %v3771_v6, %v3078_v5  ;;  %v3199_v27 = vor.u32 %v3801_v9, %v3198_v8  ;;  %v3190_v31 = vld [vmem:[%s4214_s10 + $0x460] sm:$0xf]  ;;  %v4394_v38 = vpack.c.b16 %v635_v15, %v635_v15 }
  0x4e   : > { %2012 = vmatpush.bf16.msrb.mxu0 %v2919_v21  ;;  %v3326_v13 = vld [vmem:[%s4214_s10 + $0x570] sm:$0xf]  ;;  %v3833_v14 = vld [vmem:[%s4214_s10 + $0x574] sm:$0xf0]  ;;  %v3263_v29 = vor.u32 %v3817_v12, %v3262_v10  ;;  %v3799_v32 = vld [vmem:[%s4214_s10 + $0x464] sm:$0xf0]  ;;  %v4400_v42 = vpack.c.b16 %v636_v25, %v636_v25 }
  0x4f   : > { %2025 = vmatpush.bf16.msrb.mxu1 %v2983_v23  ;;  %v3390_v21 = vld [vmem:[%s4214_s10 + $0x5f0] sm:$0xf]  ;;  %v3849_v23 = vld [vmem:[%s4214_s10 + $0x5f4] sm:$0xf0]  ;;  %v3327_v30 = vor.u32 %v3833_v14, %v3326_v13  ;;  %v3254_v33 = vld [vmem:[%s4214_s10 + $0x4e0] sm:$0xf]  ;;  %v3191_v43 = vor.u32 %v3799_v32, %v3190_v31 }
  0x50   : > { %2038 = vmatpush.bf16.msrb.mxu2 %v3047_v24  ;;  %v633_v24 = vunpack.c.l.b16 %v353_v7  ;;  %v3831_v37 = vld [vmem:[%s4214_s10 + $0x564] sm:$0xf0]  ;;  %v3382_v39 = vld [vmem:[%s4214_s10 + $0x5e0] sm:$0xf]  ;;  %v3246_v49 = vld [vmem:[%s4214_s10 + $0x4d0] sm:$0xf] }
  0x51   : > { %2051 = vmatpush.bf16.msrb.mxu3 %v3111_v28  ;;  %v634_v28 = vunpack.c.h.b16 %v353_v7  ;;  %v3813_v51 = vld [vmem:[%s4214_s10 + $0x4d4] sm:$0xf0]  ;;  %v3374_v54 = vld [vmem:[%s4214_s10 + $0x5d0] sm:$0xf]  ;;  %v3795_v60 = vld [vmem:[%s4214_s10 + $0x444] sm:$0xf0] }
  0x52   : > { %2013 = vmatpush.bf16.msrb.mxu0 %v2911_v34  ;;  %v3391_v34 = vor.u32 %v3849_v23, %v3390_v21  ;;  %v4398_v41 = vpack.c.b16 %v633_v24, %v633_v24  ;;  %v3829_v53 = vld [vmem:[%s4214_s10 + $0x554] sm:$0xf0]  ;;  %v3247_v57 = vor.u32 %v3813_v51, %v3246_v49  ;;  %v3238_v61 = vld [vmem:[%s4214_s10 + $0x4c0] sm:$0xf]  ;;  %v3827_v1 = vld [vmem:[%s4214_s10 + $0x544] sm:$0xf0] }
  0x53   : > { %2026 = vmatpush.bf16.msrb.mxu1 %v2975_v35  ;;  %v3815_v35 = vld [vmem:[%s4214_s10 + $0x4e4] sm:$0xf0]  ;;  %v4402_v44 = vpack.c.b16 %v634_v28, %v634_v28  ;;  %v3845_v55 = vld [vmem:[%s4214_s10 + $0x5d4] sm:$0xf0]  ;;  %v3366_v2 = vld [vmem:[%s4214_s10 + $0x5c0] sm:$0xf] }
  0x54   : > { %2039 = vmatpush.bf16.msrb.mxu2 %v3039_v36  ;;  %v3318_v36 = vld [vmem:[%s4214_s10 + $0x560] sm:$0xf]  ;;  %v3255_v45 = vor.u32 %v3815_v35, %v3254_v33  ;;  %v3375_v62 = vor.u32 %v3845_v55, %v3374_v54  ;;  %v3843_v3 = vld [vmem:[%s4214_s10 + $0x5c4] sm:$0xf0]  ;;  %v3166_v7 = vld [vmem:[%s4214_s10 + $0x430] sm:$0xf] }
  0x55   : > { %2052 = vmatpush.bf16.msrb.mxu3 %v3103_v40  ;;  %v3847_v40 = vld [vmem:[%s4214_s10 + $0x5e4] sm:$0xf0]  ;;  %v3793_v8 = vld [vmem:[%s4214_s10 + $0x434] sm:$0xf0]  ;;  %v3230_v9 = vld [vmem:[%s4214_s10 + $0x4b0] sm:$0xf]  ;;  %v3367_v10 = vor.u32 %v3843_v3, %v3366_v2 }
  0x56   : > { %2014 = vmatpush.bf16.msrb.mxu0 %v2903_v46  ;;  %v3319_v46 = vor.u32 %v3831_v37, %v3318_v36  ;;  %v3383_v50 = vor.u32 %v3847_v40, %v3382_v39  ;;  %v3294_v12 = vld [vmem:[%s4214_s10 + $0x530] sm:$0xf]  ;;  %v3825_v13 = vld [vmem:[%s4214_s10 + $0x534] sm:$0xf0]  ;;  %v3158_v23 = vld [vmem:[%s4214_s10 + $0x420] sm:$0xf] }
  0x57   : > { %2027 = vmatpush.bf16.msrb.mxu1 %v2967_v47  ;;  %v3182_v47 = vld [vmem:[%s4214_s10 + $0x450] sm:$0xf]  ;;  %v3841_v15 = vld [vmem:[%s4214_s10 + $0x5b4] sm:$0xf0]  ;;  %v3295_v21 = vor.u32 %v3825_v13, %v3294_v12  ;;  %v3791_v24 = vld [vmem:[%s4214_s10 + $0x424] sm:$0xf0] }
  0x58   : > { %2040 = vmatpush.bf16.msrb.mxu2 %v3031_v48  ;;  %v3797_v48 = vld [vmem:[%s4214_s10 + $0x454] sm:$0xf0]  ;;  %v3358_v14 = vld [vmem:[%s4214_s10 + $0x5b0] sm:$0xf]  ;;  %v3222_v25 = vld [vmem:[%s4214_s10 + $0x4a0] sm:$0xf]  ;;  %v3159_v32 = vor.u32 %v3791_v24, %v3158_v23 }
  0x59   : > { %2053 = vmatpush.bf16.msrb.mxu3 %v3095_v52  ;;  %v3310_v52 = vld [vmem:[%s4214_s10 + $0x550] sm:$0xf]  ;;  %v3183_v56 = vor.u32 %v3797_v48, %v3182_v47  ;;  %v3286_v28 = vld [vmem:[%s4214_s10 + $0x520] sm:$0xf]  ;;  %v3839_v31 = vld [vmem:[%s4214_s10 + $0x5a4] sm:$0xf0] }
  0x5a   : > { %2015 = vmatpush.bf16.msrb.mxu0 %v2895_v59  ;;  %v3311_v58 = vor.u32 %v3829_v53, %v3310_v52  ;;  %v3174_v59 = vld [vmem:[%s4214_s10 + $0x440] sm:$0xf]  ;;  %v3150_v35 = vld [vmem:[%s4214_s10 + $0x410] sm:$0xf]  ;;  %v3789_v36 = vld [vmem:[%s4214_s10 + $0x414] sm:$0xf0] }
  0x5b   : > { %2028 = vmatpush.bf16.msrb.mxu1 %v2959_v63  ;;  %v3811_v63 = vld [vmem:[%s4214_s10 + $0x4c4] sm:$0xf0]  ;;  %v3214_v37 = vld [vmem:[%s4214_s10 + $0x490] sm:$0xf]  ;;  %v3805_v40 = vld [vmem:[%s4214_s10 + $0x494] sm:$0xf0]  ;;  %v3151_v49 = vor.u32 %v3789_v36, %v3150_v35 }
  0x5c   : > { %2041 = vmatpush.bf16.msrb.mxu2 %v3023_v0  ;;  %v3302_v0 = vld [vmem:[%s4214_s10 + $0x540] sm:$0xf]  ;;  %v3239_v5 = vor.u32 %v3811_v63, %v3238_v61  ;;  %v3837_v47 = vld [vmem:[%s4214_s10 + $0x594] sm:$0xf0]  ;;  %v3803_v52 = vld [vmem:[%s4214_s10 + $0x484] sm:$0xf0]  ;;  %v3215_v53 = vor.u32 %v3805_v40, %v3214_v37 }
  0x5d   : > { %2054 = vmatpush.bf16.msrb.mxu3 %v3087_v4  ;;  %v3175_v4 = vor.u32 %v3795_v60, %v3174_v59  ;;  %v3303_v6 = vor.u32 %v3827_v1, %v3302_v0  ;;  %v3142_v48 = vld [vmem:[%s4214_s10 + $0x400] sm:$0xf]  ;;  %v3835_v60 = vld [vmem:[%s4214_s10 + $0x584] sm:$0xf0]  ;;  %v3865_v63 = vld [vmem:[%s4214_s10 + $0x674] sm:$0xf0] }
  0x5e   : > { %2016 = vmatpush.bf16.msrb.mxu0 %v2887_v11  ;;  %v3809_v11 = vld [vmem:[%s4214_s10 + $0x4b4] sm:$0xf0]  ;;  %v3206_v51 = vld [vmem:[%s4214_s10 + $0x480] sm:$0xf]  ;;  %v356_v61 = vld [vmem:[%s4318_s29 + $0x28] sm:$0xff] }
  0x5f   : > { %2029 = vmatpush.bf16.msrb.mxu1 %v2951_v16  ;;  %v3167_v16 = vor.u32 %v3793_v8, %v3166_v7  ;;  %v3270_v55 = vld [vmem:[%s4214_s10 + $0x500] sm:$0xf]  ;;  %v3518_v0 = vld [vmem:[%s4214_s10 + $0x6f0] sm:$0xf]  ;;  %v3881_v2 = vld [vmem:[%s4214_s10 + $0x6f4] sm:$0xf0] }
  0x60   : > { %2042 = vmatpush.bf16.msrb.mxu2 %v3015_v17  ;;  %v3231_v17 = vor.u32 %v3809_v11, %v3230_v9  ;;  %v3334_v59 = vld [vmem:[%s4214_s10 + $0x580] sm:$0xf]  ;;  %v3582_v3 = vld [vmem:[%s4214_s10 + $0x770] sm:$0xf]  ;;  %v3913_v9 = vld [vmem:[%s4214_s10 + $0x7f4] sm:$0xf0] }
  0x61   : > { %2055 = vmatpush.bf16.msrb.mxu3 %v3079_v26  ;;  %2017 = vmatmul.bf16.vlgmr.msrb.gmra.mxu0 %v4398_v41  ;;  %v3359_v26 = vor.u32 %v3841_v15, %v3358_v14  ;;  %v3646_v8 = vld [vmem:[%s4214_s10 + $0x7f0] sm:$0xf]  ;;  %v3335_v12 = vor.u32 %v3835_v60, %v3334_v59  ;;  %v640_v14 = vunpack.c.h.b16 %v356_v61  ;;  %v3519_v15 = vor.u32 %v3881_v2, %v3518_v0  ;;  %v3510_v23 = vld [vmem:[%s4214_s10 + $0x6e0] sm:$0xf]  ;;  %v3891_v59 = vld [vmem:[%s4214_s10 + $0x744] sm:$0xf0] }
  0x62   : > { %2061 = vmatpush.bf16.msra.mxu0 %v3199_v27  ;;  %2030 = vmatmul.bf16.vlgmr.msrb.gmra.mxu1 %v4402_v44  ;;  %v3807_v27 = vld [vmem:[%s4214_s10 + $0x4a4] sm:$0xf0]  ;;  %v3647_v24 = vor.u32 %v3913_v9, %v3646_v8  ;;  %v3438_v37 = vld [vmem:[%s4214_s10 + $0x650] sm:$0xf]  ;;  %v3622_v60 = vld [vmem:[%s4214_s10 + $0x7c0] sm:$0xf] }
  0x63   : > { %2074 = vmatpush.bf16.msra.mxu1 %v3263_v29  ;;  %2043 = vmatmul.bf16.vlgmr.msrb.gmra.mxu2 %v4394_v38  ;;  %v3823_v29 = vld [vmem:[%s4214_s10 + $0x524] sm:$0xf0]  ;;  %v3223_v33 = vor.u32 %v3807_v27, %v3222_v25  ;;  %v3574_v27 = vld [vmem:[%s4214_s10 + $0x760] sm:$0xf]  ;;  %v3502_v40 = vld [vmem:[%s4214_s10 + $0x6d0] sm:$0xf] }
  0x64   : > { %2087 = vmatpush.bf16.msra.mxu2 %v3327_v30  ;;  %2056 = vmatmul.bf16.vlgmr.msrb.gmra.mxu3 %v4400_v42  ;;  %v3350_v30 = vld [vmem:[%s4214_s10 + $0x5a0] sm:$0xf]  ;;  %v3857_v2 = vld [vmem:[%s4214_s10 + $0x634] sm:$0xf0]  ;;  %v3614_v8 = vld [vmem:[%s4214_s10 + $0x7b0] sm:$0xf] }
  0x65   : > { %2100 = vmatpush.bf16.msra.mxu3 %v3391_v34  ;;  %v3287_v34 = vor.u32 %v3823_v29, %v3286_v28  ;;  %v3351_v39 = vor.u32 %v3839_v31, %v3350_v30  ;;  %v3895_v28 = vld [vmem:[%s4214_s10 + $0x764] sm:$0xf0]  ;;  %v3638_v31 = vld [vmem:[%s4214_s10 + $0x7e0] sm:$0xf]  ;;  %v3905_v9 = vld [vmem:[%s4214_s10 + $0x7b4] sm:$0xf0] }
  0x66   : > { %2062 = vmatpush.bf16.msra.mxu0 %v3191_v43  ;;  %v3278_v43 = vld [vmem:[%s4214_s10 + $0x510] sm:$0xf]  ;;  %v3575_v36 = vor.u32 %v3895_v28, %v3574_v27 }
  0x67   : > { %2075 = vmatpush.bf16.msra.mxu1 %v3255_v45  ;;  %v3821_v45 = vld [vmem:[%s4214_s10 + $0x514] sm:$0xf0] }
  0x68   : > { %2088 = vmatpush.bf16.msra.mxu2 %v3319_v46  ;;  %v3342_v46 = vld [vmem:[%s4214_s10 + $0x590] sm:$0xf]  ;;  %v3279_v54 = vor.u32 %v3821_v45, %v3278_v43  ;;  %v3877_v45 = vld [vmem:[%s4214_s10 + $0x6d4] sm:$0xf0] }
  0x69   : > { %2101 = vmatpush.bf16.msra.mxu3 %v3383_v50  ;;  %v3787_v50 = vld [vmem:[%s4214_s10 + $0x404] sm:$0xf0] }
  0x6a   : > { %2063 = vmatpush.bf16.msra.mxu0 %v3183_v56  ;;  %v3819_v56 = vld [vmem:[%s4214_s10 + $0x504] sm:$0xf0]  ;;  %v3143_v1 = vor.u32 %v3787_v50, %v3142_v48  ;;  %v3630_v48 = vld [vmem:[%s4214_s10 + $0x7d0] sm:$0xf] }
  0x6b   : > { %2076 = vmatpush.bf16.msra.mxu1 %v3247_v57  ;;  %v355_v57 = vld [vmem:[%s4318_s29 + $0x20] sm:$0xff]  ;;  %v3271_v7 = vor.u32 %v3819_v56, %v3270_v55 }
  0x6c   : > { %2089 = vmatpush.bf16.msra.mxu2 %v3311_v58  ;;  %v3343_v58 = vor.u32 %v3837_v47, %v3342_v46  ;;  %v638_v11 = vunpack.c.h.b16 %v355_v57  ;;  %v3566_v46 = vld [vmem:[%s4214_s10 + $0x750] sm:$0xf]  ;;  %v3893_v47 = vld [vmem:[%s4214_s10 + $0x754] sm:$0xf0]  ;;  %v3494_v55 = vld [vmem:[%s4214_s10 + $0x6c0] sm:$0xf] }
  0x6d   : > { %2102 = vmatpush.bf16.msra.mxu3 %v3375_v62  ;;  %v3454_v62 = vld [vmem:[%s4214_s10 + $0x670] sm:$0xf] }
  0x6e   : > { %2064 = vmatpush.bf16.msra.mxu0 %v3175_v4  ;;  %v3897_v4 = vld [vmem:[%s4214_s10 + $0x774] sm:$0xf0]  ;;  %v3455_v13 = vor.u32 %v3865_v63, %v3454_v62  ;;  %v4476_v30 = vpack.c.b16 %v638_v11, %v638_v11 }
  0x6f   : > { %2077 = vmatpush.bf16.msra.mxu1 %v3239_v5  ;;  %v637_v5 = vunpack.c.l.b16 %v355_v57  ;;  %v3875_v57 = vld [vmem:[%s4214_s10 + $0x6c4] sm:$0xf0] }
  0x70   : > { %2090 = vmatpush.bf16.msra.mxu2 %v3303_v6  ;;  %v3207_v6 = vor.u32 %v3803_v52, %v3206_v51  ;;  %v3503_v51 = vor.u32 %v3877_v45, %v3502_v40  ;;  %v3567_v52 = vor.u32 %v3893_v47, %v3566_v46  ;;  %v3495_v63 = vor.u32 %v3875_v57, %v3494_v55  ;;  %v3885_v40 = vld [vmem:[%s4214_s10 + $0x714] sm:$0xf0]  ;;  %v3398_v46 = vld [vmem:[%s4214_s10 + $0x600] sm:$0xf]  ;;  %v357_v55 = vld [vmem:[%s4318_s29 + $0x30] sm:$0xff] }
  0x71   : > { %2103 = vmatpush.bf16.msra.mxu3 %v3367_v10  ;;  %v639_v10 = vunpack.c.l.b16 %v356_v61  ;;  %v4469_v25 = vpack.c.b16 %v637_v5, %v637_v5  ;;  %v3907_v61 = vld [vmem:[%s4214_s10 + $0x7c4] sm:$0xf0]  ;;  %v3873_v5 = vld [vmem:[%s4214_s10 + $0x6b4] sm:$0xf0]  ;;  %v3590_v57 = vld [vmem:[%s4214_s10 + $0x780] sm:$0xf] }
  0x72   : > { %2065 = vmatpush.bf16.msra.mxu0 %v3167_v16  ;;  %v3583_v16 = vor.u32 %v3897_v4, %v3582_v3  ;;  %v3486_v3 = vld [vmem:[%s4214_s10 + $0x6b0] sm:$0xf]  ;;  %v3623_v4 = vor.u32 %v3907_v61, %v3622_v60  ;;  %v3901_v45 = vld [vmem:[%s4214_s10 + $0x794] sm:$0xf0]  ;;  %v3672_v60 = vld [vmem:[%s4214_s10 + $0x74] sm:$0xf] }
  0x73   : > { %2078 = vmatpush.bf16.msra.mxu1 %v3231_v17  ;;  %v3446_v17 = vld [vmem:[%s4214_s10 + $0x660] sm:$0xf]  ;;  %v4474_v29 = vpack.c.b16 %v639_v10, %v639_v10  ;;  %v3487_v11 = vor.u32 %v3873_v5, %v3486_v3  ;;  %v2688_v61 = vld [vmem:[%s4214_s10 + $0x78] sm:$0xf0]  ;;  %v641_v3 = vunpack.c.l.b16 %v357_v55 }
  0x74   : > { %2091 = vmatpush.bf16.msra.mxu2 %v3295_v21  ;;  %v3863_v21 = vld [vmem:[%s4214_s10 + $0x664] sm:$0xf0] }
  0x75   : > { %2104 = vmatpush.bf16.msra.mxu3 %v3359_v26  ;;  %v3879_v26 = vld [vmem:[%s4214_s10 + $0x6e4] sm:$0xf0] }
  0x76   : > { %2066 = vmatpush.bf16.msra.mxu0 %v3159_v32  ;;  %v3911_v32 = vld [vmem:[%s4214_s10 + $0x7e4] sm:$0xf0]  ;;  %v3511_v35 = vor.u32 %v3879_v26, %v3510_v23 }
  0x77   : > { %2079 = vmatpush.bf16.msra.mxu1 %v3223_v33  ;;  %v4480_v33 = vpack.c.b16 %v640_v14, %v640_v14  ;;  %v3639_v43 = vor.u32 %v3911_v32, %v3638_v31  ;;  %v3855_v14 = vld [vmem:[%s4214_s10 + $0x624] sm:$0xf0]  ;;  %v3406_v32 = vld [vmem:[%s4214_s10 + $0x610] sm:$0xf] }
  0x78   : > { %2092 = vmatpush.bf16.msra.mxu2 %v3287_v34  ;;  %v3447_v34 = vor.u32 %v3863_v21, %v3446_v17  ;;  %v3871_v17 = vld [vmem:[%s4214_s10 + $0x6a4] sm:$0xf0]  ;;  %v3542_v21 = vld [vmem:[%s4214_s10 + $0x720] sm:$0xf] }
  0x79   : > { %2105 = vmatpush.bf16.msra.mxu3 %v3351_v39  ;;  %v3861_v39 = vld [vmem:[%s4214_s10 + $0x654] sm:$0xf0]  ;;  %v3887_v23 = vld [vmem:[%s4214_s10 + $0x724] sm:$0xf0] }
  0x7a   : > { %2067 = vmatpush.bf16.msra.mxu0 %v3151_v49  ;;  %v3909_v49 = vld [vmem:[%s4214_s10 + $0x7d4] sm:$0xf0]  ;;  %v3439_v50 = vor.u32 %v3861_v39, %v3438_v37  ;;  %v3903_v26 = vld [vmem:[%s4214_s10 + $0x7a4] sm:$0xf0]  ;;  %v3543_v31 = vor.u32 %v3887_v23, %v3542_v21  ;;  %v3534_v39 = vld [vmem:[%s4214_s10 + $0x710] sm:$0xf]  ;;  %v4547_v23 = vpack.c.b16 %v641_v3, %v641_v3 }
  0x7b   : > { %2080 = vmatpush.bf16.msra.mxu1 %v3215_v53  ;;  %v3430_v53 = vld [vmem:[%s4214_s10 + $0x640] sm:$0xf]  ;;  %v3631_v56 = vor.u32 %v3909_v49, %v3630_v48  ;;  %v3869_v37 = vld [vmem:[%s4214_s10 + $0x694] sm:$0xf0]  ;;  %v3851_v48 = vld [vmem:[%s4214_s10 + $0x604] sm:$0xf0] }
  0x7c   : > { %2093 = vmatpush.bf16.msra.mxu2 %v3279_v54  ;;  %v3859_v54 = vld [vmem:[%s4214_s10 + $0x644] sm:$0xf0]  ;;  %v3462_v49 = vld [vmem:[%s4214_s10 + $0x680] sm:$0xf]  ;;  %v3664_v3 = vld [vmem:[%s4214_s10 + $0x34] sm:$0xf] }
  0x7d   : > { %2106 = vmatpush.bf16.msra.mxu3 %v3343_v58  ;;  %v3558_v58 = vld [vmem:[%s4214_s10 + $0x740] sm:$0xf]  ;;  %v3431_v62 = vor.u32 %v3859_v54, %v3430_v53  ;;  %v3883_v54 = vld [vmem:[%s4214_s10 + $0x704] sm:$0xf0] }
  0x7e   : > { %2068 = vmatpush.bf16.msra.mxu0 %v3143_v1  ;;  %v3559_v0 = vor.u32 %v3891_v59, %v3558_v58  ;;  %v3422_v1 = vld [vmem:[%s4214_s10 + $0x630] sm:$0xf]  ;;  %v3526_v53 = vld [vmem:[%s4214_s10 + $0x700] sm:$0xf]  ;;  %v3899_v58 = vld [vmem:[%s4214_s10 + $0x784] sm:$0xf0] }
  0x7f   : > { %2081 = vmatpush.bf16.msra.mxu1 %v3207_v6  ;;  %v3550_v6 = vld [vmem:[%s4214_s10 + $0x730] sm:$0xf]  ;;  %v3423_v10 = vor.u32 %v3857_v2, %v3422_v1  ;;  %v358_v59 = vld [vmem:[%s4318_s29 + $0x38] sm:$0xff]  ;;  %v3704_v1 = vld [vmem:[%s4214_s10 + $0x174] sm:$0xf]  ;;  %v3527_v5 = vor.u32 %v3883_v54, %v3526_v53 }
  0x80   : > { %2094 = vmatpush.bf16.msra.mxu2 %v3271_v7  ;;  %v3889_v7 = vld [vmem:[%s4214_s10 + $0x734] sm:$0xf0]  ;;  %v2816_v2 = vld [vmem:[%s4214_s10 + $0x178] sm:$0xf0] }
  0x81   : > { %2107 = vmatpush.bf16.msra.mxu3 %v3335_v12  ;;  %2069 = vmatmul.bf16.vlgmr.msra.gmra.mxu0 %v4469_v25  ;;  %v3551_v12 = vor.u32 %v3889_v7, %v3550_v6  ;;  %v3720_v6 = vld [vmem:[%s4214_s10 + $0x1f4] sm:$0xf]  ;;  %v2880_v7 = vld [vmem:[%s4214_s10 + $0x1f8] sm:$0xf0] }
  0x82   : > { %2113 = vmatpush.bf16.msrb.mxu0 %v3455_v13  ;;  %2082 = vmatmul.bf16.vlgmr.msra.gmra.mxu1 %v4476_v30  ;;  %v3414_v13 = vld [vmem:[%s4214_s10 + $0x620] sm:$0xf]  ;;  %v2883_v21 = vor.u32 %v3720_v6, %v2880_v7  ;;  %v2720_v7 = vld [vmem:[%s4214_s10 + $0xb8] sm:$0xf0] }
  0x83   : > { %2126 = vmatpush.bf16.msrb.mxu1 %v3519_v15  ;;  %2095 = vmatmul.bf16.vlgmr.msra.gmra.mxu2 %v4474_v29  ;;  %v3478_v15 = vld [vmem:[%s4214_s10 + $0x6a0] sm:$0xf]  ;;  %v3415_v27 = vor.u32 %v3855_v14, %v3414_v13  ;;  %v2819_v14 = vor.u32 %v3704_v1, %v2816_v2 }
  0x84   : > { %2139 = vmatpush.bf16.msrb.mxu2 %v3583_v16  ;;  %2108 = vmatmul.bf16.vlgmr.msra.gmra.mxu3 %v4480_v33  ;;  %v3615_v16 = vor.u32 %v3905_v9, %v3614_v8  ;;  %v3479_v28 = vor.u32 %v3871_v17, %v3478_v15  ;;  %v643_v8 = vunpack.c.l.b16 %v358_v59  ;;  %v642_v9 = vunpack.c.h.b16 %v357_v55  ;;  %v3670_v15 = vld [vmem:[%s4214_s10 + $0x64] sm:$0xf] }
  0x85   : > { %2152 = vmatpush.bf16.msrb.mxu3 %v3647_v24  ;;  %v3606_v24 = vld [vmem:[%s4214_s10 + $0x7a0] sm:$0xf]  ;;  %v3686_v17 = vld [vmem:[%s4214_s10 + $0xe4] sm:$0xf] }
  0x86   : > { %2114 = vmatpush.bf16.msrb.mxu0 %v3447_v34  ;;  %v3853_v34 = vld [vmem:[%s4214_s10 + $0x614] sm:$0xf0]  ;;  %v3666_v55 = vld [vmem:[%s4214_s10 + $0x44] sm:$0xf] }
  0x87   : > { %2127 = vmatpush.bf16.msrb.mxu1 %v3511_v35  ;;  %v3470_v35 = vld [vmem:[%s4214_s10 + $0x690] sm:$0xf]  ;;  %v3407_v47 = vor.u32 %v3853_v34, %v3406_v32  ;;  %v3718_v32 = vld [vmem:[%s4214_s10 + $0x1e4] sm:$0xf]  ;;  %v2872_v34 = vld [vmem:[%s4214_s10 + $0x1e8] sm:$0xf0] }
  0x88   : > { %2140 = vmatpush.bf16.msrb.mxu2 %v3575_v36  ;;  %v3607_v36 = vor.u32 %v3903_v26, %v3606_v24  ;;  %v2744_v24 = vld [vmem:[%s4214_s10 + $0xe8] sm:$0xf0]  ;;  %v3702_v26 = vld [vmem:[%s4214_s10 + $0x164] sm:$0xf] }
  0x89   : > { %2153 = vmatpush.bf16.msrb.mxu3 %v3639_v43  ;;  %v3598_v43 = vld [vmem:[%s4214_s10 + $0x790] sm:$0xf] }
  0x8a   : > { %2115 = vmatpush.bf16.msrb.mxu0 %v3439_v50  ;;  %v3867_v50 = vld [vmem:[%s4214_s10 + $0x684] sm:$0xf0] }
  0x8b   : > { %2128 = vmatpush.bf16.msrb.mxu1 %v3503_v51  ;;  %v3471_v51 = vor.u32 %v3869_v37, %v3470_v35  ;;  %v2747_v37 = vor.u32 %v3686_v17, %v2744_v24  ;;  %v3678_v17 = vld [vmem:[%s4214_s10 + $0xa4] sm:$0xf]  ;;  %v2712_v24 = vld [vmem:[%s4214_s10 + $0xa8] sm:$0xf0] }
  0x8c   : > { %2141 = vmatpush.bf16.msrb.mxu2 %v3567_v52  ;;  %v3535_v52 = vor.u32 %v3885_v40, %v3534_v39  ;;  %v3668_v40 = vld [vmem:[%s4214_s10 + $0x54] sm:$0xf] }
  0x8d   : > { %2154 = vmatpush.bf16.msrb.mxu3 %v3631_v56  ;;  %v3599_v56 = vor.u32 %v3901_v45, %v3598_v43  ;;  %v2672_v43 = vld [vmem:[%s4214_s10 + $0x58] sm:$0xf0]  ;;  %v3684_v45 = vld [vmem:[%s4214_s10 + $0xd4] sm:$0xf] }
  0x8e   : > { %2116 = vmatpush.bf16.msrb.mxu0 %v3431_v62  ;;  %v3688_v62 = vld [vmem:[%s4214_s10 + $0xf4] sm:$0xf] }
  0x8f   : > { %2129 = vmatpush.bf16.msrb.mxu1 %v3495_v63  ;;  %v3399_v63 = vor.u32 %v3851_v48, %v3398_v46  ;;  %v2875_v46 = vor.u32 %v3718_v32, %v2872_v34  ;;  %v3700_v48 = vld [vmem:[%s4214_s10 + $0x154] sm:$0xf]  ;;  %v3710_v32 = vld [vmem:[%s4214_s10 + $0x1a4] sm:$0xf]  ;;  %v2840_v34 = vld [vmem:[%s4214_s10 + $0x1a8] sm:$0xf0] }
  0x90   : > { %2142 = vmatpush.bf16.msrb.mxu2 %v3559_v0  ;;  %v2752_v0 = vld [vmem:[%s4214_s10 + $0xf8] sm:$0xf0] }
  0x91   : > { %2155 = vmatpush.bf16.msrb.mxu3 %v3623_v4  ;;  %v3463_v4 = vor.u32 %v3867_v50, %v3462_v49  ;;  %v2755_v13 = vor.u32 %v3688_v62, %v2752_v0  ;;  %v2800_v49 = vld [vmem:[%s4214_s10 + $0x158] sm:$0xf0]  ;;  %v3716_v50 = vld [vmem:[%s4214_s10 + $0x1d4] sm:$0xf]  ;;  %v3714_v62 = vld [vmem:[%s4214_s10 + $0x1c4] sm:$0xf] }
  0x92   : > { %2117 = vmatpush.bf16.msrb.mxu0 %v3423_v10  ;;  %v3591_v10 = vor.u32 %v3899_v58, %v3590_v57  ;;  %v2803_v54 = vor.u32 %v3700_v48, %v2800_v49  ;;  %v3682_v57 = vld [vmem:[%s4214_s10 + $0xc4] sm:$0xf]  ;;  %v3692_v48 = vld [vmem:[%s4214_s10 + $0x114] sm:$0xf]  ;;  %v2768_v49 = vld [vmem:[%s4214_s10 + $0x118] sm:$0xf0] }
  0x93   : > { %2130 = vmatpush.bf16.msrb.mxu1 %v3487_v11  ;;  %v2691_v11 = vor.u32 %v3672_v60, %v2688_v61  ;;  %v3698_v60 = vld [vmem:[%s4214_s10 + $0x144] sm:$0xf]  ;;  %v2792_v61 = vld [vmem:[%s4214_s10 + $0x148] sm:$0xf0] }
  0x94   : > { %2143 = vmatpush.bf16.msrb.mxu2 %v3551_v12  ;;  %v644_v12 = vunpack.c.h.b16 %v358_v59  ;;  %v2728_v59 = vld [vmem:[%s4214_s10 + $0xc8] sm:$0xf0]  ;;  %v2795_v2 = vor.u32 %v3698_v60, %v2792_v61 }
  0x95   : > { %2156 = vmatpush.bf16.msrb.mxu3 %v3615_v16  ;;  %v2680_v16 = vld [vmem:[%s4214_s10 + $0x68] sm:$0xf0]  ;;  %v2731_v1 = vor.u32 %v3682_v57, %v2728_v59  ;;  %v3674_v57 = vld [vmem:[%s4214_s10 + $0x84] sm:$0xf] }
  0x96   : > { %2118 = vmatpush.bf16.msrb.mxu0 %v3415_v27  ;;  %v2808_v27 = vld [vmem:[%s4214_s10 + $0x168] sm:$0xf0]  ;;  %v4558_v35 = vpack.c.b16 %v644_v12, %v644_v12  ;;  %v3690_v59 = vld [vmem:[%s4214_s10 + $0x104] sm:$0xf] }
  0x97   : > { %2131 = vmatpush.bf16.msrb.mxu1 %v3479_v28  ;;  %v4552_v28 = vpack.c.b16 %v643_v8, %v643_v8  ;;  %v2811_v39 = vor.u32 %v3702_v26, %v2808_v27  ;;  %v3696_v8 = vld [vmem:[%s4214_s10 + $0x134] sm:$0xf]  ;;  %v3694_v26 = vld [vmem:[%s4214_s10 + $0x124] sm:$0xf]  ;;  %v2776_v27 = vld [vmem:[%s4214_s10 + $0x128] sm:$0xf0] }
  0x98   : > { %2144 = vmatpush.bf16.msrb.mxu2 %v3543_v31  ;;  %v4554_v31 = vpack.c.b16 %v642_v9, %v642_v9  ;;  %v2784_v9 = vld [vmem:[%s4214_s10 + $0x138] sm:$0xf0]  ;;  %v2760_v61 = vld [vmem:[%s4214_s10 + $0x108] sm:$0xf0] }
  0x99   : > { %2157 = vmatpush.bf16.msrb.mxu3 %v3607_v36  ;;  %v2683_v36 = vor.u32 %v3670_v15, %v2680_v16  ;;  %v3662_v15 = vld [vmem:[%s4214_s10 + $0x24] sm:$0xf]  ;;  %v2648_v16 = vld [vmem:[%s4214_s10 + $0x28] sm:$0xf0] }
  0x9a   : > { %2119 = vmatpush.bf16.msrb.mxu0 %v3407_v47  ;;  %v2736_v47 = vld [vmem:[%s4214_s10 + $0xd8] sm:$0xf0] }
  0x9b   : > { %2132 = vmatpush.bf16.msrb.mxu1 %v3471_v51  ;;  %v2864_v51 = vld [vmem:[%s4214_s10 + $0x1d8] sm:$0xf0]  ;;  %v2739_v53 = vor.u32 %v3684_v45, %v2736_v47  ;;  %v3676_v45 = vld [vmem:[%s4214_s10 + $0x94] sm:$0xf] }
  0x9c   : > { %2145 = vmatpush.bf16.msrb.mxu2 %v3535_v52  ;;  %v2675_v52 = vor.u32 %v3668_v40, %v2672_v43  ;;  %v2867_v58 = vor.u32 %v3716_v50, %v2864_v51  ;;  %v3660_v40 = vld [vmem:[%s4214_s10 + $0x14] sm:$0xf]  ;;  %v2640_v43 = vld [vmem:[%s4214_s10 + $0x18] sm:$0xf0] }
  0x9d   : > { %2158 = vmatpush.bf16.msrb.mxu3 %v3599_v56  ;;  %v2664_v56 = vld [vmem:[%s4214_s10 + $0x48] sm:$0xf0]  ;;  %v2704_v47 = vld [vmem:[%s4214_s10 + $0x98] sm:$0xf0]  ;;  %v3708_v50 = vld [vmem:[%s4214_s10 + $0x194] sm:$0xf] }
  0x9e   : > { %2120 = vmatpush.bf16.msrb.mxu0 %v3399_v63  ;;  %v2856_v63 = vld [vmem:[%s4214_s10 + $0x1c8] sm:$0xf0]  ;;  %v2667_v0 = vor.u32 %v3666_v55, %v2664_v56  ;;  %v2832_v51 = vld [vmem:[%s4214_s10 + $0x198] sm:$0xf0]  ;;  %v2707_v55 = vor.u32 %v3676_v45, %v2704_v47  ;;  %v2771_v56 = vor.u32 %v3692_v48, %v2768_v49  ;;  %v3748_v45 = vld [vmem:[%s4214_s10 + $0x2d4] sm:$0xf] }
  0x9f   : > { %2133 = vmatpush.bf16.msrb.mxu1 %v3463_v4  ;;  %v2656_v4 = vld [vmem:[%s4214_s10 + $0x38] sm:$0xf0]  ;;  %v2859_v6 = vor.u32 %v3714_v62, %v2856_v63  ;;  %v2835_v60 = vor.u32 %v3708_v50, %v2832_v51  ;;  %v3706_v62 = vld [vmem:[%s4214_s10 + $0x184] sm:$0xf]  ;;  %v2824_v63 = vld [vmem:[%s4214_s10 + $0x188] sm:$0xf0] }
  0xa0   : > { %2146 = vmatpush.bf16.msrb.mxu2 %v3527_v5  ;;  %v3680_v5 = vld [vmem:[%s4214_s10 + $0xb4] sm:$0xf]  ;;  %v2659_v12 = vor.u32 %v3664_v3, %v2656_v4  ;;  %v3008_v4 = vld [vmem:[%s4214_s10 + $0x2f8] sm:$0xf0] }
  0xa1   : > { %2159 = vmatpush.bf16.msrb.mxu3 %v3591_v10  ;;  %2121 = vmatmul.bf16.vlgmr.msrb.gmra.mxu0 %v4547_v23  ;;  %v3712_v10 = vld [vmem:[%s4214_s10 + $0x1b4] sm:$0xf]  ;;  %v2992_v47 = vld [vmem:[%s4214_s10 + $0x2d8] sm:$0xf0] }
  0xa2   : > { %2165 = vmatpush.bf16.msra.mxu0 %v2691_v11  ;;  %2134 = vmatmul.bf16.vlgmr.msrb.gmra.mxu1 %v4554_v31  ;;  %v2848_v11 = vld [vmem:[%s4214_s10 + $0x1b8] sm:$0xf0]  ;;  %v3764_v48 = vld [vmem:[%s4214_s10 + $0x354] sm:$0xf] }
  0xa3   : > { %2178 = vmatpush.bf16.msra.mxu1 %v2755_v13  ;;  %2147 = vmatmul.bf16.vlgmr.msrb.gmra.mxu2 %v4552_v28  ;;  %v2723_v13 = vor.u32 %v3680_v5, %v2720_v7  ;;  %v3768_v5 = vld [vmem:[%s4214_s10 + $0x374] sm:$0xf]  ;;  %v3056_v49 = vld [vmem:[%s4214_s10 + $0x358] sm:$0xf0] }
  0xa4   : > { %2191 = vmatpush.bf16.msra.mxu2 %v2819_v14  ;;  %2160 = vmatmul.bf16.vlgmr.msrb.gmra.mxu3 %v4558_v35  ;;  %v2787_v14 = vor.u32 %v3696_v8, %v2784_v9  ;;  %v2763_v8 = vor.u32 %v3690_v59, %v2760_v61  ;;  %v3784_v9 = vld [vmem:[%s4214_s10 + $0x3f4] sm:$0xf]  ;;  %v3120_v51 = vld [vmem:[%s4214_s10 + $0x3d8] sm:$0xf0]  ;;  %v3778_v59 = vld [vmem:[%s4214_s10 + $0x3c4] sm:$0xf] }
  0xa5   : > { %2204 = vmatpush.bf16.msra.mxu3 %v2883_v21  ;;  %v2851_v21 = vor.u32 %v3712_v10, %v2848_v11  ;;  %v3136_v10 = vld [vmem:[%s4214_s10 + $0x3f8] sm:$0xf0]  ;;  %v2827_v11 = vor.u32 %v3706_v62, %v2824_v63  ;;  %v3780_v50 = vld [vmem:[%s4214_s10 + $0x3d4] sm:$0xf] }
  0xa6   : > { %2166 = vmatpush.bf16.msra.mxu0 %v2683_v36  ;;  %v2651_v36 = vor.u32 %v3662_v15, %v2648_v16  ;;  %v3734_v15 = vld [vmem:[%s4214_s10 + $0x264] sm:$0xf]  ;;  %v2936_v16 = vld [vmem:[%s4214_s10 + $0x268] sm:$0xf0]  ;;  %v3728_v61 = vld [vmem:[%s4214_s10 + $0x234] sm:$0xf] }
  0xa7   : > { %2179 = vmatpush.bf16.msra.mxu1 %v2747_v37  ;;  %v2715_v37 = vor.u32 %v3678_v17, %v2712_v24  ;;  %v3750_v17 = vld [vmem:[%s4214_s10 + $0x2e4] sm:$0xf]  ;;  %v3000_v24 = vld [vmem:[%s4214_s10 + $0x2e8] sm:$0xf0] }
  0xa8   : > { %2192 = vmatpush.bf16.msra.mxu2 %v2811_v39  ;;  %v2779_v39 = vor.u32 %v3694_v26, %v2776_v27  ;;  %v3766_v26 = vld [vmem:[%s4214_s10 + $0x364] sm:$0xf]  ;;  %v3064_v27 = vld [vmem:[%s4214_s10 + $0x368] sm:$0xf0] }
  0xa9   : > { %2205 = vmatpush.bf16.msra.mxu3 %v2875_v46  ;;  %v2843_v46 = vor.u32 %v3710_v32, %v2840_v34  ;;  %v3782_v32 = vld [vmem:[%s4214_s10 + $0x3e4] sm:$0xf]  ;;  %v3128_v34 = vld [vmem:[%s4214_s10 + $0x3e8] sm:$0xf0] }
  0xaa   : > { %2167 = vmatpush.bf16.msra.mxu0 %v2675_v52  ;;  %v2643_v52 = vor.u32 %v3660_v40, %v2640_v43  ;;  %v3732_v40 = vld [vmem:[%s4214_s10 + $0x254] sm:$0xf]  ;;  %v2928_v43 = vld [vmem:[%s4214_s10 + $0x258] sm:$0xf0] }
  0xab   : > { %2180 = vmatpush.bf16.msra.mxu1 %v2739_v53  ;;  %v3658_v53 = vld [vmem:[%s4214_s10 + $0x4] sm:$0xf] }
  0xac   : > { %2193 = vmatpush.bf16.msra.mxu2 %v2803_v54  ;;  %v2632_v54 = vld [vmem:[%s4214_s10 + $0x8] sm:$0xf0] }
  0xad   : > { %2206 = vmatpush.bf16.msra.mxu3 %v2867_v58  ;;  %v2696_v58 = vld [vmem:[%s4214_s10 + $0x88] sm:$0xf0]  ;;  %v2635_v3 = vor.u32 %v3658_v53, %v2632_v54  ;;  %v2995_v53 = vor.u32 %v3748_v45, %v2992_v47  ;;  %v3730_v54 = vld [vmem:[%s4214_s10 + $0x244] sm:$0xf] }
  0xae   : > { %2168 = vmatpush.bf16.msra.mxu0 %v2667_v0  ;;  %v3736_v0 = vld [vmem:[%s4214_s10 + $0x274] sm:$0xf]  ;;  %v2699_v7 = vor.u32 %v3674_v57, %v2696_v58  ;;  %v3762_v57 = vld [vmem:[%s4214_s10 + $0x344] sm:$0xf]  ;;  %v3048_v58 = vld [vmem:[%s4214_s10 + $0x348] sm:$0xf0] }
  0xaf   : > { %2181 = vmatpush.bf16.msra.mxu1 %v2731_v1  ;;  %v2944_v1 = vld [vmem:[%s4214_s10 + $0x278] sm:$0xf0]  ;;  %v3051_v63 = vor.u32 %v3762_v57, %v3048_v58  ;;  %v2952_v57 = vld [vmem:[%s4214_s10 + $0x288] sm:$0xf0]  ;;  %v3754_v58 = vld [vmem:[%s4214_s10 + $0x304] sm:$0xf] }
  0xb0   : > { %2194 = vmatpush.bf16.msra.mxu2 %v2795_v2  ;;  %v3752_v2 = vld [vmem:[%s4214_s10 + $0x2f4] sm:$0xf] }
  0xb1   : > { %2207 = vmatpush.bf16.msra.mxu3 %v2859_v6  ;;  %v3072_v6 = vld [vmem:[%s4214_s10 + $0x378] sm:$0xf0] }
  0xb2   : > { %2169 = vmatpush.bf16.msra.mxu0 %v2659_v12  ;;  %v2947_v12 = vor.u32 %v3736_v0, %v2944_v1  ;;  %v2912_v0 = vld [vmem:[%s4214_s10 + $0x238] sm:$0xf0]  ;;  %v3744_v1 = vld [vmem:[%s4214_s10 + $0x2b4] sm:$0xf] }
  0xb3   : > { %2182 = vmatpush.bf16.msra.mxu1 %v2723_v13  ;;  %v3011_v13 = vor.u32 %v3752_v2, %v3008_v4  ;;  %v2976_v2 = vld [vmem:[%s4214_s10 + $0x2b8] sm:$0xf0]  ;;  %v3760_v4 = vld [vmem:[%s4214_s10 + $0x334] sm:$0xf] }
  0xb4   : > { %2195 = vmatpush.bf16.msra.mxu2 %v2787_v14  ;;  %v3075_v14 = vor.u32 %v3768_v5, %v3072_v6  ;;  %v3040_v5 = vld [vmem:[%s4214_s10 + $0x338] sm:$0xf0]  ;;  %v4654_v6 = vld [vmem:[#allocation4] sm:$0x3] }
  0xb5   : > { %2208 = vmatpush.bf16.msra.mxu3 %v2851_v21  ;;  %v3139_v21 = vor.u32 %v3784_v9, %v3136_v10  ;;  %v2915_v9 = vor.u32 %v3728_v61, %v2912_v0  ;;  %v3726_v10 = vld [vmem:[%s4214_s10 + $0x224] sm:$0xf] }
  0xb6   : > { %2170 = vmatpush.bf16.msra.mxu0 %v2651_v36  ;;  %v2939_v36 = vor.u32 %v3734_v15, %v2936_v16  ;;  %v617_v15 = vperm.slane %v4654_v6, 0  ;;  %v3770_v61 = vld [vmem:[%s4214_s10 + $0x384] sm:$0xf] }
  0xb7   : > { %2183 = vmatpush.bf16.msra.mxu1 %v2715_v37  ;;  %v3003_v37 = vor.u32 %v3750_v17, %v3000_v24  ;;  %v2968_v17 = vld [vmem:[%s4214_s10 + $0x2a8] sm:$0xf0] }
  0xb8   : > { %2196 = vmatpush.bf16.msra.mxu2 %v2779_v39  ;;  %v3067_v39 = vor.u32 %v3766_v26, %v3064_v27  ;;  %v3032_v24 = vld [vmem:[%s4214_s10 + $0x328] sm:$0xf0]  ;;  %v3774_v26 = vld [vmem:[%s4214_s10 + $0x3a4] sm:$0xf] }
  0xb9   : > { %2209 = vmatpush.bf16.msra.mxu3 %v2843_v46  ;;  %v3131_v46 = vor.u32 %v3782_v32, %v3128_v34  ;;  %v3096_v27 = vld [vmem:[%s4214_s10 + $0x3a8] sm:$0xf0] }
  0xba   : > { %2171 = vmatpush.bf16.msra.mxu0 %v2643_v52  ;;  %v2931_v52 = vor.u32 %v3732_v40, %v2928_v43  ;;  %v2896_v40 = vld [vmem:[%s4214_s10 + $0x218] sm:$0xf0]  ;;  %v3740_v43 = vld [vmem:[%s4214_s10 + $0x294] sm:$0xf]  ;;  %v3099_v47 = vor.u32 %v3774_v26, %v3096_v27  ;;  %v3798_v26 = vld [vmem:[%s4214_s10 + $0x464] sm:$0xf] }
  0xbb   : > { %2184 = vmatpush.bf16.msra.mxu1 %v2707_v55  ;;  %v2920_v55 = vld [vmem:[%s4214_s10 + $0x248] sm:$0xf0] }
  0xbc   : > { %2197 = vmatpush.bf16.msra.mxu2 %v2771_v56  ;;  %v3746_v56 = vld [vmem:[%s4214_s10 + $0x2c4] sm:$0xf]  ;;  %v3192_v27 = vld [vmem:[%s4214_s10 + $0x468] sm:$0xf0] }
  0xbd   : > { %2210 = vmatpush.bf16.msra.mxu3 %v2835_v60  ;;  %v2923_v60 = vor.u32 %v3730_v54, %v2920_v55  ;;  %v3722_v54 = vld [vmem:[%s4214_s10 + $0x204] sm:$0xf]  ;;  %v2888_v55 = vld [vmem:[%s4214_s10 + $0x208] sm:$0xf0] }
  0xbe   : > { %2172 = vmatpush.bf16.msra.mxu0 %v2635_v3 }
  0xbf   : > { %2185 = vmatpush.bf16.msra.mxu1 %v2699_v7  ;;  %v3776_v7 = vld [vmem:[%s4214_s10 + $0x3b4] sm:$0xf] }
  0xc0   : > { %2198 = vmatpush.bf16.msra.mxu2 %v2763_v8  ;;  %v3104_v8 = vld [vmem:[%s4214_s10 + $0x3b8] sm:$0xf0] }
  0xc1   : > { %2211 = vmatpush.bf16.msra.mxu3 %v2827_v11  ;;  %2173 = vmatmul.bf16.vlgmr.msra.gmra.mxu0 %v4336_v19  ;;  %v3123_v19 = vor.u32 %v3780_v50, %v3120_v51  ;;  %v2979_v11 = vor.u32 %v3744_v1, %v2976_v2  ;;  %v3107_v16 = vor.u32 %v3776_v7, %v3104_v8  ;;  %v1966_v34 = vpop.f32.mrf.mxu0  ;;  %v3024_v50 = vld [vmem:[%s4214_s10 + $0x318] sm:$0xf0]  ;;  %v3772_v51 = vld [vmem:[%s4214_s10 + $0x394] sm:$0xf] }
  0xc2   : > { %2217 = vmatpush.bf16.msrb.mxu0 %v2947_v12  ;;  %2186 = vmatmul.bf16.vlgmr.msra.gmra.mxu1 %v4340_v22  ;;  %v3112_v22 = vld [vmem:[%s4214_s10 + $0x3c8] sm:$0xf0]  ;;  %v3043_v12 = vor.u32 %v3760_v4, %v3040_v5  ;;  %v1967_v45 = vadd.f32 %v1966_v34, %v617_v15  ;;  %v3800_v1 = vld [vmem:[%s4214_s10 + $0x474] sm:$0xf]  ;;  %v3200_v2 = vld [vmem:[%s4214_s10 + $0x478] sm:$0xf0]  ;;  %v2891_v4 = vor.u32 %v3722_v54, %v2888_v55 }
  0xc3   : > { %2230 = vmatpush.bf16.msrb.mxu1 %v3011_v13  ;;  %2199 = vmatmul.bf16.vlgmr.msra.gmra.mxu2 %v4334_v18  ;;  %v3059_v18 = vor.u32 %v3764_v48, %v3056_v49  ;;  %v3115_v3 = vor.u32 %v3778_v59, %v3112_v22  ;;  %v2904_v13 = vld [vmem:[%s4214_s10 + $0x228] sm:$0xf0]  ;;  %v2960_v48 = vld [vmem:[%s4214_s10 + $0x298] sm:$0xf0]  ;;  %v3756_v49 = vld [vmem:[%s4214_s10 + $0x314] sm:$0xf] }
  0xc4   : > { %2243 = vmatpush.bf16.msrb.mxu2 %v3075_v14  ;;  %2212 = vmatmul.bf16.vlgmr.msra.gmra.mxu3 %v4338_v20  ;;  %v2984_v20 = vld [vmem:[%s4214_s10 + $0x2c8] sm:$0xf0]  ;;  %v3742_v14 = vld [vmem:[%s4214_s10 + $0x2a4] sm:$0xf]  ;;  %v2907_v32 = vor.u32 %v3726_v10, %v2904_v13  ;;  %v3264_v5 = vld [vmem:[%s4214_s10 + $0x4f8] sm:$0xf0] }
  0xc5   : > { %2256 = vmatpush.bf16.msrb.mxu3 %v3139_v21  ;;  %v2987_v62 = vor.u32 %v3746_v56, %v2984_v20  ;;  %v3758_v21 = vld [vmem:[%s4214_s10 + $0x324] sm:$0xf]  ;;  %v2963_v56 = vor.u32 %v3740_v43, %v2960_v48  ;;  %v3832_v7 = vld [vmem:[%s4214_s10 + $0x574] sm:$0xf]  ;;  %v3328_v8 = vld [vmem:[%s4214_s10 + $0x578] sm:$0xf0] }
  0xc6   : > { %2218 = vmatpush.bf16.msrb.mxu0 %v2939_v36  ;;  %v2971_v36 = vor.u32 %v3742_v14, %v2968_v17  ;;  %v3738_v20 = vld [vmem:[%s4214_s10 + $0x284] sm:$0xf]  ;;  %v1992_v59 = vpop.f32.mrf.mxu2  ;;  %v3848_v13 = vld [vmem:[%s4214_s10 + $0x5f4] sm:$0xf]  ;;  %v3392_v14 = vld [vmem:[%s4214_s10 + $0x5f8] sm:$0xf0]  ;;  %v3203_v17 = vor.u32 %v3800_v1, %v3200_v2 }
  0xc7   : > { %2231 = vmatpush.bf16.msrb.mxu1 %v3003_v37  ;;  %v3035_v37 = vor.u32 %v3758_v21, %v3032_v24  ;;  %v3331_v24 = vor.u32 %v3832_v7, %v3328_v8  ;;  %v3395_v34 = vor.u32 %v3848_v13, %v3392_v14  ;;  %v3384_v43 = vld [vmem:[%s4214_s10 + $0x5e8] sm:$0xf0]  ;;  %v3828_v54 = vld [vmem:[%s4214_s10 + $0x554] sm:$0xf]  ;;  %v3312_v55 = vld [vmem:[%s4214_s10 + $0x558] sm:$0xf0] }
  0xc8   : > { %2244 = vmatpush.bf16.msrb.mxu2 %v3067_v39  ;;  %v3724_v39 = vld [vmem:[%s4214_s10 + $0x214] sm:$0xf]  ;;  %v3296_v13 = vld [vmem:[%s4214_s10 + $0x538] sm:$0xf0] }
  0xc9   : > { %2257 = vmatpush.bf16.msrb.mxu3 %v3131_v46  ;;  %v1979_v46 = vpop.f32.mrf.mxu1  ;;  %v2005_v0 = vpop.f32.mrf.mxu3  ;;  %v3840_v14 = vld [vmem:[%s4214_s10 + $0x5b4] sm:$0xf] }
  0xca   : > { %2219 = vmatpush.bf16.msrb.mxu0 %v2931_v52  ;;  %v3088_v52 = vld [vmem:[%s4214_s10 + $0x398] sm:$0xf0]  ;;  %v1968_v10 = vpop.f32.mrf.mxu0 }
  0xcb   : > { %2232 = vmatpush.bf16.msrb.mxu1 %v2995_v53  ;;  %v1980_v53 = vadd.f32 %v1979_v46, %v1967_v45  ;;  %v3091_v22 = vor.u32 %v3772_v51, %v3088_v52  ;;  %v3195_v46 = vor.u32 %v3798_v26, %v3192_v27  ;;  %v3184_v51 = vld [vmem:[%s4214_s10 + $0x458] sm:$0xf0]  ;;  %v3812_v52 = vld [vmem:[%s4214_s10 + $0x4d4] sm:$0xf]  ;;  %v3160_v26 = vld [vmem:[%s4214_s10 + $0x428] sm:$0xf0] }
  0xcc   : > { %2245 = vmatpush.bf16.msrb.mxu2 %v3059_v18  ;;  %v2899_v18 = vor.u32 %v3724_v39, %v2896_v40  ;;  %v3320_v39 = vld [vmem:[%s4214_s10 + $0x568] sm:$0xf0]  ;;  %v3846_v40 = vld [vmem:[%s4214_s10 + $0x5e4] sm:$0xf] }
  0xcd   : > { %2258 = vmatpush.bf16.msrb.mxu3 %v3123_v19  ;;  %v3027_v19 = vor.u32 %v3756_v49, %v3024_v50  ;;  %v3796_v50 = vld [vmem:[%s4214_s10 + $0x454] sm:$0xf]  ;;  %v3806_v27 = vld [vmem:[%s4214_s10 + $0x4a4] sm:$0xf] }
  0xce   : > { %2220 = vmatpush.bf16.msrb.mxu0 %v2923_v60  ;;  %v3016_v60 = vld [vmem:[%s4214_s10 + $0x308] sm:$0xf0]  ;;  %v1994_v45 = vpop.f32.mrf.mxu2 }
  0xcf   : > { %2233 = vmatpush.bf16.msrb.mxu1 %v2987_v62  ;;  %v3080_v62 = vld [vmem:[%s4214_s10 + $0x388] sm:$0xf0]  ;;  %v3838_v45 = vld [vmem:[%s4214_s10 + $0x5a4] sm:$0xf] }
  0xd0   : > { %2246 = vmatpush.bf16.msrb.mxu2 %v3051_v63  ;;  %v1993_v63 = vadd.f32 %v1992_v59, %v1980_v53  ;;  %v3387_v53 = vor.u32 %v3846_v40, %v3384_v43  ;;  %v3176_v59 = vld [vmem:[%s4214_s10 + $0x448] sm:$0xf0] }
  0xd1   : > { %2259 = vmatpush.bf16.msrb.mxu3 %v3115_v3  ;;  %v3816_v3 = vld [vmem:[%s4214_s10 + $0x4f4] sm:$0xf]  ;;  %v1981_v15 = vpop.f32.mrf.mxu1 }
  0xd2   : > { %2221 = vmatpush.bf16.msrb.mxu0 %v2915_v9  ;;  %v4689_v9 = vadd.f32 %v2005_v0, %v1993_v63  ;;  %v3267_v21 = vor.u32 %v3816_v3, %v3264_v5  ;;  %v3368_v63 = vld [vmem:[%s4214_s10 + $0x5c8] sm:$0xf0]  ;;  %v3792_v3 = vld [vmem:[%s4214_s10 + $0x434] sm:$0xf]  ;;  %v3360_v15 = vld [vmem:[%s4214_s10 + $0x5b8] sm:$0xf0] }
  0xd3   : > { %2234 = vmatpush.bf16.msrb.mxu1 %v2979_v11  ;;  %v2955_v11 = vor.u32 %v3738_v20, %v2952_v57  ;;  %v3187_v20 = vor.u32 %v3796_v50, %v3184_v51  ;;  %v3315_v57 = vor.u32 %v3828_v54, %v3312_v55  ;;  %v3808_v5 = vld [vmem:[%s4214_s10 + $0x4b4] sm:$0xf] }
  0xd4   : > { %2247 = vmatpush.bf16.msrb.mxu2 %v3043_v12  ;;  %v3019_v12 = vor.u32 %v3754_v58, %v3016_v60  ;;  %v3794_v58 = vld [vmem:[%s4214_s10 + $0x444] sm:$0xf]  ;;  %v3240_v60 = vld [vmem:[%s4214_s10 + $0x4c8] sm:$0xf0] }
  0xd5   : > { %2260 = vmatpush.bf16.msrb.mxu3 %v3107_v16  ;;  %v3083_v16 = vor.u32 %v3770_v61, %v3080_v62  ;;  %v3304_v61 = vld [vmem:[%s4214_s10 + $0x548] sm:$0xf0]  ;;  %v3842_v62 = vld [vmem:[%s4214_s10 + $0x5c4] sm:$0xf] }
  0xd6   : > { %2222 = vmatpush.bf16.msrb.mxu0 %v2907_v32  ;;  %v3814_v32 = vld [vmem:[%s4214_s10 + $0x4e4] sm:$0xf]  ;;  %v3371_v10 = vor.u32 %v3842_v62, %v3368_v63 }
  0xd7   : > { %2235 = vmatpush.bf16.msrb.mxu1 %v2971_v36  ;;  %v3256_v36 = vld [vmem:[%s4214_s10 + $0x4e8] sm:$0xf0]  ;;  %v3818_v62 = vld [vmem:[%s4214_s10 + $0x504] sm:$0xf] }
  0xd8   : > { %2248 = vmatpush.bf16.msrb.mxu2 %v3035_v37  ;;  %v3830_v37 = vld [vmem:[%s4214_s10 + $0x564] sm:$0xf]  ;;  %v3259_v48 = vor.u32 %v3814_v32, %v3256_v36  ;;  %v3224_v36 = vld [vmem:[%s4214_s10 + $0x4a8] sm:$0xf0] }
  0xd9   : > { %2261 = vmatpush.bf16.msrb.mxu3 %v3099_v47  ;;  %v2007_v47 = vpop.f32.mrf.mxu3  ;;  %v3323_v49 = vor.u32 %v3830_v37, %v3320_v39  ;;  %v3822_v37 = vld [vmem:[%s4214_s10 + $0x524] sm:$0xf]  ;;  %v3288_v39 = vld [vmem:[%s4214_s10 + $0x528] sm:$0xf0]  ;;  %v3227_v50 = vor.u32 %v3806_v27, %v3224_v36 }
  0xda   : > { %2223 = vmatpush.bf16.msrb.mxu0 %v2899_v18  ;;  %v3248_v18 = vld [vmem:[%s4214_s10 + $0x4d8] sm:$0xf0]  ;;  %v3291_v51 = vor.u32 %v3822_v37, %v3288_v39  ;;  %v3448_v27 = vld [vmem:[%s4214_s10 + $0x668] sm:$0xf0]  ;;  %v3894_v37 = vld [vmem:[%s4214_s10 + $0x764] sm:$0xf] }
  0xdb   : > { %2236 = vmatpush.bf16.msrb.mxu1 %v2963_v56  ;;  %v3844_v56 = vld [vmem:[%s4214_s10 + $0x5d4] sm:$0xf]  ;;  %v3512_v36 = vld [vmem:[%s4214_s10 + $0x6e8] sm:$0xf0] }
  0xdc   : > { %2249 = vmatpush.bf16.msrb.mxu2 %v3027_v19  ;;  %v3376_v19 = vld [vmem:[%s4214_s10 + $0x5d8] sm:$0xf0]  ;;  %v3576_v39 = vld [vmem:[%s4214_s10 + $0x768] sm:$0xf0] }
  0xdd   : > { %2262 = vmatpush.bf16.msrb.mxu3 %v3091_v22  ;;  %v3810_v22 = vld [vmem:[%s4214_s10 + $0x4c4] sm:$0xf] }
  0xde   : > { %2224 = vmatpush.bf16.msrb.mxu0 %v2891_v4  ;;  %v2018_v0 = vpop.f32.mrf.mxu0  ;;  %v3243_v1 = vor.u32 %v3810_v22, %v3240_v60  ;;  %v3168_v4 = vld [vmem:[%s4214_s10 + $0x438] sm:$0xf0]  ;;  %v3144_v22 = vld [vmem:[%s4214_s10 + $0x408] sm:$0xf0] }
  0xdf   : > { %2237 = vmatpush.bf16.msrb.mxu1 %v2955_v11  ;;  %v2019_v7 = vadd.f32 %v2018_v0, %v4689_v9  ;;  %v2031_v8 = vpop.f32.mrf.mxu1  ;;  %v3232_v11 = vld [vmem:[%s4214_s10 + $0x4b8] sm:$0xf0]  ;;  %v3272_v0 = vld [vmem:[%s4214_s10 + $0x508] sm:$0xf0] }
  0xe0   : > { %2250 = vmatpush.bf16.msrb.mxu2 %v3019_v12  ;;  %v3824_v12 = vld [vmem:[%s4214_s10 + $0x534] sm:$0xf]  ;;  %v3235_v9 = vor.u32 %v3808_v5, %v3232_v11  ;;  %v3456_v5 = vld [vmem:[%s4214_s10 + $0x678] sm:$0xf0] }
  0xe1   : > { %2263 = vmatpush.bf16.msrb.mxu3 %v3083_v16  ;;  %2225 = vmatmul.bf16.vlgmr.msrb.gmra.mxu0 %v4398_v41  ;;  %v3379_v41 = vor.u32 %v3844_v56, %v3376_v19  ;;  %v2032_v16 = vadd.f32 %v2031_v8, %v2019_v7  ;;  %v3216_v56 = vld [vmem:[%s4214_s10 + $0x498] sm:$0xf0]  ;;  %v3820_v19 = vld [vmem:[%s4214_s10 + $0x514] sm:$0xf] }
  0xe2   : > { %2269 = vmatpush.bf16.msra.mxu0 %v3203_v17  ;;  %2238 = vmatmul.bf16.vlgmr.msrb.gmra.mxu1 %v4402_v44  ;;  %v3179_v44 = vor.u32 %v3794_v58, %v3176_v59  ;;  %v3171_v17 = vor.u32 %v3792_v3, %v3168_v4  ;;  %v3786_v59 = vld [vmem:[%s4214_s10 + $0x404] sm:$0xf]  ;;  %v3864_v4 = vld [vmem:[%s4214_s10 + $0x674] sm:$0xf] }
  0xe3   : > { %2282 = vmatpush.bf16.msra.mxu1 %v3267_v21  ;;  %2251 = vmatmul.bf16.vlgmr.msrb.gmra.mxu2 %v4394_v38  ;;  %v3251_v38 = vor.u32 %v3812_v52, %v3248_v18  ;;  %v3299_v21 = vor.u32 %v3824_v12, %v3296_v13  ;;  %v3788_v52 = vld [vmem:[%s4214_s10 + $0x414] sm:$0xf]  ;;  %v3147_v8 = vor.u32 %v3786_v59, %v3144_v22  ;;  %v3584_v12 = vld [vmem:[%s4214_s10 + $0x778] sm:$0xf0]  ;;  %v3890_v59 = vld [vmem:[%s4214_s10 + $0x744] sm:$0xf] }
  0xe4   : > { %2295 = vmatpush.bf16.msra.mxu2 %v3331_v24  ;;  %2264 = vmatmul.bf16.vlgmr.msrb.gmra.mxu3 %v4400_v42  ;;  %v3826_v42 = vld [vmem:[%s4214_s10 + $0x544] sm:$0xf]  ;;  %v3804_v18 = vld [vmem:[%s4214_s10 + $0x494] sm:$0xf]  ;;  %v3560_v22 = vld [vmem:[%s4214_s10 + $0x748] sm:$0xf0] }
  0xe5   : > { %2308 = vmatpush.bf16.msra.mxu3 %v3395_v34  ;;  %v3307_v2 = vor.u32 %v3826_v42, %v3304_v61  ;;  %v3790_v24 = vld [vmem:[%s4214_s10 + $0x424] sm:$0xf]  ;;  %v3363_v34 = vor.u32 %v3840_v14, %v3360_v15  ;;  %v3208_v61 = vld [vmem:[%s4214_s10 + $0x488] sm:$0xf0]  ;;  %v3880_v7 = vld [vmem:[%s4214_s10 + $0x6f4] sm:$0xf]  ;;  %v3275_v14 = vor.u32 %v3818_v62, %v3272_v0 }
  0xe6   : > { %2270 = vmatpush.bf16.msra.mxu0 %v3195_v46  ;;  %v2044_v32 = vpop.f32.mrf.mxu2  ;;  %v3352_v46 = vld [vmem:[%s4214_s10 + $0x5a8] sm:$0xf0]  ;;  %v3163_v47 = vor.u32 %v3790_v24, %v3160_v26  ;;  %v3802_v42 = vld [vmem:[%s4214_s10 + $0x484] sm:$0xf]  ;;  %v3896_v11 = vld [vmem:[%s4214_s10 + $0x774] sm:$0xf] }
  0xe7   : > { %2283 = vmatpush.bf16.msra.mxu1 %v3259_v48  ;;  %v2045_v40 = vadd.f32 %v2044_v32, %v2032_v16  ;;  %v2057_v43 = vpop.f32.mrf.mxu3  ;;  %v2033_v54 = vpop.f32.mrf.mxu1  ;;  %v3355_v55 = vor.u32 %v3838_v45, %v3352_v46  ;;  %v3211_v13 = vor.u32 %v3802_v42, %v3208_v61  ;;  %v3912_v15 = vld [vmem:[%s4214_s10 + $0x7f4] sm:$0xf]  ;;  %v3648_v16 = vld [vmem:[%s4214_s10 + $0x7f8] sm:$0xf0]  ;;  %v3587_v24 = vor.u32 %v3896_v11, %v3584_v12  ;;  %v3862_v26 = vld [vmem:[%s4214_s10 + $0x664] sm:$0xf] }
  0xe8   : > { %2296 = vmatpush.bf16.msra.mxu2 %v3323_v49  ;;  %v2020_v49 = vpop.f32.mrf.mxu0  ;;  %v3878_v32 = vld [vmem:[%s4214_s10 + $0x6e4] sm:$0xf]  ;;  %v3451_v45 = vor.u32 %v3862_v26, %v3448_v27  ;;  %v3568_v54 = vld [vmem:[%s4214_s10 + $0x758] sm:$0xf0]  ;;  %v3856_v0 = vld [vmem:[%s4214_s10 + $0x634] sm:$0xf] }
  0xe9   : > { %2309 = vmatpush.bf16.msra.mxu3 %v3387_v53  ;;  %v4738_v48 = vadd.f32 %v2057_v43, %v2045_v40  ;;  %v3152_v53 = vld [vmem:[%s4214_s10 + $0x418] sm:$0xf0]  ;;  %v3910_v40 = vld [vmem:[%s4214_s10 + $0x7e4] sm:$0xf]  ;;  %v3640_v43 = vld [vmem:[%s4214_s10 + $0x7e8] sm:$0xf0]  ;;  %v3515_v46 = vor.u32 %v3878_v32, %v3512_v36 }
  0xea   : > { %2271 = vmatpush.bf16.msra.mxu0 %v3187_v20  ;;  %v3280_v20 = vld [vmem:[%s4214_s10 + $0x518] sm:$0xf0]  ;;  %v3155_v58 = vor.u32 %v3788_v52, %v3152_v53  ;;  %v3860_v49 = vld [vmem:[%s4214_s10 + $0x654] sm:$0xf]  ;;  %v3643_v52 = vor.u32 %v3910_v40, %v3640_v43  ;;  %v3544_v26 = vld [vmem:[%s4214_s10 + $0x728] sm:$0xf0] }
  0xeb   : > { %2284 = vmatpush.bf16.msra.mxu1 %v3251_v38  ;;  %v3836_v38 = vld [vmem:[%s4214_s10 + $0x594] sm:$0xf]  ;;  %v3283_v60 = vor.u32 %v3820_v19, %v3280_v20  ;;  %v3504_v53 = vld [vmem:[%s4214_s10 + $0x6d8] sm:$0xf0]  ;;  %v3608_v36 = vld [vmem:[%s4214_s10 + $0x7a8] sm:$0xf0] }
  0xec   : > { %2297 = vmatpush.bf16.msra.mxu2 %v3315_v57  ;;  %v3344_v57 = vld [vmem:[%s4214_s10 + $0x598] sm:$0xf0] }
  0xed   : > { %2310 = vmatpush.bf16.msra.mxu3 %v3379_v41  ;;  %v3219_v41 = vor.u32 %v3804_v18, %v3216_v56  ;;  %v3892_v18 = vld [vmem:[%s4214_s10 + $0x754] sm:$0xf]  ;;  %v3632_v56 = vld [vmem:[%s4214_s10 + $0x7d8] sm:$0xf0] }
  0xee   : > { %2272 = vmatpush.bf16.msra.mxu0 %v3179_v44  ;;  %v2046_v63 = vpop.f32.mrf.mxu2  ;;  %v3347_v44 = vor.u32 %v3836_v38, %v3344_v57  ;;  %v3571_v20 = vor.u32 %v3892_v18, %v3568_v54  ;;  %v3858_v38 = vld [vmem:[%s4214_s10 + $0x644] sm:$0xf]  ;;  %v3432_v57 = vld [vmem:[%s4214_s10 + $0x648] sm:$0xf0]  ;;  %v3536_v18 = vld [vmem:[%s4214_s10 + $0x718] sm:$0xf0] }
  0xef   : > { %2285 = vmatpush.bf16.msra.mxu1 %v3243_v1  ;;  %v3834_v1 = vld [vmem:[%s4214_s10 + $0x584] sm:$0xf]  ;;  %v2059_v3 = vpop.f32.mrf.mxu3  ;;  %v3435_v61 = vor.u32 %v3858_v38, %v3432_v57  ;;  %v3900_v54 = vld [vmem:[%s4214_s10 + $0x794] sm:$0xf]  ;;  %v3400_v38 = vld [vmem:[%s4214_s10 + $0x608] sm:$0xf0] }
  0xf0   : > { %2298 = vmatpush.bf16.msra.mxu2 %v3307_v2  ;;  %v3336_v2 = vld [vmem:[%s4214_s10 + $0x588] sm:$0xf0]  ;;  %v3866_v57 = vld [vmem:[%s4214_s10 + $0x684] sm:$0xf] }
  0xf1   : > { %2311 = vmatpush.bf16.msra.mxu3 %v3371_v10  ;;  %v3520_v10 = vld [vmem:[%s4214_s10 + $0x6f8] sm:$0xf0] }
  0xf2   : > { %2273 = vmatpush.bf16.msra.mxu0 %v3171_v17  ;;  %v3339_v17 = vor.u32 %v3834_v1, %v3336_v2  ;;  %v3424_v1 = vld [vmem:[%s4214_s10 + $0x638] sm:$0xf0]  ;;  %v3872_v2 = vld [vmem:[%s4214_s10 + $0x6b4] sm:$0xf] }
  0xf3   : > { %2286 = vmatpush.bf16.msra.mxu1 %v3235_v9  ;;  %v3459_v9 = vor.u32 %v3864_v4, %v3456_v5  ;;  %v3488_v5 = vld [vmem:[%s4214_s10 + $0x6b8] sm:$0xf0]  ;;  %v3427_v11 = vor.u32 %v3856_v0, %v3424_v1 }
  0xf4   : > { %2299 = vmatpush.bf16.msra.mxu2 %v3299_v21  ;;  %v3523_v21 = vor.u32 %v3880_v7, %v3520_v10  ;;  %v3888_v7 = vld [vmem:[%s4214_s10 + $0x734] sm:$0xf]  ;;  %v3616_v10 = vld [vmem:[%s4214_s10 + $0x7b8] sm:$0xf0]  ;;  %v3491_v12 = vor.u32 %v3872_v2, %v3488_v5 }
  0xf5   : > { %2312 = vmatpush.bf16.msra.mxu3 %v3363_v34  ;;  %v3651_v34 = vor.u32 %v3912_v15, %v3648_v16  ;;  %v3416_v15 = vld [vmem:[%s4214_s10 + $0x628] sm:$0xf0]  ;;  %v3870_v16 = vld [vmem:[%s4214_s10 + $0x6a4] sm:$0xf] }
  0xf6   : > { %2274 = vmatpush.bf16.msra.mxu0 %v3163_v47  ;;  %v3579_v47 = vor.u32 %v3894_v37, %v3576_v39 }
  0xf7   : > { %2287 = vmatpush.bf16.msra.mxu1 %v3227_v50  ;;  %v3440_v50 = vld [vmem:[%s4214_s10 + $0x658] sm:$0xf0] }
  0xf8   : > { %2300 = vmatpush.bf16.msra.mxu2 %v3291_v51  ;;  %v3876_v51 = vld [vmem:[%s4214_s10 + $0x6d4] sm:$0xf] }
  0xf9   : > { %2313 = vmatpush.bf16.msra.mxu3 %v3355_v55  ;;  %v3908_v55 = vld [vmem:[%s4214_s10 + $0x7d4] sm:$0xf]  ;;  %v3507_v19 = vor.u32 %v3876_v51, %v3504_v53 }
  0xfa   : > { %2275 = vmatpush.bf16.msra.mxu0 %v3155_v58  ;;  %v3496_v58 = vld [vmem:[%s4214_s10 + $0x6c8] sm:$0xf0]  ;;  %v3884_v53 = vld [vmem:[%s4214_s10 + $0x714] sm:$0xf] }
  0xfb   : > { %2288 = vmatpush.bf16.msra.mxu1 %v3219_v41  ;;  %v3906_v41 = vld [vmem:[%s4214_s10 + $0x7c4] sm:$0xf] }
  0xfc   : > { %2301 = vmatpush.bf16.msra.mxu2 %v3283_v60  ;;  %v3624_v60 = vld [vmem:[%s4214_s10 + $0x7c8] sm:$0xf0] }
  0xfd   : > { %2314 = vmatpush.bf16.msra.mxu3 %v3347_v44  ;;  %v3563_v44 = vor.u32 %v3890_v59, %v3560_v22  ;;  %v3627_v3 = vor.u32 %v3906_v41, %v3624_v60  ;;  %v3528_v59 = vld [vmem:[%s4214_s10 + $0x708] sm:$0xf0] }
  0xfe   : > { %2276 = vmatpush.bf16.msra.mxu0 %v3147_v8  ;;  %v3904_v8 = vld [vmem:[%s4214_s10 + $0x7b4] sm:$0xf]  ;;  %v3592_v41 = vld [vmem:[%s4214_s10 + $0x788] sm:$0xf0] }
  0xff   : > { %2289 = vmatpush.bf16.msra.mxu1 %v3211_v13  ;;  %v2083_v62 = vpop.f32.mrf.mxu1 }
 0x100   : > { %2302 = vmatpush.bf16.msra.mxu2 %v3275_v14  ;;  %v3854_v14 = vld [vmem:[%s4214_s10 + $0x624] sm:$0xf] }
 0x101   : > { %2315 = vmatpush.bf16.msra.mxu3 %v3339_v17  ;;  %2277 = vmatmul.bf16.vlgmr.msra.gmra.mxu0 %v4469_v25  ;;  %v3443_v25 = vor.u32 %v3860_v49, %v3440_v50  ;;  %v3619_v17 = vor.u32 %v3904_v8, %v3616_v10  ;;  %v3419_v39 = vor.u32 %v3854_v14, %v3416_v15  ;;  %v3408_v49 = vld [vmem:[%s4214_s10 + $0x618] sm:$0xf0]  ;;  %v3868_v50 = vld [vmem:[%s4214_s10 + $0x694] sm:$0xf] }
 0x102   : > { %2321 = vmatpush.bf16.msrb.mxu0 %v3459_v9  ;;  %2290 = vmatmul.bf16.vlgmr.msra.gmra.mxu1 %v4476_v30  ;;  %v3635_v30 = vor.u32 %v3908_v55, %v3632_v56  ;;  %v3600_v55 = vld [vmem:[%s4214_s10 + $0x798] sm:$0xf0] }
 0x103   : > { %2334 = vmatpush.bf16.msrb.mxu1 %v3523_v21  ;;  %2303 = vmatmul.bf16.vlgmr.msra.gmra.mxu2 %v4474_v29  ;;  %v3874_v29 = vld [vmem:[%s4214_s10 + $0x6c4] sm:$0xf]  ;;  %v3480_v21 = vld [vmem:[%s4214_s10 + $0x6a8] sm:$0xf0] }
 0x104   : > { %2347 = vmatpush.bf16.msrb.mxu2 %v3587_v24  ;;  %2316 = vmatmul.bf16.vlgmr.msra.gmra.mxu3 %v4480_v33  ;;  %v2070_v33 = vpop.f32.mrf.mxu0  ;;  %v3499_v63 = vor.u32 %v3874_v29, %v3496_v58  ;;  %v3886_v24 = vld [vmem:[%s4214_s10 + $0x724] sm:$0xf]  ;;  %v3603_v29 = vor.u32 %v3900_v54, %v3600_v55 }
 0x105   : > { %2360 = vmatpush.bf16.msrb.mxu3 %v3651_v34  ;;  %v2071_v42 = vadd.f32 %v2070_v33, %v4738_v48  ;;  %v3552_v48 = vld [vmem:[%s4214_s10 + $0x738] sm:$0xf0]  ;;  %v3902_v34 = vld [vmem:[%s4214_s10 + $0x7a4] sm:$0xf] }
 0x106   : > { %2322 = vmatpush.bf16.msrb.mxu0 %v3451_v45  ;;  %v3555_v13 = vor.u32 %v3888_v7, %v3552_v48  ;;  %v2096_v9 = vpop.f32.mrf.mxu2  ;;  %v3483_v45 = vor.u32 %v3870_v16, %v3480_v21  ;;  %v3611_v51 = vor.u32 %v3902_v34, %v3608_v36  ;;  %v3882_v58 = vld [vmem:[%s4214_s10 + $0x704] sm:$0xf] }
 0x107   : > { %2335 = vmatpush.bf16.msrb.mxu1 %v3515_v46  ;;  %v2084_v4 = vadd.f32 %v2083_v62, %v2071_v42  ;;  %v2109_v32 = vpop.f32.mrf.mxu3  ;;  %v2085_v40 = vpop.f32.mrf.mxu1  ;;  %v3547_v46 = vor.u32 %v3886_v24, %v3544_v26  ;;  %v3898_v33 = vld [vmem:[%s4214_s10 + $0x784] sm:$0xf]  ;;  %v3531_v62 = vor.u32 %v3882_v58, %v3528_v59 }
 0x108   : > { %2348 = vmatpush.bf16.msrb.mxu2 %v3579_v47  ;;  %v3852_v47 = vld [vmem:[%s4214_s10 + $0x614] sm:$0xf] }
 0x109   : > { %2361 = vmatpush.bf16.msrb.mxu3 %v3643_v52  ;;  %v2097_v27 = vadd.f32 %v2096_v9, %v2084_v4  ;;  %v3472_v52 = vld [vmem:[%s4214_s10 + $0x698] sm:$0xf0]  ;;  %v3411_v56 = vor.u32 %v3852_v47, %v3408_v49 }
 0x10a   : > { %2323 = vmatpush.bf16.msrb.mxu0 %v3443_v25  ;;  %v3475_v25 = vor.u32 %v3868_v50, %v3472_v52 }
 0x10b   : > { %2336 = vmatpush.bf16.msrb.mxu1 %v3507_v19  ;;  %v2110_v43 = vadd.f32 %v2109_v32, %v2097_v27  ;;  %v3539_v19 = vor.u32 %v3884_v53, %v3536_v18 }
 0x10c   : > { %2349 = vmatpush.bf16.msrb.mxu2 %v3571_v20  ;;  %v2072_v37 = vpop.f32.mrf.mxu0  ;;  %v3850_v20 = vld [vmem:[%s4214_s10 + $0x604] sm:$0xf] }
 0x10d   : > { %2362 = vmatpush.bf16.msrb.mxu3 %v3635_v30  ;;  %v3464_v30 = vld [vmem:[%s4214_s10 + $0x688] sm:$0xf0]  ;;  %v3403_v42 = vor.u32 %v3850_v20, %v3400_v38 }
 0x10e   : > { %2324 = vmatpush.bf16.msrb.mxu0 %v3435_v61  ;;  %v2098_v22 = vpop.f32.mrf.mxu2  ;;  %v3467_v61 = vor.u32 %v3866_v57, %v3464_v30 }
 0x10f   : > { %2337 = vmatpush.bf16.msrb.mxu1 %v3499_v63  ;;  %v2111_v60 = vpop.f32.mrf.mxu3  ;;  %v3595_v63 = vor.u32 %v3898_v33, %v3592_v41 }
 0x110   : > { %2350 = vmatpush.bf16.msrb.mxu2 %v3563_v44 }
 0x111   : > { %2363 = vmatpush.bf16.msrb.mxu3 %v3627_v3 }
 0x112   : > { %2325 = vmatpush.bf16.msrb.mxu0 %v3427_v11 }
 0x113   : > { %2338 = vmatpush.bf16.msrb.mxu1 %v3491_v12 }
 0x114   : > { %2351 = vmatpush.bf16.msrb.mxu2 %v3555_v13 }
 0x115   : > { %2364 = vmatpush.bf16.msrb.mxu3 %v3619_v17 }
 0x116   : > { %2326 = vmatpush.bf16.msrb.mxu0 %v3419_v39 }
 0x117   : > { %2339 = vmatpush.bf16.msrb.mxu1 %v3483_v45 }
 0x118   : > { %2352 = vmatpush.bf16.msrb.mxu2 %v3547_v46 }
 0x119   : > { %2365 = vmatpush.bf16.msrb.mxu3 %v3611_v51 }
 0x11a   : > { %2327 = vmatpush.bf16.msrb.mxu0 %v3411_v56 }
 0x11b   : > { %2340 = vmatpush.bf16.msrb.mxu1 %v3475_v25 }
 0x11c   : > { %2353 = vmatpush.bf16.msrb.mxu2 %v3539_v19 }
 0x11d   : > { %2366 = vmatpush.bf16.msrb.mxu3 %v3603_v29 }
 0x11e   : > { %2328 = vmatpush.bf16.msrb.mxu0 %v3403_v42  ;;  %v2122_v44 = vpop.f32.mrf.mxu0 }
 0x11f   : > { %2341 = vmatpush.bf16.msrb.mxu1 %v3467_v61  ;;  %v2123_v0 = vadd.f32 %v2122_v44, %v2110_v43  ;;  %v2135_v1 = vpop.f32.mrf.mxu1 }
 0x120   : > { %2354 = vmatpush.bf16.msrb.mxu2 %v3531_v62 }
 0x121   : > { %2367 = vmatpush.bf16.msrb.mxu3 %v3595_v63  ;;  %2329 = vmatmul.bf16.vlgmr.msrb.gmra.mxu0 %v4547_v23  ;;  %v2136_v2 = vadd.f32 %v2135_v1, %v2123_v0  ;;  %v618_v23 = vperm.slane %v4654_v6, 1 }
 0x122   : > { %2342 = vmatmul.bf16.vlgmr.msrb.gmra.mxu1 %v4554_v31 }
 0x123   : > { %2355 = vmatmul.bf16.vlgmr.msrb.gmra.mxu2 %v4552_v28 }
 0x124   : > { %2368 = vmatmul.bf16.vlgmr.msrb.gmra.mxu3 %v4558_v35 }
 0x126   : > { %v2148_v3 = vpop.f32.mrf.mxu2  ;;  %v2124_v7 = vpop.f32.mrf.mxu0 }
 0x127   : > { %v2149_v4 = vadd.f32 %v2148_v3, %v2136_v2  ;;  %v2161_v5 = vpop.f32.mrf.mxu3  ;;  %v2137_v48 = vpop.f32.mrf.mxu1 }
 0x129   : > { %v2162_v8 = vadd.f32 %v2161_v5, %v2149_v4 }
 0x12b   : > { %v2387_v19 = vmul.f32 %v2162_v8, %v2162_v8  ;;  %v2375_v58 = vrot.slane %v2162_v8, 4 }
 0x12d   : > { %v2389_v30 = vrot.slane %v2387_v19, 4  ;;  %v2376_v62 = vadd.f32 %v2375_v58, %v2162_v8 }
 0x12e   : > { %v2150_v10 = vpop.f32.mrf.mxu2 }
 0x12f   : > { %v2163_v11 = vpop.f32.mrf.mxu3  ;;  %v2390_v33 = vadd.f32 %v2389_v30, %v2387_v19  ;;  %v2377_v3 = vrot.slane %v2376_v62, 2 }
 0x131   : > { %v2391_v44 = vrot.slane %v2390_v33, 2 }
 0x133   : > { %v2392_v48 = vadd.f32 %v2391_v44, %v2390_v33 }
 0x13e   : > { %v2174_v12 = vpop.f32.mrf.mxu0 }
 0x13f   : > { %v2175_v31 = vadd.f32 %v2174_v12, %v618_v23  ;;  %v2187_v13 = vpop.f32.mrf.mxu1  ;;  %v2378_v12 = vadd.f32 %v2377_v3, %v2376_v62 }
 0x141   : > { %v2188_v28 = vadd.f32 %v2187_v13, %v2175_v31 }
 0x146   : > { %v2200_v14 = vpop.f32.mrf.mxu2  ;;  %v2176_v17 = vpop.f32.mrf.mxu0 }
 0x147   : > { %v2201_v35 = vadd.f32 %v2200_v14, %v2188_v28  ;;  %v2213_v15 = vpop.f32.mrf.mxu3  ;;  %v2189_v9 = vpop.f32.mrf.mxu1  ;;  %v2393_v28 = vrot.slane %v2392_v48, 1 }
 0x149   : > { %v2214_v16 = vadd.f32 %v2213_v15, %v2201_v35  ;;  %v2379_v15 = vrot.slane %v2378_v12, 1 }
 0x14e   : > { %v2202_v21 = vpop.f32.mrf.mxu2 }
 0x14f   : > { %v2215_v24 = vpop.f32.mrf.mxu3  ;;  %v2380_v21 = vadd.f32 %v2379_v15, %v2378_v12 }
 0x15e   : > { %v2226_v26 = vpop.f32.mrf.mxu0 }
 0x15f   : > { %v2239_v27 = vpop.f32.mrf.mxu1  ;;  %v2227_v45 = vadd.f32 %v2226_v26, %v2214_v16  ;;  %v2394_v16 = vadd.f32 %v2393_v28, %v2392_v48 }
 0x161   : > { %v2240_v50 = vadd.f32 %v2239_v27, %v2227_v45  ;;  %v2402_v27 = vsel %vm2401_vm0, %v2380_v21, %v2394_v16 }
 0x166   : > { %v2252_v32 = vpop.f32.mrf.mxu2  ;;  %v2228_v36 = vpop.f32.mrf.mxu0 }
 0x167   : > { %v2265_v34 = vpop.f32.mrf.mxu3  ;;  %v2241_v37 = vpop.f32.mrf.mxu1  ;;  %v2253_v52 = vadd.f32 %v2252_v32, %v2240_v50 }
 0x169   : > { %v2266_v54 = vadd.f32 %v2265_v34, %v2253_v52 }
 0x16e   : > { %v2254_v39 = vpop.f32.mrf.mxu2 }
 0x16f   : > { %v2267_v6 = vpop.f32.mrf.mxu3 }
 0x17e   : > { %v2278_v40 = vpop.f32.mrf.mxu0 }
 0x17f   : > { %v2291_v43 = vpop.f32.mrf.mxu1  ;;  %v2279_v55 = vadd.f32 %v2278_v40, %v2266_v54 }
 0x181   : > { %v2292_v56 = vadd.f32 %v2291_v43, %v2279_v55 }
 0x186   : > { %v2304_v46 = vpop.f32.mrf.mxu2  ;;  %v2280_v49 = vpop.f32.mrf.mxu0 }
 0x187   : > { %v2317_v47 = vpop.f32.mrf.mxu3  ;;  %v2293_v51 = vpop.f32.mrf.mxu1  ;;  %v2305_v25 = vadd.f32 %v2304_v46, %v2292_v56 }
 0x189   : > { %v2318_v20 = vadd.f32 %v2317_v47, %v2305_v25 }
 0x18e   : > { %v2306_v53 = vpop.f32.mrf.mxu2 }
 0x18f   : > { %v2319_v18 = vpop.f32.mrf.mxu3 }
 0x19e   : > { %v2330_v38 = vpop.f32.mrf.mxu0 }
 0x19f   : > { %v2343_v57 = vpop.f32.mrf.mxu1  ;;  %v2331_v29 = vadd.f32 %v2330_v38, %v2318_v20 }
 0x1a1   : > { %v2344_v59 = vadd.f32 %v2343_v57, %v2331_v29 }
 0x1a6   : > { %v2356_v22 = vpop.f32.mrf.mxu2  ;;  %v2332_v42 = vpop.f32.mrf.mxu0 }
 0x1a7   : > { %v2357_v41 = vadd.f32 %v2356_v22, %v2344_v59  ;;  %v2369_v60 = vpop.f32.mrf.mxu3  ;;  %v2345_v61 = vpop.f32.mrf.mxu1 }
 0x1a9   : > { %v2370_v63 = vadd.f32 %v2369_v60, %v2357_v41 }
 0x1ab   : > { %v2373_v0 = vpack.c.bf16 %v2370_v63, %v2162_v8  ;;  %v2381_v1 = vrot.slane %v2370_v63, 4  ;;  %v2388_v2 = vmul.f32 %v2370_v63, %v2370_v63 }
 0x1ad   : > { %2374 = vst [vmem:[%s337_s13] sm:$0xff] %v2373_v0  ;;  %v2382_v4 = vadd.f32 %v2381_v1, %v2370_v63  ;;  %v2395_v5 = vrot.slane %v2388_v2, 4 }
 0x1ae   : > { %v2358_v7 = vpop.f32.mrf.mxu2 }
 0x1af   : > { %v2383_v10 = vrot.slane %v2382_v4, 2  ;;  %v2396_v11 = vadd.f32 %v2395_v5, %v2388_v2  ;;  %v2371_v23 = vpop.f32.mrf.mxu3 }
 0x1b1   : > { %v2384_v31 = vadd.f32 %v2383_v10, %v2382_v4  ;;  %v2397_v13 = vrot.slane %v2396_v11, 2 }
 0x1b3   : > { %v2385_v14 = vrot.slane %v2384_v31, 1  ;;  %v2398_v35 = vadd.f32 %v2397_v13, %v2396_v11 }
 0x1b5   : > { %v2399_v8 = vrot.slane %v2398_v35, 1  ;;  %v2386_v17 = vadd.f32 %v2385_v14, %v2384_v31 }
 0x1b7   : > { %v2400_v9 = vadd.f32 %v2399_v8, %v2398_v35 }
 0x1b9   : > { %v2403_v24 = vsel %vm2401_vm0, %v2386_v17, %v2400_v9 }
 0x1ba   : > { %v2406_v26 = vrot.slane %v2403_v24, 6 }
 0x1bc   : > { %v2408_v32 = vsel %vm2407_vm1, %v2402_v27, %v2406_v26 }
 0x1bd   : > { %2410 = vst [vmem:[%s348_s24] sm:$0xf] %v2408_v32 }
 0x1be PF: > { %s19_s20 = sadd.s32 1, %s4096_s20   ;;  %s4866_s15 = smov %s4080_s16 }
 0x1bf   : > { %p16_p2 = scmp.ge.s32.totalorder %s19_s20, 6   ;;  %s4867_s16 = smov %s4084_s17 }
 0x1c0   : > { %s4868_s17 = smov %s4207_s26  ;;  %s4869_s18 = smov %s4092_s19 }
 0x1c1   : > { %s4870_s19 = smov %s4872_s7  ;;  %18 = sbr.rel (!%p16_p2) target bundleno = 5 (0x5), region = 92 }
 0x1c6   :  { %2477 = vsyncpa [#allocation3], 1 }
 0x1c7   :  { %2479 = vsyncpa [#allocation3 + $0x1], 1 }
 0x1c8   :  { %2480 = vsyncpa [#allocation5], 1 }

// kernel: _lambda_.16
= control target key start
LH: loop header
LB: loop body
LE: loop exit
PB: predicated region body
PF: predicated region fallthrough
CT: control target
= control target key end

     0   :  { %10 = vsyncpa [#allocation3], 0  ;;  %s2200_s0 = inlined_call_operand.vmem [shape: bf16[4,32,1024], index: 0, kind: input, shape index: {}]   ;;  %s2201_s1 = inlined_call_operand.hbm [shape: bf16[4,1024,128], index: 1, kind: input, shape index: {}]   ;;  %s2202_s2 = inlined_call_operand.hbm [shape: f32[1,128], index: 2, kind: input, shape index: {}]   ;;  %s2203_s3 = inlined_call_operand.vmem [shape: bf16[4,32,128], index: 3, kind: output, shape index: {0}]   ;;  %s2204_s4 = inlined_call_operand.vmem [shape: f32[4,2,128], index: 4, kind: output, shape index: {1}]  }
   0x1   :  { %12 = vsyncpa [#allocation3 + $0x1], 0 }
   0x2   :  { %13 = vsyncpa [#allocation5], 0  ;;  %s1970_s15 = smov 0   ;;  %s1972_s16 = smov 0  }
   0x3   :  { %s1974_s17 = smov 0   ;;  %s1976_s18 = smov 0  }
   0x4   :  { %s1978_s19 = smov 0   ;;  %s1980_s20 = smov 0  }
   0x5 LB: > { %s1325_s21 = sadd.s32 4294967295, %s1940_s20   ;;  %s75_s22 = sadd.s32 1, %s1928_s17  ;;  %s1940_s20 = sphi %s1980_s20, %s19_s20   ;;  %s1936_s19 = sphi %s1978_s19, %s2214_s19   ;;  %s1932_s18 = sphi %s1976_s18, %s2213_s18   ;;  %s1928_s17 = sphi %s1974_s17, %s2212_s17   ;;  %s1924_s16 = sphi %s1972_s16, %s2211_s16   ;;  %s1920_s15 = sphi %s1970_s15, %s2210_s15  }
   0x6   : > { %p82_p0 = scmp.ne.s32.totalorder %s1928_s17, %s1924_s16  ;;  %p83_p1 = scmp.eq.s32.totalorder %s1940_s20, 0 }
   0x7   : > { %p88_p2 = scmp.ne.s32.totalorder %s1924_s16, %s1920_s15  ;;  %p2004_p3 = scmp.eq.s32.totalorder %s1325_s21, 0 }
   0x8   : > { %p2008_p4 = por %p83_p1, %p82_p0  ;;  %p1327_p5 = scmp.ge.s32.totalorder %s1940_s20, 1 }
   0x9   : > { %p2015_p6 = por %p2004_p3, %p88_p2  ;;  %p185_p7 = scmp.lt.s32.totalorder %s1940_s20, 5 }
   0xa   : > { %s198_s28 = sshll.u32 %s2202_s2, 4  ;;  %s1942_s30 = smov [#allocation4]   ;;  %s199_s28 = int_to_ptr.hbm [resolvable:$true] %s198_s28 }
   0xb   : > { %p2023_p8 = pnand %p1327_p5, %p185_p7  ;;  %s200_s5 = sshll.u32 %s1942_s30, 4  ;;  %s201_s5 = int_to_ptr.vmem [resolvable:$true] %s200_s5 }
   0xc   : > { %p1772_p10 = scmp.lt.s32.totalorder %s1940_s20, 4  ;;  %s38_s7 = sadd.s32 1, %s1936_s19 }
   0xd   : > { %p1763_p9 = pneg %p2023_p8  ;;  %p40_p13 = scmp.ge.s32.totalorder %s38_s7, 4 }
   0xe   : > { %p2034_p12 = pnand %p1772_p10, %p2008_p4  ;;  %s225_s8 = sand.u32 1, %s1928_s17  }
   0xf   : > { %p1764_p11 = pnand %p1763_p9, %p2004_p3  ;;  %s1663_s9 = sshll.u32 %s1936_s19, 9 }
  0x10   : > { %s2216_s7 = smov (%p40_p13, %s38_s7), 0  ;;  %s1330_s10 = sshll.u32 %s225_s8, 9 }
  0x11   : > { %1766 = dma.hbm_to_vmem [thread:$0]  (!%p1764_p11), %s199_s28, 16, %s201_s5, [#allocation5]  }
  0x12   : > { %s70_s11 = ssub.s32 %s1936_s19, %s2216_s7  ;;  %s235_s14 = scalar_lea.hbm %s2201_s1, %s1663_s9 }
  0x13   : > { %p73_p0 = scmp.eq.s32.totalorder %s70_s11, 0  ;;  %s236_s15 = sshll.u32 %s235_s14, 4  ;;  %s237_s15 = int_to_ptr.hbm [resolvable:$true] %s236_s15 }
  0x14   : > { %s229_s21 = scalar_lea.vmem [#allocation2], %s1330_s10  ;;  %s226_s27 = scalar_lea.sflag [#allocation3], %s225_s8 }
  0x15   : > { %s238_s24 = sshll.u32 %s229_s21, 4  ;;  %s1943_s28 = smov 64   ;;  %s239_s24 = int_to_ptr.vmem [resolvable:$true] %s238_s24 }
  0x16   : > { %s2051_s26 = scalar_select %p73_p0, %s1928_s17, %s75_s22  }
  0x17   : > { %s1944_s30 = smov 4   ;;  %250 = sbr.rel (%p2023_p8) target bundleno = 275 (0x113), region = 32 }
  0x18   : > { %1770 = dma.hbm_to_vmem [thread:$0]  (!%p2034_p12), %s237_s15, 8192, %s239_s24, %s226_s27, %s1943_s28, %s1943_s28, %s1944_s30  }
  0x19   : > { %s252_s5 = sand.u32 (!%p2023_p8), 1, %s1924_s16  }
  0x1a   : > { %s1334_s9 = sshll.u32 (!%p2023_p8), %s252_s5, 9  ;;  %s253_s11 = scalar_lea.sflag (!%p2023_p8), [#allocation3], %s252_s5 }
  0x1b   : > { %s2058_s10 = scalar_lea.vmem (!%p2023_p8), [#allocation2], %s1334_s9 }
  0x1c   : > { %1911 = dma.done.wait (%p2015_p6), %s253_s11, 8192  }
  0x1d   : > { %1913 = vsyncadd (%p2015_p6), %s253_s11, 4294959104 }
  0x1e   : > { %1915 = dma.done.wait (%p2004_p3), [#allocation5], 16  }
  0x1f   : > { %1917 = vsyncadd (%p2004_p3), [#allocation5], 4294967280  ;;  %v1689_v0 = vld [vmem:[%s2058_s10 + $0x38] sm:$0xff]  ;;  %v1688_v4 = vld [vmem:[%s2058_s10 + $0x30] sm:$0xff]  ;;  %p313_p1 = scmp.lt.s32.totalorder %s1932_s18, 3  ;;  %vm1139_vm0 = vcmask 1040384  }
  0x20   : > { %v1697_v1 = vld [vmem:[%s2058_s10 + $0x78] sm:$0xff]  ;;  %957 = vmatpush.bf16.msra.mxu0 %v1689_v0  ;;  %v1696_v5 = vld [vmem:[%s2058_s10 + $0x70] sm:$0xff]  ;;  %v1687_v8 = vld [vmem:[%s2058_s10 + $0x28] sm:$0xff] }
  0x21   : > { %v1705_v2 = vld [vmem:[%s2058_s10 + $0xb8] sm:$0xff]  ;;  %976 = vmatpush.bf16.msra.mxu1 %v1697_v1  ;;  %v1704_v6 = vld [vmem:[%s2058_s10 + $0xb0] sm:$0xff]  ;;  %v1695_v9 = vld [vmem:[%s2058_s10 + $0x68] sm:$0xff]  ;;  %s2218_s18 = smov (!%p313_p1, %s1932_s18), 3 }
  0x22   : > { %v1713_v3 = vld [vmem:[%s2058_s10 + $0xf8] sm:$0xff]  ;;  %995 = vmatpush.bf16.msra.mxu2 %v1705_v2  ;;  %v1712_v7 = vld [vmem:[%s2058_s10 + $0xf0] sm:$0xff]  ;;  %v1703_v10 = vld [vmem:[%s2058_s10 + $0xa8] sm:$0xff]  ;;  %s1664_s22 = sshll.u32 %s2218_s18, 7  ;;  %s1665_s6 = sshll.u32 %s2218_s18, 4 }
  0x23   : > { %1014 = vmatpush.bf16.msra.mxu3 %v1713_v3  ;;  %v1711_v11 = vld [vmem:[%s2058_s10 + $0xe8] sm:$0xff]  ;;  %v1686_v12 = vld [vmem:[%s2058_s10 + $0x20] sm:$0xff]  ;;  %v1685_v16 = vld [vmem:[%s2058_s10 + $0x18] sm:$0xff]  ;;  %s2102_s29 = scalar_lea.vmem %s2200_s0, %s1664_s22  ;;  %s334_s13 = scalar_lea.vmem %s2203_s3, %s1665_s6 }
  0x24   : > { %958 = vmatpush.bf16.msra.mxu0 %v1688_v4  ;;  %v1694_v13 = vld [vmem:[%s2058_s10 + $0x60] sm:$0xff]  ;;  %v1693_v17 = vld [vmem:[%s2058_s10 + $0x58] sm:$0xff]  ;;  %v1684_v20 = vld [vmem:[%s2058_s10 + $0x10] sm:$0xff]  ;;  %s1340_s14 = sshll.u32 %s2218_s18, 1 }
  0x25   : > { %977 = vmatpush.bf16.msra.mxu1 %v1696_v5  ;;  %v1702_v14 = vld [vmem:[%s2058_s10 + $0xa0] sm:$0xff]  ;;  %v1701_v18 = vld [vmem:[%s2058_s10 + $0x98] sm:$0xff]  ;;  %v1692_v21 = vld [vmem:[%s2058_s10 + $0x50] sm:$0xff]  ;;  %s343_s24 = scalar_lea.vmem %s2204_s4, %s1340_s14 }
  0x26   : > { %996 = vmatpush.bf16.msra.mxu2 %v1704_v6  ;;  %v1710_v15 = vld [vmem:[%s2058_s10 + $0xe0] sm:$0xff]  ;;  %v1709_v19 = vld [vmem:[%s2058_s10 + $0xd8] sm:$0xff]  ;;  %v1700_v22 = vld [vmem:[%s2058_s10 + $0x90] sm:$0xff] }
  0x27   : > { %1015 = vmatpush.bf16.msra.mxu3 %v1712_v7  ;;  %v1708_v23 = vld [vmem:[%s2058_s10 + $0xd0] sm:$0xff]  ;;  %v1683_v24 = vld [vmem:[%s2058_s10 + $0x8] sm:$0xff]  ;;  %v1682_v28 = vld [vmem:[%s2058_s10] sm:$0xff] }
  0x28   : > { %959 = vmatpush.bf16.msra.mxu0 %v1687_v8  ;;  %v1691_v25 = vld [vmem:[%s2058_s10 + $0x48] sm:$0xff]  ;;  %v1690_v29 = vld [vmem:[%s2058_s10 + $0x40] sm:$0xff]  ;;  %v1737_v40 = vld [vmem:[%s2058_s10 + $0x1b8] sm:$0xff] }
  0x29   : > { %978 = vmatpush.bf16.msra.mxu1 %v1695_v9  ;;  %v1699_v26 = vld [vmem:[%s2058_s10 + $0x88] sm:$0xff]  ;;  %v1698_v30 = vld [vmem:[%s2058_s10 + $0x80] sm:$0xff]  ;;  %v1721_v41 = vld [vmem:[%s2058_s10 + $0x138] sm:$0xff] }
  0x2a   : > { %997 = vmatpush.bf16.msra.mxu2 %v1703_v10  ;;  %v1707_v27 = vld [vmem:[%s2058_s10 + $0xc8] sm:$0xff]  ;;  %v1706_v31 = vld [vmem:[%s2058_s10 + $0xc0] sm:$0xff]  ;;  %v1729_v46 = vld [vmem:[%s2058_s10 + $0x178] sm:$0xff] }
  0x2b   : > { %1016 = vmatpush.bf16.msra.mxu3 %v1711_v11  ;;  %v1343_v32 = vld [vmem:[%s2102_s29] sm:$0xf]  ;;  %v1666_v34 = vld [vmem:[%s2102_s29 + $0x4] sm:$0xf]  ;;  %v1351_v36 = vld [vmem:[%s2102_s29 + $0x8] sm:$0xf] }
  0x2c   : > { %960 = vmatpush.bf16.msra.mxu0 %v1686_v12  ;;  %v1670_v33 = vld [vmem:[%s2102_s29 + $0x1c] sm:$0xf0]  ;;  %v1345_v35 = vld [vmem:[%s2102_s29 + $0x20] sm:$0xf0]  ;;  %v1671_v37 = vld [vmem:[%s2102_s29 + $0x24] sm:$0xf0] }
  0x2d   : > { %979 = vmatpush.bf16.msra.mxu1 %v1694_v13  ;;  %v1667_v38 = vld [vmem:[%s2102_s29 + $0xc] sm:$0xf]  ;;  %v1344_v42 = vor.u32 %v1670_v33, %v1343_v32  ;;  %v1348_v43 = vor.u32 %v1666_v34, %v1345_v35  ;;  %v1352_v44 = vor.u32 %v1671_v37, %v1351_v36  ;;  %v1745_v47 = vld [vmem:[%s2058_s10 + $0x1f8] sm:$0xff]  ;;  %v1736_v48 = vld [vmem:[%s2058_s10 + $0x1b0] sm:$0xff] }
  0x2e   : > { %998 = vmatpush.bf16.msra.mxu2 %v1702_v14  ;;  %v1353_v39 = vld [vmem:[%s2102_s29 + $0x28] sm:$0xf0]  ;;  %v1720_v49 = vld [vmem:[%s2058_s10 + $0x130] sm:$0xff]  ;;  %v1734_v56 = vld [vmem:[%s2058_s10 + $0x1a0] sm:$0xff] }
  0x2f   : > { %1017 = vmatpush.bf16.msra.mxu3 %v1710_v15  ;;  %v1356_v45 = vor.u32 %v1667_v38, %v1353_v39  ;;  %v1728_v50 = vld [vmem:[%s2058_s10 + $0x170] sm:$0xff]  ;;  %v1735_v52 = vld [vmem:[%s2058_s10 + $0x1a8] sm:$0xff]  ;;  %v1718_v57 = vld [vmem:[%s2058_s10 + $0x120] sm:$0xff] }
  0x30   : > { %961 = vmatpush.bf16.msra.mxu0 %v1685_v16  ;;  %v1744_v51 = vld [vmem:[%s2058_s10 + $0x1f0] sm:$0xff]  ;;  %v1719_v53 = vld [vmem:[%s2058_s10 + $0x128] sm:$0xff]  ;;  %v1726_v58 = vld [vmem:[%s2058_s10 + $0x160] sm:$0xff] }
  0x31   : > { %980 = vmatpush.bf16.msra.mxu1 %v1693_v17  ;;  %v1727_v54 = vld [vmem:[%s2058_s10 + $0x168] sm:$0xff]  ;;  %v1742_v59 = vld [vmem:[%s2058_s10 + $0x1e0] sm:$0xff]  ;;  %v1733_v4 = vld [vmem:[%s2058_s10 + $0x198] sm:$0xff] }
  0x32   : > { %999 = vmatpush.bf16.msra.mxu2 %v1701_v18  ;;  %v1743_v55 = vld [vmem:[%s2058_s10 + $0x1e8] sm:$0xff]  ;;  %v1375_v60 = vld [vmem:[%s2102_s29 + $0x40] sm:$0xf]  ;;  %v1674_v62 = vld [vmem:[%s2102_s29 + $0x44] sm:$0xf] }
  0x33   : > { %1018 = vmatpush.bf16.msra.mxu3 %v1709_v19  ;;  %v1678_v61 = vld [vmem:[%s2102_s29 + $0x5c] sm:$0xf0]  ;;  %v1377_v63 = vld [vmem:[%s2102_s29 + $0x60] sm:$0xf0]  ;;  %v1383_v0 = vld [vmem:[%s2102_s29 + $0x48] sm:$0xf] }
  0x34   : > { %962 = vmatpush.bf16.msra.mxu0 %v1684_v20  ;;  %v1679_v1 = vld [vmem:[%s2102_s29 + $0x64] sm:$0xf0]  ;;  %v1675_v2 = vld [vmem:[%s2102_s29 + $0x4c] sm:$0xf]  ;;  %v1717_v5 = vld [vmem:[%s2058_s10 + $0x118] sm:$0xff]  ;;  %v1376_v6 = vor.u32 %v1678_v61, %v1375_v60  ;;  %v1380_v7 = vor.u32 %v1674_v62, %v1377_v63 }
  0x35   : > { %981 = vmatpush.bf16.msra.mxu1 %v1692_v21  ;;  %v1385_v3 = vld [vmem:[%s2102_s29 + $0x68] sm:$0xf0]  ;;  %v1384_v8 = vor.u32 %v1679_v1, %v1383_v0  ;;  %v1725_v10 = vld [vmem:[%s2058_s10 + $0x158] sm:$0xff]  ;;  %v1732_v12 = vld [vmem:[%s2058_s10 + $0x190] sm:$0xff] }
  0x36   : > { %1000 = vmatpush.bf16.msra.mxu2 %v1700_v22  ;;  %v1388_v9 = vor.u32 %v1675_v2, %v1385_v3  ;;  %v1741_v11 = vld [vmem:[%s2058_s10 + $0x1d8] sm:$0xff]  ;;  %v1716_v13 = vld [vmem:[%s2058_s10 + $0x110] sm:$0xff]  ;;  %v1731_v16 = vld [vmem:[%s2058_s10 + $0x188] sm:$0xff] }
  0x37   : > { %1019 = vmatpush.bf16.msra.mxu3 %v1708_v23  ;;  %v1724_v14 = vld [vmem:[%s2058_s10 + $0x150] sm:$0xff]  ;;  %v1715_v17 = vld [vmem:[%s2058_s10 + $0x108] sm:$0xff]  ;;  %v1730_v20 = vld [vmem:[%s2058_s10 + $0x180] sm:$0xff] }
  0x38   : > { %963 = vmatpush.bf16.msra.mxu0 %v1683_v24  ;;  %v1740_v15 = vld [vmem:[%s2058_s10 + $0x1d0] sm:$0xff]  ;;  %v1723_v18 = vld [vmem:[%s2058_s10 + $0x148] sm:$0xff]  ;;  %v1714_v21 = vld [vmem:[%s2058_s10 + $0x100] sm:$0xff] }
  0x39   : > { %982 = vmatpush.bf16.msra.mxu1 %v1691_v25  ;;  %v1739_v19 = vld [vmem:[%s2058_s10 + $0x1c8] sm:$0xff]  ;;  %v1722_v22 = vld [vmem:[%s2058_s10 + $0x140] sm:$0xff]  ;;  %v1359_v24 = vld [vmem:[%s2102_s29 + $0x10] sm:$0xf] }
  0x3a   : > { %1001 = vmatpush.bf16.msra.mxu2 %v1699_v26  ;;  %v1738_v23 = vld [vmem:[%s2058_s10 + $0x1c0] sm:$0xff]  ;;  %v1672_v25 = vld [vmem:[%s2102_s29 + $0x2c] sm:$0xf0]  ;;  %v1668_v26 = vld [vmem:[%s2102_s29 + $0x14] sm:$0xf] }
  0x3b   : > { %1020 = vmatpush.bf16.msra.mxu3 %v1707_v27  ;;  %v1361_v27 = vld [vmem:[%s2102_s29 + $0x30] sm:$0xf0]  ;;  %v1360_v32 = vor.u32 %v1672_v25, %v1359_v24  ;;  %v1391_v36 = vld [vmem:[%s2102_s29 + $0x50] sm:$0xf] }
  0x3c   : > { %964 = vmatpush.bf16.msra.mxu0 %v1682_v28  ;;  %v1367_v28 = vld [vmem:[%s2102_s29 + $0x18] sm:$0xf]  ;;  %v1364_v33 = vor.u32 %v1668_v26, %v1361_v27  ;;  %v1680_v37 = vld [vmem:[%s2102_s29 + $0x6c] sm:$0xf0]  ;;  %v1676_v38 = vld [vmem:[%s2102_s29 + $0x54] sm:$0xf] }
  0x3d   : > { %983 = vmatpush.bf16.msra.mxu1 %v1690_v29  ;;  %v1673_v29 = vld [vmem:[%s2102_s29 + $0x34] sm:$0xf0]  ;;  %v1393_v39 = vld [vmem:[%s2102_s29 + $0x70] sm:$0xf0] }
  0x3e   : > { %1002 = vmatpush.bf16.msra.mxu2 %v1698_v30  ;;  %v1669_v30 = vld [vmem:[%s2102_s29 + $0x1c] sm:$0xf]  ;;  %v1368_v34 = vor.u32 %v1673_v29, %v1367_v28 }
  0x3f   : > { %1021 = vmatpush.bf16.msra.mxu3 %v1706_v31  ;;  %965 = vmatmul.bf16.vlgmr.msra.gmra.mxu0 %v1344_v42  ;;  %v1369_v31 = vld [vmem:[%s2102_s29 + $0x38] sm:$0xf0] }
  0x40   : > { %1033 = vmatpush.bf16.msrb.mxu0 %v1721_v41  ;;  %984 = vmatmul.bf16.vlgmr.msra.gmra.mxu1 %v1348_v43  ;;  %v1372_v35 = vor.u32 %v1669_v30, %v1369_v31  ;;  %v1681_v41 = vld [vmem:[%s2102_s29 + $0x74] sm:$0xf0]  ;;  %v1677_v42 = vld [vmem:[%s2102_s29 + $0x5c] sm:$0xf] }
  0x41   : > { %1003 = vmatmul.bf16.vlgmr.msra.gmra.mxu2 %v1352_v44  ;;  %1052 = vmatpush.bf16.msrb.mxu1 %v1729_v46  ;;  %v1401_v43 = vld [vmem:[%s2102_s29 + $0x78] sm:$0xf0]  ;;  %v1392_v44 = vor.u32 %v1680_v37, %v1391_v36 }
  0x42   : > { %1071 = vmatpush.bf16.msrb.mxu2 %v1737_v40  ;;  %1022 = vmatmul.bf16.vlgmr.msra.gmra.mxu3 %v1356_v45  ;;  %v1399_v40 = vld [vmem:[%s2102_s29 + $0x58] sm:$0xf]  ;;  %v1396_v45 = vor.u32 %v1676_v38, %v1393_v39 }
  0x43   : > { %1090 = vmatpush.bf16.msrb.mxu3 %v1745_v47  ;;  %v1400_v46 = vor.u32 %v1681_v41, %v1399_v40  ;;  %v1404_v47 = vor.u32 %v1677_v42, %v1401_v43 }
  0x44   : > { %1034 = vmatpush.bf16.msrb.mxu0 %v1720_v49 }
  0x45   : > { %1053 = vmatpush.bf16.msrb.mxu1 %v1728_v50 }
  0x46   : > { %1072 = vmatpush.bf16.msrb.mxu2 %v1736_v48 }
  0x47   : > { %1091 = vmatpush.bf16.msrb.mxu3 %v1744_v51 }
  0x48   : > { %1035 = vmatpush.bf16.msrb.mxu0 %v1719_v53 }
  0x49   : > { %1054 = vmatpush.bf16.msrb.mxu1 %v1727_v54 }
  0x4a   : > { %1073 = vmatpush.bf16.msrb.mxu2 %v1735_v52 }
  0x4b   : > { %1092 = vmatpush.bf16.msrb.mxu3 %v1743_v55 }
  0x4c   : > { %1036 = vmatpush.bf16.msrb.mxu0 %v1718_v57 }
  0x4d   : > { %1055 = vmatpush.bf16.msrb.mxu1 %v1726_v58  ;;  %v1825_v58 = vld [vmem:[#allocation4] ss:$0 sm:$0xff] }
  0x4e   : > { %1074 = vmatpush.bf16.msrb.mxu2 %v1734_v56 }
  0x4f   : > { %1093 = vmatpush.bf16.msrb.mxu3 %v1742_v59  ;;  %970 = vmatmul.bf16.gmra.mxu0 %v1376_v6 }
  0x50   : > { %1037 = vmatpush.bf16.msrb.mxu0 %v1717_v5  ;;  %989 = vmatmul.bf16.gmra.mxu1 %v1380_v7 }
  0x51   : > { %1008 = vmatmul.bf16.gmra.mxu2 %v1384_v8  ;;  %1056 = vmatpush.bf16.msrb.mxu1 %v1725_v10 }
  0x52   : > { %1075 = vmatpush.bf16.msrb.mxu2 %v1733_v4  ;;  %1027 = vmatmul.bf16.gmra.mxu3 %v1388_v9 }
  0x53   : > { %1094 = vmatpush.bf16.msrb.mxu3 %v1741_v11 }
  0x54   : > { %1038 = vmatpush.bf16.msrb.mxu0 %v1716_v13 }
  0x55   : > { %1057 = vmatpush.bf16.msrb.mxu1 %v1724_v14 }
  0x56   : > { %1076 = vmatpush.bf16.msrb.mxu2 %v1732_v12 }
  0x57   : > { %1095 = vmatpush.bf16.msrb.mxu3 %v1740_v15 }
  0x58   : > { %1039 = vmatpush.bf16.msrb.mxu0 %v1715_v17 }
  0x59   : > { %1058 = vmatpush.bf16.msrb.mxu1 %v1723_v18 }
  0x5a   : > { %1077 = vmatpush.bf16.msrb.mxu2 %v1731_v16 }
  0x5b   : > { %1096 = vmatpush.bf16.msrb.mxu3 %v1739_v19 }
  0x5c   : > { %1040 = vmatpush.bf16.msrb.mxu0 %v1714_v21 }
  0x5d   : > { %1059 = vmatpush.bf16.msrb.mxu1 %v1722_v22 }
  0x5e   : > { %1078 = vmatpush.bf16.msrb.mxu2 %v1730_v20 }
  0x5f   : > { %1097 = vmatpush.bf16.msrb.mxu3 %v1738_v23  ;;  %1041 = vmatmul.bf16.vlgmr.msrb.gmra.mxu0 %v1360_v32 }
  0x60   : > { %1060 = vmatmul.bf16.vlgmr.msrb.gmra.mxu1 %v1364_v33 }
  0x61   : > { %1079 = vmatmul.bf16.vlgmr.msrb.gmra.mxu2 %v1368_v34 }
  0x62   : > { %1098 = vmatmul.bf16.vlgmr.msrb.gmra.mxu3 %v1372_v35 }
  0x6f   : > { %1046 = vmatmul.bf16.gmra.mxu0 %v1392_v44 }
  0x70   : > { %1065 = vmatmul.bf16.gmra.mxu1 %v1396_v45 }
  0x71   : > { %1084 = vmatmul.bf16.gmra.mxu2 %v1400_v46 }
  0x72   : > { %1103 = vmatmul.bf16.gmra.mxu3 %v1404_v47 }
  0xbc   : > { %v966_v48 = vpop.f32.mrf.mxu0 }
  0xbd   : > { %v985_v49 = vpop.f32.mrf.mxu1  ;;  %v967_v63 = vadd.f32 %v1825_v58, %v966_v48 }
  0xbf   : > { %v986_v0 = vadd.f32 %v985_v49, %v967_v63 }
  0xc4   : > { %v1004_v50 = vpop.f32.mrf.mxu2  ;;  %v968_v52 = vpop.f32.mrf.mxu0 }
  0xc5   : > { %v1023_v51 = vpop.f32.mrf.mxu3  ;;  %v987_v53 = vpop.f32.mrf.mxu1  ;;  %v969_v1 = vadd.f32 %v1825_v58, %v968_v52  ;;  %v1005_v6 = vadd.f32 %v1004_v50, %v986_v0 }
  0xc7   : > { %v988_v7 = vadd.f32 %v987_v53, %v969_v1  ;;  %v1024_v10 = vadd.f32 %v1023_v51, %v1005_v6 }
  0xcc   : > { %v1006_v54 = vpop.f32.mrf.mxu2  ;;  %v971_v56 = vpop.f32.mrf.mxu0 }
  0xcd   : > { %v1025_v55 = vpop.f32.mrf.mxu3  ;;  %v990_v57 = vpop.f32.mrf.mxu1  ;;  %v1007_v8 = vadd.f32 %v1006_v54, %v988_v7  ;;  %v972_v9 = vadd.f32 %v1825_v58, %v971_v56 }
  0xcf   : > { %v1026_v12 = vadd.f32 %v1025_v55, %v1007_v8  ;;  %v991_v13 = vadd.f32 %v990_v57, %v972_v9 }
  0xd4   : > { %v1009_v59 = vpop.f32.mrf.mxu2  ;;  %v973_v61 = vpop.f32.mrf.mxu0 }
  0xd5   : > { %v1028_v60 = vpop.f32.mrf.mxu3  ;;  %v992_v62 = vpop.f32.mrf.mxu1  ;;  %v1010_v19 = vadd.f32 %v1009_v59, %v991_v13  ;;  %v974_v21 = vadd.f32 %v1825_v58, %v973_v61 }
  0xd7   : > { %v1029_v25 = vadd.f32 %v1028_v60, %v1010_v19  ;;  %v993_v29 = vadd.f32 %v992_v62, %v974_v21 }
  0xdc   : > { %v1011_v2 = vpop.f32.mrf.mxu2  ;;  %v1042_v4 = vpop.f32.mrf.mxu0 }
  0xdd   : > { %v1030_v3 = vpop.f32.mrf.mxu3  ;;  %v1061_v5 = vpop.f32.mrf.mxu1  ;;  %v1043_v14 = vadd.f32 %v1042_v4, %v1024_v10  ;;  %v1012_v34 = vadd.f32 %v1011_v2, %v993_v29 }
  0xdf   : > { %v1062_v20 = vadd.f32 %v1061_v5, %v1043_v14  ;;  %v1031_v38 = vadd.f32 %v1030_v3, %v1012_v34 }
  0xe4   : > { %v1080_v11 = vpop.f32.mrf.mxu2  ;;  %v1044_v16 = vpop.f32.mrf.mxu0 }
  0xe5   : > { %v1099_v15 = vpop.f32.mrf.mxu3  ;;  %v1063_v17 = vpop.f32.mrf.mxu1  ;;  %v1045_v18 = vadd.f32 %v1044_v16, %v1026_v12  ;;  %v1081_v22 = vadd.f32 %v1080_v11, %v1062_v20 }
  0xe7   : > { %v1064_v23 = vadd.f32 %v1063_v17, %v1045_v18  ;;  %v1100_v30 = vadd.f32 %v1099_v15, %v1081_v22 }
  0xe9   : > { %v1126_v48 = vmul.f32 %v1100_v30, %v1100_v30 }
  0xec   : > { %v1082_v24 = vpop.f32.mrf.mxu2  ;;  %v1047_v28 = vpop.f32.mrf.mxu0 }
  0xed   : > { %v1083_v26 = vadd.f32 %v1082_v24, %v1064_v23  ;;  %v1101_v27 = vpop.f32.mrf.mxu3  ;;  %v1048_v32 = vadd.f32 %v1047_v28, %v1029_v25  ;;  %v1066_v33 = vpop.f32.mrf.mxu1 }
  0xef   : > { %v1102_v31 = vadd.f32 %v1101_v27, %v1083_v26  ;;  %v1067_v36 = vadd.f32 %v1066_v33, %v1048_v32 }
  0xf1   : > { %v1749_v35 = vpack.c.bf16 %v1102_v31, %v1100_v30  ;;  %v1127_v45 = vmul.f32 %v1102_v31, %v1102_v31  ;;  %v1117_v49 = vadd.f32 %v1102_v31, %v1100_v30 }
  0xf3   : > { %1750 = vst [vmem:[%s334_s13] sm:$0xff] %v1749_v35   ;;  %v1130_v53 = vadd.f32 %v1127_v45, %v1126_v48 }
  0xf4   : > { %v1085_v37 = vpop.f32.mrf.mxu2  ;;  %v1049_v41 = vpop.f32.mrf.mxu0 }
  0xf5   : > { %v1086_v39 = vadd.f32 %v1085_v37, %v1067_v36  ;;  %v1104_v40 = vpop.f32.mrf.mxu3  ;;  %v1050_v42 = vadd.f32 %v1049_v41, %v1031_v38  ;;  %v1068_v44 = vpop.f32.mrf.mxu1 }
  0xf7   : > { %v1105_v43 = vadd.f32 %v1104_v40, %v1086_v39  ;;  %v1069_v46 = vadd.f32 %v1068_v44, %v1050_v42 }
  0xf9   : > { %v1128_v50 = vmul.f32 %v1105_v43, %v1105_v43  ;;  %v1118_v54 = vadd.f32 %v1117_v49, %v1105_v43 }
  0xfb   : > { %v1131_v56 = vadd.f32 %v1130_v53, %v1128_v50 }
  0xfc   : > { %v1087_v47 = vpop.f32.mrf.mxu2 }
  0xfd   : > { %v1088_v51 = vadd.f32 %v1087_v47, %v1069_v46  ;;  %v1106_v52 = vpop.f32.mrf.mxu3 }
  0xff   : > { %v1107_v55 = vadd.f32 %v1106_v52, %v1088_v51 }
 0x101   : > { %v1754_v57 = vpack.c.bf16 %v1107_v55, %v1105_v43  ;;  %v1119_v58 = vadd.f32 %v1118_v54, %v1107_v55  ;;  %v1129_v59 = vmul.f32 %v1107_v55, %v1107_v55 }
 0x103   : > { %1756 = vst [vmem:[%s334_s13 + $0x8] sm:$0xff] %v1754_v57   ;;  %v1120_v60 = vrot.slane %v1119_v58, 4  ;;  %v1132_v61 = vadd.f32 %v1131_v56, %v1129_v59 }
 0x105   : > { %v1121_v62 = vadd.f32 %v1120_v60, %v1119_v58  ;;  %v1133_v63 = vrot.slane %v1132_v61, 4 }
 0x107   : > { %v1122_v0 = vrot.slane %v1121_v62, 2  ;;  %v1134_v1 = vadd.f32 %v1133_v63, %v1132_v61 }
 0x109   : > { %v1123_v2 = vadd.f32 %v1122_v0, %v1121_v62  ;;  %v1135_v3 = vrot.slane %v1134_v1, 2 }
 0x10b   : > { %v1124_v4 = vrot.slane %v1123_v2, 1  ;;  %v1136_v5 = vadd.f32 %v1135_v3, %v1134_v1 }
 0x10d   : > { %v1137_v6 = vrot.slane %v1136_v5, 1  ;;  %v1125_v7 = vadd.f32 %v1124_v4, %v1123_v2 }
 0x10f   : > { %v1138_v8 = vadd.f32 %v1137_v6, %v1136_v5 }
 0x111   : > { %v1140_v9 = vsel %vm1139_vm0, %v1125_v7, %v1138_v8 }
 0x112   : > { %1141 = vst [vmem:[%s343_s24] sm:$0x3] %v1140_v9 }
 0x113 PF: > { %s19_s20 = sadd.s32 1, %s1940_s20   ;;  %s2210_s15 = smov %s1924_s16 }
 0x114   : > { %p16_p2 = scmp.ge.s32.totalorder %s19_s20, 6   ;;  %s2211_s16 = smov %s1928_s17 }
 0x115   : > { %s2212_s17 = smov %s2051_s26  ;;  %s2213_s18 = smov %s1936_s19 }
 0x116   : > { %s2214_s19 = smov %s2216_s7  ;;  %18 = sbr.rel (!%p16_p2) target bundleno = 5 (0x5), region = 92 }
 0x11b   :  { %1201 = vsyncpa [#allocation3], 1 }
 0x11c   :  { %1203 = vsyncpa [#allocation3 + $0x1], 1 }
 0x11d   :  { %1204 = vsyncpa [#allocation5], 1 }

// kernel: _lambda_.17
= control target key start
LH: loop header
LB: loop body
LE: loop exit
PB: predicated region body
PF: predicated region fallthrough
CT: control target
= control target key end

     0   :  { %s540_s12 = smov 0   ;;  %s542_s13 = smov 0   ;;  %s579_s0 = inlined_call_operand.vmem [shape: bf16[4,32,128], index: 0, kind: input, shape index: {}]   ;;  %s580_s1 = inlined_call_operand.vmem [shape: f32[1,128], index: 1, kind: input, shape index: {}]   ;;  %s581_s2 = inlined_call_operand.vmem [shape: f32[1,128], index: 2, kind: input, shape index: {}]   ;;  %s582_s3 = inlined_call_operand.vmem [shape: bf16[4,32,128], index: 3, kind: output, shape index: {}]  }
   0x1   :  { %s544_s14 = smov 0  }
   0x2 LB: > { %s32_s15 = sadd.s32 1, %s514_s13  ;;  %p441_p0 = scmp.ge.s32.totalorder %s518_s14, 1  ;;  %s518_s14 = sphi %s544_s14, %s13_s14   ;;  %s514_s13 = sphi %s542_s13, %s584_s13   ;;  %s510_s12 = sphi %s540_s12, %s583_s12  }
   0x3   : > { %p34_p1 = scmp.ge.s32.totalorder %s32_s15, 4  ;;  %p188_p2 = scmp.lt.s32.totalorder %s518_s14, 5 }
   0x5   : > { %s586_s15 = smov (%p34_p1, %s32_s15), 0  ;;  %p189_p3 = pnand %p441_p0, %p188_p2 }
   0x6   : > { %p233_p4 = scmp.lt.s32.totalorder (!%p189_p3), %s510_s12, 3 }
   0x7   : > { %192 = sbr.rel (%p189_p3) target bundleno = 29 (0x1d), region = 32 }
   0xc   : > { %s588_s12 = smov (!%p233_p4, %s510_s12), 3  ;;  %v494_v0 = vld [vmem:[%s580_s1] ss:$0 sm:$0xff] }
   0xd   : > { %s448_s16 = sshll.u32 %s588_s12, 4  ;;  %v495_v7 = vld [vmem:[%s581_s2] ss:$0 sm:$0xff] }
   0xe   : > { %s243_s19 = scalar_lea.vmem %s579_s0, %s448_s16  ;;  %s262_s26 = scalar_lea.vmem %s582_s3, %s448_s16 }
   0xf   : > { %v451_v1 = vld [vmem:[%s243_s19] sm:$0xff]   ;;  %v468_v2 = vld [vmem:[%s243_s19 + $0x8] sm:$0xff]  }
  0x10   : > { %v452_v3 = vunpack.c.l.bf16 %v451_v1  ;;  %v453_v4 = vunpack.c.h.bf16 %v451_v1  ;;  %v456_v5 = vunpack.c.l.bf16 %v468_v2  ;;  %v457_v6 = vunpack.c.h.bf16 %v468_v2 }
  0x12   : > { %v276_v8 = vmul.f32 %v494_v0, %v452_v3  ;;  %v277_v9 = vmul.f32 %v494_v0, %v453_v4  ;;  %v278_v10 = vmul.f32 %v494_v0, %v456_v5  ;;  %v279_v11 = vmul.f32 %v494_v0, %v457_v6 }
  0x14   : > { %v284_v12 = vadd.f32 %v495_v7, %v276_v8  ;;  %v285_v13 = vadd.f32 %v495_v7, %v277_v9  ;;  %v286_v14 = vadd.f32 %v495_v7, %v278_v10  ;;  %v287_v15 = vadd.f32 %v495_v7, %v279_v11 }
  0x16   : > { %vm288_vm0 = vcmp.ge.f32.partialorder %v284_v12, 0.0  ;;  %vm289_vm1 = vcmp.ge.f32.partialorder %v285_v13, 0.0  ;;  %v292_v16 = vmul.f32 0.2, %v284_v12  ;;  %v293_v17 = vmul.f32 0.2, %v285_v13 }
  0x17   : > { %vm290_vm2 = vcmp.ge.f32.partialorder %v286_v14, 0.0  ;;  %vm291_vm3 = vcmp.ge.f32.partialorder %v287_v15, 0.0  ;;  %v294_v18 = vmul.f32 0.2, %v286_v14  ;;  %v295_v19 = vmul.f32 0.2, %v287_v15 }
  0x18   : > { %v296_v20 = vsel %vm288_vm0, %v284_v12, %v292_v16  ;;  %v297_v21 = vsel %vm289_vm1, %v285_v13, %v293_v17 }
  0x19   : > { %v461_v22 = vpack.c.bf16 %v297_v21, %v296_v20  ;;  %v298_v23 = vsel %vm290_vm2, %v286_v14, %v294_v18  ;;  %v299_v24 = vsel %vm291_vm3, %v287_v15, %v295_v19 }
  0x1a   : > { %v466_v25 = vpack.c.bf16 %v299_v24, %v298_v23 }
  0x1b   : > { %462 = vst [vmem:[%s262_s26] sm:$0xff] %v461_v22  }
  0x1c   : > { %469 = vst [vmem:[%s262_s26 + $0x8] sm:$0xff] %v466_v25  }
  0x1d PF: > { %s13_s14 = sadd.s32 1, %s518_s14   ;;  %s583_s12 = smov %s514_s13 }
  0x1e   : > { %p10_p5 = scmp.ge.s32.totalorder %s13_s14, 6   ;;  %s584_s13 = smov %s586_s15 }
  0x20   :  { %12 = sbr.rel (!%p10_p5) target bundleno = 2 (0x2), region = 68 }

// kernel: _lambda_.19
= control target key start
LH: loop header
LB: loop body
LE: loop exit
PB: predicated region body
PF: predicated region fallthrough
CT: control target
= control target key end

     0   :  { %s714_s12 = smov 0   ;;  %s716_s13 = smov 0   ;;  %s817_s0 = inlined_call_operand.vmem [shape: bf16[4,128,128], index: 0, kind: input, shape index: {}]   ;;  %s818_s1 = inlined_call_operand.vmem [shape: f32[1,128], index: 1, kind: input, shape index: {}]   ;;  %s819_s2 = inlined_call_operand.vmem [shape: f32[1,128], index: 2, kind: input, shape index: {}]   ;;  %s820_s3 = inlined_call_operand.vmem [shape: bf16[4,128,128], index: 3, kind: output, shape index: {}]  }
   0x1   :  { %s718_s14 = smov 0  }
   0x2 LB: > { %s32_s15 = sadd.s32 1, %s688_s13  ;;  %p549_p0 = scmp.ge.s32.totalorder %s692_s14, 1  ;;  %s692_s14 = sphi %s718_s14, %s13_s14   ;;  %s688_s13 = sphi %s716_s13, %s822_s13   ;;  %s684_s12 = sphi %s714_s12, %s821_s12  }
   0x3   : > { %p34_p1 = scmp.ge.s32.totalorder %s32_s15, 4  ;;  %p188_p2 = scmp.lt.s32.totalorder %s692_s14, 5 }
   0x5   : > { %s824_s15 = smov (%p34_p1, %s32_s15), 0  ;;  %p189_p3 = pnand %p549_p0, %p188_p2 }
   0x6   : > { %p233_p4 = scmp.lt.s32.totalorder (!%p189_p3), %s684_s12, 3 }
   0x7   : > { %192 = sbr.rel (%p189_p3) target bundleno = 48 (0x30), region = 32 }
   0xc   : > { %s826_s12 = smov (!%p233_p4, %s684_s12), 3  ;;  %v745_v0 = vld [vmem:[%s818_s1] ss:$0 sm:$0xff] }
   0xd   : > { %s556_s16 = sshll.u32 %s826_s12, 6  ;;  %v753_v6 = vld [vmem:[%s819_s2] ss:$0 sm:$0xff] }
   0xe   : > { %s740_s19 = scalar_lea.vmem %s817_s0, %s556_s16  ;;  %s777_s26 = scalar_lea.vmem %s820_s3, %s556_s16 }
   0xf   : > { %v559_v1 = vld [vmem:[%s740_s19] sm:$0xff]   ;;  %v630_v2 = vld [vmem:[%s740_s19 + $0x8] sm:$0xff]   ;;  %v631_v3 = vld [vmem:[%s740_s19 + $0x10] sm:$0xff]  }
  0x10   : > { %v560_v4 = vunpack.c.l.bf16 %v559_v1  ;;  %v561_v5 = vunpack.c.h.bf16 %v559_v1  ;;  %v564_v7 = vunpack.c.l.bf16 %v630_v2  ;;  %v565_v8 = vunpack.c.h.bf16 %v630_v2  ;;  %v632_v9 = vld [vmem:[%s740_s19 + $0x18] sm:$0xff]   ;;  %v633_v36 = vld [vmem:[%s740_s19 + $0x20] sm:$0xff]   ;;  %v634_v41 = vld [vmem:[%s740_s19 + $0x28] sm:$0xff]  }
  0x11   : > { %v568_v10 = vunpack.c.l.bf16 %v631_v3  ;;  %v569_v11 = vunpack.c.h.bf16 %v631_v3  ;;  %v572_v12 = vunpack.c.l.bf16 %v632_v9  ;;  %v573_v13 = vunpack.c.h.bf16 %v632_v9  ;;  %v635_v52 = vld [vmem:[%s740_s19 + $0x30] sm:$0xff]   ;;  %v636_v53 = vld [vmem:[%s740_s19 + $0x38] sm:$0xff]  }
  0x12   : > { %v300_v14 = vmul.f32 %v745_v0, %v560_v4  ;;  %v301_v15 = vmul.f32 %v745_v0, %v561_v5  ;;  %v302_v16 = vmul.f32 %v745_v0, %v564_v7  ;;  %v303_v17 = vmul.f32 %v745_v0, %v565_v8 }
  0x13   : > { %v304_v18 = vmul.f32 %v745_v0, %v568_v10  ;;  %v305_v19 = vmul.f32 %v745_v0, %v569_v11  ;;  %v306_v20 = vmul.f32 %v745_v0, %v572_v12  ;;  %v307_v21 = vmul.f32 %v745_v0, %v573_v13 }
  0x14   : > { %v320_v22 = vadd.f32 %v753_v6, %v300_v14  ;;  %v321_v23 = vadd.f32 %v753_v6, %v301_v15  ;;  %v322_v24 = vadd.f32 %v753_v6, %v302_v16  ;;  %v323_v25 = vadd.f32 %v753_v6, %v303_v17 }
  0x15   : > { %v324_v26 = vadd.f32 %v753_v6, %v304_v18  ;;  %v325_v27 = vadd.f32 %v753_v6, %v305_v19  ;;  %v326_v28 = vadd.f32 %v753_v6, %v306_v20  ;;  %v327_v29 = vadd.f32 %v753_v6, %v307_v21 }
  0x16   : > { %vm336_vm0 = vcmp.ge.f32.partialorder %v320_v22, 0.0  ;;  %vm337_vm1 = vcmp.ge.f32.partialorder %v321_v23, 0.0  ;;  %v352_v30 = vmul.f32 0.2, %v320_v22  ;;  %v353_v31 = vmul.f32 0.2, %v321_v23 }
  0x17   : > { %vm338_vm2 = vcmp.ge.f32.partialorder %v322_v24, 0.0  ;;  %vm339_vm3 = vcmp.ge.f32.partialorder %v323_v25, 0.0  ;;  %v354_v32 = vmul.f32 0.2, %v322_v24  ;;  %v355_v33 = vmul.f32 0.2, %v323_v25 }
  0x18   : > { %v368_v34 = vsel %vm336_vm0, %v320_v22, %v352_v30  ;;  %v369_v35 = vsel %vm337_vm1, %v321_v23, %v353_v31  ;;  %vm340_vm4 = vcmp.ge.f32.partialorder %v324_v26, 0.0  ;;  %vm341_vm5 = vcmp.ge.f32.partialorder %v325_v27, 0.0 }
  0x19   : > { %v593_v37 = vpack.c.bf16 %v369_v35, %v368_v34  ;;  %v370_v38 = vsel %vm338_vm2, %v322_v24, %v354_v32  ;;  %v371_v39 = vsel %vm339_vm3, %v323_v25, %v355_v33  ;;  %v356_v40 = vmul.f32 0.2, %v324_v26 }
  0x1a   : > { %v598_v42 = vpack.c.bf16 %v371_v39, %v370_v38  ;;  %v357_v43 = vmul.f32 0.2, %v325_v27  ;;  %vm342_vm6 = vcmp.ge.f32.partialorder %v326_v28, 0.0  ;;  %vm343_vm7 = vcmp.ge.f32.partialorder %v327_v29, 0.0 }
  0x1b   : > { %594 = vst [vmem:[%s777_s26] sm:$0xff] %v593_v37   ;;  %v372_v44 = vsel %vm340_vm4, %v324_v26, %v356_v40  ;;  %v358_v45 = vmul.f32 0.2, %v326_v28  ;;  %v359_v46 = vmul.f32 0.2, %v327_v29  ;;  %v576_v47 = vunpack.c.l.bf16 %v633_v36 }
  0x1c   : > { %637 = vst [vmem:[%s777_s26 + $0x8] sm:$0xff] %v598_v42   ;;  %v373_v48 = vsel %vm341_vm5, %v325_v27, %v357_v43  ;;  %v577_v49 = vunpack.c.h.bf16 %v633_v36  ;;  %v580_v50 = vunpack.c.l.bf16 %v634_v41  ;;  %v581_v51 = vunpack.c.h.bf16 %v634_v41 }
  0x1d   : > { %v603_v54 = vpack.c.bf16 %v373_v48, %v372_v44  ;;  %v374_v55 = vsel %vm342_vm6, %v326_v28, %v358_v45  ;;  %v375_v56 = vsel %vm343_vm7, %v327_v29, %v359_v46  ;;  %v308_v57 = vmul.f32 %v745_v0, %v576_v47 }
  0x1e   : > { %v608_v58 = vpack.c.bf16 %v375_v56, %v374_v55  ;;  %v309_v59 = vmul.f32 %v745_v0, %v577_v49  ;;  %v310_v60 = vmul.f32 %v745_v0, %v580_v50  ;;  %v311_v61 = vmul.f32 %v745_v0, %v581_v51 }
  0x1f   : > { %638 = vst [vmem:[%s777_s26 + $0x10] sm:$0xff] %v603_v54   ;;  %v328_v62 = vadd.f32 %v753_v6, %v308_v57  ;;  %v584_v63 = vunpack.c.l.bf16 %v635_v52  ;;  %v585_v1 = vunpack.c.h.bf16 %v635_v52  ;;  %v588_v2 = vunpack.c.l.bf16 %v636_v53 }
  0x20   : > { %639 = vst [vmem:[%s777_s26 + $0x18] sm:$0xff] %v608_v58   ;;  %v329_v3 = vadd.f32 %v753_v6, %v309_v59  ;;  %v330_v4 = vadd.f32 %v753_v6, %v310_v60  ;;  %v331_v5 = vadd.f32 %v753_v6, %v311_v61  ;;  %v589_v7 = vunpack.c.h.bf16 %v636_v53 }
  0x21   : > { %vm344_vm8 = vcmp.ge.f32.partialorder %v328_v62, 0.0  ;;  %v360_v8 = vmul.f32 0.2, %v328_v62  ;;  %v312_v9 = vmul.f32 %v745_v0, %v584_v63  ;;  %v313_v10 = vmul.f32 %v745_v0, %v585_v1 }
  0x22   : > { %vm345_vm9 = vcmp.ge.f32.partialorder %v329_v3, 0.0  ;;  %v361_v11 = vmul.f32 0.2, %v329_v3  ;;  %vm346_vm10 = vcmp.ge.f32.partialorder %v330_v4, 0.0  ;;  %vm347_vm11 = vcmp.ge.f32.partialorder %v331_v5, 0.0 }
  0x23   : > { %v376_v12 = vsel %vm344_vm8, %v328_v62, %v360_v8  ;;  %v362_v13 = vmul.f32 0.2, %v330_v4  ;;  %v363_v14 = vmul.f32 0.2, %v331_v5  ;;  %v332_v15 = vadd.f32 %v753_v6, %v312_v9 }
  0x24   : > { %v377_v16 = vsel %vm345_vm9, %v329_v3, %v361_v11  ;;  %v333_v17 = vadd.f32 %v753_v6, %v313_v10  ;;  %v314_v18 = vmul.f32 %v745_v0, %v588_v2  ;;  %v315_v19 = vmul.f32 %v745_v0, %v589_v7 }
  0x25   : > { %v613_v20 = vpack.c.bf16 %v377_v16, %v376_v12  ;;  %v378_v21 = vsel %vm346_vm10, %v330_v4, %v362_v13  ;;  %v379_v22 = vsel %vm347_vm11, %v331_v5, %v363_v14  ;;  %vm348_vm12 = vcmp.ge.f32.partialorder %v332_v15, 0.0 }
  0x26   : > { %v618_v23 = vpack.c.bf16 %v379_v22, %v378_v21  ;;  %vm349_vm13 = vcmp.ge.f32.partialorder %v333_v17, 0.0  ;;  %v364_v24 = vmul.f32 0.2, %v332_v15  ;;  %v365_v25 = vmul.f32 0.2, %v333_v17 }
  0x27   : > { %640 = vst [vmem:[%s777_s26 + $0x20] sm:$0xff] %v613_v20   ;;  %v334_v26 = vadd.f32 %v753_v6, %v314_v18  ;;  %v335_v27 = vadd.f32 %v753_v6, %v315_v19 }
  0x28   : > { %641 = vst [vmem:[%s777_s26 + $0x28] sm:$0xff] %v618_v23   ;;  %v380_v28 = vsel %vm348_vm12, %v332_v15, %v364_v24  ;;  %v381_v29 = vsel %vm349_vm13, %v333_v17, %v365_v25 }
  0x29   : > { %v623_v30 = vpack.c.bf16 %v381_v29, %v380_v28  ;;  %vm350_vm14 = vcmp.ge.f32.partialorder %v334_v26, 0.0  ;;  %vm351_vm15 = vcmp.ge.f32.partialorder %v335_v27, 0.0  ;;  %v366_v0 = vmul.f32 0.2, %v334_v26 }
  0x2a   : > { %v367_v31 = vmul.f32 0.2, %v335_v27 }
  0x2b   : > { %642 = vst [vmem:[%s777_s26 + $0x30] sm:$0xff] %v623_v30   ;;  %v382_v32 = vsel %vm350_vm14, %v334_v26, %v366_v0 }
  0x2c   : > { %v383_v33 = vsel %vm351_vm15, %v335_v27, %v367_v31 }
  0x2d   : > { %v628_v34 = vpack.c.bf16 %v383_v33, %v382_v32 }
  0x2f   : > { %643 = vst [vmem:[%s777_s26 + $0x38] sm:$0xff] %v628_v34  }
  0x30 PF: > { %s13_s14 = sadd.s32 1, %s692_s14   ;;  %s821_s12 = smov %s688_s13 }
  0x31   : > { %p10_p5 = scmp.ge.s32.totalorder %s13_s14, 6   ;;  %s822_s13 = smov %s824_s15 }
  0x33   :  { %12 = sbr.rel (!%p10_p5) target bundleno = 2 (0x2), region = 68 }

// kernel: _lambda_.18
= control target key start
LH: loop header
LB: loop body
LE: loop exit
PB: predicated region body
PF: predicated region fallthrough
CT: control target
= control target key end

     0   :  { %s1701_s15 = smov 0   ;;  %s1703_s16 = smov 0   ;;  %s1904_s0 = inlined_call_operand.vmem [shape: bf16[4,128,512], index: 0, kind: input, shape index: {}]   ;;  %s1905_s1 = inlined_call_operand.vmem [shape: bf16[4,512,128], index: 1, kind: input, shape index: {}]   ;;  %s1906_s2 = inlined_call_operand.vmem [shape: f32[1,128], index: 2, kind: input, shape index: {}]   ;;  %s1907_s3 = inlined_call_operand.vmem [shape: bf16[4,128,128], index: 3, kind: output, shape index: {0}]   ;;  %s1908_s4 = inlined_call_operand.vmem [shape: f32[4,2,128], index: 4, kind: output, shape index: {1}]  }
   0x1   :  { %s1705_s17 = smov 0  }
   0x2 LB: > { %s34_s18 = sadd.s32 1, %s1670_s16  ;;  %p1247_p0 = scmp.ge.s32.totalorder %s1674_s17, 1  ;;  %s1674_s17 = sphi %s1705_s17, %s15_s17   ;;  %s1670_s16 = sphi %s1703_s16, %s1910_s16   ;;  %s1666_s15 = sphi %s1701_s15, %s1909_s15  }
   0x3   : > { %p36_p1 = scmp.ge.s32.totalorder %s34_s18, 4  ;;  %p223_p2 = scmp.lt.s32.totalorder %s1674_s17, 5 }
   0x5   : > { %s1912_s18 = smov (%p36_p1, %s34_s18), 0  ;;  %p224_p3 = pnand %p1247_p0, %p223_p2 }
   0x6   : > { %p281_p4 = scmp.lt.s32.totalorder (!%p224_p3), %s1666_s15, 3 }
   0x7   : > { %227 = sbr.rel (%p224_p3) target bundleno = 323 (0x143), region = 32 }
   0xc   : > { %s1914_s15 = smov (!%p281_p4, %s1666_s15), 3  ;;  %vm1062_vm0 = vcmask 1040384  }
   0xd   : > { %s1513_s19 = sshll.u32 %s1914_s15, 8  ;;  %s1515_s28 = sshll.u32 %s1914_s15, 6 }
   0xe   : > { %s1727_s22 = scalar_lea.vmem %s1905_s1, %s1513_s19  ;;  %s1760_s25 = scalar_lea.vmem %s1904_s0, %s1513_s19 }
   0xf   : > { %v1555_v0 = vld [vmem:[%s1727_s22 + $0x38] sm:$0xff]  ;;  %v1554_v4 = vld [vmem:[%s1727_s22 + $0x30] sm:$0xff]  ;;  %v1553_v8 = vld [vmem:[%s1727_s22 + $0x28] sm:$0xff]  ;;  %s1844_s5 = scalar_lea.vmem %s1907_s3, %s1515_s28  ;;  %s1254_s6 = sshll.u32 %s1914_s15, 1 }
  0x10   : > { %v1563_v1 = vld [vmem:[%s1727_s22 + $0x78] sm:$0xff]  ;;  %776 = vmatpush.bf16.msra.mxu0 %v1555_v0  ;;  %v1562_v5 = vld [vmem:[%s1727_s22 + $0x70] sm:$0xff]  ;;  %v1561_v9 = vld [vmem:[%s1727_s22 + $0x68] sm:$0xff]  ;;  %s322_s9 = scalar_lea.vmem %s1908_s4, %s1254_s6 }
  0x11   : > { %v1571_v2 = vld [vmem:[%s1727_s22 + $0xb8] sm:$0xff]  ;;  %825 = vmatpush.bf16.msra.mxu1 %v1563_v1  ;;  %v1570_v6 = vld [vmem:[%s1727_s22 + $0xb0] sm:$0xff]  ;;  %v1569_v10 = vld [vmem:[%s1727_s22 + $0xa8] sm:$0xff] }
  0x12   : > { %v1579_v3 = vld [vmem:[%s1727_s22 + $0xf8] sm:$0xff]  ;;  %874 = vmatpush.bf16.msra.mxu2 %v1571_v2  ;;  %v1578_v7 = vld [vmem:[%s1727_s22 + $0xf0] sm:$0xff]  ;;  %v1577_v11 = vld [vmem:[%s1727_s22 + $0xe8] sm:$0xff] }
  0x13   : > { %923 = vmatpush.bf16.msra.mxu3 %v1579_v3  ;;  %v1552_v12 = vld [vmem:[%s1727_s22 + $0x20] sm:$0xff]  ;;  %v1551_v16 = vld [vmem:[%s1727_s22 + $0x18] sm:$0xff]  ;;  %v1550_v20 = vld [vmem:[%s1727_s22 + $0x10] sm:$0xff] }
  0x14   : > { %777 = vmatpush.bf16.msra.mxu0 %v1554_v4  ;;  %v1560_v13 = vld [vmem:[%s1727_s22 + $0x60] sm:$0xff]  ;;  %v1559_v17 = vld [vmem:[%s1727_s22 + $0x58] sm:$0xff]  ;;  %v1558_v21 = vld [vmem:[%s1727_s22 + $0x50] sm:$0xff] }
  0x15   : > { %826 = vmatpush.bf16.msra.mxu1 %v1562_v5  ;;  %v1568_v14 = vld [vmem:[%s1727_s22 + $0xa0] sm:$0xff]  ;;  %v1567_v18 = vld [vmem:[%s1727_s22 + $0x98] sm:$0xff]  ;;  %v1566_v22 = vld [vmem:[%s1727_s22 + $0x90] sm:$0xff] }
  0x16   : > { %875 = vmatpush.bf16.msra.mxu2 %v1570_v6  ;;  %v1576_v15 = vld [vmem:[%s1727_s22 + $0xe0] sm:$0xff]  ;;  %v1575_v19 = vld [vmem:[%s1727_s22 + $0xd8] sm:$0xff]  ;;  %v1574_v23 = vld [vmem:[%s1727_s22 + $0xd0] sm:$0xff] }
  0x17   : > { %924 = vmatpush.bf16.msra.mxu3 %v1578_v7  ;;  %v1549_v24 = vld [vmem:[%s1727_s22 + $0x8] sm:$0xff]  ;;  %v1548_v28 = vld [vmem:[%s1727_s22] sm:$0xff]  ;;  %v1518_v33 = vld [vmem:[%s1760_s25 + $0xc] sm:$0xf0] }
  0x18   : > { %778 = vmatpush.bf16.msra.mxu0 %v1553_v8  ;;  %v1557_v25 = vld [vmem:[%s1727_s22 + $0x48] sm:$0xff]  ;;  %v1556_v29 = vld [vmem:[%s1727_s22 + $0x40] sm:$0xff]  ;;  %v1259_v35 = vld [vmem:[%s1760_s25 + $0x10] sm:$0xf0] }
  0x19   : > { %827 = vmatpush.bf16.msra.mxu1 %v1561_v9  ;;  %v1565_v26 = vld [vmem:[%s1727_s22 + $0x88] sm:$0xff]  ;;  %v1564_v30 = vld [vmem:[%s1727_s22 + $0x80] sm:$0xff]  ;;  %v1519_v37 = vld [vmem:[%s1760_s25 + $0x14] sm:$0xf0] }
  0x1a   : > { %876 = vmatpush.bf16.msra.mxu2 %v1569_v10  ;;  %v1573_v27 = vld [vmem:[%s1727_s22 + $0xc8] sm:$0xff]  ;;  %v1572_v31 = vld [vmem:[%s1727_s22 + $0xc0] sm:$0xff]  ;;  %v1267_v39 = vld [vmem:[%s1760_s25 + $0x18] sm:$0xf0] }
  0x1b   : > { %925 = vmatpush.bf16.msra.mxu3 %v1577_v11  ;;  %v1257_v32 = vld [vmem:[%s1760_s25] sm:$0xf]  ;;  %v1516_v34 = vld [vmem:[%s1760_s25 + $0x4] sm:$0xf]  ;;  %v1265_v36 = vld [vmem:[%s1760_s25 + $0x8] sm:$0xf] }
  0x1c   : > { %779 = vmatpush.bf16.msra.mxu0 %v1552_v12  ;;  %v1517_v38 = vld [vmem:[%s1760_s25 + $0xc] sm:$0xf]  ;;  %v1258_v40 = vor.u32 %v1518_v33, %v1257_v32  ;;  %v1262_v41 = vor.u32 %v1516_v34, %v1259_v35  ;;  %v1266_v42 = vor.u32 %v1519_v37, %v1265_v36  ;;  %v1273_v44 = vld [vmem:[%s1760_s25 + $0x20] sm:$0xf]  ;;  %v1522_v45 = vld [vmem:[%s1760_s25 + $0x2c] sm:$0xf0] }
  0x1d   : > { %828 = vmatpush.bf16.msra.mxu1 %v1560_v13  ;;  %v1270_v43 = vor.u32 %v1517_v38, %v1267_v39  ;;  %v1520_v46 = vld [vmem:[%s1760_s25 + $0x24] sm:$0xf]  ;;  %v1275_v47 = vld [vmem:[%s1760_s25 + $0x30] sm:$0xf0]  ;;  %v1281_v48 = vld [vmem:[%s1760_s25 + $0x28] sm:$0xf]  ;;  %v1274_v52 = vor.u32 %v1522_v45, %v1273_v44 }
  0x1e   : > { %877 = vmatpush.bf16.msra.mxu2 %v1568_v14  ;;  %v1523_v49 = vld [vmem:[%s1760_s25 + $0x34] sm:$0xf0]  ;;  %v1521_v50 = vld [vmem:[%s1760_s25 + $0x2c] sm:$0xf]  ;;  %v1283_v51 = vld [vmem:[%s1760_s25 + $0x38] sm:$0xf0]  ;;  %v1278_v53 = vor.u32 %v1520_v46, %v1275_v47 }
  0x1f   : > { %926 = vmatpush.bf16.msra.mxu3 %v1576_v15  ;;  %v1282_v54 = vor.u32 %v1523_v49, %v1281_v48  ;;  %v1286_v55 = vor.u32 %v1521_v50, %v1283_v51  ;;  %v1289_v56 = vld [vmem:[%s1760_s25 + $0x40] sm:$0xf]  ;;  %v1526_v57 = vld [vmem:[%s1760_s25 + $0x4c] sm:$0xf0]  ;;  %v1524_v58 = vld [vmem:[%s1760_s25 + $0x44] sm:$0xf] }
  0x20   : > { %780 = vmatpush.bf16.msra.mxu0 %v1551_v16  ;;  %v1291_v59 = vld [vmem:[%s1760_s25 + $0x50] sm:$0xf0]  ;;  %v1297_v60 = vld [vmem:[%s1760_s25 + $0x48] sm:$0xf]  ;;  %v1527_v61 = vld [vmem:[%s1760_s25 + $0x54] sm:$0xf0]  ;;  %v1290_v0 = vor.u32 %v1526_v57, %v1289_v56 }
  0x21   : > { %829 = vmatpush.bf16.msra.mxu1 %v1559_v17  ;;  %v1525_v62 = vld [vmem:[%s1760_s25 + $0x4c] sm:$0xf]  ;;  %v1299_v63 = vld [vmem:[%s1760_s25 + $0x58] sm:$0xf0]  ;;  %v1294_v1 = vor.u32 %v1524_v58, %v1291_v59  ;;  %v1298_v2 = vor.u32 %v1527_v61, %v1297_v60  ;;  %v1305_v4 = vld [vmem:[%s1760_s25 + $0x60] sm:$0xf] }
  0x22   : > { %878 = vmatpush.bf16.msra.mxu2 %v1567_v18  ;;  %v1302_v3 = vor.u32 %v1525_v62, %v1299_v63  ;;  %v1530_v5 = vld [vmem:[%s1760_s25 + $0x6c] sm:$0xf0]  ;;  %v1528_v6 = vld [vmem:[%s1760_s25 + $0x64] sm:$0xf]  ;;  %v1307_v7 = vld [vmem:[%s1760_s25 + $0x70] sm:$0xf0] }
  0x23   : > { %927 = vmatpush.bf16.msra.mxu3 %v1575_v19  ;;  %v1313_v8 = vld [vmem:[%s1760_s25 + $0x68] sm:$0xf]  ;;  %v1531_v9 = vld [vmem:[%s1760_s25 + $0x74] sm:$0xf0]  ;;  %v1529_v10 = vld [vmem:[%s1760_s25 + $0x6c] sm:$0xf]  ;;  %v1306_v12 = vor.u32 %v1530_v5, %v1305_v4  ;;  %v1310_v13 = vor.u32 %v1528_v6, %v1307_v7 }
  0x24   : > { %781 = vmatpush.bf16.msra.mxu0 %v1550_v20  ;;  %v1315_v11 = vld [vmem:[%s1760_s25 + $0x78] sm:$0xf0]  ;;  %v1314_v14 = vor.u32 %v1531_v9, %v1313_v8  ;;  %v1321_v16 = vld [vmem:[%s1760_s25 + $0x80] sm:$0xf]  ;;  %v1534_v17 = vld [vmem:[%s1760_s25 + $0x8c] sm:$0xf0] }
  0x25   : > { %830 = vmatpush.bf16.msra.mxu1 %v1558_v21  ;;  %v1318_v15 = vor.u32 %v1529_v10, %v1315_v11  ;;  %v1532_v18 = vld [vmem:[%s1760_s25 + $0x84] sm:$0xf]  ;;  %v1323_v19 = vld [vmem:[%s1760_s25 + $0x90] sm:$0xf0]  ;;  %v1329_v20 = vld [vmem:[%s1760_s25 + $0x88] sm:$0xf] }
  0x26   : > { %879 = vmatpush.bf16.msra.mxu2 %v1566_v22  ;;  %v1535_v21 = vld [vmem:[%s1760_s25 + $0x94] sm:$0xf0]  ;;  %v1533_v22 = vld [vmem:[%s1760_s25 + $0x8c] sm:$0xf]  ;;  %v1345_v32 = vld [vmem:[%s1760_s25 + $0xa8] sm:$0xf] }
  0x27   : > { %928 = vmatpush.bf16.msra.mxu3 %v1574_v23  ;;  %v1331_v23 = vld [vmem:[%s1760_s25 + $0x98] sm:$0xf0]  ;;  %v1539_v33 = vld [vmem:[%s1760_s25 + $0xb4] sm:$0xf0]  ;;  %v1537_v34 = vld [vmem:[%s1760_s25 + $0xac] sm:$0xf] }
  0x28   : > { %782 = vmatpush.bf16.msra.mxu0 %v1549_v24  ;;  %v1322_v24 = vor.u32 %v1534_v17, %v1321_v16  ;;  %v1347_v35 = vld [vmem:[%s1760_s25 + $0xb8] sm:$0xf0]  ;;  %v1346_v38 = vor.u32 %v1539_v33, %v1345_v32  ;;  %v1361_v44 = vld [vmem:[%s1760_s25 + $0xc8] sm:$0xf]  ;;  %v1543_v45 = vld [vmem:[%s1760_s25 + $0xd4] sm:$0xf0] }
  0x29   : > { %831 = vmatpush.bf16.msra.mxu1 %v1557_v25  ;;  %v1326_v25 = vor.u32 %v1532_v18, %v1323_v19  ;;  %v1350_v39 = vor.u32 %v1537_v34, %v1347_v35  ;;  %v1541_v46 = vld [vmem:[%s1760_s25 + $0xcc] sm:$0xf]  ;;  %v1363_v47 = vld [vmem:[%s1760_s25 + $0xd8] sm:$0xf0]  ;;  %v1362_v50 = vor.u32 %v1543_v45, %v1361_v44  ;;  %v1377_v56 = vld [vmem:[%s1760_s25 + $0xe8] sm:$0xf] }
  0x2a   : > { %880 = vmatpush.bf16.msra.mxu2 %v1565_v26  ;;  %v1330_v26 = vor.u32 %v1535_v21, %v1329_v20  ;;  %v1366_v51 = vor.u32 %v1541_v46, %v1363_v47  ;;  %v1547_v57 = vld [vmem:[%s1760_s25 + $0xf4] sm:$0xf0]  ;;  %v1545_v58 = vld [vmem:[%s1760_s25 + $0xec] sm:$0xf]  ;;  %v1379_v59 = vld [vmem:[%s1760_s25 + $0xf8] sm:$0xf0] }
  0x2b   : > { %929 = vmatpush.bf16.msra.mxu3 %v1573_v27  ;;  %v1334_v27 = vor.u32 %v1533_v22, %v1331_v23  ;;  %v1378_v62 = vor.u32 %v1547_v57, %v1377_v56  ;;  %v1382_v63 = vor.u32 %v1545_v58, %v1379_v59 }
  0x2c   : > { %783 = vmatpush.bf16.msra.mxu0 %v1548_v28  ;;  %v1337_v28 = vld [vmem:[%s1760_s25 + $0xa0] sm:$0xf] }
  0x2d   : > { %832 = vmatpush.bf16.msra.mxu1 %v1556_v29  ;;  %v1538_v29 = vld [vmem:[%s1760_s25 + $0xac] sm:$0xf0] }
  0x2e   : > { %881 = vmatpush.bf16.msra.mxu2 %v1564_v30  ;;  %v1536_v30 = vld [vmem:[%s1760_s25 + $0xa4] sm:$0xf]  ;;  %v1338_v36 = vor.u32 %v1538_v29, %v1337_v28 }
  0x2f   : > { %930 = vmatpush.bf16.msra.mxu3 %v1572_v31  ;;  %784 = vmatmul.bf16.vlgmr.msra.gmra.mxu0 %v1258_v40  ;;  %v1339_v31 = vld [vmem:[%s1760_s25 + $0xb0] sm:$0xf0]  ;;  %v1353_v40 = vld [vmem:[%s1760_s25 + $0xc0] sm:$0xf] }
  0x30   : > { %833 = vmatmul.bf16.vlgmr.msra.gmra.mxu1 %v1262_v41  ;;  %v1342_v37 = vor.u32 %v1536_v30, %v1339_v31  ;;  %v1542_v41 = vld [vmem:[%s1760_s25 + $0xcc] sm:$0xf0] }
  0x31   : > { %882 = vmatmul.bf16.vlgmr.msra.gmra.mxu2 %v1266_v42  ;;  %v1540_v42 = vld [vmem:[%s1760_s25 + $0xc4] sm:$0xf]  ;;  %v1354_v48 = vor.u32 %v1542_v41, %v1353_v40 }
  0x32   : > { %931 = vmatmul.bf16.vlgmr.msra.gmra.mxu3 %v1270_v43  ;;  %v1355_v43 = vld [vmem:[%s1760_s25 + $0xd0] sm:$0xf0] }
  0x33   : > { %v1358_v49 = vor.u32 %v1540_v42, %v1355_v43 }
  0x3f   : > { %789 = vmatmul.bf16.gmra.mxu0 %v1274_v52  ;;  %v1369_v52 = vld [vmem:[%s1760_s25 + $0xe0] sm:$0xf] }
  0x40   : > { %838 = vmatmul.bf16.gmra.mxu1 %v1278_v53  ;;  %v1546_v53 = vld [vmem:[%s1760_s25 + $0xec] sm:$0xf0] }
  0x41   : > { %887 = vmatmul.bf16.gmra.mxu2 %v1282_v54  ;;  %v1544_v54 = vld [vmem:[%s1760_s25 + $0xe4] sm:$0xf]  ;;  %v1370_v60 = vor.u32 %v1546_v53, %v1369_v52 }
  0x42   : > { %936 = vmatmul.bf16.gmra.mxu3 %v1286_v55  ;;  %v1371_v55 = vld [vmem:[%s1760_s25 + $0xf0] sm:$0xf0] }
  0x43   : > { %v1374_v61 = vor.u32 %v1544_v54, %v1371_v55 }
  0x4f   : > { %794 = vmatmul.bf16.gmra.mxu0 %v1290_v0  ;;  %v1835_v0 = vld [vmem:[%s1906_s2] ss:$0 sm:$0xff] }
  0x50   : > { %843 = vmatmul.bf16.gmra.mxu1 %v1294_v1 }
  0x51   : > { %892 = vmatmul.bf16.gmra.mxu2 %v1298_v2 }
  0x52   : > { %941 = vmatmul.bf16.gmra.mxu3 %v1302_v3 }
  0x5f   : > { %799 = vmatmul.bf16.gmra.mxu0 %v1306_v12 }
  0x60   : > { %848 = vmatmul.bf16.gmra.mxu1 %v1310_v13 }
  0x61   : > { %897 = vmatmul.bf16.gmra.mxu2 %v1314_v14 }
  0x62   : > { %946 = vmatmul.bf16.gmra.mxu3 %v1318_v15 }
  0x6f   : > { %804 = vmatmul.bf16.gmra.mxu0 %v1322_v24 }
  0x70   : > { %853 = vmatmul.bf16.gmra.mxu1 %v1326_v25 }
  0x71   : > { %902 = vmatmul.bf16.gmra.mxu2 %v1330_v26 }
  0x72   : > { %951 = vmatmul.bf16.gmra.mxu3 %v1334_v27 }
  0x7f   : > { %809 = vmatmul.bf16.gmra.mxu0 %v1338_v36 }
  0x80   : > { %858 = vmatmul.bf16.gmra.mxu1 %v1342_v37 }
  0x81   : > { %907 = vmatmul.bf16.gmra.mxu2 %v1346_v38 }
  0x82   : > { %956 = vmatmul.bf16.gmra.mxu3 %v1350_v39 }
  0x8f   : > { %814 = vmatmul.bf16.gmra.mxu0 %v1354_v48 }
  0x90   : > { %863 = vmatmul.bf16.gmra.mxu1 %v1358_v49 }
  0x91   : > { %912 = vmatmul.bf16.gmra.mxu2 %v1362_v50 }
  0x92   : > { %961 = vmatmul.bf16.gmra.mxu3 %v1366_v51 }
  0x9f   : > { %819 = vmatmul.bf16.gmra.mxu0 %v1370_v60 }
  0xa0   : > { %868 = vmatmul.bf16.gmra.mxu1 %v1374_v61 }
  0xa1   : > { %917 = vmatmul.bf16.gmra.mxu2 %v1378_v62 }
  0xa2   : > { %966 = vmatmul.bf16.gmra.mxu3 %v1382_v63 }
  0xac   : > { %v785_v1 = vpop.f32.mrf.mxu0 }
  0xad   : > { %v834_v2 = vpop.f32.mrf.mxu1  ;;  %v786_v3 = vadd.f32 %v1835_v0, %v785_v1 }
  0xaf   : > { %v835_v4 = vadd.f32 %v834_v2, %v786_v3 }
  0xb4   : > { %v883_v5 = vpop.f32.mrf.mxu2  ;;  %v787_v7 = vpop.f32.mrf.mxu0 }
  0xb5   : > { %v932_v6 = vpop.f32.mrf.mxu3  ;;  %v836_v8 = vpop.f32.mrf.mxu1  ;;  %v788_v9 = vadd.f32 %v1835_v0, %v787_v7  ;;  %v884_v10 = vadd.f32 %v883_v5, %v835_v4 }
  0xb7   : > { %v837_v11 = vadd.f32 %v836_v8, %v788_v9  ;;  %v933_v12 = vadd.f32 %v932_v6, %v884_v10 }
  0xb9   : > { %v1025_v20 = vmul.f32 %v933_v12, %v933_v12 }
  0xbc   : > { %v885_v13 = vpop.f32.mrf.mxu2  ;;  %v790_v16 = vpop.f32.mrf.mxu0 }
  0xbd   : > { %v934_v14 = vpop.f32.mrf.mxu3  ;;  %v886_v15 = vadd.f32 %v885_v13, %v837_v11  ;;  %v839_v17 = vpop.f32.mrf.mxu1  ;;  %v791_v18 = vadd.f32 %v1835_v0, %v790_v16 }
  0xbf   : > { %v935_v19 = vadd.f32 %v934_v14, %v886_v15  ;;  %v840_v24 = vadd.f32 %v839_v17, %v791_v18 }
  0xc1   : > { %v1583_v21 = vpack.c.bf16 %v935_v19, %v933_v12  ;;  %v1004_v22 = vadd.f32 %v935_v19, %v933_v12  ;;  %v1026_v23 = vmul.f32 %v935_v19, %v935_v19 }
  0xc3   : > { %1584 = vst [vmem:[%s1844_s5] sm:$0xff] %v1583_v21   ;;  %v1041_v25 = vadd.f32 %v1026_v23, %v1025_v20 }
  0xc4   : > { %v888_v26 = vpop.f32.mrf.mxu2  ;;  %v792_v29 = vpop.f32.mrf.mxu0 }
  0xc5   : > { %v937_v27 = vpop.f32.mrf.mxu3  ;;  %v889_v28 = vadd.f32 %v888_v26, %v840_v24  ;;  %v841_v30 = vpop.f32.mrf.mxu1  ;;  %v793_v32 = vadd.f32 %v1835_v0, %v792_v29 }
  0xc7   : > { %v938_v31 = vadd.f32 %v937_v27, %v889_v28  ;;  %v842_v36 = vadd.f32 %v841_v30, %v793_v32 }
  0xc9   : > { %v1005_v33 = vadd.f32 %v1004_v22, %v938_v31  ;;  %v1027_v34 = vmul.f32 %v938_v31, %v938_v31 }
  0xcb   : > { %v1042_v35 = vadd.f32 %v1041_v25, %v1027_v34 }
  0xcc   : > { %v890_v37 = vpop.f32.mrf.mxu2  ;;  %v795_v40 = vpop.f32.mrf.mxu0 }
  0xcd   : > { %v939_v38 = vpop.f32.mrf.mxu3  ;;  %v891_v39 = vadd.f32 %v890_v37, %v842_v36  ;;  %v844_v41 = vpop.f32.mrf.mxu1  ;;  %v796_v47 = vadd.f32 %v1835_v0, %v795_v40 }
  0xcf   : > { %v940_v42 = vadd.f32 %v939_v38, %v891_v39  ;;  %v845_v52 = vadd.f32 %v844_v41, %v796_v47 }
  0xd1   : > { %v1588_v43 = vpack.c.bf16 %v940_v42, %v938_v31  ;;  %v1848_v44 = vadd.f32 %v1005_v33, %v940_v42  ;;  %v1028_v45 = vmul.f32 %v940_v42, %v940_v42 }
  0xd3   : > { %1620 = vst [vmem:[%s1844_s5 + $0x8] sm:$0xff] %v1588_v43   ;;  %v1851_v46 = vadd.f32 %v1042_v35, %v1028_v45 }
  0xd4   : > { %v893_v48 = vpop.f32.mrf.mxu2  ;;  %v797_v50 = vpop.f32.mrf.mxu0 }
  0xd5   : > { %v942_v49 = vpop.f32.mrf.mxu3  ;;  %v846_v51 = vpop.f32.mrf.mxu1  ;;  %v798_v53 = vadd.f32 %v1835_v0, %v797_v50  ;;  %v894_v54 = vadd.f32 %v893_v48, %v845_v52 }
  0xd7   : > { %v847_v55 = vadd.f32 %v846_v51, %v798_v53  ;;  %v1855_v61 = vadd.f32 %v942_v49, %v894_v54 }
  0xdc   : > { %v895_v56 = vpop.f32.mrf.mxu2  ;;  %v800_v59 = vpop.f32.mrf.mxu0 }
  0xdd   : > { %v944_v57 = vpop.f32.mrf.mxu3  ;;  %v896_v58 = vadd.f32 %v895_v56, %v847_v55  ;;  %v849_v60 = vpop.f32.mrf.mxu1  ;;  %v801_v1 = vadd.f32 %v1835_v0, %v800_v59 }
  0xdf   : > { %v1857_v62 = vadd.f32 %v944_v57, %v896_v58  ;;  %v850_v6 = vadd.f32 %v849_v60, %v801_v1 }
  0xe1   : > { %v1593_v63 = vpack.c.bf16 %v1857_v62, %v1855_v61  ;;  %v1030_v1 = vmul.f32 %v1857_v62, %v1857_v62 }
  0xe3   : > { %1621 = vst [vmem:[%s1844_s5 + $0x10] sm:$0xff] %v1593_v63   ;;  %v1029_v63 = vmul.f32 %v1855_v61, %v1855_v61 }
  0xe4   : > { %v898_v2 = vpop.f32.mrf.mxu2  ;;  %v802_v4 = vpop.f32.mrf.mxu0 }
  0xe5   : > { %v947_v3 = vpop.f32.mrf.mxu3  ;;  %v851_v5 = vpop.f32.mrf.mxu1  ;;  %v803_v7 = vadd.f32 %v1835_v0, %v802_v4  ;;  %v899_v8 = vadd.f32 %v898_v2, %v850_v6  ;;  %v1007_v2 = vadd.f32 %v1848_v44, %v1855_v61 }
  0xe7   : > { %v852_v9 = vadd.f32 %v851_v5, %v803_v7  ;;  %v948_v15 = vadd.f32 %v947_v3, %v899_v8  ;;  %v1044_v5 = vadd.f32 %v1851_v46, %v1029_v63 }
  0xe9   : > { %v1031_v6 = vmul.f32 %v948_v15, %v948_v15 }
  0xec   : > { %v900_v10 = vpop.f32.mrf.mxu2  ;;  %v805_v13 = vpop.f32.mrf.mxu0 }
  0xed   : > { %v949_v11 = vpop.f32.mrf.mxu3  ;;  %v901_v12 = vadd.f32 %v900_v10, %v852_v9  ;;  %v854_v14 = vpop.f32.mrf.mxu1  ;;  %v806_v18 = vadd.f32 %v1835_v0, %v805_v13  ;;  %v1008_v9 = vadd.f32 %v1007_v2, %v1857_v62 }
  0xef   : > { %v1864_v16 = vadd.f32 %v949_v11, %v901_v12  ;;  %v855_v23 = vadd.f32 %v854_v14, %v806_v18  ;;  %v1045_v12 = vadd.f32 %v1044_v5, %v1030_v1  ;;  %v1009_v14 = vadd.f32 %v1008_v9, %v948_v15 }
  0xf1   : > { %v1598_v17 = vpack.c.bf16 %v1864_v16, %v948_v15  ;;  %v1046_v18 = vadd.f32 %v1045_v12, %v1031_v6  ;;  %v1010_v46 = vadd.f32 %v1009_v14, %v1864_v16 }
  0xf3   : > { %1622 = vst [vmem:[%s1844_s5 + $0x18] sm:$0xff] %v1598_v17   ;;  %v1032_v17 = vmul.f32 %v1864_v16, %v1864_v16 }
  0xf4   : > { %v903_v19 = vpop.f32.mrf.mxu2  ;;  %v807_v21 = vpop.f32.mrf.mxu0 }
  0xf5   : > { %v952_v20 = vpop.f32.mrf.mxu3  ;;  %v856_v22 = vpop.f32.mrf.mxu1  ;;  %v808_v24 = vadd.f32 %v1835_v0, %v807_v21  ;;  %v904_v25 = vadd.f32 %v903_v19, %v855_v23  ;;  %v1047_v62 = vadd.f32 %v1046_v18, %v1032_v17 }
  0xf7   : > { %v857_v26 = vadd.f32 %v856_v22, %v808_v24  ;;  %v953_v32 = vadd.f32 %v952_v20, %v904_v25 }
  0xf9   : > { %v1033_v20 = vmul.f32 %v953_v32, %v953_v32  ;;  %v1011_v23 = vadd.f32 %v1010_v46, %v953_v32 }
  0xfc   : > { %v905_v27 = vpop.f32.mrf.mxu2  ;;  %v810_v30 = vpop.f32.mrf.mxu0 }
  0xfd   : > { %v954_v28 = vpop.f32.mrf.mxu3  ;;  %v906_v29 = vadd.f32 %v905_v27, %v857_v26  ;;  %v859_v31 = vpop.f32.mrf.mxu1  ;;  %v811_v35 = vadd.f32 %v1835_v0, %v810_v30  ;;  %v1048_v27 = vadd.f32 %v1047_v62, %v1033_v20 }
  0xff   : > { %v955_v33 = vadd.f32 %v954_v28, %v906_v29  ;;  %v860_v40 = vadd.f32 %v859_v31, %v811_v35 }
 0x101   : > { %v1603_v34 = vpack.c.bf16 %v955_v33, %v953_v32  ;;  %v1034_v24 = vmul.f32 %v955_v33, %v955_v33  ;;  %v1012_v15 = vadd.f32 %v1011_v23, %v955_v33 }
 0x103   : > { %1623 = vst [vmem:[%s1844_s5 + $0x20] sm:$0xff] %v1603_v34   ;;  %v1049_v31 = vadd.f32 %v1048_v27, %v1034_v24 }
 0x104   : > { %v908_v36 = vpop.f32.mrf.mxu2  ;;  %v812_v38 = vpop.f32.mrf.mxu0 }
 0x105   : > { %v957_v37 = vpop.f32.mrf.mxu3  ;;  %v861_v39 = vpop.f32.mrf.mxu1  ;;  %v813_v41 = vadd.f32 %v1835_v0, %v812_v38  ;;  %v909_v42 = vadd.f32 %v908_v36, %v860_v40 }
 0x107   : > { %v862_v43 = vadd.f32 %v861_v39, %v813_v41  ;;  %v958_v51 = vadd.f32 %v957_v37, %v909_v42 }
 0x109   : > { %v1035_v28 = vmul.f32 %v958_v51, %v958_v51  ;;  %v1013_v34 = vadd.f32 %v1012_v15, %v958_v51 }
 0x10b   : > { %v1050_v16 = vadd.f32 %v1049_v31, %v1035_v28 }
 0x10c   : > { %v910_v45 = vpop.f32.mrf.mxu2  ;;  %v815_v49 = vpop.f32.mrf.mxu0 }
 0x10d   : > { %v959_v47 = vpop.f32.mrf.mxu3  ;;  %v911_v48 = vadd.f32 %v910_v45, %v862_v43  ;;  %v864_v50 = vpop.f32.mrf.mxu1  ;;  %v816_v54 = vadd.f32 %v1835_v0, %v815_v49 }
 0x10f   : > { %v960_v52 = vadd.f32 %v959_v47, %v911_v48  ;;  %v865_v59 = vadd.f32 %v864_v50, %v816_v54 }
 0x111   : > { %v1608_v53 = vpack.c.bf16 %v960_v52, %v958_v51  ;;  %v1036_v35 = vmul.f32 %v960_v52, %v960_v52  ;;  %v1014_v37 = vadd.f32 %v1013_v34, %v960_v52 }
 0x113   : > { %1624 = vst [vmem:[%s1844_s5 + $0x28] sm:$0xff] %v1608_v53   ;;  %v1051_v32 = vadd.f32 %v1050_v16, %v1036_v35 }
 0x114   : > { %v913_v55 = vpop.f32.mrf.mxu2  ;;  %v817_v57 = vpop.f32.mrf.mxu0 }
 0x115   : > { %v962_v56 = vpop.f32.mrf.mxu3  ;;  %v866_v58 = vpop.f32.mrf.mxu1  ;;  %v818_v60 = vadd.f32 %v1835_v0, %v817_v57  ;;  %v914_v3 = vadd.f32 %v913_v55, %v865_v59 }
 0x117   : > { %v867_v4 = vadd.f32 %v866_v58, %v818_v60  ;;  %v963_v44 = vadd.f32 %v962_v56, %v914_v3 }
 0x119   : > { %v1037_v38 = vmul.f32 %v963_v44, %v963_v44  ;;  %v1015_v41 = vadd.f32 %v1014_v37, %v963_v44 }
 0x11b   : > { %v1052_v33 = vadd.f32 %v1051_v32, %v1037_v38 }
 0x11c   : > { %v915_v7 = vpop.f32.mrf.mxu2  ;;  %v820_v11 = vpop.f32.mrf.mxu0 }
 0x11d   : > { %v964_v8 = vpop.f32.mrf.mxu3  ;;  %v916_v10 = vadd.f32 %v915_v7, %v867_v4  ;;  %v821_v13 = vadd.f32 %v1835_v0, %v820_v11  ;;  %v869_v19 = vpop.f32.mrf.mxu1 }
 0x11f   : > { %v965_v61 = vadd.f32 %v964_v8, %v916_v10  ;;  %v870_v22 = vadd.f32 %v869_v19, %v821_v13 }
 0x121   : > { %v1613_v21 = vpack.c.bf16 %v965_v61, %v963_v44  ;;  %v1038_v42 = vmul.f32 %v965_v61, %v965_v61  ;;  %v1016_v47 = vadd.f32 %v1015_v41, %v965_v61 }
 0x123   : > { %1625 = vst [vmem:[%s1844_s5 + $0x30] sm:$0xff] %v1613_v21   ;;  %v1053_v51 = vadd.f32 %v1052_v33, %v1038_v42 }
 0x124   : > { %v918_v25 = vpop.f32.mrf.mxu2  ;;  %v822_v30 = vpop.f32.mrf.mxu0 }
 0x125   : > { %v967_v26 = vpop.f32.mrf.mxu3  ;;  %v919_v29 = vadd.f32 %v918_v25, %v870_v22  ;;  %v823_v36 = vadd.f32 %v1835_v0, %v822_v30  ;;  %v871_v40 = vpop.f32.mrf.mxu1 }
 0x127   : > { %v968_v39 = vadd.f32 %v967_v26, %v919_v29  ;;  %v872_v43 = vadd.f32 %v871_v40, %v823_v36 }
 0x129   : > { %v1039_v48 = vmul.f32 %v968_v39, %v968_v39  ;;  %v1017_v53 = vadd.f32 %v1016_v47, %v968_v39 }
 0x12b   : > { %v1054_v0 = vadd.f32 %v1053_v51, %v1039_v48 }
 0x12c   : > { %v920_v45 = vpop.f32.mrf.mxu2 }
 0x12d   : > { %v921_v49 = vadd.f32 %v920_v45, %v872_v43  ;;  %v969_v50 = vpop.f32.mrf.mxu3 }
 0x12f   : > { %v970_v54 = vadd.f32 %v969_v50, %v921_v49 }
 0x131   : > { %v1618_v52 = vpack.c.bf16 %v970_v54, %v968_v39  ;;  %v1018_v55 = vadd.f32 %v1017_v53, %v970_v54  ;;  %v1040_v56 = vmul.f32 %v970_v54, %v970_v54 }
 0x133   : > { %1626 = vst [vmem:[%s1844_s5 + $0x38] sm:$0xff] %v1618_v52   ;;  %v1019_v57 = vrot.slane %v1018_v55, 4  ;;  %v1055_v58 = vadd.f32 %v1054_v0, %v1040_v56 }
 0x135   : > { %v1020_v59 = vadd.f32 %v1019_v57, %v1018_v55  ;;  %v1056_v60 = vrot.slane %v1055_v58, 4 }
 0x137   : > { %v1021_v63 = vrot.slane %v1020_v59, 2  ;;  %v1057_v1 = vadd.f32 %v1056_v60, %v1055_v58 }
 0x139   : > { %v1022_v2 = vadd.f32 %v1021_v63, %v1020_v59  ;;  %v1058_v3 = vrot.slane %v1057_v1, 2 }
 0x13b   : > { %v1023_v4 = vrot.slane %v1022_v2, 1  ;;  %v1059_v5 = vadd.f32 %v1058_v3, %v1057_v1 }
 0x13d   : > { %v1060_v6 = vrot.slane %v1059_v5, 1  ;;  %v1024_v7 = vadd.f32 %v1023_v4, %v1022_v2 }
 0x13f   : > { %v1061_v8 = vadd.f32 %v1060_v6, %v1059_v5 }
 0x141   : > { %v1063_v9 = vsel %vm1062_vm0, %v1024_v7, %v1061_v8 }
 0x142   : > { %1064 = vst [vmem:[%s322_s9] sm:$0x3] %v1063_v9 }
 0x143 PF: > { %s15_s17 = sadd.s32 1, %s1674_s17   ;;  %s1909_s15 = smov %s1670_s16 }
 0x144   : > { %p12_p5 = scmp.ge.s32.totalorder %s15_s17, 6   ;;  %s1910_s16 = smov %s1912_s18 }
 0x146   :  { %14 = sbr.rel (!%p12_p5) target bundleno = 2 (0x2), region = 80 }

// kernel: _lambda_.20
= control target key start
LH: loop header
LB: loop body
LE: loop exit
PB: predicated region body
PF: predicated region fallthrough
CT: control target
= control target key end

     0   :  { %s1666_s15 = smov 0   ;;  %s1668_s16 = smov 0   ;;  %s2006_s0 = inlined_call_operand.vmem [shape: bf16[4,512,256], index: 0, kind: input, shape index: {}]   ;;  %s2007_s1 = inlined_call_operand.vmem [shape: bf16[4,256,128], index: 1, kind: input, shape index: {}]   ;;  %s2008_s2 = inlined_call_operand.vmem [shape: f32[1,128], index: 2, kind: input, shape index: {}]   ;;  %s2009_s3 = inlined_call_operand.vmem [shape: bf16[4,512,128], index: 3, kind: output, shape index: {0}]   ;;  %s2010_s4 = inlined_call_operand.vmem [shape: f32[8,2,128], index: 4, kind: output, shape index: {1}]  }
   0x1   :  { %s1670_s17 = smov 0   ;;  %s1672_s18 = smov 0  }
   0x2   :  { %s1674_s19 = smov 0  }
   0x3 LB: > { %s30_s20 = sadd.s32 1, %s1631_s17  ;;  %s34_s21 = sadd.s32 1, %s1635_s18  ;;  %s1639_s19 = sphi %s1674_s19, %s15_s19   ;;  %s1635_s18 = sphi %s1672_s18, %s2014_s18   ;;  %s1631_s17 = sphi %s1670_s17, %s2013_s17   ;;  %s1627_s16 = sphi %s1668_s16, %s2012_s16   ;;  %s1623_s15 = sphi %s1666_s15, %s2011_s15  }
   0x4   : > { %p32_p0 = scmp.ge.s32.totalorder %s30_s20, 2  ;;  %p1194_p1 = scmp.ge.s32.totalorder %s1639_s19, 1 }
   0x5   : > { %p225_p2 = scmp.lt.s32.totalorder %s1639_s19, 9 }
   0x6   : > { %s2016_s20 = smov (%p32_p0, %s30_s20), 0  ;;  %s2018_s21 = smov (!%p32_p0, %s34_s21), %s1635_s18 }
   0x7   : > { %p226_p3 = pnand %p1194_p1, %p225_p2  ;;  %p36_p4 = scmp.ge.s32.totalorder %s2018_s21, 4 }
   0x8   : > { %p284_p5 = scmp.lt.s32.totalorder (!%p226_p3), %s1627_s16, 3  ;;  %s1195_s27 = sshll.u32 (!%p226_p3), %s1623_s15, 5 }
   0x9   : > { %s2020_s21 = smov (%p36_p4, %s2018_s21), 0  ;;  %229 = sbr.rel (%p226_p3) target bundleno = 350 (0x15e), region = 32 }
   0xa   : > { %p286_p6 = scmp.lt.s32.totalorder (!%p226_p3), %s1195_s27, 63 }
   0xe   : > { %s1702_s22 = scalar_select %p284_p5, %s1627_s16, 3  ;;  %vm1001_vm0 = vcmask 1040384  }
   0xf   : > { %s2022_s27 = smov (!%p286_p6, %s1195_s27), 63 }
  0x10   : > { %s1197_s23 = sshll.u32 %s1702_s22, 7  ;;  %s1196_s28 = sshll.u32 %s2022_s27, 1 }
  0x11   : > { %s1710_s26 = scalar_lea.vmem %s2007_s1, %s1197_s23  ;;  %s290_s29 = sadd.s32 %s1197_s23, %s1196_s28 }
  0x12   : > { %v1440_v0 = vld [vmem:[%s1710_s26 + $0x38] sm:$0xff]  ;;  %v1439_v2 = vld [vmem:[%s1710_s26 + $0x30] sm:$0xff]  ;;  %v1438_v4 = vld [vmem:[%s1710_s26 + $0x28] sm:$0xff]  ;;  %s1198_s30 = sshll.u32 %s290_s29, 2  ;;  %s1202_s8 = sshll.u32 %s1702_s22, 6 }
  0x13   : > { %v1448_v1 = vld [vmem:[%s1710_s26 + $0x78] sm:$0xff]  ;;  %653 = vmatpush.bf16.msra.mxu0 %v1440_v0  ;;  %v1447_v3 = vld [vmem:[%s1710_s26 + $0x70] sm:$0xff]  ;;  %1544 = vmatpush.bf16.msra.mxu2 %v1440_v0  ;;  %v1446_v5 = vld [vmem:[%s1710_s26 + $0x68] sm:$0xff]  ;;  %s1733_s7 = scalar_lea.vmem %s2006_s0, %s1198_s30  ;;  %s1749_s9 = sadd.s32 %s1202_s8, %s2022_s27 }
  0x14   : > { %742 = vmatpush.bf16.msra.mxu1 %v1448_v1  ;;  %1552 = vmatpush.bf16.msra.mxu3 %v1448_v1  ;;  %v1437_v6 = vld [vmem:[%s1710_s26 + $0x20] sm:$0xff]  ;;  %v1436_v8 = vld [vmem:[%s1710_s26 + $0x18] sm:$0xff]  ;;  %v1435_v10 = vld [vmem:[%s1710_s26 + $0x10] sm:$0xff]  ;;  %s1203_s12 = sshll.u32 %s1749_s9, 2  ;;  %s1204_s23 = sshll.u32 %s1627_s16, 1 }
  0x15   : > { %v1445_v7 = vld [vmem:[%s1710_s26 + $0x60] sm:$0xff]  ;;  %v1444_v9 = vld [vmem:[%s1710_s26 + $0x58] sm:$0xff]  ;;  %v1443_v11 = vld [vmem:[%s1710_s26 + $0x50] sm:$0xff]  ;;  %s1818_s22 = scalar_lea.vmem %s2009_s3, %s1203_s12  ;;  %s319_s24 = sadd.s32 %s1623_s15, %s1204_s23 }
  0x16   : > { %v1434_v12 = vld [vmem:[%s1710_s26 + $0x8] sm:$0xff]  ;;  %v1433_v14 = vld [vmem:[%s1710_s26] sm:$0xff]  ;;  %v1216_v28 = vld [vmem:[%s1733_s7 + $0x10] sm:$0xf]  ;;  %p320_p7 = scmp.lt.s32.totalorder %s319_s24, 7 }
  0x17   : > { %654 = vmatpush.bf16.msra.mxu0 %v1439_v2  ;;  %1545 = vmatpush.bf16.msra.mxu2 %v1439_v2  ;;  %v1442_v13 = vld [vmem:[%s1710_s26 + $0x48] sm:$0xff]  ;;  %v1441_v15 = vld [vmem:[%s1710_s26 + $0x40] sm:$0xff]  ;;  %v1404_v29 = vld [vmem:[%s1733_s7 + $0x14] sm:$0xf0] }
  0x18   : > { %743 = vmatpush.bf16.msra.mxu1 %v1447_v3  ;;  %1553 = vmatpush.bf16.msra.mxu3 %v1447_v3  ;;  %v1208_v16 = vld [vmem:[%s1733_s7] sm:$0xf]  ;;  %v1402_v17 = vld [vmem:[%s1733_s7 + $0x4] sm:$0xf0]  ;;  %v1401_v18 = vld [vmem:[%s1733_s7 + $0x4] sm:$0xf]  ;;  %v1217_v36 = vor.u32 %v1404_v29, %v1216_v28 }
  0x19   : > { %v1210_v19 = vld [vmem:[%s1733_s7 + $0x8] sm:$0xf0]  ;;  %v1272_v20 = vld [vmem:[%s1733_s7 + $0x80] sm:$0xf]  ;;  %v1418_v21 = vld [vmem:[%s1733_s7 + $0x84] sm:$0xf0]  ;;  %v1209_v24 = vor.u32 %v1402_v17, %v1208_v16 }
  0x1a   : > { %v1417_v22 = vld [vmem:[%s1733_s7 + $0x84] sm:$0xf]  ;;  %v1274_v23 = vld [vmem:[%s1733_s7 + $0x88] sm:$0xf0]  ;;  %v1213_v25 = vor.u32 %v1401_v18, %v1210_v19  ;;  %v1273_v26 = vor.u32 %v1418_v21, %v1272_v20  ;;  %v1403_v30 = vld [vmem:[%s1733_s7 + $0x14] sm:$0xf] }
  0x1b   : > { %655 = vmatpush.bf16.msra.mxu0 %v1438_v4  ;;  %1546 = vmatpush.bf16.msra.mxu2 %v1438_v4  ;;  %v1277_v27 = vor.u32 %v1417_v22, %v1274_v23  ;;  %v1218_v31 = vld [vmem:[%s1733_s7 + $0x18] sm:$0xf0]  ;;  %v1280_v32 = vld [vmem:[%s1733_s7 + $0x90] sm:$0xf]  ;;  %v1420_v33 = vld [vmem:[%s1733_s7 + $0x94] sm:$0xf0] }
  0x1c   : > { %744 = vmatpush.bf16.msra.mxu1 %v1446_v5  ;;  %1554 = vmatpush.bf16.msra.mxu3 %v1446_v5  ;;  %v1419_v34 = vld [vmem:[%s1733_s7 + $0x94] sm:$0xf]  ;;  %v1282_v35 = vld [vmem:[%s1733_s7 + $0x98] sm:$0xf0]  ;;  %v1221_v37 = vor.u32 %v1403_v30, %v1218_v31  ;;  %v1281_v38 = vor.u32 %v1420_v33, %v1280_v32  ;;  %v1224_v40 = vld [vmem:[%s1733_s7 + $0x20] sm:$0xf] }
  0x1d   : > { %v1285_v39 = vor.u32 %v1419_v34, %v1282_v35  ;;  %v1406_v41 = vld [vmem:[%s1733_s7 + $0x24] sm:$0xf0]  ;;  %v1405_v42 = vld [vmem:[%s1733_s7 + $0x24] sm:$0xf]  ;;  %v1226_v43 = vld [vmem:[%s1733_s7 + $0x28] sm:$0xf0] }
  0x1e   : > { %v1288_v44 = vld [vmem:[%s1733_s7 + $0xa0] sm:$0xf]  ;;  %v1422_v45 = vld [vmem:[%s1733_s7 + $0xa4] sm:$0xf0]  ;;  %v1421_v46 = vld [vmem:[%s1733_s7 + $0xa4] sm:$0xf]  ;;  %v1225_v48 = vor.u32 %v1406_v41, %v1224_v40  ;;  %v1229_v49 = vor.u32 %v1405_v42, %v1226_v43 }
  0x1f   : > { %656 = vmatpush.bf16.msra.mxu0 %v1437_v6  ;;  %1547 = vmatpush.bf16.msra.mxu2 %v1437_v6  ;;  %v1290_v47 = vld [vmem:[%s1733_s7 + $0xa8] sm:$0xf0]  ;;  %v1289_v50 = vor.u32 %v1422_v45, %v1288_v44  ;;  %v1232_v52 = vld [vmem:[%s1733_s7 + $0x30] sm:$0xf]  ;;  %v1408_v53 = vld [vmem:[%s1733_s7 + $0x34] sm:$0xf0] }
  0x20   : > { %745 = vmatpush.bf16.msra.mxu1 %v1445_v7  ;;  %1555 = vmatpush.bf16.msra.mxu3 %v1445_v7  ;;  %v1293_v51 = vor.u32 %v1421_v46, %v1290_v47  ;;  %v1407_v54 = vld [vmem:[%s1733_s7 + $0x34] sm:$0xf]  ;;  %v1234_v55 = vld [vmem:[%s1733_s7 + $0x38] sm:$0xf0]  ;;  %v1296_v56 = vld [vmem:[%s1733_s7 + $0xb0] sm:$0xf]  ;;  %v1233_v60 = vor.u32 %v1408_v53, %v1232_v52 }
  0x21   : > { %v1424_v57 = vld [vmem:[%s1733_s7 + $0xb4] sm:$0xf0]  ;;  %v1423_v58 = vld [vmem:[%s1733_s7 + $0xb4] sm:$0xf]  ;;  %v1298_v59 = vld [vmem:[%s1733_s7 + $0xb8] sm:$0xf0]  ;;  %v1237_v61 = vor.u32 %v1407_v54, %v1234_v55 }
  0x22   : > { %v1297_v62 = vor.u32 %v1424_v57, %v1296_v56  ;;  %v1301_v63 = vor.u32 %v1423_v58, %v1298_v59  ;;  %v1240_v0 = vld [vmem:[%s1733_s7 + $0x40] sm:$0xf]  ;;  %v1410_v1 = vld [vmem:[%s1733_s7 + $0x44] sm:$0xf0]  ;;  %v1409_v2 = vld [vmem:[%s1733_s7 + $0x44] sm:$0xf] }
  0x23   : > { %657 = vmatpush.bf16.msra.mxu0 %v1436_v8  ;;  %1548 = vmatpush.bf16.msra.mxu2 %v1436_v8  ;;  %v1242_v3 = vld [vmem:[%s1733_s7 + $0x48] sm:$0xf0]  ;;  %v1304_v4 = vld [vmem:[%s1733_s7 + $0xc0] sm:$0xf]  ;;  %v1426_v5 = vld [vmem:[%s1733_s7 + $0xc4] sm:$0xf0]  ;;  %v1241_v8 = vor.u32 %v1410_v1, %v1240_v0 }
  0x24   : > { %746 = vmatpush.bf16.msra.mxu1 %v1444_v9  ;;  %1556 = vmatpush.bf16.msra.mxu3 %v1444_v9  ;;  %v1425_v6 = vld [vmem:[%s1733_s7 + $0xc4] sm:$0xf]  ;;  %v1306_v7 = vld [vmem:[%s1733_s7 + $0xc8] sm:$0xf0]  ;;  %v1245_v9 = vor.u32 %v1409_v2, %v1242_v3  ;;  %v1312_v16 = vld [vmem:[%s1733_s7 + $0xd0] sm:$0xf] }
  0x25   : > { %v1428_v17 = vld [vmem:[%s1733_s7 + $0xd4] sm:$0xf0]  ;;  %v1427_v18 = vld [vmem:[%s1733_s7 + $0xd4] sm:$0xf]  ;;  %v1314_v19 = vld [vmem:[%s1733_s7 + $0xd8] sm:$0xf0] }
  0x26   : > { %v1313_v22 = vor.u32 %v1428_v17, %v1312_v16  ;;  %v1317_v23 = vor.u32 %v1427_v18, %v1314_v19  ;;  %v1320_v28 = vld [vmem:[%s1733_s7 + $0xe0] sm:$0xf]  ;;  %v1430_v29 = vld [vmem:[%s1733_s7 + $0xe4] sm:$0xf0]  ;;  %v1429_v30 = vld [vmem:[%s1733_s7 + $0xe4] sm:$0xf] }
  0x27   : > { %658 = vmatpush.bf16.msra.mxu0 %v1435_v10  ;;  %1549 = vmatpush.bf16.msra.mxu2 %v1435_v10  ;;  %v1305_v10 = vor.u32 %v1426_v5, %v1304_v4  ;;  %v1322_v31 = vld [vmem:[%s1733_s7 + $0xe8] sm:$0xf0]  ;;  %v1321_v34 = vor.u32 %v1430_v29, %v1320_v28  ;;  %v1328_v40 = vld [vmem:[%s1733_s7 + $0xf0] sm:$0xf]  ;;  %v1432_v41 = vld [vmem:[%s1733_s7 + $0xf4] sm:$0xf0] }
  0x28   : > { %747 = vmatpush.bf16.msra.mxu1 %v1443_v11  ;;  %1557 = vmatpush.bf16.msra.mxu3 %v1443_v11  ;;  %v1309_v11 = vor.u32 %v1425_v6, %v1306_v7  ;;  %v1325_v35 = vor.u32 %v1429_v30, %v1322_v31  ;;  %v1431_v42 = vld [vmem:[%s1733_s7 + $0xf4] sm:$0xf]  ;;  %v1330_v43 = vld [vmem:[%s1733_s7 + $0xf8] sm:$0xf0]  ;;  %v1329_v46 = vor.u32 %v1432_v41, %v1328_v40  ;;  %s2024_s24 = smov (!%p320_p7, %s319_s24), 7 }
  0x29   : > { %v1333_v47 = vor.u32 %v1431_v42, %v1330_v43  ;;  %s1205_s16 = sshll.u32 %s2024_s24, 1 }
  0x2a   : > { %s326_s15 = scalar_lea.vmem %s2010_s4, %s1205_s16 }
  0x2b   : > { %659 = vmatpush.bf16.msra.mxu0 %v1434_v12  ;;  %1550 = vmatpush.bf16.msra.mxu2 %v1434_v12  ;;  %v1248_v12 = vld [vmem:[%s1733_s7 + $0x50] sm:$0xf] }
  0x2c   : > { %748 = vmatpush.bf16.msra.mxu1 %v1442_v13  ;;  %1558 = vmatpush.bf16.msra.mxu3 %v1442_v13  ;;  %v1412_v13 = vld [vmem:[%s1733_s7 + $0x54] sm:$0xf0] }
  0x2d   : > { %v1249_v20 = vor.u32 %v1412_v13, %v1248_v12 }
  0x2f   : > { %660 = vmatpush.bf16.msra.mxu0 %v1433_v14  ;;  %1551 = vmatpush.bf16.msra.mxu2 %v1433_v14  ;;  %v1411_v14 = vld [vmem:[%s1733_s7 + $0x54] sm:$0xf] }
  0x30   : > { %749 = vmatpush.bf16.msra.mxu1 %v1441_v15  ;;  %1559 = vmatpush.bf16.msra.mxu3 %v1441_v15  ;;  %v1250_v15 = vld [vmem:[%s1733_s7 + $0x58] sm:$0xf0] }
  0x31   : > { %v1253_v21 = vor.u32 %v1411_v14, %v1250_v15 }
  0x32   : > { %661 = vmatmul.bf16.vlgmr.msra.gmra.mxu0 %v1209_v24  ;;  %701 = vmatmul.bf16.vlgmr.msra.gmra.mxu2 %v1273_v26  ;;  %v1256_v24 = vld [vmem:[%s1733_s7 + $0x60] sm:$0xf]  ;;  %v1413_v26 = vld [vmem:[%s1733_s7 + $0x64] sm:$0xf] }
  0x33   : > { %750 = vmatmul.bf16.vlgmr.msra.gmra.mxu1 %v1213_v25  ;;  %790 = vmatmul.bf16.vlgmr.msra.gmra.mxu3 %v1277_v27  ;;  %v1414_v25 = vld [vmem:[%s1733_s7 + $0x64] sm:$0xf0]  ;;  %v1258_v27 = vld [vmem:[%s1733_s7 + $0x68] sm:$0xf0] }
  0x34   : > { %v1257_v32 = vor.u32 %v1414_v25, %v1256_v24  ;;  %v1261_v33 = vor.u32 %v1413_v26, %v1258_v27 }
  0x42   : > { %666 = vmatmul.bf16.gmra.mxu0 %v1217_v36  ;;  %706 = vmatmul.bf16.gmra.mxu2 %v1281_v38  ;;  %v1264_v36 = vld [vmem:[%s1733_s7 + $0x70] sm:$0xf]  ;;  %v1415_v38 = vld [vmem:[%s1733_s7 + $0x74] sm:$0xf] }
  0x43   : > { %755 = vmatmul.bf16.gmra.mxu1 %v1221_v37  ;;  %795 = vmatmul.bf16.gmra.mxu3 %v1285_v39  ;;  %v1416_v37 = vld [vmem:[%s1733_s7 + $0x74] sm:$0xf0]  ;;  %v1266_v39 = vld [vmem:[%s1733_s7 + $0x78] sm:$0xf0] }
  0x44   : > { %v1265_v44 = vor.u32 %v1416_v37, %v1264_v36  ;;  %v1269_v45 = vor.u32 %v1415_v38, %v1266_v39 }
  0x52   : > { %671 = vmatmul.bf16.gmra.mxu0 %v1225_v48  ;;  %711 = vmatmul.bf16.gmra.mxu2 %v1289_v50  ;;  %v1810_v50 = vld [vmem:[%s2008_s2] ss:$0 sm:$0xff] }
  0x53   : > { %760 = vmatmul.bf16.gmra.mxu1 %v1229_v49  ;;  %800 = vmatmul.bf16.gmra.mxu3 %v1293_v51 }
  0x62   : > { %676 = vmatmul.bf16.gmra.mxu0 %v1233_v60  ;;  %716 = vmatmul.bf16.gmra.mxu2 %v1297_v62 }
  0x63   : > { %765 = vmatmul.bf16.gmra.mxu1 %v1237_v61  ;;  %805 = vmatmul.bf16.gmra.mxu3 %v1301_v63 }
  0x72   : > { %681 = vmatmul.bf16.gmra.mxu0 %v1241_v8  ;;  %721 = vmatmul.bf16.gmra.mxu2 %v1305_v10 }
  0x73   : > { %770 = vmatmul.bf16.gmra.mxu1 %v1245_v9  ;;  %810 = vmatmul.bf16.gmra.mxu3 %v1309_v11 }
  0x82   : > { %686 = vmatmul.bf16.gmra.mxu0 %v1249_v20  ;;  %726 = vmatmul.bf16.gmra.mxu2 %v1313_v22 }
  0x83   : > { %775 = vmatmul.bf16.gmra.mxu1 %v1253_v21  ;;  %815 = vmatmul.bf16.gmra.mxu3 %v1317_v23 }
  0x92   : > { %691 = vmatmul.bf16.gmra.mxu0 %v1257_v32  ;;  %731 = vmatmul.bf16.gmra.mxu2 %v1321_v34 }
  0x93   : > { %780 = vmatmul.bf16.gmra.mxu1 %v1261_v33  ;;  %820 = vmatmul.bf16.gmra.mxu3 %v1325_v35 }
  0xa2   : > { %696 = vmatmul.bf16.gmra.mxu0 %v1265_v44  ;;  %736 = vmatmul.bf16.gmra.mxu2 %v1329_v46 }
  0xa3   : > { %785 = vmatmul.bf16.gmra.mxu1 %v1269_v45  ;;  %825 = vmatmul.bf16.gmra.mxu3 %v1333_v47 }
  0xaf   : > { %v662_v48 = vpop.f32.mrf.mxu0 }
  0xb0   : > { %v751_v49 = vpop.f32.mrf.mxu1  ;;  %v663_v51 = vadd.f32 %v1810_v50, %v662_v48 }
  0xb2   : > { %v752_v56 = vadd.f32 %v751_v49, %v663_v51 }
  0xb4   : > { %v932_v60 = vmul.f32 %v752_v56, %v752_v56 }
  0xb5   : > { %v702_v52 = vpop.f32.mrf.mxu2 }
  0xb6   : > { %v791_v53 = vpop.f32.mrf.mxu3  ;;  %v703_v59 = vadd.f32 %v1810_v50, %v702_v52 }
  0xb7   : > { %v664_v54 = vpop.f32.mrf.mxu0 }
  0xb8   : > { %v753_v55 = vpop.f32.mrf.mxu1  ;;  %v665_v57 = vadd.f32 %v1810_v50, %v664_v54  ;;  %v1822_v5 = vadd.f32 %v791_v53, %v703_v59 }
  0xba   : > { %v754_v58 = vadd.f32 %v753_v55, %v665_v57 }
  0xbc   : > { %v1452_v61 = vpack.c.bf16 %v754_v58, %v752_v56  ;;  %v895_v62 = vadd.f32 %v754_v58, %v752_v56  ;;  %v933_v63 = vmul.f32 %v754_v58, %v754_v58 }
  0xbd   : > { %v704_v1 = vpop.f32.mrf.mxu2 }
  0xbe   : > { %1453 = vst [vmem:[%s1818_s22] sm:$0xff] %v1452_v61   ;;  %v964_v0 = vadd.f32 %v933_v63, %v932_v60  ;;  %v793_v2 = vpop.f32.mrf.mxu3  ;;  %v705_v6 = vadd.f32 %v1810_v50, %v704_v1 }
  0xbf   : > { %v667_v3 = vpop.f32.mrf.mxu0 }
  0xc0   : > { %v756_v4 = vpop.f32.mrf.mxu1  ;;  %v668_v7 = vadd.f32 %v1810_v50, %v667_v3  ;;  %v1826_v8 = vadd.f32 %v793_v2, %v705_v6 }
  0xc2   : > { %v757_v9 = vadd.f32 %v756_v4, %v668_v7  ;;  %v1492_v10 = vpack.c.bf16 %v1826_v8, %v1822_v5 }
  0xc4   : > { %v896_v11 = vadd.f32 %v895_v62, %v757_v9  ;;  %v934_v12 = vmul.f32 %v757_v9, %v757_v9  ;;  %1536 = vst [vmem:[%s1818_s22 + $0x40] sm:$0xff] %v1492_v10  }
  0xc5   : > { %v707_v14 = vpop.f32.mrf.mxu2 }
  0xc6   : > { %v965_v13 = vadd.f32 %v964_v0, %v934_v12  ;;  %v796_v15 = vpop.f32.mrf.mxu3  ;;  %v708_v20 = vadd.f32 %v1810_v50, %v707_v14 }
  0xc7   : > { %v669_v16 = vpop.f32.mrf.mxu0 }
  0xc8   : > { %v758_v17 = vpop.f32.mrf.mxu1  ;;  %v670_v18 = vadd.f32 %v1810_v50, %v669_v16  ;;  %v1838_v29 = vadd.f32 %v796_v15, %v708_v20 }
  0xca   : > { %v759_v19 = vadd.f32 %v758_v17, %v670_v18 }
  0xcc   : > { %v1457_v21 = vpack.c.bf16 %v759_v19, %v757_v9  ;;  %v1833_v22 = vadd.f32 %v896_v11, %v759_v19  ;;  %v935_v23 = vmul.f32 %v759_v19, %v759_v19 }
  0xcd   : > { %v709_v25 = vpop.f32.mrf.mxu2 }
  0xce   : > { %1529 = vst [vmem:[%s1818_s22 + $0x8] sm:$0xff] %v1457_v21   ;;  %v1836_v24 = vadd.f32 %v965_v13, %v935_v23  ;;  %v798_v26 = vpop.f32.mrf.mxu3  ;;  %v710_v30 = vadd.f32 %v1810_v50, %v709_v25 }
  0xcf   : > { %v672_v27 = vpop.f32.mrf.mxu0 }
  0xd0   : > { %v761_v28 = vpop.f32.mrf.mxu1  ;;  %v1841_v31 = vadd.f32 %v798_v26, %v710_v30  ;;  %v673_v33 = vadd.f32 %v1810_v50, %v672_v27 }
  0xd2   : > { %v1497_v32 = vpack.c.bf16 %v1841_v31, %v1838_v29  ;;  %v1848_v39 = vadd.f32 %v761_v28, %v673_v33 }
  0xd4   : > { %1537 = vst [vmem:[%s1818_s22 + $0x48] sm:$0xff] %v1497_v32  }
  0xd5   : > { %v712_v34 = vpop.f32.mrf.mxu2 }
  0xd6   : > { %v801_v35 = vpop.f32.mrf.mxu3  ;;  %v713_v41 = vadd.f32 %v1810_v50, %v712_v34 }
  0xd7   : > { %v674_v36 = vpop.f32.mrf.mxu0 }
  0xd8   : > { %v763_v37 = vpop.f32.mrf.mxu1  ;;  %v675_v38 = vadd.f32 %v1810_v50, %v674_v36  ;;  %v1856_v47 = vadd.f32 %v801_v35, %v713_v41 }
  0xda   : > { %v1850_v40 = vadd.f32 %v763_v37, %v675_v38 }
  0xdc   : > { %v1462_v42 = vpack.c.bf16 %v1850_v40, %v1848_v39 }
  0xdd   : > { %v714_v43 = vpop.f32.mrf.mxu2 }
  0xde   : > { %1530 = vst [vmem:[%s1818_s22 + $0x10] sm:$0xff] %v1462_v42   ;;  %v803_v44 = vpop.f32.mrf.mxu3  ;;  %v715_v48 = vadd.f32 %v1810_v50, %v714_v43 }
  0xdf   : > { %v677_v45 = vpop.f32.mrf.mxu0 }
  0xe0   : > { %v766_v46 = vpop.f32.mrf.mxu1  ;;  %v1859_v49 = vadd.f32 %v803_v44, %v715_v48  ;;  %v678_v52 = vadd.f32 %v1810_v50, %v677_v45 }
  0xe2   : > { %v1502_v51 = vpack.c.bf16 %v1859_v49, %v1856_v47  ;;  %v1866_v58 = vadd.f32 %v766_v46, %v678_v52  ;;  %v936_v52 = vmul.f32 %v1848_v39, %v1848_v39 }
  0xe4   : > { %1538 = vst [vmem:[%s1818_s22 + $0x50] sm:$0xff] %v1502_v51  }
  0xe5   : > { %v717_v53 = vpop.f32.mrf.mxu2 }
  0xe6   : > { %v806_v54 = vpop.f32.mrf.mxu3  ;;  %v718_v60 = vadd.f32 %v1810_v50, %v717_v53 }
  0xe7   : > { %v679_v55 = vpop.f32.mrf.mxu0 }
  0xe8   : > { %v768_v56 = vpop.f32.mrf.mxu1  ;;  %v680_v57 = vadd.f32 %v1810_v50, %v679_v55  ;;  %v1874_v2 = vadd.f32 %v806_v54, %v718_v60  ;;  %v937_v54 = vmul.f32 %v1850_v40, %v1850_v40  ;;  %v898_v55 = vadd.f32 %v1833_v22, %v1848_v39 }
  0xea   : > { %v1868_v59 = vadd.f32 %v768_v56, %v680_v57 }
  0xec   : > { %v1467_v61 = vpack.c.bf16 %v1868_v59, %v1866_v58  ;;  %v939_v22 = vmul.f32 %v1868_v59, %v1868_v59 }
  0xed   : > { %v719_v62 = vpop.f32.mrf.mxu2 }
  0xee   : > { %1531 = vst [vmem:[%s1818_s22 + $0x18] sm:$0xff] %v1467_v61   ;;  %v808_v63 = vpop.f32.mrf.mxu3  ;;  %v720_v3 = vadd.f32 %v1810_v50, %v719_v62  ;;  %v967_v61 = vadd.f32 %v1836_v24, %v936_v52 }
  0xef   : > { %v682_v0 = vpop.f32.mrf.mxu0 }
  0xf0   : > { %v771_v1 = vpop.f32.mrf.mxu1  ;;  %v1877_v4 = vadd.f32 %v808_v63, %v720_v3  ;;  %v683_v7 = vadd.f32 %v1810_v50, %v682_v0  ;;  %v899_v0 = vadd.f32 %v898_v55, %v1850_v40 }
  0xf2   : > { %v1507_v6 = vpack.c.bf16 %v1877_v4, %v1874_v2  ;;  %v772_v14 = vadd.f32 %v771_v1, %v683_v7  ;;  %v938_v1 = vmul.f32 %v1866_v58, %v1866_v58  ;;  %v900_v7 = vadd.f32 %v899_v0, %v1866_v58 }
  0xf4   : > { %1539 = vst [vmem:[%s1818_s22 + $0x58] sm:$0xff] %v1507_v6   ;;  %v968_v6 = vadd.f32 %v967_v61, %v937_v54  ;;  %v940_v40 = vmul.f32 %v772_v14, %v772_v14 }
  0xf5   : > { %v722_v9 = vpop.f32.mrf.mxu2 }
  0xf6   : > { %v811_v10 = vpop.f32.mrf.mxu3  ;;  %v723_v16 = vadd.f32 %v1810_v50, %v722_v9 }
  0xf7   : > { %v684_v11 = vpop.f32.mrf.mxu0 }
  0xf8   : > { %v773_v12 = vpop.f32.mrf.mxu1  ;;  %v685_v13 = vadd.f32 %v1810_v50, %v684_v11  ;;  %v1889_v23 = vadd.f32 %v811_v10, %v723_v16  ;;  %v969_v10 = vadd.f32 %v968_v6, %v938_v1  ;;  %v901_v11 = vadd.f32 %v900_v7, %v1868_v59 }
  0xf9   : > { %v948_v6 = vmul.f32 %v1822_v5, %v1822_v5 }
  0xfa   : > { %v1884_v15 = vadd.f32 %v773_v12, %v685_v13  ;;  %v970_v13 = vadd.f32 %v969_v10, %v939_v22  ;;  %v902_v16 = vadd.f32 %v901_v11, %v772_v14  ;;  %v949_v11 = vmul.f32 %v1826_v8, %v1826_v8 }
  0xfc   : > { %v1472_v17 = vpack.c.bf16 %v1884_v15, %v772_v14  ;;  %v903_v59 = vadd.f32 %v902_v16, %v1884_v15  ;;  %v950_v16 = vmul.f32 %v1838_v29, %v1838_v29 }
  0xfd   : > { %v724_v18 = vpop.f32.mrf.mxu2 }
  0xfe   : > { %1532 = vst [vmem:[%s1818_s22 + $0x20] sm:$0xff] %v1472_v17   ;;  %v813_v19 = vpop.f32.mrf.mxu3  ;;  %v725_v25 = vadd.f32 %v1810_v50, %v724_v18  ;;  %v941_v17 = vmul.f32 %v1884_v15, %v1884_v15 }
  0xff   : > { %v687_v20 = vpop.f32.mrf.mxu0 }
 0x100   : > { %v776_v21 = vpop.f32.mrf.mxu1  ;;  %v1892_v26 = vadd.f32 %v813_v19, %v725_v25  ;;  %v688_v28 = vadd.f32 %v1810_v50, %v687_v20 }
 0x102   : > { %v1512_v27 = vpack.c.bf16 %v1892_v26, %v1889_v23  ;;  %v777_v36 = vadd.f32 %v776_v21, %v688_v28 }
 0x104   : > { %1540 = vst [vmem:[%s1818_s22 + $0x60] sm:$0xff] %v1512_v27   ;;  %v971_v27 = vadd.f32 %v970_v13, %v940_v40  ;;  %v942_v28 = vmul.f32 %v777_v36, %v777_v36 }
 0x105   : > { %v727_v30 = vpop.f32.mrf.mxu2 }
 0x106   : > { %v816_v32 = vpop.f32.mrf.mxu3  ;;  %v728_v38 = vadd.f32 %v1810_v50, %v727_v30 }
 0x107   : > { %v689_v33 = vpop.f32.mrf.mxu0 }
 0x108   : > { %v778_v34 = vpop.f32.mrf.mxu1  ;;  %v690_v35 = vadd.f32 %v1810_v50, %v689_v33  ;;  %v1901_v46 = vadd.f32 %v816_v32, %v728_v38  ;;  %v972_v32 = vadd.f32 %v971_v27, %v941_v17  ;;  %v904_v33 = vadd.f32 %v903_v59, %v777_v36 }
 0x109   : > { %v953_v27 = vmul.f32 %v1859_v49, %v1859_v49 }
 0x10a   : > { %v779_v37 = vadd.f32 %v778_v34, %v690_v35  ;;  %v973_v38 = vadd.f32 %v972_v32, %v942_v28  ;;  %v954_v28 = vmul.f32 %v1874_v2, %v1874_v2  ;;  %v955_v32 = vmul.f32 %v1877_v4, %v1877_v4 }
 0x10c   : > { %v1477_v41 = vpack.c.bf16 %v779_v37, %v777_v36  ;;  %v943_v34 = vmul.f32 %v779_v37, %v779_v37 }
 0x10d   : > { %v729_v42 = vpop.f32.mrf.mxu2 }
 0x10e   : > { %1533 = vst [vmem:[%s1818_s22 + $0x28] sm:$0xff] %v1477_v41   ;;  %v818_v43 = vpop.f32.mrf.mxu3  ;;  %v730_v48 = vadd.f32 %v1810_v50, %v729_v42  ;;  %v905_v41 = vadd.f32 %v904_v33, %v779_v37 }
 0x10f   : > { %v692_v44 = vpop.f32.mrf.mxu0 }
 0x110   : > { %v781_v45 = vpop.f32.mrf.mxu1  ;;  %v1904_v51 = vadd.f32 %v818_v43, %v730_v48  ;;  %v693_v56 = vadd.f32 %v1810_v50, %v692_v44  ;;  %v974_v44 = vadd.f32 %v973_v38, %v943_v34 }
 0x112   : > { %v1517_v53 = vpack.c.bf16 %v1904_v51, %v1901_v46  ;;  %v782_v39 = vadd.f32 %v781_v45, %v693_v56 }
 0x114   : > { %1541 = vst [vmem:[%s1818_s22 + $0x68] sm:$0xff] %v1517_v53   ;;  %v944_v42 = vmul.f32 %v782_v39, %v782_v39  ;;  %v906_v45 = vadd.f32 %v905_v41, %v782_v39 }
 0x115   : > { %v732_v57 = vpop.f32.mrf.mxu2 }
 0x116   : > { %v821_v60 = vpop.f32.mrf.mxu3  ;;  %v733_v24 = vadd.f32 %v1810_v50, %v732_v57  ;;  %v975_v54 = vadd.f32 %v974_v44, %v944_v42  ;;  %v959_v44 = vmul.f32 %v1904_v51, %v1904_v51 }
 0x117   : > { %v694_v62 = vpop.f32.mrf.mxu0 }
 0x118   : > { %v783_v63 = vpop.f32.mrf.mxu1  ;;  %v695_v3 = vadd.f32 %v1810_v50, %v694_v62  ;;  %v1929_v21 = vadd.f32 %v821_v60, %v733_v24 }
 0x11a   : > { %v784_v9 = vadd.f32 %v783_v63, %v695_v3 }
 0x11c   : > { %v1482_v12 = vpack.c.bf16 %v784_v9, %v782_v39  ;;  %v945_v48 = vmul.f32 %v784_v9, %v784_v9  ;;  %v907_v55 = vadd.f32 %v906_v45, %v784_v9 }
 0x11d   : > { %v734_v18 = vpop.f32.mrf.mxu2 }
 0x11e   : > { %1534 = vst [vmem:[%s1818_s22 + $0x30] sm:$0xff] %v1482_v12   ;;  %v823_v58 = vpop.f32.mrf.mxu3  ;;  %v735_v25 = vadd.f32 %v1810_v50, %v734_v18  ;;  %v976_v60 = vadd.f32 %v975_v54, %v945_v48 }
 0x11f   : > { %v697_v19 = vpop.f32.mrf.mxu0 }
 0x120   : > { %v786_v20 = vpop.f32.mrf.mxu1  ;;  %v698_v30 = vadd.f32 %v1810_v50, %v697_v19  ;;  %v1934_v14 = vadd.f32 %v823_v58, %v735_v25  ;;  %v951_v58 = vmul.f32 %v1841_v31, %v1841_v31 }
 0x122   : > { %v1522_v35 = vpack.c.bf16 %v1934_v14, %v1929_v21  ;;  %v787_v43 = vadd.f32 %v786_v20, %v698_v30  ;;  %v952_v20 = vmul.f32 %v1856_v47, %v1856_v47 }
 0x124   : > { %1542 = vst [vmem:[%s1818_s22 + $0x70] sm:$0xff] %v1522_v35   ;;  %v946_v56 = vmul.f32 %v787_v43, %v787_v43  ;;  %v908_v61 = vadd.f32 %v907_v55, %v787_v43 }
 0x125   : > { %v737_v15 = vpop.f32.mrf.mxu2 }
 0x126   : > { %v826_v52 = vpop.f32.mrf.mxu3  ;;  %v738_v37 = vadd.f32 %v1810_v50, %v737_v15  ;;  %v977_v63 = vadd.f32 %v976_v60, %v946_v56  ;;  %v960_v15 = vmul.f32 %v1929_v21, %v1929_v21 }
 0x127   : > { %v699_v53 = vpop.f32.mrf.mxu0 }
 0x128   : > { %v700_v36 = vadd.f32 %v1810_v50, %v699_v53  ;;  %v788_v57 = vpop.f32.mrf.mxu1  ;;  %v827_v24 = vadd.f32 %v826_v52, %v738_v37 }
 0x12a   : > { %v789_v62 = vadd.f32 %v788_v57, %v700_v36  ;;  %v962_v56 = vmul.f32 %v827_v24, %v827_v24 }
 0x12c   : > { %v1487_v0 = vpack.c.bf16 %v789_v62, %v787_v43  ;;  %v909_v1 = vadd.f32 %v908_v61, %v789_v62  ;;  %v947_v3 = vmul.f32 %v789_v62, %v789_v62 }
 0x12d   : > { %v739_v39 = vpop.f32.mrf.mxu2 }
 0x12e   : > { %1535 = vst [vmem:[%s1818_s22 + $0x38] sm:$0xff] %v1487_v0   ;;  %v910_v7 = vadd.f32 %v909_v1, %v1822_v5  ;;  %v978_v22 = vadd.f32 %v977_v63, %v947_v3  ;;  %v828_v9 = vpop.f32.mrf.mxu3  ;;  %v740_v10 = vadd.f32 %v1810_v50, %v739_v39 }
 0x130   : > { %v911_v40 = vadd.f32 %v910_v7, %v1826_v8  ;;  %v979_v12 = vadd.f32 %v978_v22, %v948_v6  ;;  %v829_v13 = vadd.f32 %v828_v9, %v740_v10 }
 0x132   : > { %v912_v17 = vadd.f32 %v911_v40, %v1838_v29  ;;  %v980_v5 = vadd.f32 %v979_v12, %v949_v11  ;;  %v1527_v18 = vpack.c.bf16 %v829_v13, %v827_v24  ;;  %v963_v57 = vmul.f32 %v829_v13, %v829_v13 }
 0x134   : > { %v913_v19 = vadd.f32 %v912_v17, %v1841_v31  ;;  %v981_v50 = vadd.f32 %v980_v5, %v950_v16  ;;  %1543 = vst [vmem:[%s1818_s22 + $0x78] sm:$0xff] %v1527_v18  }
 0x136   : > { %v914_v8 = vadd.f32 %v913_v19, %v1856_v47  ;;  %v982_v25 = vadd.f32 %v981_v50, %v951_v58  ;;  %v956_v47 = vmul.f32 %v1889_v23, %v1889_v23 }
 0x138   : > { %v915_v29 = vadd.f32 %v914_v8, %v1859_v49  ;;  %v983_v59 = vadd.f32 %v982_v25, %v952_v20  ;;  %v957_v49 = vmul.f32 %v1892_v26, %v1892_v26 }
 0x13a   : > { %v984_v30 = vadd.f32 %v983_v59, %v953_v27  ;;  %v916_v31 = vadd.f32 %v915_v29, %v1874_v2  ;;  %v958_v2 = vmul.f32 %v1901_v46, %v1901_v46 }
 0x13c   : > { %v917_v33 = vadd.f32 %v916_v31, %v1877_v4  ;;  %v985_v34 = vadd.f32 %v984_v30, %v954_v28 }
 0x13e   : > { %v918_v35 = vadd.f32 %v917_v33, %v1889_v23  ;;  %v986_v38 = vadd.f32 %v985_v34, %v955_v32 }
 0x140   : > { %v919_v41 = vadd.f32 %v918_v35, %v1892_v26  ;;  %v987_v42 = vadd.f32 %v986_v38, %v956_v47 }
 0x142   : > { %v920_v43 = vadd.f32 %v919_v41, %v1901_v46  ;;  %v988_v4 = vadd.f32 %v987_v42, %v957_v49  ;;  %v961_v46 = vmul.f32 %v1934_v14, %v1934_v14 }
 0x144   : > { %v921_v23 = vadd.f32 %v920_v43, %v1904_v51  ;;  %v989_v45 = vadd.f32 %v988_v4, %v958_v2 }
 0x146   : > { %v922_v48 = vadd.f32 %v921_v23, %v1929_v21  ;;  %v990_v26 = vadd.f32 %v989_v45, %v959_v44 }
 0x148   : > { %v991_v52 = vadd.f32 %v990_v26, %v960_v15  ;;  %v923_v53 = vadd.f32 %v922_v48, %v1934_v14 }
 0x14a   : > { %v992_v54 = vadd.f32 %v991_v52, %v961_v46  ;;  %v924_v55 = vadd.f32 %v923_v53, %v827_v24 }
 0x14c   : > { %v993_v36 = vadd.f32 %v992_v54, %v962_v56  ;;  %v925_v51 = vadd.f32 %v924_v55, %v829_v13 }
 0x14e   : > { %v926_v60 = vrot.slane %v925_v51, 4  ;;  %v994_v61 = vadd.f32 %v993_v36, %v963_v57 }
 0x150   : > { %v927_v62 = vadd.f32 %v926_v60, %v925_v51  ;;  %v995_v21 = vrot.slane %v994_v61, 4 }
 0x152   : > { %v928_v37 = vrot.slane %v927_v62, 2  ;;  %v996_v63 = vadd.f32 %v995_v21, %v994_v61 }
 0x154   : > { %v929_v0 = vadd.f32 %v928_v37, %v927_v62  ;;  %v997_v1 = vrot.slane %v996_v63, 2 }
 0x156   : > { %v930_v3 = vrot.slane %v929_v0, 1  ;;  %v998_v14 = vadd.f32 %v997_v1, %v996_v63 }
 0x158   : > { %v999_v6 = vrot.slane %v998_v14, 1  ;;  %v931_v7 = vadd.f32 %v930_v3, %v929_v0 }
 0x15a   : > { %v1000_v22 = vadd.f32 %v999_v6, %v998_v14 }
 0x15c   : > { %v1002_v39 = vsel %vm1001_vm0, %v931_v7, %v1000_v22 }
 0x15d   : > { %1003 = vst [vmem:[%s326_s15] sm:$0x3] %v1002_v39 }
 0x15e PF: > { %s15_s19 = sadd.s32 1, %s1639_s19   ;;  %s2011_s15 = smov %s1631_s17 }
 0x15f   : > { %p12_p8 = scmp.ge.s32.totalorder %s15_s19, 10   ;;  %s2012_s16 = smov %s1635_s18 }
 0x160   : > { %s2013_s17 = smov %s2016_s20  ;;  %s2014_s18 = smov %s2020_s21 }
 0x161   :  { %14 = sbr.rel (!%p12_p8) target bundleno = 3 (0x3), region = 80 }

// kernel: _lambda_.21
= control target key start
LH: loop header
LB: loop body
LE: loop exit
PB: predicated region body
PF: predicated region fallthrough
CT: control target
= control target key end

     0   :  { %s981_s12 = smov 0   ;;  %s983_s13 = smov 0   ;;  %s1150_s0 = inlined_call_operand.vmem [shape: bf16[4,512,128], index: 0, kind: input, shape index: {}]   ;;  %s1151_s1 = inlined_call_operand.vmem [shape: f32[1,128], index: 1, kind: input, shape index: {}]   ;;  %s1152_s2 = inlined_call_operand.vmem [shape: f32[1,128], index: 2, kind: input, shape index: {}]   ;;  %s1153_s3 = inlined_call_operand.vmem [shape: bf16[4,512,128], index: 3, kind: output, shape index: {}]  }
   0x1   :  { %s985_s14 = smov 0   ;;  %s987_s15 = smov 0  }
   0x2   :  { %s989_s16 = smov 0  }
   0x3 LB: > { %s28_s17 = sadd.s32 1, %s951_s14  ;;  %s32_s18 = sadd.s32 1, %s955_s15  ;;  %s959_s16 = sphi %s989_s16, %s13_s16   ;;  %s955_s15 = sphi %s987_s15, %s1157_s15   ;;  %s951_s14 = sphi %s985_s14, %s1156_s14   ;;  %s947_s13 = sphi %s983_s13, %s1155_s13   ;;  %s943_s12 = sphi %s981_s12, %s1154_s12  }
   0x4   : > { %p30_p0 = scmp.ge.s32.totalorder %s28_s17, 2  ;;  %p696_p1 = scmp.ge.s32.totalorder %s959_s16, 1 }
   0x5   : > { %p188_p2 = scmp.lt.s32.totalorder %s959_s16, 9 }
   0x6   : > { %s1159_s17 = smov (%p30_p0, %s28_s17), 0  ;;  %s1161_s18 = smov (!%p30_p0, %s32_s18), %s955_s15 }
   0x7   : > { %p189_p3 = pnand %p696_p1, %p188_p2  ;;  %p34_p4 = scmp.ge.s32.totalorder %s1161_s18, 4 }
   0x8   : > { %s697_s19 = sshll.u32 (!%p189_p3), %s943_s12, 5  ;;  %p233_p5 = scmp.lt.s32.totalorder (!%p189_p3), %s947_s13, 3 }
   0x9   : > { %s1163_s18 = smov (%p34_p4, %s1161_s18), 0  ;;  %192 = sbr.rel (%p189_p3) target bundleno = 79 (0x4f), region = 32 }
   0xa   : > { %p235_p6 = scmp.lt.s32.totalorder (!%p189_p3), %s697_s19, 63 }
   0xe   : > { %s1165_s13 = smov (!%p233_p5, %s947_s13), 3  ;;  %s1167_s19 = smov (!%p235_p6, %s697_s19), 63  ;;  %v1024_v0 = vld [vmem:[%s1151_s1] ss:$0 sm:$0xff] }
   0xf   : > { %s698_s20 = sshll.u32 %s1165_s13, 6  ;;  %v1032_v6 = vld [vmem:[%s1152_s2] ss:$0 sm:$0xff] }
  0x10   : > { %s1011_s21 = sadd.s32 %s698_s20, %s1167_s19 }
  0x11   : > { %s699_s22 = sshll.u32 %s1011_s21, 2 }
  0x12   : > { %s1019_s25 = scalar_lea.vmem %s1150_s0, %s699_s22  ;;  %s1056_s5 = scalar_lea.vmem %s1153_s3, %s699_s22 }
  0x13   : > { %v706_v1 = vld [vmem:[%s1019_s25] sm:$0xff]   ;;  %v849_v2 = vld [vmem:[%s1019_s25 + $0x8] sm:$0xff]   ;;  %v850_v3 = vld [vmem:[%s1019_s25 + $0x10] sm:$0xff]  }
  0x14   : > { %v707_v4 = vunpack.c.l.bf16 %v706_v1  ;;  %v708_v5 = vunpack.c.h.bf16 %v706_v1  ;;  %v711_v7 = vunpack.c.l.bf16 %v849_v2  ;;  %v712_v8 = vunpack.c.h.bf16 %v849_v2  ;;  %v851_v9 = vld [vmem:[%s1019_s25 + $0x18] sm:$0xff]   ;;  %v852_v36 = vld [vmem:[%s1019_s25 + $0x20] sm:$0xff]   ;;  %v853_v41 = vld [vmem:[%s1019_s25 + $0x28] sm:$0xff]  }
  0x15   : > { %v715_v10 = vunpack.c.l.bf16 %v850_v3  ;;  %v716_v11 = vunpack.c.h.bf16 %v850_v3  ;;  %v719_v12 = vunpack.c.l.bf16 %v851_v9  ;;  %v720_v13 = vunpack.c.h.bf16 %v851_v9  ;;  %v854_v52 = vld [vmem:[%s1019_s25 + $0x30] sm:$0xff]   ;;  %v855_v53 = vld [vmem:[%s1019_s25 + $0x38] sm:$0xff]  }
  0x16   : > { %v332_v14 = vmul.f32 %v1024_v0, %v707_v4  ;;  %v333_v15 = vmul.f32 %v1024_v0, %v708_v5  ;;  %v334_v16 = vmul.f32 %v1024_v0, %v711_v7  ;;  %v335_v17 = vmul.f32 %v1024_v0, %v712_v8 }
  0x17   : > { %v336_v18 = vmul.f32 %v1024_v0, %v715_v10  ;;  %v337_v19 = vmul.f32 %v1024_v0, %v716_v11  ;;  %v338_v20 = vmul.f32 %v1024_v0, %v719_v12  ;;  %v339_v21 = vmul.f32 %v1024_v0, %v720_v13 }
  0x18   : > { %v368_v22 = vadd.f32 %v1032_v6, %v332_v14  ;;  %v369_v23 = vadd.f32 %v1032_v6, %v333_v15  ;;  %v370_v24 = vadd.f32 %v1032_v6, %v334_v16  ;;  %v371_v25 = vadd.f32 %v1032_v6, %v335_v17 }
  0x19   : > { %v372_v26 = vadd.f32 %v1032_v6, %v336_v18  ;;  %v373_v27 = vadd.f32 %v1032_v6, %v337_v19  ;;  %v374_v28 = vadd.f32 %v1032_v6, %v338_v20  ;;  %v375_v29 = vadd.f32 %v1032_v6, %v339_v21  ;;  %v856_v20 = vld [vmem:[%s1019_s25 + $0x40] sm:$0xff]  }
  0x1a   : > { %vm400_vm0 = vcmp.ge.f32.partialorder %v368_v22, 0.0  ;;  %vm401_vm1 = vcmp.ge.f32.partialorder %v369_v23, 0.0  ;;  %v432_v30 = vmul.f32 0.2, %v368_v22  ;;  %v433_v31 = vmul.f32 0.2, %v369_v23 }
  0x1b   : > { %vm402_vm2 = vcmp.ge.f32.partialorder %v370_v24, 0.0  ;;  %vm403_vm3 = vcmp.ge.f32.partialorder %v371_v25, 0.0  ;;  %v434_v32 = vmul.f32 0.2, %v370_v24  ;;  %v435_v33 = vmul.f32 0.2, %v371_v25 }
  0x1c   : > { %v464_v34 = vsel %vm400_vm0, %v368_v22, %v432_v30  ;;  %v465_v35 = vsel %vm401_vm1, %v369_v23, %v433_v31  ;;  %vm404_vm4 = vcmp.ge.f32.partialorder %v372_v26, 0.0  ;;  %vm405_vm5 = vcmp.ge.f32.partialorder %v373_v27, 0.0 }
  0x1d   : > { %v772_v37 = vpack.c.bf16 %v465_v35, %v464_v34  ;;  %v466_v38 = vsel %vm402_vm2, %v370_v24, %v434_v32  ;;  %v467_v39 = vsel %vm403_vm3, %v371_v25, %v435_v33  ;;  %v436_v40 = vmul.f32 0.2, %v372_v26  ;;  %v857_v24 = vld [vmem:[%s1019_s25 + $0x48] sm:$0xff]  }
  0x1e   : > { %v777_v42 = vpack.c.bf16 %v467_v39, %v466_v38  ;;  %v437_v43 = vmul.f32 0.2, %v373_v27  ;;  %vm406_vm6 = vcmp.ge.f32.partialorder %v374_v28, 0.0  ;;  %vm407_vm7 = vcmp.ge.f32.partialorder %v375_v29, 0.0 }
  0x1f   : > { %773 = vst [vmem:[%s1056_s5] sm:$0xff] %v772_v37   ;;  %v468_v44 = vsel %vm404_vm4, %v372_v26, %v436_v40  ;;  %v438_v45 = vmul.f32 0.2, %v374_v28  ;;  %v439_v46 = vmul.f32 0.2, %v375_v29  ;;  %v723_v47 = vunpack.c.l.bf16 %v852_v36 }
  0x20   : > { %864 = vst [vmem:[%s1056_s5 + $0x8] sm:$0xff] %v777_v42   ;;  %v469_v48 = vsel %vm405_vm5, %v373_v27, %v437_v43  ;;  %v724_v49 = vunpack.c.h.bf16 %v852_v36  ;;  %v727_v50 = vunpack.c.l.bf16 %v853_v41  ;;  %v728_v51 = vunpack.c.h.bf16 %v853_v41  ;;  %v858_v36 = vld [vmem:[%s1019_s25 + $0x50] sm:$0xff]  }
  0x21   : > { %v782_v54 = vpack.c.bf16 %v469_v48, %v468_v44  ;;  %v470_v55 = vsel %vm406_vm6, %v374_v28, %v438_v45  ;;  %v471_v56 = vsel %vm407_vm7, %v375_v29, %v439_v46  ;;  %v340_v57 = vmul.f32 %v1024_v0, %v723_v47 }
  0x22   : > { %v787_v58 = vpack.c.bf16 %v471_v56, %v470_v55  ;;  %v341_v59 = vmul.f32 %v1024_v0, %v724_v49  ;;  %v342_v60 = vmul.f32 %v1024_v0, %v727_v50  ;;  %v343_v61 = vmul.f32 %v1024_v0, %v728_v51 }
  0x23   : > { %865 = vst [vmem:[%s1056_s5 + $0x10] sm:$0xff] %v782_v54   ;;  %v376_v62 = vadd.f32 %v1032_v6, %v340_v57  ;;  %v731_v63 = vunpack.c.l.bf16 %v854_v52  ;;  %v732_v1 = vunpack.c.h.bf16 %v854_v52  ;;  %v735_v2 = vunpack.c.l.bf16 %v855_v53 }
  0x24   : > { %866 = vst [vmem:[%s1056_s5 + $0x18] sm:$0xff] %v787_v58   ;;  %v377_v3 = vadd.f32 %v1032_v6, %v341_v59  ;;  %v378_v4 = vadd.f32 %v1032_v6, %v342_v60  ;;  %v379_v5 = vadd.f32 %v1032_v6, %v343_v61  ;;  %v736_v7 = vunpack.c.h.bf16 %v855_v53  ;;  %v859_v59 = vld [vmem:[%s1019_s25 + $0x58] sm:$0xff]  }
  0x25   : > { %vm408_vm8 = vcmp.ge.f32.partialorder %v376_v62, 0.0  ;;  %v440_v8 = vmul.f32 0.2, %v376_v62  ;;  %v344_v9 = vmul.f32 %v1024_v0, %v731_v63  ;;  %v345_v10 = vmul.f32 %v1024_v0, %v732_v1  ;;  %v860_v1 = vld [vmem:[%s1019_s25 + $0x60] sm:$0xff]  }
  0x26   : > { %vm409_vm9 = vcmp.ge.f32.partialorder %v377_v3, 0.0  ;;  %v441_v11 = vmul.f32 0.2, %v377_v3  ;;  %vm410_vm10 = vcmp.ge.f32.partialorder %v378_v4, 0.0  ;;  %vm411_vm11 = vcmp.ge.f32.partialorder %v379_v5, 0.0 }
  0x27   : > { %v472_v12 = vsel %vm408_vm8, %v376_v62, %v440_v8  ;;  %v442_v13 = vmul.f32 0.2, %v378_v4  ;;  %v443_v14 = vmul.f32 0.2, %v379_v5  ;;  %v380_v15 = vadd.f32 %v1032_v6, %v344_v9 }
  0x28   : > { %v473_v16 = vsel %vm409_vm9, %v377_v3, %v441_v11  ;;  %v381_v17 = vadd.f32 %v1032_v6, %v345_v10  ;;  %v346_v18 = vmul.f32 %v1024_v0, %v735_v2  ;;  %v347_v19 = vmul.f32 %v1024_v0, %v736_v7 }
  0x29   : > { %v792_v21 = vpack.c.bf16 %v473_v16, %v472_v12  ;;  %v474_v22 = vsel %vm410_vm10, %v378_v4, %v442_v13  ;;  %v475_v23 = vsel %vm411_vm11, %v379_v5, %v443_v14  ;;  %vm412_vm12 = vcmp.ge.f32.partialorder %v380_v15, 0.0  ;;  %v861_v5 = vld [vmem:[%s1019_s25 + $0x68] sm:$0xff]   ;;  %v862_v14 = vld [vmem:[%s1019_s25 + $0x70] sm:$0xff]  }
  0x2a   : > { %v797_v25 = vpack.c.bf16 %v475_v23, %v474_v22  ;;  %vm413_vm13 = vcmp.ge.f32.partialorder %v381_v17, 0.0  ;;  %v444_v26 = vmul.f32 0.2, %v380_v15  ;;  %v445_v27 = vmul.f32 0.2, %v381_v17 }
  0x2b   : > { %867 = vst [vmem:[%s1056_s5 + $0x20] sm:$0xff] %v792_v21   ;;  %v382_v28 = vadd.f32 %v1032_v6, %v346_v18  ;;  %v383_v29 = vadd.f32 %v1032_v6, %v347_v19  ;;  %v739_v30 = vunpack.c.l.bf16 %v856_v20  ;;  %v740_v31 = vunpack.c.h.bf16 %v856_v20 }
  0x2c   : > { %868 = vst [vmem:[%s1056_s5 + $0x28] sm:$0xff] %v797_v25   ;;  %v476_v32 = vsel %vm412_vm12, %v380_v15, %v444_v26  ;;  %v477_v33 = vsel %vm413_vm13, %v381_v17, %v445_v27  ;;  %v743_v34 = vunpack.c.l.bf16 %v857_v24  ;;  %v744_v35 = vunpack.c.h.bf16 %v857_v24 }
  0x2d   : > { %v802_v37 = vpack.c.bf16 %v477_v33, %v476_v32  ;;  %vm414_vm14 = vcmp.ge.f32.partialorder %v382_v28, 0.0  ;;  %vm415_vm15 = vcmp.ge.f32.partialorder %v383_v29, 0.0  ;;  %v446_v38 = vmul.f32 0.2, %v382_v28 }
  0x2e   : > { %v447_v39 = vmul.f32 0.2, %v383_v29  ;;  %v348_v40 = vmul.f32 %v1024_v0, %v739_v30  ;;  %v349_v41 = vmul.f32 %v1024_v0, %v740_v31  ;;  %v350_v42 = vmul.f32 %v1024_v0, %v743_v34 }
  0x2f   : > { %869 = vst [vmem:[%s1056_s5 + $0x30] sm:$0xff] %v802_v37   ;;  %v478_v43 = vsel %vm414_vm14, %v382_v28, %v446_v38  ;;  %v351_v44 = vmul.f32 %v1024_v0, %v744_v35  ;;  %v747_v45 = vunpack.c.l.bf16 %v858_v36  ;;  %v748_v46 = vunpack.c.h.bf16 %v858_v36 }
  0x30   : > { %v479_v47 = vsel %vm415_vm15, %v383_v29, %v447_v39  ;;  %v384_v48 = vadd.f32 %v1032_v6, %v348_v40  ;;  %v385_v49 = vadd.f32 %v1032_v6, %v349_v41  ;;  %v386_v50 = vadd.f32 %v1032_v6, %v350_v42  ;;  %v863_v42 = vld [vmem:[%s1019_s25 + $0x78] sm:$0xff]  }
  0x31   : > { %v807_v51 = vpack.c.bf16 %v479_v47, %v478_v43  ;;  %v387_v52 = vadd.f32 %v1032_v6, %v351_v44  ;;  %v352_v53 = vmul.f32 %v1024_v0, %v747_v45  ;;  %v353_v54 = vmul.f32 %v1024_v0, %v748_v46 }
  0x32   : > { %vm416_vm0 = vcmp.ge.f32.partialorder %v384_v48, 0.0  ;;  %vm417_vm1 = vcmp.ge.f32.partialorder %v385_v49, 0.0  ;;  %v448_v55 = vmul.f32 0.2, %v384_v48  ;;  %v449_v56 = vmul.f32 0.2, %v385_v49 }
  0x33   : > { %870 = vst [vmem:[%s1056_s5 + $0x38] sm:$0xff] %v807_v51   ;;  %vm418_vm2 = vcmp.ge.f32.partialorder %v386_v50, 0.0  ;;  %vm419_vm3 = vcmp.ge.f32.partialorder %v387_v52, 0.0  ;;  %v450_v57 = vmul.f32 0.2, %v386_v50  ;;  %v388_v58 = vadd.f32 %v1032_v6, %v352_v53 }
  0x34   : > { %v480_v60 = vsel %vm416_vm0, %v384_v48, %v448_v55  ;;  %v481_v61 = vsel %vm417_vm1, %v385_v49, %v449_v56  ;;  %v451_v62 = vmul.f32 0.2, %v387_v52  ;;  %v389_v63 = vadd.f32 %v1032_v6, %v353_v54 }
  0x35   : > { %v812_v2 = vpack.c.bf16 %v481_v61, %v480_v60  ;;  %v482_v3 = vsel %vm418_vm2, %v386_v50, %v450_v57  ;;  %vm420_vm4 = vcmp.ge.f32.partialorder %v388_v58, 0.0  ;;  %v452_v4 = vmul.f32 0.2, %v388_v58 }
  0x36   : > { %v483_v7 = vsel %vm419_vm3, %v387_v52, %v451_v62  ;;  %vm421_vm5 = vcmp.ge.f32.partialorder %v389_v63, 0.0  ;;  %v453_v8 = vmul.f32 0.2, %v389_v63  ;;  %v751_v9 = vunpack.c.l.bf16 %v859_v59 }
  0x37   : > { %871 = vst [vmem:[%s1056_s5 + $0x40] sm:$0xff] %v812_v2   ;;  %v817_v10 = vpack.c.bf16 %v483_v7, %v482_v3  ;;  %v484_v11 = vsel %vm420_vm4, %v388_v58, %v452_v4  ;;  %v752_v12 = vunpack.c.h.bf16 %v859_v59  ;;  %v755_v13 = vunpack.c.l.bf16 %v860_v1 }
  0x38   : > { %v485_v15 = vsel %vm421_vm5, %v389_v63, %v453_v8  ;;  %v354_v16 = vmul.f32 %v1024_v0, %v751_v9  ;;  %v756_v17 = vunpack.c.h.bf16 %v860_v1  ;;  %v759_v18 = vunpack.c.l.bf16 %v861_v5 }
  0x39   : > { %872 = vst [vmem:[%s1056_s5 + $0x48] sm:$0xff] %v817_v10   ;;  %v822_v19 = vpack.c.bf16 %v485_v15, %v484_v11  ;;  %v355_v20 = vmul.f32 %v1024_v0, %v752_v12  ;;  %v356_v21 = vmul.f32 %v1024_v0, %v755_v13  ;;  %v760_v22 = vunpack.c.h.bf16 %v861_v5 }
  0x3a   : > { %v390_v23 = vadd.f32 %v1032_v6, %v354_v16  ;;  %v357_v24 = vmul.f32 %v1024_v0, %v756_v17  ;;  %v358_v25 = vmul.f32 %v1024_v0, %v759_v18  ;;  %v763_v26 = vunpack.c.l.bf16 %v862_v14 }
  0x3b   : > { %873 = vst [vmem:[%s1056_s5 + $0x50] sm:$0xff] %v822_v19   ;;  %v391_v27 = vadd.f32 %v1032_v6, %v355_v20  ;;  %v392_v28 = vadd.f32 %v1032_v6, %v356_v21  ;;  %v359_v29 = vmul.f32 %v1024_v0, %v760_v22  ;;  %v764_v30 = vunpack.c.h.bf16 %v862_v14 }
  0x3c   : > { %vm422_vm6 = vcmp.ge.f32.partialorder %v390_v23, 0.0  ;;  %v454_v31 = vmul.f32 0.2, %v390_v23  ;;  %v393_v32 = vadd.f32 %v1032_v6, %v357_v24  ;;  %v394_v33 = vadd.f32 %v1032_v6, %v358_v25 }
  0x3d   : > { %vm423_vm7 = vcmp.ge.f32.partialorder %v391_v27, 0.0  ;;  %v455_v34 = vmul.f32 0.2, %v391_v27  ;;  %vm424_vm8 = vcmp.ge.f32.partialorder %v392_v28, 0.0  ;;  %v456_v35 = vmul.f32 0.2, %v392_v28 }
  0x3e   : > { %v486_v36 = vsel %vm422_vm6, %v390_v23, %v454_v31  ;;  %vm425_vm9 = vcmp.ge.f32.partialorder %v393_v32, 0.0  ;;  %v457_v37 = vmul.f32 0.2, %v393_v32  ;;  %v395_v38 = vadd.f32 %v1032_v6, %v359_v29 }
  0x3f   : > { %v487_v39 = vsel %vm423_vm7, %v391_v27, %v455_v34  ;;  %v488_v40 = vsel %vm424_vm8, %v392_v28, %v456_v35  ;;  %vm426_vm10 = vcmp.ge.f32.partialorder %v394_v33, 0.0  ;;  %v458_v41 = vmul.f32 0.2, %v394_v33 }
  0x40   : > { %v827_v43 = vpack.c.bf16 %v487_v39, %v486_v36  ;;  %v489_v44 = vsel %vm425_vm9, %v393_v32, %v457_v37  ;;  %vm427_vm11 = vcmp.ge.f32.partialorder %v395_v38, 0.0  ;;  %v459_v45 = vmul.f32 0.2, %v395_v38 }
  0x41   : > { %v832_v46 = vpack.c.bf16 %v489_v44, %v488_v40  ;;  %v490_v47 = vsel %vm426_vm10, %v394_v33, %v458_v41  ;;  %v360_v48 = vmul.f32 %v1024_v0, %v763_v26  ;;  %v361_v49 = vmul.f32 %v1024_v0, %v764_v30 }
  0x42   : > { %874 = vst [vmem:[%s1056_s5 + $0x58] sm:$0xff] %v827_v43   ;;  %v491_v50 = vsel %vm427_vm11, %v395_v38, %v459_v45  ;;  %v767_v51 = vunpack.c.l.bf16 %v863_v42  ;;  %v768_v52 = vunpack.c.h.bf16 %v863_v42 }
  0x43   : > { %875 = vst [vmem:[%s1056_s5 + $0x60] sm:$0xff] %v832_v46   ;;  %v837_v53 = vpack.c.bf16 %v491_v50, %v490_v47  ;;  %v396_v54 = vadd.f32 %v1032_v6, %v360_v48  ;;  %v397_v55 = vadd.f32 %v1032_v6, %v361_v49 }
  0x44   : > { %v362_v56 = vmul.f32 %v1024_v0, %v767_v51  ;;  %v363_v57 = vmul.f32 %v1024_v0, %v768_v52 }
  0x45   : > { %876 = vst [vmem:[%s1056_s5 + $0x68] sm:$0xff] %v837_v53   ;;  %vm428_vm12 = vcmp.ge.f32.partialorder %v396_v54, 0.0  ;;  %vm429_vm13 = vcmp.ge.f32.partialorder %v397_v55, 0.0  ;;  %v460_v58 = vmul.f32 0.2, %v396_v54 }
  0x46   : > { %v461_v59 = vmul.f32 0.2, %v397_v55  ;;  %v398_v60 = vadd.f32 %v1032_v6, %v362_v56  ;;  %v399_v61 = vadd.f32 %v1032_v6, %v363_v57 }
  0x47   : > { %v492_v62 = vsel %vm428_vm12, %v396_v54, %v460_v58 }
  0x48   : > { %v493_v63 = vsel %vm429_vm13, %v397_v55, %v461_v59  ;;  %vm430_vm14 = vcmp.ge.f32.partialorder %v398_v60, 0.0  ;;  %vm431_vm15 = vcmp.ge.f32.partialorder %v399_v61, 0.0  ;;  %v462_v1 = vmul.f32 0.2, %v398_v60 }
  0x49   : > { %v842_v2 = vpack.c.bf16 %v493_v63, %v492_v62  ;;  %v463_v3 = vmul.f32 0.2, %v399_v61 }
  0x4a   : > { %v494_v4 = vsel %vm430_vm14, %v398_v60, %v462_v1 }
  0x4b   : > { %877 = vst [vmem:[%s1056_s5 + $0x70] sm:$0xff] %v842_v2   ;;  %v495_v0 = vsel %vm431_vm15, %v399_v61, %v463_v3 }
  0x4c   : > { %v847_v5 = vpack.c.bf16 %v495_v0, %v494_v4 }
  0x4e   : > { %878 = vst [vmem:[%s1056_s5 + $0x78] sm:$0xff] %v847_v5  }
  0x4f PF: > { %s13_s16 = sadd.s32 1, %s959_s16   ;;  %s1154_s12 = smov %s951_s14 }
  0x50   : > { %p10_p7 = scmp.ge.s32.totalorder %s13_s16, 10   ;;  %s1155_s13 = smov %s955_s15 }
  0x51   : > { %s1156_s14 = smov %s1159_s17  ;;  %s1157_s15 = smov %s1163_s18 }
  0x52   :  { %12 = sbr.rel (!%p10_p7) target bundleno = 3 (0x3), region = 68 }

// kernel: _lambda_.22
= control target key start
LH: loop header
LB: loop body
LE: loop exit
PB: predicated region body
PF: predicated region fallthrough
CT: control target
= control target key end

     0   :  { %s2002_s15 = smov 0   ;;  %s2004_s16 = smov 0   ;;  %s2360_s0 = inlined_call_operand.vmem [shape: bf16[1,2048,288], index: 0, kind: input, shape index: {}]   ;;  %s2361_s1 = inlined_call_operand.vmem [shape: bf16[1,288,128], index: 1, kind: input, shape index: {}]   ;;  %s2362_s2 = inlined_call_operand.vmem [shape: f32[1,128], index: 2, kind: input, shape index: {}]   ;;  %s2363_s3 = inlined_call_operand.vmem [shape: bf16[1,2048,128], index: 3, kind: output, shape index: {0}]   ;;  %s2364_s4 = inlined_call_operand.vmem [shape: f32[8,2,128], index: 4, kind: output, shape index: {1}]  }
   0x1   :  { %s2006_s17 = smov 0  }
   0x2 LB: > { %s30_s18 = sadd.s32 1, %s1971_s16  ;;  %p1460_p0 = scmp.ge.s32.totalorder %s1975_s17, 1  ;;  %s1975_s17 = sphi %s2006_s17, %s15_s17   ;;  %s1971_s16 = sphi %s2004_s16, %s2366_s16   ;;  %s1967_s15 = sphi %s2002_s15, %s2365_s15  }
   0x3   : > { %p32_p1 = scmp.ge.s32.totalorder %s30_s18, 8  ;;  %p225_p2 = scmp.lt.s32.totalorder %s1975_s17, 9 }
   0x5   : > { %s2368_s18 = smov (%p32_p1, %s30_s18), 0  ;;  %p226_p3 = pnand %p1460_p0, %p225_p2 }
   0x6   : > { %s1461_s25 = sshll.u32 (!%p226_p3), %s1967_s15, 5  ;;  %p320_p5 = scmp.lt.s32.totalorder (!%p226_p3), %s1967_s15, 7 }
   0x7   : > { %229 = sbr.rel (%p226_p3) target bundleno = 398 (0x18e), region = 32  ;;  %p286_p4 = scmp.lt.s32.totalorder (!%p226_p3), %s1461_s25, 255 }
   0xc   : > { %v1803_v0 = vld [vmem:[%s2361_s1 + $0x38] sm:$0xff]  ;;  %v2033_v2 = vld [vmem:[%s2361_s1 + $0x88] sm:$0xff]  ;;  %v1802_v3 = vld [vmem:[%s2361_s1 + $0x30] sm:$0xff]  ;;  %s2370_s25 = smov (!%p286_p4, %s1461_s25), 255  ;;  %vm782_vm0 = vcmask 261120   ;;  %s2372_s15 = smov (!%p320_p5, %s1967_s15), 7 }
   0xd   : > { %v2028_v1 = vld [vmem:[%s2361_s1 + $0x78] sm:$0xff]  ;;  %831 = vmatpush.bf16.msra.mxu0 %v1803_v0  ;;  %1909 = vmatpush.bf16.msra.mxu3 %v1803_v0  ;;  %v1810_v4 = vld [vmem:[%s2361_s1 + $0x70] sm:$0xff]  ;;  %v2047_v5 = vld [vmem:[%s2361_s1 + $0x80] sm:$0xff]  ;;  %s1927_s6 = smul.u32 12, %s2370_s25  ;;  %s1464_s20 = sshll.u32 %s2370_s25, 2  ;;  %vm1268_vm1 = vcmask 1040384  }
   0xe   : > { %920 = vmatpush.bf16.msra.mxu1 %v2028_v1  ;;  %1015 = vmatpush.bf16.msra.mxu2 %v2033_v2  ;;  %v1801_v6 = vld [vmem:[%s2361_s1 + $0x28] sm:$0xff]  ;;  %v1800_v11 = vld [vmem:[%s2361_s1 + $0x20] sm:$0xff]  ;;  %v1799_v13 = vld [vmem:[%s2361_s1 + $0x18] sm:$0xff]  ;;  %s2204_s23 = scalar_lea.vmem %s2363_s3, %s1464_s20  ;;  %s1465_s25 = sshll.u32 %s2372_s15, 1 }
   0xf   : > { %v1809_v7 = vld [vmem:[%s2361_s1 + $0x68] sm:$0xff]  ;;  %s2062_s13 = scalar_lea.vmem %s2360_s0, %s1927_s6  ;;  %v1808_v12 = vld [vmem:[%s2361_s1 + $0x60] sm:$0xff]  ;;  %v1807_v14 = vld [vmem:[%s2361_s1 + $0x58] sm:$0xff]  ;;  %s326_s26 = scalar_lea.vmem %s2364_s4, %s1465_s25 }
  0x10   : > { %v1476_v8 = vld [vmem:[%s2062_s13 + $0x8] sm:$0xf]  ;;  %v1750_v9 = vld [vmem:[%s2062_s13 + $0x10] sm:$0xf0]  ;;  %v1488_v17 = vld [vmem:[%s2062_s13 + $0x20] sm:$0xf] }
  0x11   : > { %832 = vmatpush.bf16.msra.mxu0 %v1802_v3  ;;  %1910 = vmatpush.bf16.msra.mxu3 %v1802_v3  ;;  %v1477_v10 = vor.u32 %v1750_v9, %v1476_v8  ;;  %v1798_v15 = vld [vmem:[%s2361_s1 + $0x10] sm:$0xff]  ;;  %v1753_v18 = vld [vmem:[%s2062_s13 + $0x28] sm:$0xf0]  ;;  %v1796_v22 = vld [vmem:[%s2361_s1] sm:$0xff] }
  0x12   : > { %921 = vmatpush.bf16.msra.mxu1 %v1810_v4  ;;  %1016 = vmatpush.bf16.msra.mxu2 %v2047_v5  ;;  %v1806_v16 = vld [vmem:[%s2361_s1 + $0x50] sm:$0xff]  ;;  %v1797_v19 = vld [vmem:[%s2361_s1 + $0x8] sm:$0xff]  ;;  %v1489_v21 = vor.u32 %v1753_v18, %v1488_v17  ;;  %v1468_v23 = vld [vmem:[%s2062_s13] sm:$0xf] }
  0x13   : > { %v1805_v20 = vld [vmem:[%s2361_s1 + $0x48] sm:$0xff]  ;;  %v1612_v25 = vld [vmem:[%s2062_s13 + $0x120] sm:$0xf]  ;;  %v1748_v28 = vld [vmem:[%s2062_s13 + $0x4] sm:$0xf] }
  0x14   : > { %v1749_v24 = vld [vmem:[%s2062_s13 + $0x8] sm:$0xf0]  ;;  %v1804_v27 = vld [vmem:[%s2361_s1 + $0x40] sm:$0xff]  ;;  %v1470_v29 = vld [vmem:[%s2062_s13 + $0xc] sm:$0xf0] }
  0x15   : > { %833 = vmatpush.bf16.msra.mxu0 %v1801_v6  ;;  %1911 = vmatpush.bf16.msra.mxu3 %v1801_v6  ;;  %v1785_v26 = vld [vmem:[%s2062_s13 + $0x128] sm:$0xf0]  ;;  %v1469_v30 = vor.u32 %v1749_v24, %v1468_v23  ;;  %v1473_v32 = vor.u32 %v1748_v28, %v1470_v29  ;;  %v1500_v33 = vld [vmem:[%s2062_s13 + $0x38] sm:$0xf]  ;;  %v1756_v34 = vld [vmem:[%s2062_s13 + $0x40] sm:$0xf0] }
  0x16   : > { %922 = vmatpush.bf16.msra.mxu1 %v1809_v7  ;;  %1730 = vmatmul.msk.bf16.vlgmr.msra.gmra.mxu2 %vm782_vm0, %v1477_v10  ;;  %v1613_v31 = vor.u32 %v1785_v26, %v1612_v25  ;;  %v1501_v35 = vor.u32 %v1756_v34, %v1500_v33  ;;  %v1480_v36 = vld [vmem:[%s2062_s13 + $0x18] sm:$0xf]  ;;  %v1752_v37 = vld [vmem:[%s2062_s13 + $0x20] sm:$0xf0]  ;;  %v1751_v40 = vld [vmem:[%s2062_s13 + $0x1c] sm:$0xf] }
  0x17   : > { %v1624_v38 = vld [vmem:[%s2062_s13 + $0x138] sm:$0xf]  ;;  %v1788_v39 = vld [vmem:[%s2062_s13 + $0x140] sm:$0xf0]  ;;  %v1482_v41 = vld [vmem:[%s2062_s13 + $0x24] sm:$0xf0]  ;;  %v1481_v42 = vor.u32 %v1752_v37, %v1480_v36 }
  0x18   : > { %v1625_v43 = vor.u32 %v1788_v39, %v1624_v38  ;;  %v1485_v44 = vor.u32 %v1751_v40, %v1482_v41  ;;  %v1512_v45 = vld [vmem:[%s2062_s13 + $0x50] sm:$0xf]  ;;  %v1759_v46 = vld [vmem:[%s2062_s13 + $0x58] sm:$0xf0]  ;;  %v1754_v52 = vld [vmem:[%s2062_s13 + $0x34] sm:$0xf] }
  0x19   : > { %834 = vmatpush.bf16.msra.mxu0 %v1800_v11  ;;  %1912 = vmatpush.bf16.msra.mxu3 %v1800_v11  ;;  %v1513_v47 = vor.u32 %v1759_v46, %v1512_v45  ;;  %v1492_v48 = vld [vmem:[%s2062_s13 + $0x30] sm:$0xf]  ;;  %v1755_v49 = vld [vmem:[%s2062_s13 + $0x38] sm:$0xf0]  ;;  %v1494_v53 = vld [vmem:[%s2062_s13 + $0x3c] sm:$0xf0] }
  0x1a   : > { %923 = vmatpush.bf16.msra.mxu1 %v1808_v12  ;;  %v1636_v50 = vld [vmem:[%s2062_s13 + $0x150] sm:$0xf]  ;;  %v1791_v51 = vld [vmem:[%s2062_s13 + $0x158] sm:$0xf0]  ;;  %v1493_v54 = vor.u32 %v1755_v49, %v1492_v48  ;;  %v1497_v56 = vor.u32 %v1754_v52, %v1494_v53  ;;  %v1524_v57 = vld [vmem:[%s2062_s13 + $0x68] sm:$0xf] }
  0x1b   : > { %v1637_v55 = vor.u32 %v1791_v51, %v1636_v50  ;;  %v1762_v58 = vld [vmem:[%s2062_s13 + $0x70] sm:$0xf0]  ;;  %v1504_v60 = vld [vmem:[%s2062_s13 + $0x48] sm:$0xf]  ;;  %v1757_v0 = vld [vmem:[%s2062_s13 + $0x4c] sm:$0xf] }
  0x1c   : > { %v1525_v59 = vor.u32 %v1762_v58, %v1524_v57  ;;  %v1758_v61 = vld [vmem:[%s2062_s13 + $0x50] sm:$0xf0]  ;;  %v1648_v62 = vld [vmem:[%s2062_s13 + $0x168] sm:$0xf]  ;;  %v1765_v6 = vld [vmem:[%s2062_s13 + $0x88] sm:$0xf0] }
  0x1d   : > { %835 = vmatpush.bf16.msra.mxu0 %v1799_v13  ;;  %1913 = vmatpush.bf16.msra.mxu3 %v1799_v13  ;;  %v1794_v63 = vld [vmem:[%s2062_s13 + $0x170] sm:$0xf0]  ;;  %v1516_v8 = vld [vmem:[%s2062_s13 + $0x60] sm:$0xf]  ;;  %v1761_v9 = vld [vmem:[%s2062_s13 + $0x68] sm:$0xf0] }
  0x1e   : > { %924 = vmatpush.bf16.msra.mxu1 %v1807_v14  ;;  %v1649_v3 = vor.u32 %v1794_v63, %v1648_v62  ;;  %v1784_v10 = vld [vmem:[%s2062_s13 + $0x124] sm:$0xf]  ;;  %v1614_v11 = vld [vmem:[%s2062_s13 + $0x12c] sm:$0xf0]  ;;  %v1548_v17 = vld [vmem:[%s2062_s13 + $0x98] sm:$0xf] }
  0x1f   : > { %v1518_v13 = vld [vmem:[%s2062_s13 + $0x6c] sm:$0xf0]  ;;  %v1768_v18 = vld [vmem:[%s2062_s13 + $0xa0] sm:$0xf0]  ;;  %v1626_v23 = vld [vmem:[%s2062_s13 + $0x144] sm:$0xf0] }
  0x20   : > { %v1763_v24 = vld [vmem:[%s2062_s13 + $0x7c] sm:$0xf]  ;;  %v1530_v25 = vld [vmem:[%s2062_s13 + $0x84] sm:$0xf0]  ;;  %v1560_v29 = vld [vmem:[%s2062_s13 + $0xb0] sm:$0xf] }
  0x21   : > { %836 = vmatpush.bf16.msra.mxu0 %v1798_v15  ;;  %1914 = vmatpush.bf16.msra.mxu3 %v1798_v15  ;;  %v1617_v15 = vor.u32 %v1784_v10, %v1614_v11  ;;  %v1533_v28 = vor.u32 %v1763_v24, %v1530_v25  ;;  %v1767_v33 = vld [vmem:[%s2062_s13 + $0x98] sm:$0xf0]  ;;  %v1790_v34 = vld [vmem:[%s2062_s13 + $0x154] sm:$0xf]  ;;  %v1542_v37 = vld [vmem:[%s2062_s13 + $0x9c] sm:$0xf0] }
  0x22   : > { %925 = vmatpush.bf16.msra.mxu1 %v1806_v16  ;;  %v1766_v36 = vld [vmem:[%s2062_s13 + $0x94] sm:$0xf]  ;;  %v1572_v41 = vld [vmem:[%s2062_s13 + $0xc8] sm:$0xf]  ;;  %v1793_v46 = vld [vmem:[%s2062_s13 + $0x16c] sm:$0xf] }
  0x23   : > { %v1545_v40 = vor.u32 %v1766_v36, %v1542_v37  ;;  %v1770_v45 = vld [vmem:[%s2062_s13 + $0xb0] sm:$0xf0]  ;;  %v1769_v48 = vld [vmem:[%s2062_s13 + $0xac] sm:$0xf]  ;;  %v1554_v49 = vld [vmem:[%s2062_s13 + $0xb4] sm:$0xf0] }
  0x24   : > { %v1557_v53 = vor.u32 %v1769_v48, %v1554_v49  ;;  %v1564_v58 = vld [vmem:[%s2062_s13 + $0xc0] sm:$0xf]  ;;  %v1772_v62 = vld [vmem:[%s2062_s13 + $0xc4] sm:$0xf]  ;;  %v1566_v63 = vld [vmem:[%s2062_s13 + $0xcc] sm:$0xf0] }
  0x25   : > { %837 = vmatpush.bf16.msra.mxu0 %v1797_v19  ;;  %1915 = vmatpush.bf16.msra.mxu3 %v1797_v19  ;;  %v1549_v19 = vor.u32 %v1768_v18, %v1548_v17  ;;  %v1780_v10 = vld [vmem:[%s2062_s13 + $0x100] sm:$0xf0]  ;;  %v1576_v17 = vld [vmem:[%s2062_s13 + $0xd8] sm:$0xf]  ;;  %v1775_v24 = vld [vmem:[%s2062_s13 + $0xdc] sm:$0xf] }
  0x26   : > { %926 = vmatpush.bf16.msra.mxu1 %v1805_v20  ;;  %1731 = vmatmul.msk.bf16.gmra.mxu2 %vm782_vm0, %v1489_v21  ;;  %v1764_v21 = vld [vmem:[%s2062_s13 + $0x80] sm:$0xf0]  ;;  %v1578_v25 = vld [vmem:[%s2062_s13 + $0xe4] sm:$0xf0] }
  0x29   : > { %838 = vmatpush.bf16.msra.mxu0 %v1796_v22  ;;  %1916 = vmatpush.bf16.msra.mxu3 %v1796_v22  ;;  %v1787_v22 = vld [vmem:[%s2062_s13 + $0x13c] sm:$0xf] }
  0x2a   : > { %927 = vmatpush.bf16.msra.mxu1 %v1804_v27 }
  0x2c   : > { %839 = vmatmul.bf16.vlgmr.msra.gmra.mxu0 %v1469_v30  ;;  %899 = vmatmul.bf16.vlgmr.msra.gmra.mxu3 %v1613_v31  ;;  %v1771_v30 = vld [vmem:[%s2062_s13 + $0xb8] sm:$0xf0] }
  0x2d   : > { %1917 = vmatpush.bf16.msrb.mxu3 %v2028_v1  ;;  %928 = vmatmul.bf16.vlgmr.msra.gmra.mxu1 %v1473_v32  ;;  %v1506_v1 = vld [vmem:[%s2062_s13 + $0x54] sm:$0xf0]  ;;  %v1561_v31 = vor.u32 %v1771_v30, %v1560_v29  ;;  %v1540_v32 = vld [vmem:[%s2062_s13 + $0x90] sm:$0xf] }
  0x2e   : > { %v1541_v38 = vor.u32 %v1767_v33, %v1540_v32 }
  0x31   : > { %1918 = vmatpush.bf16.msrb.mxu3 %v1810_v4  ;;  %v1509_v4 = vor.u32 %v1757_v0, %v1506_v1  ;;  %v2184_v0 = vld [vmem:[%s2362_s2] ss:$0 sm:$0xff] }
  0x35   : > { %1919 = vmatpush.bf16.msrb.mxu3 %v1809_v7 }
  0x36   : > { %1732 = vmatmul.msk.bf16.gmra.mxu2 %vm782_vm0, %v1501_v35  ;;  %v1638_v35 = vld [vmem:[%s2062_s13 + $0x15c] sm:$0xf0] }
  0x37   : > { %v1641_v39 = vor.u32 %v1790_v34, %v1638_v35  ;;  %v1581_v35 = vor.u32 %v1775_v24, %v1578_v25  ;;  %v1781_v24 = vld [vmem:[%s2062_s13 + $0x10c] sm:$0xf]  ;;  %v1602_v25 = vld [vmem:[%s2062_s13 + $0x114] sm:$0xf0] }
  0x39   : > { %1920 = vmatpush.bf16.msrb.mxu3 %v1808_v12  ;;  %v1760_v12 = vld [vmem:[%s2062_s13 + $0x64] sm:$0xf] }
  0x3c   : > { %844 = vmatmul.bf16.gmra.mxu0 %v1481_v42  ;;  %904 = vmatmul.bf16.gmra.mxu3 %v1625_v43  ;;  %v1774_v42 = vld [vmem:[%s2062_s13 + $0xd0] sm:$0xf0] }
  0x3d   : > { %1921 = vmatpush.bf16.msrb.mxu3 %v1807_v14  ;;  %933 = vmatmul.bf16.gmra.mxu1 %v1485_v44  ;;  %v1517_v14 = vor.u32 %v1761_v9, %v1516_v8  ;;  %v1573_v43 = vor.u32 %v1774_v42, %v1572_v41  ;;  %v1552_v44 = vld [vmem:[%s2062_s13 + $0xa8] sm:$0xf]  ;;  %v1596_v9 = vld [vmem:[%s2062_s13 + $0xf8] sm:$0xf]  ;;  %v1608_v42 = vld [vmem:[%s2062_s13 + $0x110] sm:$0xf] }
  0x3e   : > { %v1553_v50 = vor.u32 %v1770_v45, %v1552_v44 }
  0x41   : > { %1922 = vmatpush.bf16.msrb.mxu3 %v1806_v16  ;;  %v1521_v16 = vor.u32 %v1760_v12, %v1518_v13 }
  0x45   : > { %1923 = vmatpush.bf16.msrb.mxu3 %v1805_v20  ;;  %v1528_v20 = vld [vmem:[%s2062_s13 + $0x78] sm:$0xf] }
  0x46   : > { %1733 = vmatmul.msk.bf16.gmra.mxu2 %vm782_vm0, %v1513_v47  ;;  %v1529_v26 = vor.u32 %v1764_v21, %v1528_v20  ;;  %v1650_v47 = vld [vmem:[%s2062_s13 + $0x174] sm:$0xf0]  ;;  %v1776_v20 = vld [vmem:[%s2062_s13 + $0xe0] sm:$0xf0]  ;;  %v1656_v21 = vld [vmem:[%s2062_s13 + $0x170] sm:$0xf] }
  0x47   : > { %v1653_v51 = vor.u32 %v1793_v46, %v1650_v47 }
  0x49   : > { %1924 = vmatpush.bf16.msrb.mxu3 %v1804_v27  ;;  %v1629_v27 = vor.u32 %v1787_v22, %v1626_v23  ;;  %v1795_v22 = vld [vmem:[%s2062_s13 + $0x178] sm:$0xf0] }
  0x4c   : > { %849 = vmatmul.bf16.gmra.mxu0 %v1493_v54  ;;  %909 = vmatmul.bf16.gmra.mxu3 %v1637_v55  ;;  %v1584_v54 = vld [vmem:[%s2062_s13 + $0xe0] sm:$0xf]  ;;  %v1777_v55 = vld [vmem:[%s2062_s13 + $0xe8] sm:$0xf0] }
  0x4d   : > { %1925 = vmatpush.bf16.msra.mxu3 %v2033_v2  ;;  %938 = vmatmul.bf16.gmra.mxu1 %v1497_v56  ;;  %v1505_v2 = vor.u32 %v1758_v61, %v1504_v60  ;;  %v1585_v57 = vor.u32 %v1777_v55, %v1584_v54  ;;  %v1644_v60 = vld [vmem:[%s2062_s13 + $0x158] sm:$0xf]  ;;  %v1792_v61 = vld [vmem:[%s2062_s13 + $0x160] sm:$0xf0]  ;;  %v1779_v54 = vld [vmem:[%s2062_s13 + $0xf8] sm:$0xf0] }
  0x51   : > { %1926 = vmatpush.bf16.msra.mxu3 %v2047_v5  ;;  %v1536_v5 = vld [vmem:[%s2062_s13 + $0x80] sm:$0xf] }
  0x52   : > { %v1537_v7 = vor.u32 %v1765_v6, %v1536_v5  ;;  %v1569_v5 = vor.u32 %v1772_v62, %v1566_v63 }
  0x56   : > { %1734 = vmatmul.msk.bf16.gmra.mxu2 %vm782_vm0, %v1525_v59  ;;  %v1773_v59 = vld [vmem:[%s2062_s13 + $0xc8] sm:$0xf0] }
  0x57   : > { %v1565_v1 = vor.u32 %v1773_v59, %v1564_v58 }
  0x5c   : > { %854 = vmatmul.bf16.gmra.mxu0 %v1505_v2  ;;  %914 = vmatmul.bf16.gmra.mxu3 %v1649_v3  ;;  %v1645_v2 = vor.u32 %v1792_v61, %v1644_v60 }
  0x5d   : > { %943 = vmatmul.bf16.gmra.mxu1 %v1509_v4 }
  0x66   : > { %1735 = vmatmul.msk.bf16.gmra.mxu2 %vm782_vm0, %v1537_v7 }
  0x6c   : > { %859 = vmatmul.bf16.gmra.mxu0 %v1517_v14  ;;  %988 = vmatmul.bf16.vlgmr.msrb.gmra.mxu3 %v1617_v15 }
  0x6d   : > { %948 = vmatmul.bf16.gmra.mxu1 %v1521_v16  ;;  %v1597_v16 = vor.u32 %v1780_v10, %v1596_v9  ;;  %v1620_v10 = vld [vmem:[%s2062_s13 + $0x128] sm:$0xf] }
  0x76   : > { %1736 = vmatmul.msk.bf16.gmra.mxu2 %vm782_vm0, %v1549_v19 }
  0x7c   : > { %864 = vmatmul.bf16.gmra.mxu0 %v1529_v26  ;;  %993 = vmatmul.bf16.gmra.mxu3 %v1629_v27  ;;  %v1577_v27 = vor.u32 %v1776_v20, %v1576_v17 }
  0x7d   : > { %953 = vmatmul.bf16.gmra.mxu1 %v1533_v28  ;;  %v1657_v28 = vor.u32 %v1795_v22, %v1656_v21  ;;  %v1600_v21 = vld [vmem:[%s2062_s13 + $0x108] sm:$0xf]  ;;  %v1782_v22 = vld [vmem:[%s2062_s13 + $0x110] sm:$0xf0] }
  0x86   : > { %1737 = vmatmul.msk.bf16.gmra.mxu2 %vm782_vm0, %v1561_v31 }
  0x8c   : > { %869 = vmatmul.bf16.gmra.mxu0 %v1541_v38  ;;  %998 = vmatmul.bf16.gmra.mxu3 %v1641_v39 }
  0x8d   : > { %958 = vmatmul.bf16.gmra.mxu1 %v1545_v40 }
  0x96   : > { %1738 = vmatmul.msk.bf16.gmra.mxu2 %vm782_vm0, %v1573_v43  ;;  %v1783_v43 = vld [vmem:[%s2062_s13 + $0x118] sm:$0xf0] }
  0x99   : > { %v1018_v52 = vpop.f32.mrf.mxu2 }
  0x9c   : > { %874 = vmatmul.bf16.gmra.mxu0 %v1553_v50  ;;  %1003 = vmatmul.bf16.gmra.mxu3 %v1653_v51  ;;  %v1609_v51 = vor.u32 %v1783_v43, %v1608_v42  ;;  %v1632_v42 = vld [vmem:[%s2062_s13 + $0x140] sm:$0xf]  ;;  %v1789_v43 = vld [vmem:[%s2062_s13 + $0x148] sm:$0xf0] }
  0x9d   : > { %963 = vmatmul.bf16.gmra.mxu1 %v1557_v53  ;;  %v1588_v53 = vld [vmem:[%s2062_s13 + $0xf0] sm:$0xf] }
  0x9e   : > { %v1589_v62 = vor.u32 %v1779_v54, %v1588_v53 }
  0xa1   : > { %v1020_v56 = vpop.f32.mrf.mxu2 }
  0xa6   : > { %1739 = vmatmul.msk.bf16.gmra.mxu2 %vm782_vm0, %v1585_v57  ;;  %v1590_v57 = vld [vmem:[%s2062_s13 + $0xfc] sm:$0xf0] }
  0xa9   : > { %v1023_v3 = vpop.f32.mrf.mxu2  ;;  %v840_v4 = vpop.f32.mrf.mxu0 }
  0xaa   : > { %v929_v6 = vpop.f32.mrf.mxu1  ;;  %v841_v7 = vadd.f32 %v2184_v0, %v840_v4 }
  0xac   : > { %879 = vmatmul.bf16.gmra.mxu0 %v1565_v1  ;;  %1744 = vmatmul.msk.bf16.vlgmr.msra.gmra.mxu3 %vm782_vm0, %v1645_v2  ;;  %v930_v11 = vadd.f32 %v929_v6, %v841_v7 }
  0xad   : > { %968 = vmatmul.bf16.gmra.mxu1 %v1569_v5 }
  0xae   : > { %v1019_v18 = vadd.f32 %v1018_v52, %v930_v11  ;;  %v1786_v11 = vld [vmem:[%s2062_s13 + $0x130] sm:$0xf0] }
  0xaf   : > { %v2188_v8 = vpop.f32.mrf.mxu3 }
  0xb0   : > { %v1199_v29 = vmul.f32 %v1019_v18, %v1019_v18 }
  0xb1   : > { %v1025_v12 = vpop.f32.mrf.mxu2  ;;  %v842_v13 = vpop.f32.mrf.mxu0 }
  0xb2   : > { %v843_v14 = vadd.f32 %v2184_v0, %v842_v13  ;;  %v931_v15 = vpop.f32.mrf.mxu1 }
  0xb4   : > { %v932_v19 = vadd.f32 %v931_v15, %v843_v14 }
  0xb6   : > { %v1021_v23 = vadd.f32 %v1020_v56, %v932_v19  ;;  %1740 = vmatmul.msk.bf16.gmra.mxu2 %vm782_vm0, %v1597_v16  ;;  %v1778_v56 = vld [vmem:[%s2062_s13 + $0xf4] sm:$0xf]  ;;  %v1621_v19 = vor.u32 %v1786_v11, %v1620_v10 }
  0xb7   : > { %v2206_v26 = vpop.f32.mrf.mxu3  ;;  %v1593_v2 = vor.u32 %v1778_v56, %v1590_v57 }
  0xb8   : > { %v1817_v30 = vpack.c.bf16 %v1021_v23, %v1019_v18  ;;  %v1162_v31 = vadd.f32 %v1021_v23, %v1019_v18  ;;  %v1200_v32 = vmul.f32 %v1021_v23, %v1021_v23 }
  0xb9   : > { %v1028_v33 = vpop.f32.mrf.mxu2  ;;  %v845_v34 = vpop.f32.mrf.mxu0 }
  0xba   : > { %1818 = vst [vmem:[%s2204_s23] sm:$0xff] %v1817_v30   ;;  %v1231_v36 = vadd.f32 %v1200_v32, %v1199_v29  ;;  %v846_v37 = vadd.f32 %v2184_v0, %v845_v34  ;;  %v934_v38 = vpop.f32.mrf.mxu1  ;;  %v1605_v34 = vor.u32 %v1781_v24, %v1602_v25 }
  0xbc   : > { %v935_v39 = vadd.f32 %v934_v38, %v846_v37  ;;  %884 = vmatmul.bf16.gmra.mxu0 %v1577_v27  ;;  %1745 = vmatmul.msk.bf16.gmra.mxu3 %vm782_vm0, %v1657_v28 }
  0xbd   : > { %973 = vmatmul.bf16.gmra.mxu1 %v1581_v35 }
  0xbe   : > { %v1024_v40 = vadd.f32 %v1023_v3, %v935_v39 }
  0xbf   : > { %v2211_v41 = vpop.f32.mrf.mxu3 }
  0xc0   : > { %v1163_v44 = vadd.f32 %v1162_v31, %v1024_v40  ;;  %v1201_v45 = vmul.f32 %v1024_v40, %v1024_v40  ;;  %v1601_v31 = vor.u32 %v1782_v22, %v1600_v21 }
  0xc1   : > { %v1030_v46 = vpop.f32.mrf.mxu2  ;;  %v847_v47 = vpop.f32.mrf.mxu0 }
  0xc2   : > { %v1232_v48 = vadd.f32 %v1231_v36, %v1201_v45  ;;  %v848_v49 = vadd.f32 %v2184_v0, %v847_v47  ;;  %v936_v50 = vpop.f32.mrf.mxu1 }
  0xc4   : > { %v937_v52 = vadd.f32 %v936_v50, %v848_v49 }
  0xc6   : > { %v1026_v55 = vadd.f32 %v1025_v12, %v937_v52  ;;  %1741 = vmatmul.msk.bf16.gmra.mxu2 %vm782_vm0, %v1609_v51  ;;  %v1633_v51 = vor.u32 %v1789_v43, %v1632_v42 }
  0xc7   : > { %v2221_v58 = vpop.f32.mrf.mxu3 }
  0xc8   : > { %v1822_v59 = vpack.c.bf16 %v1026_v55, %v1024_v40  ;;  %v1164_v60 = vadd.f32 %v1163_v44, %v1026_v55  ;;  %v1202_v61 = vmul.f32 %v1026_v55, %v1026_v55  ;;  %v908_v43 = vadd.f32 %v2184_v0, %v2221_v58 }
  0xc9   : > { %v1033_v63 = vpop.f32.mrf.mxu2  ;;  %v850_v1 = vpop.f32.mrf.mxu0 }
  0xca   : > { %1894 = vst [vmem:[%s2204_s23 + $0x8] sm:$0xff] %v1822_v59   ;;  %v1233_v3 = vadd.f32 %v1232_v48, %v1202_v61  ;;  %v851_v4 = vadd.f32 %v2184_v0, %v850_v1  ;;  %v939_v5 = vpop.f32.mrf.mxu1 }
  0xcc   : > { %v940_v6 = vadd.f32 %v939_v5, %v851_v4  ;;  %889 = vmatmul.bf16.gmra.mxu0 %v1589_v62 }
  0xcd   : > { %978 = vmatmul.bf16.gmra.mxu1 %v1593_v2  ;;  %v901_v2 = vadd.f32 %v2184_v0, %v2188_v8 }
  0xce   : > { %v1029_v7 = vadd.f32 %v1028_v33, %v940_v6 }
  0xcf   : > { %v2225_v9 = vpop.f32.mrf.mxu3 }
  0xd0   : > { %v1165_v12 = vadd.f32 %v1164_v60, %v1029_v7  ;;  %v1203_v13 = vmul.f32 %v1029_v7, %v1029_v7 }
  0xd1   : > { %v1035_v14 = vpop.f32.mrf.mxu2  ;;  %v852_v15 = vpop.f32.mrf.mxu0 }
  0xd2   : > { %v1234_v16 = vadd.f32 %v1233_v3, %v1203_v13  ;;  %v853_v17 = vadd.f32 %v2184_v0, %v852_v15  ;;  %v941_v18 = vpop.f32.mrf.mxu1 }
  0xd4   : > { %v942_v20 = vadd.f32 %v941_v18, %v853_v17 }
  0xd6   : > { %v1031_v23 = vadd.f32 %v1030_v46, %v942_v20  ;;  %1742 = vmatmul.msk.bf16.gmra.mxu2 %vm782_vm0, %v1621_v19 }
  0xd7   : > { %v2235_v27 = vpop.f32.mrf.mxu3 }
  0xd8   : > { %v1827_v28 = vpack.c.bf16 %v1031_v23, %v1029_v7  ;;  %v1166_v29 = vadd.f32 %v1165_v12, %v1031_v23  ;;  %v1204_v30 = vmul.f32 %v1031_v23, %v1031_v23 }
  0xd9   : > { %v1038_v32 = vpop.f32.mrf.mxu2  ;;  %v855_v33 = vpop.f32.mrf.mxu0 }
  0xda   : > { %1895 = vst [vmem:[%s2204_s23 + $0x10] sm:$0xff] %v1827_v28   ;;  %v1235_v35 = vadd.f32 %v1234_v16, %v1204_v30  ;;  %v856_v36 = vadd.f32 %v2184_v0, %v855_v33  ;;  %v944_v37 = vpop.f32.mrf.mxu1  ;;  %v903_v16 = vadd.f32 %v2184_v0, %v2206_v26  ;;  %v906_v30 = vadd.f32 %v2184_v0, %v2211_v41 }
  0xdc   : > { %v945_v38 = vadd.f32 %v944_v37, %v856_v36  ;;  %894 = vmatmul.bf16.gmra.mxu0 %v1601_v31 }
  0xdd   : > { %983 = vmatmul.bf16.gmra.mxu1 %v1605_v34 }
  0xde   : > { %v1034_v39 = vadd.f32 %v1033_v63, %v945_v38 }
  0xdf   : > { %v2239_v40 = vpop.f32.mrf.mxu3 }
  0xe0   : > { %v1167_v44 = vadd.f32 %v1166_v29, %v1034_v39  ;;  %v1205_v45 = vmul.f32 %v1034_v39, %v1034_v39 }
  0xe1   : > { %v1040_v46 = vpop.f32.mrf.mxu2  ;;  %v857_v47 = vpop.f32.mrf.mxu0 }
  0xe2   : > { %v1236_v48 = vadd.f32 %v1235_v35, %v1205_v45  ;;  %v858_v49 = vadd.f32 %v2184_v0, %v857_v47  ;;  %v946_v50 = vpop.f32.mrf.mxu1 }
  0xe4   : > { %v947_v52 = vadd.f32 %v946_v50, %v858_v49 }
  0xe6   : > { %v1036_v53 = vadd.f32 %v1035_v14, %v947_v52  ;;  %1743 = vmatmul.msk.bf16.gmra.mxu2 %vm782_vm0, %v1633_v51 }
  0xe7   : > { %v2245_v54 = vpop.f32.mrf.mxu3 }
  0xe8   : > { %v1832_v55 = vpack.c.bf16 %v1036_v53, %v1034_v39  ;;  %v1168_v56 = vadd.f32 %v1167_v44, %v1036_v53  ;;  %v1206_v57 = vmul.f32 %v1036_v53, %v1036_v53 }
  0xe9   : > { %v1043_v59 = vpop.f32.mrf.mxu2  ;;  %v860_v60 = vpop.f32.mrf.mxu0 }
  0xea   : > { %1896 = vst [vmem:[%s2204_s23 + $0x18] sm:$0xff] %v1832_v55   ;;  %v1237_v61 = vadd.f32 %v1236_v48, %v1206_v57  ;;  %v861_v62 = vadd.f32 %v2184_v0, %v860_v60  ;;  %v949_v63 = vpop.f32.mrf.mxu1 }
  0xec   : > { %v950_v1 = vadd.f32 %v949_v63, %v861_v62 }
  0xee   : > { %v1039_v3 = vadd.f32 %v1038_v32, %v950_v1 }
  0xef   : > { %v989_v4 = vpop.f32.mrf.mxu3 }
  0xf0   : > { %v1169_v5 = vadd.f32 %v1168_v56, %v1039_v3  ;;  %v1207_v6 = vmul.f32 %v1039_v3, %v1039_v3  ;;  %v2251_v7 = vadd.f32 %v989_v4, %v901_v2 }
  0xf1   : > { %v1045_v10 = vpop.f32.mrf.mxu2  ;;  %v862_v11 = vpop.f32.mrf.mxu0 }
  0xf2   : > { %v1238_v12 = vadd.f32 %v1237_v61, %v1207_v6  ;;  %v863_v13 = vadd.f32 %v2184_v0, %v862_v11  ;;  %v951_v14 = vpop.f32.mrf.mxu1 }
  0xf4   : > { %v952_v15 = vadd.f32 %v951_v14, %v863_v13 }
  0xf6   : > { %v1041_v17 = vadd.f32 %v1040_v46, %v952_v15 }
  0xf7   : > { %v991_v18 = vpop.f32.mrf.mxu3 }
  0xf8   : > { %v1837_v8 = vpack.c.bf16 %v1041_v17, %v1039_v3  ;;  %v1170_v19 = vadd.f32 %v1169_v5, %v1041_v17  ;;  %v1208_v20 = vmul.f32 %v1041_v17, %v1041_v17  ;;  %v2256_v21 = vadd.f32 %v991_v18, %v903_v16 }
  0xf9   : > { %v1048_v22 = vpop.f32.mrf.mxu2  ;;  %v865_v23 = vpop.f32.mrf.mxu0 }
  0xfa   : > { %1897 = vst [vmem:[%s2204_s23 + $0x20] sm:$0xff] %v1837_v8   ;;  %v1239_v24 = vadd.f32 %v1238_v12, %v1208_v20  ;;  %v866_v25 = vadd.f32 %v2184_v0, %v865_v23  ;;  %v954_v28 = vpop.f32.mrf.mxu1 }
  0xfc   : > { %v955_v29 = vadd.f32 %v954_v28, %v866_v25 }
  0xfe   : > { %v1044_v31 = vadd.f32 %v1043_v59, %v955_v29 }
  0xff   : > { %v994_v26 = vpop.f32.mrf.mxu3 }
 0x100   : > { %v1171_v32 = vadd.f32 %v1170_v19, %v1044_v31  ;;  %v1209_v33 = vmul.f32 %v1044_v31, %v1044_v31  ;;  %v2262_v34 = vadd.f32 %v994_v26, %v906_v30 }
 0x101   : > { %v1050_v35 = vpop.f32.mrf.mxu2  ;;  %v867_v36 = vpop.f32.mrf.mxu0 }
 0x102   : > { %v1240_v37 = vadd.f32 %v1239_v24, %v1209_v33  ;;  %v868_v38 = vadd.f32 %v2184_v0, %v867_v36  ;;  %v956_v39 = vpop.f32.mrf.mxu1 }
 0x104   : > { %v957_v42 = vadd.f32 %v956_v39, %v868_v38  ;;  %v911_v39 = vadd.f32 %v2184_v0, %v2225_v9 }
 0x106   : > { %v1046_v44 = vadd.f32 %v1045_v10, %v957_v42  ;;  %v913_v42 = vadd.f32 %v2184_v0, %v2235_v27 }
 0x107   : > { %v996_v45 = vpop.f32.mrf.mxu3 }
 0x108   : > { %v1842_v41 = vpack.c.bf16 %v1046_v44, %v1044_v31  ;;  %v1172_v46 = vadd.f32 %v1171_v32, %v1046_v44  ;;  %v1210_v47 = vmul.f32 %v1046_v44, %v1046_v44  ;;  %v2267_v48 = vadd.f32 %v996_v45, %v908_v43 }
 0x109   : > { %v1053_v49 = vpop.f32.mrf.mxu2  ;;  %v870_v50 = vpop.f32.mrf.mxu0 }
 0x10a   : > { %1898 = vst [vmem:[%s2204_s23 + $0x28] sm:$0xff] %v1842_v41   ;;  %v1241_v51 = vadd.f32 %v1240_v37, %v1210_v47  ;;  %v871_v52 = vadd.f32 %v2184_v0, %v870_v50  ;;  %v959_v53 = vpop.f32.mrf.mxu1 }
 0x10c   : > { %v960_v55 = vadd.f32 %v959_v53, %v871_v52 }
 0x10e   : > { %v1049_v56 = vadd.f32 %v1048_v22, %v960_v55 }
 0x10f   : > { %v999_v57 = vpop.f32.mrf.mxu3 }
 0x110   : > { %v1173_v59 = vadd.f32 %v1172_v46, %v1049_v56  ;;  %v1211_v63 = vmul.f32 %v1049_v56, %v1049_v56  ;;  %v1000_v44 = vadd.f32 %v999_v57, %v911_v39 }
 0x111   : > { %v1055_v58 = vpop.f32.mrf.mxu2  ;;  %v872_v60 = vpop.f32.mrf.mxu0 }
 0x112   : > { %v873_v61 = vadd.f32 %v2184_v0, %v872_v60  ;;  %v961_v62 = vpop.f32.mrf.mxu1  ;;  %v1242_v4 = vadd.f32 %v1241_v51, %v1211_v63  ;;  %v918_v63 = vadd.f32 %v2184_v0, %v2245_v54 }
 0x114   : > { %v962_v1 = vadd.f32 %v961_v62, %v873_v61  ;;  %v916_v62 = vadd.f32 %v2184_v0, %v2239_v40 }
 0x116   : > { %v1051_v2 = vadd.f32 %v1050_v35, %v962_v1 }
 0x117   : > { %v1001_v3 = vpop.f32.mrf.mxu3 }
 0x118   : > { %v1847_v5 = vpack.c.bf16 %v1051_v2, %v1049_v56  ;;  %v2272_v6 = vadd.f32 %v1173_v59, %v1051_v2  ;;  %v1212_v10 = vmul.f32 %v1051_v2, %v1051_v2  ;;  %v1002_v45 = vadd.f32 %v1001_v3, %v913_v42 }
 0x119   : > { %v1058_v11 = vpop.f32.mrf.mxu2  ;;  %v875_v12 = vpop.f32.mrf.mxu0 }
 0x11a   : > { %1899 = vst [vmem:[%s2204_s23 + $0x30] sm:$0xff] %v1847_v5   ;;  %v2275_v13 = vadd.f32 %v1242_v4, %v1212_v10  ;;  %v964_v14 = vpop.f32.mrf.mxu1  ;;  %v876_v15 = vadd.f32 %v2184_v0, %v875_v12 }
 0x11c   : > { %v965_v8 = vadd.f32 %v964_v14, %v876_v15 }
 0x11e   : > { %v2279_v23 = vadd.f32 %v1053_v49, %v965_v8 }
 0x11f   : > { %v1004_v16 = vpop.f32.mrf.mxu3 }
 0x120   : > { %v1005_v2 = vadd.f32 %v1004_v16, %v916_v62 }
 0x121   : > { %v1060_v17 = vpop.f32.mrf.mxu2  ;;  %v877_v18 = vpop.f32.mrf.mxu0 }
 0x122   : > { %v878_v19 = vadd.f32 %v2184_v0, %v877_v18  ;;  %v966_v20 = vpop.f32.mrf.mxu1 }
 0x124   : > { %v967_v22 = vadd.f32 %v966_v20, %v878_v19 }
 0x126   : > { %v2281_v24 = vadd.f32 %v1055_v58, %v967_v22 }
 0x127   : > { %v1006_v25 = vpop.f32.mrf.mxu3 }
 0x128   : > { %v1852_v28 = vpack.c.bf16 %v2281_v24, %v2279_v23  ;;  %v1007_v3 = vadd.f32 %v1006_v25, %v918_v63  ;;  %v1213_v25 = vmul.f32 %v2279_v23, %v2279_v23 }
 0x129   : > { %v1063_v29 = vpop.f32.mrf.mxu2  ;;  %v880_v30 = vpop.f32.mrf.mxu0 }
 0x12a   : > { %1900 = vst [vmem:[%s2204_s23 + $0x38] sm:$0xff] %v1852_v28   ;;  %v969_v31 = vpop.f32.mrf.mxu1  ;;  %v881_v26 = vadd.f32 %v2184_v0, %v880_v30  ;;  %v1214_v30 = vmul.f32 %v2281_v24, %v2281_v24 }
 0x12c   : > { %v970_v36 = vadd.f32 %v969_v31, %v881_v26 }
 0x12e   : > { %v1059_v41 = vadd.f32 %v1058_v11, %v970_v36 }
 0x12f   : > { %v1088_v32 = vpop.f32.mrf.mxu3 }
 0x130   : > { %v2292_v49 = vadd.f32 %v1088_v32, %v1000_v44  ;;  %v1244_v32 = vadd.f32 %v2275_v13, %v1213_v25 }
 0x131   : > { %v1065_v33 = vpop.f32.mrf.mxu2  ;;  %v882_v35 = vpop.f32.mrf.mxu0 }
 0x132   : > { %v883_v37 = vadd.f32 %v2184_v0, %v882_v35  ;;  %v971_v38 = vpop.f32.mrf.mxu1  ;;  %v1215_v35 = vmul.f32 %v1059_v41, %v1059_v41 }
 0x134   : > { %v972_v43 = vadd.f32 %v971_v38, %v883_v37  ;;  %v1245_v37 = vadd.f32 %v1244_v32, %v1214_v30 }
 0x136   : > { %v1061_v46 = vadd.f32 %v1060_v17, %v972_v43 }
 0x137   : > { %v1090_v47 = vpop.f32.mrf.mxu3 }
 0x138   : > { %v1857_v50 = vpack.c.bf16 %v1061_v46, %v1059_v41  ;;  %v2294_v51 = vadd.f32 %v1090_v47, %v1002_v45  ;;  %v1216_v39 = vmul.f32 %v1061_v46, %v1061_v46 }
 0x139   : > { %v1068_v52 = vpop.f32.mrf.mxu2  ;;  %v885_v53 = vpop.f32.mrf.mxu0 }
 0x13a   : > { %1901 = vst [vmem:[%s2204_s23 + $0x40] sm:$0xff] %v1857_v50   ;;  %v1887_v9 = vpack.c.bf16 %v2294_v51, %v2292_v49  ;;  %v974_v55 = vpop.f32.mrf.mxu1  ;;  %v886_v27 = vadd.f32 %v2184_v0, %v885_v53 }
 0x13c   : > { %1907 = vst [vmem:[%s2204_s23 + $0x70] sm:$0xff] %v1887_v9   ;;  %v975_v58 = vadd.f32 %v974_v55, %v886_v27 }
 0x13e   : > { %v1064_v4 = vadd.f32 %v1063_v29, %v975_v58  ;;  %v1175_v29 = vadd.f32 %v2272_v6, %v2279_v23  ;;  %v1246_v23 = vadd.f32 %v1245_v37, %v1215_v35  ;;  %v1227_v35 = vmul.f32 %v2292_v49, %v2292_v49 }
 0x13f   : > { %v1093_v56 = vpop.f32.mrf.mxu3  ;;  %v1228_v37 = vmul.f32 %v2294_v51, %v2294_v51 }
 0x140   : > { %v2306_v11 = vadd.f32 %v1093_v56, %v1005_v2  ;;  %v1217_v47 = vmul.f32 %v1064_v4, %v1064_v4 }
 0x141   : > { %v1070_v57 = vpop.f32.mrf.mxu2  ;;  %v887_v59 = vpop.f32.mrf.mxu0 }
 0x142   : > { %v888_v60 = vadd.f32 %v2184_v0, %v887_v59  ;;  %v976_v61 = vpop.f32.mrf.mxu1 }
 0x144   : > { %v977_v1 = vadd.f32 %v976_v61, %v888_v60 }
 0x146   : > { %v1066_v5 = vadd.f32 %v1065_v33, %v977_v1  ;;  %v1176_v33 = vadd.f32 %v1175_v29, %v2281_v24 }
 0x147   : > { %v1095_v10 = vpop.f32.mrf.mxu3 }
 0x148   : > { %v1862_v12 = vpack.c.bf16 %v1066_v5, %v1064_v4  ;;  %v2308_v14 = vadd.f32 %v1095_v10, %v1007_v3  ;;  %v1177_v38 = vadd.f32 %v1176_v33, %v1059_v41  ;;  %v1218_v13 = vmul.f32 %v1066_v5, %v1066_v5 }
 0x149   : > { %v1073_v15 = vpop.f32.mrf.mxu2  ;;  %v890_v17 = vpop.f32.mrf.mxu0 }
 0x14a   : > { %1902 = vst [vmem:[%s2204_s23 + $0x48] sm:$0xff] %v1862_v12   ;;  %v1892_v40 = vpack.c.bf16 %v2308_v14, %v2306_v11  ;;  %v979_v18 = vpop.f32.mrf.mxu1  ;;  %v891_v54 = vadd.f32 %v2184_v0, %v890_v17  ;;  %v1178_v45 = vadd.f32 %v1177_v38, %v1061_v46 }
 0x14c   : > { %1908 = vst [vmem:[%s2204_s23 + $0x78] sm:$0xff] %v1892_v40   ;;  %v980_v19 = vadd.f32 %v979_v18, %v891_v54  ;;  %v1179_v53 = vadd.f32 %v1178_v45, %v1064_v4 }
 0x14e   : > { %v1069_v31 = vadd.f32 %v1068_v52, %v980_v19  ;;  %v1247_v52 = vadd.f32 %v1246_v23, %v1216_v39  ;;  %v1180_v24 = vadd.f32 %v1179_v53, %v1066_v5 }
 0x150   : > { %v1248_v9 = vadd.f32 %v1247_v52, %v1217_v47  ;;  %v1219_v55 = vmul.f32 %v1069_v31, %v1069_v31  ;;  %v1181_v41 = vadd.f32 %v1180_v24, %v1069_v31 }
 0x151   : > { %v1075_v16 = vpop.f32.mrf.mxu2  ;;  %v892_v8 = vpop.f32.mrf.mxu0 }
 0x152   : > { %v893_v20 = vadd.f32 %v2184_v0, %v892_v8  ;;  %v981_v22 = vpop.f32.mrf.mxu1  ;;  %v1249_v56 = vadd.f32 %v1248_v9, %v1218_v13 }
 0x154   : > { %v982_v28 = vadd.f32 %v981_v22, %v893_v20  ;;  %v1250_v62 = vadd.f32 %v1249_v56, %v1219_v55 }
 0x156   : > { %v1071_v26 = vadd.f32 %v1070_v57, %v982_v28 }
 0x158   : > { %v1867_v36 = vpack.c.bf16 %v1071_v26, %v1069_v31  ;;  %v1220_v58 = vmul.f32 %v1071_v26, %v1071_v26  ;;  %v1182_v1 = vadd.f32 %v1181_v41, %v1071_v26 }
 0x159   : > { %v1078_v42 = vpop.f32.mrf.mxu2  ;;  %v895_v43 = vpop.f32.mrf.mxu0 }
 0x15a   : > { %1903 = vst [vmem:[%s2204_s23 + $0x50] sm:$0xff] %v1867_v36   ;;  %v896_v44 = vadd.f32 %v2184_v0, %v895_v43  ;;  %v984_v6 = vpop.f32.mrf.mxu1  ;;  %v1079_v60 = vadd.f32 %v1078_v42, %v2251_v7  ;;  %v1251_v5 = vadd.f32 %v1250_v62, %v1220_v58 }
 0x15c   : > { %v985_v50 = vadd.f32 %v984_v6, %v896_v44  ;;  %v1223_v54 = vmul.f32 %v1079_v60, %v1079_v60  ;;  %v1230_v44 = vmul.f32 %v2308_v14, %v2308_v14 }
 0x15e   : > { %v1074_v27 = vadd.f32 %v1073_v15, %v985_v50 }
 0x160   : > { %v1221_v2 = vmul.f32 %v1074_v27, %v1074_v27  ;;  %v1183_v10 = vadd.f32 %v1182_v1, %v1074_v27 }
 0x161   : > { %v1080_v57 = vpop.f32.mrf.mxu2  ;;  %v897_v59 = vpop.f32.mrf.mxu0 }
 0x162   : > { %v1081_v61 = vadd.f32 %v1080_v57, %v2256_v21  ;;  %v898_v46 = vadd.f32 %v2184_v0, %v897_v59  ;;  %v986_v63 = vpop.f32.mrf.mxu1  ;;  %v1252_v15 = vadd.f32 %v1251_v5, %v1221_v2 }
 0x164   : > { %v1877_v3 = vpack.c.bf16 %v1081_v61, %v1079_v60  ;;  %v987_v4 = vadd.f32 %v986_v63, %v898_v46  ;;  %v1224_v19 = vmul.f32 %v1081_v61, %v1081_v61 }
 0x166   : > { %1905 = vst [vmem:[%s2204_s23 + $0x60] sm:$0xff] %v1877_v3   ;;  %v1076_v12 = vadd.f32 %v1075_v16, %v987_v4 }
 0x168   : > { %v1872_v17 = vpack.c.bf16 %v1076_v12, %v1074_v27  ;;  %v1184_v40 = vadd.f32 %v1183_v10, %v1076_v12  ;;  %v1222_v18 = vmul.f32 %v1076_v12, %v1076_v12 }
 0x169   : > { %v1083_v7 = vpop.f32.mrf.mxu2 }
 0x16a   : > { %1904 = vst [vmem:[%s2204_s23 + $0x58] sm:$0xff] %v1872_v17   ;;  %v1253_v21 = vadd.f32 %v1252_v15, %v1222_v18  ;;  %v1084_v0 = vadd.f32 %v1083_v7, %v2262_v34  ;;  %v1185_v8 = vadd.f32 %v1184_v40, %v1079_v60 }
 0x16c   : > { %v1186_v20 = vadd.f32 %v1185_v8, %v1081_v61  ;;  %v1254_v22 = vadd.f32 %v1253_v21, %v1223_v54  ;;  %v1225_v28 = vmul.f32 %v1084_v0, %v1084_v0 }
 0x16e   : > { %v1187_v25 = vadd.f32 %v1186_v20, %v1084_v0  ;;  %v1255_v29 = vadd.f32 %v1254_v22, %v1224_v19 }
 0x170   : > { %v1256_v30 = vadd.f32 %v1255_v29, %v1225_v28 }
 0x171   : > { %v1085_v16 = vpop.f32.mrf.mxu2 }
 0x172   : > { %v1086_v31 = vadd.f32 %v1085_v16, %v2267_v48  ;;  %v1229_v48 = vmul.f32 %v2306_v11, %v2306_v11 }
 0x174   : > { %v1882_v26 = vpack.c.bf16 %v1086_v31, %v1084_v0  ;;  %v1188_v32 = vadd.f32 %v1187_v25, %v1086_v31  ;;  %v1226_v33 = vmul.f32 %v1086_v31, %v1086_v31 }
 0x176   : > { %1906 = vst [vmem:[%s2204_s23 + $0x68] sm:$0xff] %v1882_v26   ;;  %v1189_v34 = vadd.f32 %v1188_v32, %v2292_v49  ;;  %v1257_v36 = vadd.f32 %v1256_v30, %v1226_v33 }
 0x178   : > { %v1190_v38 = vadd.f32 %v1189_v34, %v2294_v51  ;;  %v1258_v39 = vadd.f32 %v1257_v36, %v1227_v35 }
 0x17a   : > { %v1191_v42 = vadd.f32 %v1190_v38, %v2306_v11  ;;  %v1259_v43 = vadd.f32 %v1258_v39, %v1228_v37 }
 0x17c   : > { %v1192_v6 = vadd.f32 %v1191_v42, %v2308_v14  ;;  %v1260_v49 = vadd.f32 %v1259_v43, %v1229_v48 }
 0x17e   : > { %v1193_v23 = vrot.slane %v1192_v6, 4  ;;  %v1261_v45 = vadd.f32 %v1260_v49, %v1230_v44 }
 0x180   : > { %v1194_v47 = vadd.f32 %v1193_v23, %v1192_v6  ;;  %v1262_v50 = vrot.slane %v1261_v45, 4 }
 0x182   : > { %v1195_v52 = vrot.slane %v1194_v47, 2  ;;  %v1263_v51 = vadd.f32 %v1262_v50, %v1261_v45 }
 0x184   : > { %v1196_v53 = vadd.f32 %v1195_v52, %v1194_v47  ;;  %v1264_v13 = vrot.slane %v1263_v51, 2 }
 0x186   : > { %v1197_v9 = vrot.slane %v1196_v53, 1  ;;  %v1265_v24 = vadd.f32 %v1264_v13, %v1263_v51 }
 0x188   : > { %v1266_v11 = vrot.slane %v1265_v24, 1  ;;  %v1198_v14 = vadd.f32 %v1197_v9, %v1196_v53 }
 0x18a   : > { %v1267_v55 = vadd.f32 %v1266_v11, %v1265_v24 }
 0x18c   : > { %v1269_v27 = vsel %vm1268_vm1, %v1198_v14, %v1267_v55 }
 0x18d   : > { %1270 = vst [vmem:[%s326_s26] sm:$0x3] %v1269_v27 }
 0x18e PF: > { %s15_s17 = sadd.s32 1, %s1975_s17   ;;  %s2365_s15 = smov %s1971_s16 }
 0x18f   : > { %p12_p6 = scmp.ge.s32.totalorder %s15_s17, 10   ;;  %s2366_s16 = smov %s2368_s18 }
 0x191   :  { %14 = sbr.rel (!%p12_p6) target bundleno = 2 (0x2), region = 80 }

// kernel: _lambda_.23
= control target key start
LH: loop header
LB: loop body
LE: loop exit
PB: predicated region body
PF: predicated region fallthrough
CT: control target
= control target key end

     0   :  { %s1459_s12 = smov 0   ;;  %s1461_s13 = smov 0   ;;  %s2236_s0 = inlined_call_operand.vmem [shape: bf16[1,2048,128], index: 0, kind: input, shape index: {}]   ;;  %s2237_s1 = inlined_call_operand.vmem [shape: f32[1,128], index: 1, kind: input, shape index: {}]   ;;  %s2238_s2 = inlined_call_operand.vmem [shape: f32[1,128], index: 2, kind: input, shape index: {}]   ;;  %s2239_s3 = inlined_call_operand.vmem [shape: f32[1,2048,128], index: 3, kind: output, shape index: {}]  }
   0x1   :  { %s1463_s14 = smov 0  }
   0x2 LB: > { %s28_s15 = sadd.s32 1, %s1433_s13  ;;  %p1173_p0 = scmp.ge.s32.totalorder %s1437_s14, 1  ;;  %s1437_s14 = sphi %s1463_s14, %s13_s14   ;;  %s1433_s13 = sphi %s1461_s13, %s2348_s13   ;;  %s1429_s12 = sphi %s1459_s12, %s2347_s12  }
   0x3   : > { %p30_p1 = scmp.ge.s32.totalorder %s28_s15, 8  ;;  %p188_p2 = scmp.lt.s32.totalorder %s1437_s14, 9 }
   0x5   : > { %s2350_s15 = smov (%p30_p1, %s28_s15), 0  ;;  %p189_p3 = pnand %p1173_p0, %p188_p2 }
   0x6   : > { %s1174_s16 = sshll.u32 (!%p189_p3), %s1429_s12, 5 }
   0x7   : > { %192 = sbr.rel (%p189_p3) target bundleno = 191 (0xbf), region = 32  ;;  %p235_p4 = scmp.lt.s32.totalorder (!%p189_p3), %s1174_s16, 255 }
   0xc   : > { %s2352_s16 = smov (!%p235_p4, %s1174_s16), 255  ;;  %v1488_v0 = vld [vmem:[%s2237_s1] ss:$0 sm:$0xff] }
   0xd   : > { %s1175_s17 = sshll.u32 %s2352_s16, 2  ;;  %v1496_v5 = vld [vmem:[%s2238_s2] ss:$0 sm:$0xff]  ;;  %s1177_s25 = sshll.u32 %s2352_s16, 3 }
   0xe   : > { %s1483_s20 = scalar_lea.vmem %s2236_s0, %s1175_s17  ;;  %s1625_s28 = scalar_lea.vmem %s2239_s3, %s1177_s25 }
   0xf   : > { %v1181_v1 = vld [vmem:[%s1483_s20] sm:$0xff]   ;;  %v1244_v2 = vld [vmem:[%s1483_s20 + $0x8] sm:$0xff]   ;;  %v1245_v3 = vld [vmem:[%s1483_s20 + $0x10] sm:$0xff]  }
  0x10   : > { %v1182_v4 = vunpack.c.l.bf16 %v1181_v1  ;;  %v1183_v6 = vunpack.c.h.bf16 %v1181_v1  ;;  %v1186_v7 = vunpack.c.l.bf16 %v1244_v2  ;;  %v1187_v8 = vunpack.c.h.bf16 %v1244_v2  ;;  %v1246_v9 = vld [vmem:[%s1483_s20 + $0x18] sm:$0xff]   ;;  %v1247_v30 = vld [vmem:[%s1483_s20 + $0x20] sm:$0xff]   ;;  %v1248_v37 = vld [vmem:[%s1483_s20 + $0x28] sm:$0xff]  }
  0x11   : > { %v1190_v10 = vunpack.c.l.bf16 %v1245_v3  ;;  %v1191_v11 = vunpack.c.h.bf16 %v1245_v3  ;;  %v1194_v12 = vunpack.c.l.bf16 %v1246_v9  ;;  %v1195_v13 = vunpack.c.h.bf16 %v1246_v9  ;;  %v1249_v46 = vld [vmem:[%s1483_s20 + $0x30] sm:$0xff]  }
  0x12   : > { %v332_v14 = vmul.f32 %v1488_v0, %v1182_v4  ;;  %v333_v15 = vmul.f32 %v1488_v0, %v1183_v6  ;;  %v334_v16 = vmul.f32 %v1488_v0, %v1186_v7  ;;  %v335_v17 = vmul.f32 %v1488_v0, %v1187_v8 }
  0x13   : > { %v336_v18 = vmul.f32 %v1488_v0, %v1190_v10  ;;  %v337_v19 = vmul.f32 %v1488_v0, %v1191_v11  ;;  %v338_v20 = vmul.f32 %v1488_v0, %v1194_v12  ;;  %v339_v21 = vmul.f32 %v1488_v0, %v1195_v13 }
  0x14   : > { %v368_v22 = vadd.f32 %v1496_v5, %v332_v14  ;;  %v369_v23 = vadd.f32 %v1496_v5, %v333_v15  ;;  %v370_v24 = vadd.f32 %v1496_v5, %v334_v16  ;;  %v371_v25 = vadd.f32 %v1496_v5, %v335_v17 }
  0x15   : > { %v372_v26 = vadd.f32 %v1496_v5, %v336_v18  ;;  %v373_v27 = vadd.f32 %v1496_v5, %v337_v19  ;;  %v374_v28 = vadd.f32 %v1496_v5, %v338_v20  ;;  %v375_v29 = vadd.f32 %v1496_v5, %v339_v21 }
  0x16   : > { %v400_v31 = vsub.f32 0.0, %v368_v22  ;;  %v401_v32 = vsub.f32 0.0, %v369_v23  ;;  %v402_v33 = vsub.f32 0.0, %v370_v24  ;;  %v403_v34 = vsub.f32 0.0, %v371_v25 }
  0x17   : > { %v404_v35 = vsub.f32 0.0, %v372_v26  ;;  %v405_v36 = vsub.f32 0.0, %v373_v27  ;;  %v1198_v41 = vunpack.c.l.bf16 %v1247_v30  ;;  %v406_v43 = vsub.f32 0.0, %v374_v28 }
  0x18   : > { %v432_v38 = vmul.f32 1.442695, %v400_v31  ;;  %v434_v39 = vmul.f32 1.442695, %v401_v32  ;;  %v436_v40 = vmul.f32 1.442695, %v402_v33  ;;  %v1199_v45 = vunpack.c.h.bf16 %v1247_v30 }
  0x19   : > { %v438_v42 = vmul.f32 1.442695, %v403_v34  ;;  %v407_v44 = vsub.f32 0.0, %v375_v29  ;;  %v440_v47 = vmul.f32 1.442695, %v404_v35  ;;  %v340_v49 = vmul.f32 %v1488_v0, %v1198_v41 }
  0x1a   : > { %1285 = vpow2.f32 %v432_v38  ;;  %v442_v48 = vmul.f32 1.442695, %v405_v36  ;;  %v341_v50 = vmul.f32 %v1488_v0, %v1199_v45  ;;  %v1202_v51 = vunpack.c.l.bf16 %v1248_v37 }
  0x1b   : > { %1287 = vpow2.f32 %v434_v39  ;;  %v1203_v52 = vunpack.c.h.bf16 %v1248_v37  ;;  %v376_v53 = vadd.f32 %v1496_v5, %v340_v49  ;;  %v1206_v54 = vunpack.c.l.bf16 %v1249_v46 }
  0x1c   : > { %1289 = vpow2.f32 %v436_v40  ;;  %v1207_v55 = vunpack.c.h.bf16 %v1249_v46  ;;  %v444_v56 = vmul.f32 1.442695, %v406_v43  ;;  %v377_v57 = vadd.f32 %v1496_v5, %v341_v50 }
  0x1d   : > { %1291 = vpow2.f32 %v438_v42  ;;  %v342_v58 = vmul.f32 %v1488_v0, %v1202_v51  ;;  %v446_v59 = vmul.f32 1.442695, %v407_v44  ;;  %v408_v60 = vsub.f32 0.0, %v376_v53 }
  0x1e   : > { %1293 = vpow2.f32 %v440_v47  ;;  %v343_v61 = vmul.f32 %v1488_v0, %v1203_v52  ;;  %v344_v62 = vmul.f32 %v1488_v0, %v1206_v54  ;;  %v345_v63 = vmul.f32 %v1488_v0, %v1207_v55 }
  0x1f   : > { %1295 = vpow2.f32 %v442_v48  ;;  %v409_v2 = vsub.f32 0.0, %v377_v57  ;;  %v1527_v3 = vadd.f32 %v1496_v5, %v342_v58  ;;  %v448_v9 = vmul.f32 1.442695, %v408_v60 }
  0x20   : > { %v1286_v1 = vpop.eup %1285  ;;  %1297 = vpow2.f32 %v444_v56  ;;  %v1534_v10 = vadd.f32 %v1496_v5, %v343_v61  ;;  %v1539_v13 = vadd.f32 %v1496_v5, %v344_v62  ;;  %v1542_v14 = vadd.f32 %v1496_v5, %v345_v63 }
  0x21   : > { %v1288_v4 = vpop.eup %1287  ;;  %v1529_v6 = vadd.f32 1.0, %v1286_v1  ;;  %1299 = vpow2.f32 %v446_v59  ;;  %v1546_v17 = vmul.f32 1.442695, %v409_v2  ;;  %v410_v18 = vsub.f32 0.0, %v1527_v3 }
  0x22   : > { %v1290_v7 = vpop.eup %1289  ;;  %v1531_v8 = vadd.f32 1.0, %v1288_v4  ;;  %v411_v25 = vsub.f32 0.0, %v1534_v10 }
  0x23   : > { %v1292_v11 = vpop.eup %1291  ;;  %1301 = vrcp.f32 %v1529_v6  ;;  %v539_v12 = vand.u32 2147483648, %v1529_v6  ;;  %v537_v16 = vand.u32 2147483647, %v1529_v6  ;;  %v1551_v22 = vadd.f32 1.0, %v1290_v7 }
  0x24   : > { %v1294_v15 = vpop.eup %1293  ;;  %1303 = vrcp.f32 %v1531_v8  ;;  %v552_v20 = vand.u32 2147483647, %v1531_v8  ;;  %v554_v21 = vand.u32 2147483648, %v1531_v8  ;;  %v1553_v23 = vadd.f32 1.0, %v1292_v11 }
  0x25   : > { %v1296_v19 = vpop.eup %1295  ;;  %vm533_vm0 = vweird.f32 %v1529_v6  ;;  %v1556_v24 = vadd.f32 1.0, %v1294_v15  ;;  %1305 = vpow2.f32 %v448_v9  ;;  %v1559_v27 = vor.u32 1.1754944e-38, %v539_v12 }
  0x26   : > { %v1298_v26 = vpop.eup %1297  ;;  %vm548_vm1 = vweird.f32 %v1531_v8  ;;  %1307 = vrcp.f32 %v1551_v22  ;;  %v569_v28 = vand.u32 2147483648, %v1551_v22  ;;  %vm1564_vm2 = vcmp.eq.f32.partialorder %v537_v16, 8.507059e+37 }
  0x27   : > { %v1300_v29 = vpop.eup %1299  ;;  %v567_v31 = vand.u32 2147483647, %v1551_v22  ;;  %1309 = vrcp.f32 %v1553_v23  ;;  %v584_v32 = vand.u32 2147483648, %v1553_v23  ;;  %v1571_v33 = vadd.f32 1.0, %v1296_v19 }
  0x28   : > { %vm1573_vm3 = vcmp.eq.f32.partialorder %v552_v20, 8.507059e+37  ;;  %v555_v36 = vor.u32 1.1754944e-38, %v554_v21  ;;  %v582_v37 = vand.u32 2147483647, %v1553_v23  ;;  %1311 = vrcp.f32 %v1556_v24 }
  0x29   : > { %v1302_v34 = vpop.eup %1301  ;;  %vm563_vm4 = vweird.f32 %v1551_v22  ;;  %v1581_v40 = vor.u32 1.1754944e-38, %v569_v28  ;;  %vm578_vm5 = vweird.f32 %v1553_v23  ;;  %vm593_vm6 = vweird.f32 %v1556_v24 }
  0x2a   : > { %v1304_v38 = vpop.eup %1303  ;;  %v529_v39 = vmul.f32 %v1302_v34, %v1529_v6  ;;  %v597_v42 = vand.u32 2147483647, %v1556_v24  ;;  %v599_v43 = vand.u32 2147483648, %v1556_v24  ;;  %vm534_vm7 = vweird.f32 %v1302_v34 }
  0x2b   : > { %v544_v41 = vmul.f32 %v1304_v38, %v1531_v8  ;;  %v1306_v44 = vpop.eup %1305  ;;  %vm1588_vm8 = vcmp.eq.f32.partialorder %v567_v31, 8.507059e+37  ;;  %v585_v47 = vor.u32 1.1754944e-38, %v584_v32  ;;  %1313 = vrcp.f32 %v1571_v33  ;;  %vm1608_vm13 = vmor %vm533_vm0, %vm534_vm7 }
  0x2c   : > { %v530_v45 = vsub.f32 1.0, %v529_v39  ;;  %v1308_v48 = vpop.eup %1307  ;;  %vm549_vm9 = vweird.f32 %v1304_v38  ;;  %vm1593_vm10 = vcmp.eq.f32.partialorder %v582_v37, 8.507059e+37  ;;  %v612_v51 = vand.u32 2147483647, %v1571_v33 }
  0x2d   : > { %v545_v49 = vsub.f32 1.0, %v544_v41  ;;  %v1310_v52 = vpop.eup %1309  ;;  %v559_v54 = vmul.f32 %v1308_v48, %v1551_v22  ;;  %vm1601_vm12 = vcmp.eq.f32.partialorder %v597_v42, 8.507059e+37  ;;  %v600_v56 = vor.u32 1.1754944e-38, %v599_v43  ;;  %vm1617_vm15 = vmor %vm548_vm1, %vm549_vm9 }
  0x2e   : > { %v531_v53 = vmul.f32 %v1302_v34, %v530_v45  ;;  %v1312_v57 = vpop.eup %1311  ;;  %vm564_vm14 = vweird.f32 %v1308_v48  ;;  %v574_v60 = vmul.f32 %v1310_v52, %v1553_v23  ;;  %v614_v61 = vand.u32 2147483648, %v1571_v33 }
  0x2f   : > { %v546_v59 = vmul.f32 %v1304_v38, %v545_v49  ;;  %v560_v1 = vsub.f32 1.0, %v559_v54  ;;  %vm579_vm11 = vweird.f32 %v1310_v52  ;;  %v589_v2 = vmul.f32 %v1312_v57, %v1556_v24  ;;  %vm1641_vm1 = vmor %vm563_vm4, %vm564_vm14  ;;  %v1250_v54 = vld [vmem:[%s1483_s20 + $0x38] sm:$0xff]  }
  0x30   : > { %v532_v62 = vadd.f32 %v1302_v34, %v531_v53  ;;  %v575_v6 = vsub.f32 1.0, %v574_v60  ;;  %vm594_vm0 = vweird.f32 %v1312_v57  ;;  %v1627_v7 = vadd.f32 1.0, %v1298_v26 }
  0x31   : > { %v547_v4 = vadd.f32 %v1304_v38, %v546_v59  ;;  %v1314_v8 = vpop.eup %1313  ;;  %v561_v11 = vmul.f32 %v1308_v48, %v560_v1  ;;  %v590_v12 = vsub.f32 1.0, %v589_v2  ;;  %v1631_v15 = vadd.f32 1.0, %v1300_v29  ;;  %vm1662_vm4 = vmor %vm593_vm6, %vm594_vm0 }
  0x32   : > { %v536_v9 = vsel %vm1608_vm13, %v1302_v34, %v532_v62  ;;  %v576_v21 = vmul.f32 %v1310_v52, %v575_v6  ;;  %v604_v26 = vmul.f32 %v1314_v8, %v1571_v33  ;;  %v1656_v30 = vadd.f32 1.0, %v1306_v44 }
  0x33   : > { %v541_v16 = vsel %vm1564_vm2, %v1559_v27, %v536_v9  ;;  %v551_v19 = vsel %vm1617_vm15, %v1304_v38, %v547_v4  ;;  %v562_v29 = vadd.f32 %v1308_v48, %v561_v11  ;;  %vm1652_vm2 = vmor %vm578_vm5, %vm579_vm11  ;;  %v591_v22 = vmul.f32 %v1312_v57, %v590_v12 }
  0x34   : > { %1008 = vst [vmem:[%s1625_s28] sm:$0xff] %v541_v16  ;;  %v556_v28 = vsel %vm1573_vm3, %v555_v36, %v551_v19  ;;  %v577_v31 = vadd.f32 %v1310_v52, %v576_v21  ;;  %v605_v34 = vsub.f32 1.0, %v604_v26  ;;  %vm609_vm3 = vweird.f32 %v1314_v8 }
  0x35   : > { %1009 = vst [vmem:[%s1625_s28 + $0x8] sm:$0xff] %v556_v28  ;;  %1315 = vrcp.f32 %v1627_v7  ;;  %v566_v23 = vsel %vm1641_vm1, %v1308_v48, %v562_v29  ;;  %v592_v35 = vadd.f32 %v1312_v57, %v591_v22  ;;  %v627_v36 = vand.u32 2147483647, %v1627_v7  ;;  %v1745_v28 = vld [vmem:[%s1483_s20 + $0x40] sm:$0xff]  }
  0x36   : > { %v629_v37 = vand.u32 2147483648, %v1627_v7  ;;  %v571_v24 = vsel %vm1588_vm8, %v1581_v40, %v566_v23  ;;  %v581_v38 = vsel %vm1652_vm2, %v1310_v52, %v577_v31  ;;  %v606_v39 = vmul.f32 %v1314_v8, %v605_v34 }
  0x37   : > { %1317 = vrcp.f32 %v1631_v15  ;;  %1010 = vst [vmem:[%s1625_s28 + $0x10] sm:$0xff] %v571_v24  ;;  %v586_v41 = vsel %vm1593_vm10, %v585_v47, %v581_v38  ;;  %v596_v42 = vsel %vm1662_vm4, %v1312_v57, %v592_v35  ;;  %vm2260_vm5 = vweird.f32 %v1571_v33 }
  0x38   : > { %vm1684_vm6 = vmor %vm2260_vm5, %vm609_vm3  ;;  %v615_v40 = vor.u32 1.1754944e-38, %v614_v61  ;;  %v412_v44 = vsub.f32 0.0, %v1539_v13  ;;  %1011 = vst [vmem:[%s1625_s28 + $0x18] sm:$0xff] %v586_v41  ;;  %v601_v45 = vsel %vm1601_vm12, %v600_v56, %v596_v42  ;;  %v607_v46 = vadd.f32 %v1314_v8, %v606_v39 }
  0x39   : > { %vm613_vm7 = vcmp.eq.f32.partialorder %v612_v51, 8.507059e+37  ;;  %v642_v47 = vand.u32 2147483647, %v1631_v15  ;;  %1012 = vst [vmem:[%s1625_s28 + $0x20] sm:$0xff] %v601_v45  ;;  %vm623_vm8 = vweird.f32 %v1627_v7  ;;  %vm1695_vm9 = vcmp.eq.f32.partialorder %v627_v36, 8.507059e+37 }
  0x3a   : > { %v630_v48 = vor.u32 1.1754944e-38, %v629_v37  ;;  %1319 = vrcp.f32 %v1656_v30  ;;  %v611_v49 = vsel %vm1684_vm6, %v1314_v8, %v607_v46  ;;  %vm638_vm10 = vweird.f32 %v1631_v15 }
  0x3b   : > { %v1316_v13 = vpop.eup %1315  ;;  %v644_v50 = vand.u32 2147483648, %v1631_v15  ;;  %1321 = vpow2.f32 %v1546_v17  ;;  %v616_v51 = vsel %vm613_vm7, %v615_v40, %v611_v49  ;;  %vm653_vm11 = vweird.f32 %v1656_v30 }
  0x3c   : > { %v619_v52 = vmul.f32 %v1316_v13, %v1627_v7  ;;  %v657_v53 = vand.u32 2147483647, %v1656_v30  ;;  %1013 = vst [vmem:[%s1625_s28 + $0x28] sm:$0xff] %v616_v51  ;;  %vm624_vm12 = vweird.f32 %v1316_v13  ;;  %vm1710_vm13 = vcmp.eq.f32.partialorder %v642_v47, 8.507059e+37 }
  0x3d   : > { %v1318_v55 = vpop.eup %1317  ;;  %v452_v57 = vmul.f32 1.442695, %v410_v18  ;;  %v413_v17 = vsub.f32 0.0, %v1542_v14  ;;  %v454_v60 = vmul.f32 1.442695, %v411_v25  ;;  %v1210_v63 = vunpack.c.l.bf16 %v1250_v54  ;;  %vm1723_vm15 = vmor %vm623_vm8, %vm624_vm12 }
  0x3e   : > { %v620_v58 = vsub.f32 1.0, %v619_v52  ;;  %v634_v59 = vmul.f32 %v1318_v55, %v1631_v15  ;;  %vm639_vm14 = vweird.f32 %v1318_v55  ;;  %v456_v61 = vmul.f32 1.442695, %v412_v44 }
  0x3f   : > { %1323 = vpow2.f32 %v452_v57  ;;  %v458_v62 = vmul.f32 1.442695, %v413_v17  ;;  %v1211_v6 = vunpack.c.h.bf16 %v1250_v54  ;;  %v659_v18 = vand.u32 2147483648, %v1656_v30  ;;  %vm1735_vm0 = vmor %vm638_vm10, %vm639_vm14 }
  0x40   : > { %v1320_v1 = vpop.eup %1319  ;;  %v621_v2 = vmul.f32 %v1316_v13, %v620_v58  ;;  %v635_v4 = vsub.f32 1.0, %v634_v59  ;;  %1325 = vpow2.f32 %v454_v60  ;;  %v346_v25 = vmul.f32 %v1488_v0, %v1210_v63 }
  0x41   : > { %v1322_v3 = vpop.eup %1321  ;;  %v649_v10 = vmul.f32 %v1320_v1, %v1656_v30  ;;  %1327 = vpow2.f32 %v456_v61  ;;  %v645_v12 = vor.u32 1.1754944e-38, %v644_v50  ;;  %vm654_vm1 = vweird.f32 %v1320_v1 }
  0x42   : > { %v622_v8 = vadd.f32 %v1316_v13, %v621_v2  ;;  %v636_v9 = vmul.f32 %v1318_v55, %v635_v4  ;;  %v1730_v11 = vadd.f32 1.0, %v1322_v3  ;;  %1329 = vpow2.f32 %v458_v62  ;;  %vm1758_vm4 = vmor %vm653_vm11, %vm654_vm1 }
  0x43   : > { %v650_v16 = vsub.f32 1.0, %v649_v10  ;;  %v382_v19 = vadd.f32 %v1496_v5, %v346_v25  ;;  %v347_v26 = vmul.f32 %v1488_v0, %v1211_v6  ;;  %vm1749_vm2 = vcmp.eq.f32.partialorder %v657_v53, 8.507059e+37 }
  0x44   : > { %v626_v20 = vsel %vm1723_vm15, %v1316_v13, %v622_v8  ;;  %v637_v21 = vadd.f32 %v1318_v55, %v636_v9  ;;  %1331 = vrcp.f32 %v1730_v11  ;;  %v660_v23 = vor.u32 1.1754944e-38, %v659_v18 }
  0x45   : > { %v1324_v15 = vpop.eup %1323  ;;  %v631_v29 = vsel %vm1695_vm9, %v630_v48, %v626_v20  ;;  %v651_v27 = vmul.f32 %v1320_v1, %v650_v16  ;;  %v672_v35 = vand.u32 2147483647, %v1730_v11  ;;  %v674_v39 = vand.u32 2147483648, %v1730_v11 }
  0x46   : > { %v1326_v31 = vpop.eup %1325  ;;  %1014 = vst [vmem:[%s1625_s28 + $0x30] sm:$0xff] %v631_v29  ;;  %v641_v32 = vsel %vm1735_vm0, %v1318_v55, %v637_v21  ;;  %v1763_v36 = vadd.f32 1.0, %v1324_v15  ;;  %v1214_v41 = vunpack.c.l.bf16 %v1745_v28  ;;  %vm668_vm3 = vweird.f32 %v1730_v11 }
  0x47   : > { %v1328_v37 = vpop.eup %1327  ;;  %v646_v24 = vsel %vm1710_vm13, %v645_v12, %v641_v32  ;;  %v652_v38 = vadd.f32 %v1320_v1, %v651_v27  ;;  %v414_v42 = vsub.f32 0.0, %v382_v19  ;;  %v383_v43 = vadd.f32 %v1496_v5, %v347_v26 }
  0x48   : > { %v1330_v30 = vpop.eup %1329  ;;  %1015 = vst [vmem:[%s1625_s28 + $0x38] sm:$0xff] %v646_v24  ;;  %1333 = vrcp.f32 %v1763_v36  ;;  %v1775_v44 = vadd.f32 1.0, %v1326_v31  ;;  %v1777_v45 = vadd.f32 1.0, %v1328_v37  ;;  %vm1783_vm5 = vcmp.eq.f32.partialorder %v672_v35, 8.507059e+37 }
  0x49   : > { %v656_v40 = vsel %vm1758_vm4, %v1320_v1, %v652_v38  ;;  %v1779_v46 = vadd.f32 1.0, %v1330_v30  ;;  %v687_v13 = vand.u32 2147483647, %v1763_v36  ;;  %v689_v49 = vand.u32 2147483648, %v1763_v36 }
  0x4a   : > { %v1332_v47 = vpop.eup %1331  ;;  %v661_v33 = vsel %vm1749_vm2, %v660_v23, %v656_v40  ;;  %v675_v51 = vor.u32 1.1754944e-38, %v674_v39  ;;  %vm683_vm6 = vweird.f32 %v1763_v36  ;;  %1335 = vrcp.f32 %v1775_v44 }
  0x4b   : > { %1016 = vst [vmem:[%s1625_s28 + $0x40] sm:$0xff] %v661_v33  ;;  %v664_v50 = vmul.f32 %v1332_v47, %v1730_v11  ;;  %v702_v52 = vand.u32 2147483647, %v1775_v44  ;;  %v704_v53 = vand.u32 2147483648, %v1775_v44  ;;  %1337 = vrcp.f32 %v1777_v45 }
  0x4c   : > { %v460_v54 = vmul.f32 1.442695, %v414_v42  ;;  %vm669_vm7 = vweird.f32 %v1332_v47  ;;  %v717_v56 = vand.u32 2147483647, %v1777_v45  ;;  %1339 = vrcp.f32 %v1779_v46 }
  0x4d   : > { %v665_v55 = vsub.f32 1.0, %v664_v50  ;;  %vm1798_vm8 = vcmp.eq.f32.partialorder %v687_v13, 8.507059e+37  ;;  %v690_v58 = vor.u32 1.1754944e-38, %v689_v49  ;;  %vm698_vm9 = vweird.f32 %v1775_v44  ;;  %vm1808_vm11 = vmor %vm668_vm3, %vm669_vm7 }
  0x4e   : > { %v1334_v57 = vpop.eup %1333  ;;  %v719_v59 = vand.u32 2147483648, %v1777_v45  ;;  %v705_v62 = vor.u32 1.1754944e-38, %v704_v53  ;;  %vm713_vm10 = vweird.f32 %v1777_v45  ;;  %vm1812_vm13 = vcmp.eq.f32.partialorder %v702_v52, 8.507059e+37  ;;  %v1253_v53 = vld [vmem:[%s1483_s20 + $0x50] sm:$0xff]  }
  0x4f   : > { %v666_v60 = vmul.f32 %v1332_v47, %v665_v55  ;;  %v679_v61 = vmul.f32 %v1334_v57, %v1763_v36  ;;  %vm684_vm12 = vweird.f32 %v1334_v57  ;;  %vm728_vm14 = vweird.f32 %v1779_v46  ;;  %v1252_v36 = vld [vmem:[%s1483_s20 + $0x48] sm:$0xff]  }
  0x50   : > { %v732_v2 = vand.u32 2147483647, %v1779_v46  ;;  %1341 = vpow2.f32 %v460_v54  ;;  %v1336_v4 = vpop.eup %1335  ;;  %vm1818_vm15 = vcmp.eq.f32.partialorder %v717_v56, 8.507059e+37  ;;  %v415_v10 = vsub.f32 0.0, %v383_v43  ;;  %vm1834_vm1 = vmor %vm683_vm6, %vm684_vm12 }
  0x51   : > { %v667_v6 = vadd.f32 %v1332_v47, %v666_v60  ;;  %v680_v3 = vsub.f32 1.0, %v679_v61  ;;  %v348_v18 = vmul.f32 %v1488_v0, %v1214_v41  ;;  %v1338_v25 = vpop.eup %1337  ;;  %v694_v8 = vmul.f32 %v1336_v4, %v1775_v44 }
  0x52   : > { %v720_v9 = vor.u32 1.1754944e-38, %v719_v59  ;;  %v734_v11 = vand.u32 2147483648, %v1779_v46  ;;  %v1215_v7 = vunpack.c.h.bf16 %v1745_v28  ;;  %v1340_v12 = vpop.eup %1339  ;;  %vm699_vm0 = vweird.f32 %v1336_v4 }
  0x53   : > { %v671_v16 = vsel %vm1808_vm11, %v1332_v47, %v667_v6  ;;  %v681_v19 = vmul.f32 %v1334_v57, %v680_v3  ;;  %v709_v20 = vmul.f32 %v1338_v25, %v1777_v45  ;;  %v695_v28 = vsub.f32 1.0, %v694_v8  ;;  %vm1848_vm3 = vmor %vm698_vm9, %vm699_vm0 }
  0x54   : > { %v676_v21 = vsel %vm1783_vm5, %v675_v51, %v671_v16  ;;  %vm714_vm2 = vweird.f32 %v1338_v25  ;;  %v724_v15 = vmul.f32 %v1340_v12, %v1779_v46  ;;  %v462_v22 = vmul.f32 1.442695, %v415_v10  ;;  %v1902_v10 = vld [vmem:[%s1483_s20 + $0x58] sm:$0xff]  }
  0x55   : > { %1017 = vst [vmem:[%s1625_s28 + $0x48] sm:$0xff] %v676_v21  ;;  %v682_v29 = vadd.f32 %v1334_v57, %v681_v19  ;;  %v710_v27 = vsub.f32 1.0, %v709_v20  ;;  %v384_v31 = vadd.f32 %v1496_v5, %v348_v18  ;;  %v696_v34 = vmul.f32 %v1336_v4, %v695_v28  ;;  %vm1859_vm5 = vmor %vm713_vm10, %vm714_vm2 }
  0x56   : > { %v1342_v32 = vpop.eup %1341  ;;  %v725_v23 = vsub.f32 1.0, %v724_v15  ;;  %vm729_vm4 = vweird.f32 %v1340_v12  ;;  %v349_v35 = vmul.f32 %v1488_v0, %v1215_v7  ;;  %1343 = vpow2.f32 %v462_v22 }
  0x57   : > { %v686_v37 = vsel %vm1834_vm1, %v1334_v57, %v682_v29  ;;  %v711_v38 = vmul.f32 %v1338_v25, %v710_v27  ;;  %v1852_v39 = vadd.f32 1.0, %v1342_v32  ;;  %v697_v30 = vadd.f32 %v1336_v4, %v696_v34  ;;  %vm1867_vm6 = vmor %vm728_vm14, %vm729_vm4 }
  0x58   : > { %v691_v41 = vsel %vm1798_vm8, %v690_v58, %v686_v37  ;;  %v726_v43 = vmul.f32 %v1340_v12, %v725_v23  ;;  %v416_v40 = vsub.f32 0.0, %v384_v31  ;;  %v735_v33 = vor.u32 1.1754944e-38, %v734_v11 }
  0x59   : > { %1018 = vst [vmem:[%s1625_s28 + $0x50] sm:$0xff] %v691_v41  ;;  %v712_v44 = vadd.f32 %v1338_v25, %v711_v38  ;;  %1345 = vrcp.f32 %v1852_v39  ;;  %v1218_v45 = vunpack.c.l.bf16 %v1252_v36  ;;  %v701_v48 = vsel %vm1848_vm3, %v1336_v4, %v697_v30 }
  0x5a   : > { %v727_v13 = vadd.f32 %v1340_v12, %v726_v43  ;;  %vm733_vm7 = vcmp.eq.f32.partialorder %v732_v2, 8.507059e+37  ;;  %v464_v49 = vmul.f32 1.442695, %v416_v40  ;;  %v706_v50 = vsel %vm1812_vm13, %v705_v62, %v701_v48 }
  0x5b   : > { %v716_v46 = vsel %vm1859_vm5, %v1338_v25, %v712_v44  ;;  %v747_v51 = vand.u32 2147483647, %v1852_v39  ;;  %v385_v52 = vadd.f32 %v1496_v5, %v349_v35  ;;  %1019 = vst [vmem:[%s1625_s28 + $0x58] sm:$0xff] %v706_v50  ;;  %v749_v56 = vand.u32 2147483648, %v1852_v39 }
  0x5c   : > { %v721_v54 = vsel %vm1818_vm15, %v720_v9, %v716_v46  ;;  %v731_v55 = vsel %vm1867_vm6, %v1340_v12, %v727_v13  ;;  %1347 = vpow2.f32 %v464_v49  ;;  %v1344_v57 = vpop.eup %1343  ;;  %v350_v59 = vmul.f32 %v1488_v0, %v1218_v45 }
  0x5d   : > { %1020 = vst [vmem:[%s1625_s28 + $0x60] sm:$0xff] %v721_v54  ;;  %v736_v17 = vsel %vm733_vm7, %v735_v33, %v731_v55  ;;  %v417_v58 = vsub.f32 0.0, %v385_v52  ;;  %v1219_v60 = vunpack.c.h.bf16 %v1252_v36  ;;  %v1890_v61 = vadd.f32 1.0, %v1344_v57 }
  0x5e   : > { %1021 = vst [vmem:[%s1625_s28 + $0x68] sm:$0xff] %v736_v17  ;;  %v1222_v62 = vunpack.c.l.bf16 %v1253_v53  ;;  %v1223_v63 = vunpack.c.h.bf16 %v1253_v53  ;;  %v386_v4 = vadd.f32 %v1496_v5, %v350_v59  ;;  %vm743_vm8 = vweird.f32 %v1852_v39 }
  0x5f   : > { %v1346_v1 = vpop.eup %1345  ;;  %v466_v2 = vmul.f32 1.442695, %v417_v58  ;;  %v351_v6 = vmul.f32 %v1488_v0, %v1219_v60  ;;  %vm1896_vm9 = vcmp.eq.f32.partialorder %v747_v51, 8.507059e+37  ;;  %1349 = vrcp.f32 %v1890_v61  ;;  %v1960_v60 = vld [vmem:[%s1483_s20 + $0x60] sm:$0xff]  }
  0x60   : > { %v739_v3 = vmul.f32 %v1346_v1, %v1852_v39  ;;  %vm744_vm10 = vweird.f32 %v1346_v1  ;;  %v750_v18 = vor.u32 1.1754944e-38, %v749_v56  ;;  %v418_v25 = vsub.f32 0.0, %v386_v4 }
  0x61   : > { %1351 = vpow2.f32 %v466_v2  ;;  %v387_v11 = vadd.f32 %v1496_v5, %v351_v6  ;;  %v352_v7 = vmul.f32 %v1488_v0, %v1222_v62  ;;  %v353_v12 = vmul.f32 %v1488_v0, %v1223_v63  ;;  %vm1916_vm11 = vmor %vm743_vm8, %vm744_vm10 }
  0x62   : > { %v1348_v8 = vpop.eup %1347  ;;  %v740_v9 = vsub.f32 1.0, %v739_v3  ;;  %v762_v16 = vand.u32 2147483647, %v1890_v61  ;;  %v468_v20 = vmul.f32 1.442695, %v418_v25  ;;  %v1226_v21 = vunpack.c.l.bf16 %v1902_v10 }
  0x63   : > { %v1908_v19 = vadd.f32 1.0, %v1348_v8  ;;  %v419_v28 = vsub.f32 0.0, %v387_v11  ;;  %v388_v15 = vadd.f32 %v1496_v5, %v352_v7  ;;  %v1227_v29 = vunpack.c.h.bf16 %v1902_v10 }
  0x64   : > { %v741_v26 = vmul.f32 %v1346_v1, %v740_v9  ;;  %vm758_vm12 = vweird.f32 %v1890_v61  ;;  %v764_v22 = vand.u32 2147483648, %v1890_v61  ;;  %v389_v31 = vadd.f32 %v1496_v5, %v353_v12 }
  0x65   : > { %1353 = vrcp.f32 %v1908_v19  ;;  %v1350_v32 = vpop.eup %1349  ;;  %v470_v23 = vmul.f32 1.442695, %v419_v28  ;;  %v420_v35 = vsub.f32 0.0, %v388_v15  ;;  %vm1925_vm14 = vcmp.eq.f32.partialorder %v762_v16, 8.507059e+37 }
  0x66   : > { %v742_v34 = vadd.f32 %v1346_v1, %v741_v26  ;;  %1355 = vpow2.f32 %v468_v20  ;;  %v754_v37 = vmul.f32 %v1350_v32, %v1890_v61  ;;  %vm759_vm13 = vweird.f32 %v1350_v32 }
  0x67   : > { %v1352_v36 = vpop.eup %1351  ;;  %v777_v38 = vand.u32 2147483647, %v1908_v19  ;;  %1357 = vpow2.f32 %v470_v23  ;;  %v472_v30 = vmul.f32 1.442695, %v420_v35  ;;  %v421_v40 = vsub.f32 0.0, %v389_v31  ;;  %vm1946_vm15 = vmor %vm758_vm12, %vm759_vm13 }
  0x68   : > { %v746_v39 = vsel %vm1916_vm11, %v1346_v1, %v742_v34  ;;  %v1932_v41 = vadd.f32 1.0, %v1352_v36  ;;  %v755_v43 = vsub.f32 1.0, %v754_v37  ;;  %v354_v44 = vmul.f32 %v1488_v0, %v1226_v21 }
  0x69   : > { %v751_v42 = vsel %vm1896_vm9, %v750_v18, %v746_v39  ;;  %v779_v47 = vand.u32 2147483648, %v1908_v19  ;;  %v474_v49 = vmul.f32 1.442695, %v421_v40  ;;  %v765_v52 = vor.u32 1.1754944e-38, %v764_v22 }
  0x6a   : > { %1022 = vst [vmem:[%s1625_s28 + $0x70] sm:$0xff] %v751_v42  ;;  %1359 = vrcp.f32 %v1932_v41  ;;  %v792_v33 = vand.u32 2147483647, %v1932_v41  ;;  %v794_v45 = vand.u32 2147483648, %v1932_v41  ;;  %v756_v13 = vmul.f32 %v1350_v32, %v755_v43 }
  0x6b   : > { %v1354_v48 = vpop.eup %1353  ;;  %1361 = vpow2.f32 %v472_v30  ;;  %v390_v50 = vadd.f32 %v1496_v5, %v354_v44  ;;  %vm773_vm0 = vweird.f32 %v1908_v19  ;;  %vm1952_vm1 = vcmp.eq.f32.partialorder %v777_v38, 8.507059e+37 }
  0x6c   : > { %v1356_v46 = vpop.eup %1355  ;;  %v769_v53 = vmul.f32 %v1354_v48, %v1908_v19  ;;  %v757_v55 = vadd.f32 %v1350_v32, %v756_v13  ;;  %1363 = vpow2.f32 %v474_v49  ;;  %vm774_vm2 = vweird.f32 %v1354_v48 }
  0x6d   : > { %v1956_v56 = vadd.f32 1.0, %v1356_v46  ;;  %v422_v57 = vsub.f32 0.0, %v390_v50  ;;  %v1358_v17 = vpop.eup %1357  ;;  %v780_v59 = vor.u32 1.1754944e-38, %v779_v47  ;;  %vm788_vm4 = vweird.f32 %v1932_v41  ;;  %vm1979_vm5 = vmor %vm773_vm0, %vm774_vm2  ;;  %v1256_v50 = vld [vmem:[%s1483_s20 + $0x68] sm:$0xff]  }
  0x6e   : > { %v770_v58 = vsub.f32 1.0, %v769_v53  ;;  %v761_v61 = vsel %vm1946_vm15, %v1350_v32, %v757_v55  ;;  %vm1964_vm3 = vcmp.eq.f32.partialorder %v792_v33, 8.507059e+37  ;;  %v795_v63 = vor.u32 1.1754944e-38, %v794_v45  ;;  %v2051_v55 = vld [vmem:[%s2237_s1] ss:$0 sm:$0xff] }
  0x6f   : > { %1365 = vrcp.f32 %v1956_v56  ;;  %v355_v1 = vmul.f32 %v1488_v0, %v1227_v29  ;;  %v766_v4 = vsel %vm1925_vm14, %v765_v52, %v761_v61  ;;  %v807_v3 = vand.u32 2147483647, %v1956_v56 }
  0x70   : > { %v1360_v2 = vpop.eup %1359  ;;  %v771_v6 = vmul.f32 %v1354_v48, %v770_v58  ;;  %v1973_v14 = vadd.f32 1.0, %v1358_v17  ;;  %1023 = vst [vmem:[%s1625_s28 + $0x78] sm:$0xff] %v766_v4  ;;  %v809_v25 = vand.u32 2147483648, %v1956_v56  ;;  %v476_v8 = vmul.f32 1.442695, %v422_v57 }
  0x71   : > { %v1362_v10 = vpop.eup %1361  ;;  %v784_v0 = vmul.f32 %v1360_v2, %v1932_v41  ;;  %v1230_v9 = vunpack.c.l.bf16 %v1960_v60  ;;  %vm803_vm6 = vweird.f32 %v1956_v56  ;;  %v1231_v7 = vunpack.c.h.bf16 %v1960_v60 }
  0x72   : > { %v772_v11 = vadd.f32 %v1354_v48, %v771_v6  ;;  %1367 = vrcp.f32 %v1973_v14  ;;  %v1364_v12 = vpop.eup %1363  ;;  %vm789_vm7 = vweird.f32 %v1360_v2  ;;  %v822_v19 = vand.u32 2147483647, %v1973_v14 }
  0x73   : > { %v785_v16 = vsub.f32 1.0, %v784_v0  ;;  %v1990_v20 = vadd.f32 1.0, %v1362_v10  ;;  %vm1994_vm8 = vcmp.eq.f32.partialorder %v807_v3, 8.507059e+37  ;;  %v1998_v28 = vadd.f32 1.0, %v1364_v12  ;;  %vm2006_vm9 = vmor %vm788_vm4, %vm789_vm7 }
  0x74   : > { %v776_v21 = vsel %vm1979_vm5, %v1354_v48, %v772_v11  ;;  %1369 = vpow2.f32 %v476_v8  ;;  %v810_v22 = vor.u32 1.1754944e-38, %v809_v25  ;;  %v824_v31 = vand.u32 2147483648, %v1973_v14 }
  0x75   : > { %v1366_v15 = vpop.eup %1365  ;;  %v781_v29 = vsel %vm1952_vm1, %v780_v59, %v776_v21  ;;  %v786_v27 = vmul.f32 %v1360_v2, %v785_v16  ;;  %vm818_vm10 = vweird.f32 %v1973_v14  ;;  %1371 = vrcp.f32 %v1990_v20 }
  0x76   : > { %1024 = vst [vmem:[%s1625_s28 + $0x80] sm:$0xff] %v781_v29  ;;  %v799_v34 = vmul.f32 %v1366_v15, %v1956_v56  ;;  %v391_v23 = vadd.f32 %v1496_v5, %v355_v1  ;;  %vm2014_vm11 = vcmp.eq.f32.partialorder %v822_v19, 8.507059e+37  ;;  %v837_v37 = vand.u32 2147483647, %v1990_v20 }
  0x77   : > { %v787_v35 = vadd.f32 %v1360_v2, %v786_v27  ;;  %v839_v24 = vand.u32 2147483648, %v1990_v20  ;;  %1373 = vrcp.f32 %v1998_v28  ;;  %vm804_vm12 = vweird.f32 %v1366_v15 }
  0x78   : > { %v1368_v38 = vpop.eup %1367  ;;  %v800_v39 = vsub.f32 1.0, %v799_v34  ;;  %v852_v41 = vand.u32 2147483647, %v1998_v28  ;;  %v854_v30 = vand.u32 2147483648, %v1998_v28  ;;  %v825_v43 = vor.u32 1.1754944e-38, %v824_v31  ;;  %vm2033_vm0 = vmor %vm803_vm6, %vm804_vm12  ;;  %v1257_v31 = vld [vmem:[%s1483_s20 + $0x70] sm:$0xff]  }
  0x79   : > { %v791_v5 = vsel %vm2006_vm9, %v1360_v2, %v787_v35  ;;  %v814_v42 = vmul.f32 %v1368_v38, %v1973_v14  ;;  %vm833_vm13 = vweird.f32 %v1990_v20  ;;  %vm819_vm14 = vweird.f32 %v1368_v38  ;;  %v2074_v14 = vld [vmem:[%s2238_s2] ss:$0 sm:$0xff] }
  0x7a   : > { %v1370_v40 = vpop.eup %1369  ;;  %v796_v44 = vsel %vm1964_vm3, %v795_v63, %v791_v5  ;;  %v801_v47 = vmul.f32 %v1366_v15, %v800_v39  ;;  %vm848_vm15 = vweird.f32 %v1998_v28  ;;  %vm2037_vm1 = vcmp.eq.f32.partialorder %v837_v37, 8.507059e+37  ;;  %vm2062_vm4 = vmor %vm818_vm10, %vm819_vm14 }
  0x7b   : > { %1025 = vst [vmem:[%s1625_s28 + $0x88] sm:$0xff] %v796_v44  ;;  %v815_v45 = vsub.f32 1.0, %v814_v42  ;;  %v840_v13 = vor.u32 1.1754944e-38, %v839_v24  ;;  %v2041_v49 = vadd.f32 1.0, %v1370_v40  ;;  %v1372_v46 = vpop.eup %1371  ;;  %vm2044_vm2 = vcmp.eq.f32.partialorder %v852_v41, 8.507059e+37  ;;  %v1258_v40 = vld [vmem:[%s1483_s20 + $0x78] sm:$0xff]  }
  0x7c   : > { %v802_v51 = vadd.f32 %v1366_v15, %v801_v47  ;;  %v855_v53 = vor.u32 1.1754944e-38, %v854_v30  ;;  %v423_v54 = vsub.f32 0.0, %v391_v23  ;;  %v356_v56 = vmul.f32 %v2051_v55, %v1230_v9 }
  0x7d   : > { %v1374_v57 = vpop.eup %1373  ;;  %v816_v17 = vmul.f32 %v1368_v38, %v815_v45  ;;  %v829_v58 = vmul.f32 %v1372_v46, %v1990_v20  ;;  %1375 = vrcp.f32 %v2041_v49  ;;  %v357_v59 = vmul.f32 %v2051_v55, %v1231_v7 }
  0x7e   : > { %v806_v60 = vsel %vm2033_vm0, %v1366_v15, %v802_v51  ;;  %vm834_vm3 = vweird.f32 %v1372_v46  ;;  %v844_v62 = vmul.f32 %v1374_v57, %v1998_v28  ;;  %v1234_v63 = vunpack.c.l.bf16 %v1256_v50 }
  0x7f   : > { %v811_v1 = vsel %vm1994_vm8, %v810_v22, %v806_v60  ;;  %v817_v2 = vadd.f32 %v1368_v38, %v816_v17  ;;  %v830_v4 = vsub.f32 1.0, %v829_v58  ;;  %vm849_vm5 = vweird.f32 %v1374_v57  ;;  %vm2086_vm7 = vmor %vm833_vm13, %vm834_vm3 }
  0x80   : > { %1026 = vst [vmem:[%s1625_s28 + $0x90] sm:$0xff] %v811_v1  ;;  %v845_v6 = vsub.f32 1.0, %v844_v62  ;;  %vm863_vm6 = vweird.f32 %v2041_v49  ;;  %v478_v3 = vmul.f32 1.442695, %v423_v54  ;;  %v392_v10 = vadd.f32 %v2074_v14, %v356_v56  ;;  %vm2095_vm8 = vmor %vm848_vm15, %vm849_vm5 }
  0x81   : > { %v821_v18 = vsel %vm2062_vm4, %v1368_v38, %v817_v2  ;;  %v831_v0 = vmul.f32 %v1372_v46, %v830_v4  ;;  %v867_v25 = vand.u32 2147483647, %v2041_v49  ;;  %v393_v8 = vadd.f32 %v2074_v14, %v357_v59 }
  0x82   : > { %v826_v9 = vsel %vm2014_vm11, %v825_v43, %v821_v18  ;;  %v846_v7 = vmul.f32 %v1374_v57, %v845_v6  ;;  %v869_v12 = vand.u32 2147483648, %v2041_v49  ;;  %1377 = vpow2.f32 %v478_v3 }
  0x83   : > { %v1376_v16 = vpop.eup %1375  ;;  %1027 = vst [vmem:[%s1625_s28 + $0x98] sm:$0xff] %v826_v9  ;;  %v832_v19 = vadd.f32 %v1372_v46, %v831_v0  ;;  %v424_v20 = vsub.f32 0.0, %v392_v10  ;;  %v425_v26 = vsub.f32 0.0, %v393_v8  ;;  %v358_v15 = vmul.f32 %v2051_v55, %v1234_v63 }
  0x84   : > { %v847_v29 = vadd.f32 %v1374_v57, %v846_v7  ;;  %v859_v27 = vmul.f32 %v1376_v16, %v2041_v49  ;;  %vm864_vm9 = vweird.f32 %v1376_v16  ;;  %v1235_v22 = vunpack.c.h.bf16 %v1256_v50 }
  0x85   : > { %v836_v32 = vsel %vm2086_vm7, %v1372_v46, %v832_v19  ;;  %v480_v28 = vmul.f32 1.442695, %v424_v20  ;;  %v482_v34 = vmul.f32 1.442695, %v425_v26  ;;  %v394_v23 = vadd.f32 %v2074_v14, %v358_v15  ;;  %vm2119_vm10 = vmor %vm863_vm6, %vm864_vm9 }
  0x86   : > { %v841_v35 = vsel %vm2037_vm1, %v840_v13, %v836_v32  ;;  %v851_v36 = vsel %vm2095_vm8, %v1374_v57, %v847_v29  ;;  %v860_v37 = vsub.f32 1.0, %v859_v27  ;;  %v359_v24 = vmul.f32 %v2051_v55, %v1235_v22 }
  0x87   : > { %1028 = vst [vmem:[%s1625_s28 + $0xa0] sm:$0xff] %v841_v35  ;;  %v856_v38 = vsel %vm2044_vm2, %v855_v53, %v851_v36  ;;  %1379 = vpow2.f32 %v480_v28  ;;  %v426_v39 = vsub.f32 0.0, %v394_v23  ;;  %v1238_v41 = vunpack.c.l.bf16 %v1257_v31 }
  0x88   : > { %v1378_v30 = vpop.eup %1377  ;;  %1029 = vst [vmem:[%s1625_s28 + $0xa8] sm:$0xff] %v856_v38  ;;  %v861_v5 = vmul.f32 %v1376_v16, %v860_v37  ;;  %1381 = vpow2.f32 %v482_v34  ;;  %v395_v42 = vadd.f32 %v2074_v14, %v359_v24  ;;  %v1239_v43 = vunpack.c.h.bf16 %v1257_v31 }
  0x89   : > { %v870_v47 = vor.u32 1.1754944e-38, %v869_v12  ;;  %v519_v33 = vadd.f32 1.0, %v1378_v30  ;;  %v484_v45 = vmul.f32 1.442695, %v426_v39  ;;  %v360_v48 = vmul.f32 %v2051_v55, %v1238_v41 }
  0x8a   : > { %v862_v13 = vadd.f32 %v1376_v16, %v861_v5  ;;  %vm868_vm11 = vcmp.eq.f32.partialorder %v867_v25, 8.507059e+37  ;;  %v427_v50 = vsub.f32 0.0, %v395_v42  ;;  %v361_v46 = vmul.f32 %v2051_v55, %v1239_v43 }
  0x8b   : > { %1383 = vrcp.f32 %v519_v33  ;;  %v1242_v51 = vunpack.c.l.bf16 %v1258_v40  ;;  %v396_v53 = vadd.f32 %v2074_v14, %v360_v48  ;;  %v1243_v17 = vunpack.c.h.bf16 %v1258_v40 }
  0x8c   : > { %v866_v49 = vsel %vm2119_vm10, %v1376_v16, %v862_v13  ;;  %1385 = vpow2.f32 %v484_v45  ;;  %v486_v52 = vmul.f32 1.442695, %v427_v50  ;;  %v397_v57 = vadd.f32 %v2074_v14, %v361_v46 }
  0x8d   : > { %v1380_v54 = vpop.eup %1379  ;;  %v871_v56 = vsel %vm868_vm11, %v870_v47, %v866_v49  ;;  %v882_v59 = vand.u32 2147483647, %v519_v33  ;;  %v884_v60 = vand.u32 2147483648, %v519_v33  ;;  %v428_v63 = vsub.f32 0.0, %v396_v53 }
  0x8e   : > { %v1382_v58 = vpop.eup %1381  ;;  %1030 = vst [vmem:[%s1625_s28 + $0xb0] sm:$0xff] %v871_v56  ;;  %v520_v61 = vadd.f32 1.0, %v1380_v54  ;;  %1387 = vpow2.f32 %v486_v52  ;;  %v362_v1 = vmul.f32 %v2051_v55, %v1242_v51  ;;  %vm878_vm12 = vweird.f32 %v519_v33 }
  0x8f   : > { %v521_v62 = vadd.f32 1.0, %v1382_v58  ;;  %v429_v4 = vsub.f32 0.0, %v397_v57  ;;  %vm2131_vm13 = vcmp.eq.f32.partialorder %v882_v59, 8.507059e+37  ;;  %v885_v18 = vor.u32 1.1754944e-38, %v884_v60 }
  0x90   : > { %1389 = vrcp.f32 %v520_v61  ;;  %v363_v0 = vmul.f32 %v2051_v55, %v1243_v17  ;;  %v897_v25 = vand.u32 2147483647, %v520_v61  ;;  %v899_v8 = vand.u32 2147483648, %v520_v61 }
  0x91   : > { %v1384_v2 = vpop.eup %1383  ;;  %1391 = vrcp.f32 %v521_v62  ;;  %v488_v11 = vmul.f32 1.442695, %v428_v63  ;;  %v912_v16 = vand.u32 2147483647, %v521_v62  ;;  %v398_v19 = vadd.f32 %v2074_v14, %v362_v1 }
  0x92   : > { %v1386_v6 = vpop.eup %1385  ;;  %v874_v3 = vmul.f32 %v1384_v2, %v519_v33  ;;  %vm879_vm14 = vweird.f32 %v1384_v2  ;;  %vm893_vm15 = vweird.f32 %v520_v61  ;;  %vm908_vm0 = vweird.f32 %v521_v62 }
  0x93   : > { %v2136_v9 = vadd.f32 1.0, %v1386_v6  ;;  %v490_v21 = vmul.f32 1.442695, %v429_v4  ;;  %v430_v55 = vsub.f32 0.0, %v398_v19  ;;  %vm2143_vm1 = vmor %vm878_vm12, %vm879_vm14  ;;  %vm2147_vm2 = vcmp.eq.f32.partialorder %v897_v25, 8.507059e+37 }
  0x94   : > { %v1388_v7 = vpop.eup %1387  ;;  %v875_v12 = vsub.f32 1.0, %v874_v3  ;;  %v900_v32 = vor.u32 1.1754944e-38, %v899_v8  ;;  %v914_v28 = vand.u32 2147483648, %v521_v62  ;;  %vm2151_vm4 = vcmp.eq.f32.partialorder %v912_v16, 8.507059e+37 }
  0x95   : > { %1393 = vrcp.f32 %v2136_v9  ;;  %v2140_v15 = vadd.f32 1.0, %v1388_v7  ;;  %v929_v37 = vand.u32 2147483648, %v2136_v9  ;;  %v492_v39 = vmul.f32 1.442695, %v430_v55 }
  0x96   : > { %v1390_v20 = vpop.eup %1389  ;;  %v876_v26 = vmul.f32 %v1384_v2, %v875_v12  ;;  %1395 = vpow2.f32 %v488_v11  ;;  %v915_v42 = vor.u32 1.1754944e-38, %v914_v28  ;;  %v399_v43 = vadd.f32 %v2074_v14, %v363_v0 }
  0x97   : > { %v1392_v29 = vpop.eup %1391  ;;  %v889_v22 = vmul.f32 %v1390_v20, %v520_v61  ;;  %1397 = vrcp.f32 %v2140_v15  ;;  %vm894_vm3 = vweird.f32 %v1390_v20  ;;  %vm923_vm7 = vweird.f32 %v2136_v9 }
  0x98   : > { %v877_v34 = vadd.f32 %v1384_v2, %v876_v26  ;;  %v904_v23 = vmul.f32 %v1392_v29, %v521_v62  ;;  %vm909_vm5 = vweird.f32 %v1392_v29  ;;  %1399 = vpow2.f32 %v490_v21  ;;  %vm2164_vm6 = vmor %vm893_vm15, %vm894_vm3 }
  0x99   : > { %v890_v36 = vsub.f32 1.0, %v889_v22  ;;  %1401 = vpow2.f32 %v492_v39  ;;  %vm2172_vm8 = vmor %vm908_vm0, %vm909_vm5  ;;  %v927_v14 = vand.u32 2147483647, %v2136_v9  ;;  %v930_v13 = vor.u32 1.1754944e-38, %v929_v37 }
  0x9a   : > { %v881_v24 = vsel %vm2143_vm1, %v1384_v2, %v877_v34  ;;  %v905_v38 = vsub.f32 1.0, %v904_v23  ;;  %vm938_vm10 = vweird.f32 %v2140_v15  ;;  %v944_v54 = vand.u32 2147483648, %v2140_v15 }
  0x9b   : > { %v1394_v41 = vpop.eup %1393  ;;  %v886_v30 = vsel %vm2131_vm13, %v885_v18, %v881_v24  ;;  %v891_v5 = vmul.f32 %v1390_v20, %v890_v36  ;;  %v431_v59 = vsub.f32 0.0, %v399_v43  ;;  %v942_v63 = vand.u32 2147483647, %v2140_v15 }
  0x9c   : > { %v1396_v40 = vpop.eup %1395  ;;  %1031 = vst [vmem:[%s1625_s28 + $0xb8] sm:$0xff] %v886_v30  ;;  %v906_v47 = vmul.f32 %v1392_v29, %v905_v38  ;;  %v919_v33 = vmul.f32 %v1394_v41, %v2136_v9  ;;  %vm924_vm9 = vweird.f32 %v1394_v41  ;;  %vm928_vm13 = vcmp.eq.f32.partialorder %v927_v14, 8.507059e+37 }
  0x9d   : > { %v892_v45 = vadd.f32 %v1390_v20, %v891_v5  ;;  %v524_v50 = vadd.f32 1.0, %v1396_v40  ;;  %v1398_v46 = vpop.eup %1397  ;;  %vm2191_vm11 = vmor %vm923_vm7, %vm924_vm9  ;;  %v945_v0 = vor.u32 1.1754944e-38, %v944_v54  ;;  %v494_v25 = vmul.f32 1.442695, %v431_v59 }
  0x9e   : > { %v907_v51 = vadd.f32 %v1392_v29, %v906_v47  ;;  %v920_v49 = vsub.f32 1.0, %v919_v33  ;;  %v934_v53 = vmul.f32 %v1398_v46, %v2140_v15  ;;  %v1400_v56 = vpop.eup %1399  ;;  %vm939_vm12 = vweird.f32 %v1398_v46 }
  0x9f   : > { %v896_v52 = vsel %vm2164_vm6, %v1390_v20, %v892_v45  ;;  %1403 = vrcp.f32 %v524_v50  ;;  %v1402_v1 = vpop.eup %1401  ;;  %v525_v4 = vadd.f32 1.0, %v1400_v56  ;;  %vm2201_vm14 = vmor %vm938_vm10, %vm939_vm12  ;;  %vm943_vm15 = vcmp.eq.f32.partialorder %v942_v63, 8.507059e+37 }
  0xa0   : > { %v901_v57 = vsel %vm2147_vm2, %v900_v32, %v896_v52  ;;  %v911_v17 = vsel %vm2172_vm8, %v1392_v29, %v907_v51  ;;  %v921_v58 = vmul.f32 %v1394_v41, %v920_v49  ;;  %v935_v62 = vsub.f32 1.0, %v934_v53 }
  0xa1   : > { %1032 = vst [vmem:[%s1625_s28 + $0xc0] sm:$0xff] %v901_v57  ;;  %v916_v60 = vsel %vm2151_vm4, %v915_v42, %v911_v17  ;;  %v526_v3 = vadd.f32 1.0, %v1402_v1  ;;  %1405 = vrcp.f32 %v525_v4  ;;  %vm953_vm0 = vweird.f32 %v524_v50 }
  0xa2   : > { %1033 = vst [vmem:[%s1625_s28 + $0xc8] sm:$0xff] %v916_v60  ;;  %v922_v2 = vadd.f32 %v1394_v41, %v921_v58  ;;  %v936_v6 = vmul.f32 %v1398_v46, %v935_v62  ;;  %v957_v16 = vand.u32 2147483647, %v524_v50  ;;  %v959_v19 = vand.u32 2147483648, %v524_v50 }
  0xa3   : > { %1407 = vrcp.f32 %v526_v3  ;;  %vm968_vm3 = vweird.f32 %v525_v4  ;;  %v972_v28 = vand.u32 2147483647, %v525_v4  ;;  %v974_v34 = vand.u32 2147483648, %v525_v4 }
  0xa4   : > { %v926_v10 = vsel %vm2191_vm11, %v1394_v41, %v922_v2  ;;  %v937_v11 = vadd.f32 %v1398_v46, %v936_v6  ;;  %1409 = vpow2.f32 %v494_v25  ;;  %vm2213_vm4 = vcmp.eq.f32.partialorder %v957_v16, 8.507059e+37 }
  0xa5   : > { %v1404_v8 = vpop.eup %1403  ;;  %v931_v9 = vsel %vm928_vm13, %v930_v13, %v926_v10  ;;  %v960_v22 = vor.u32 1.1754944e-38, %v959_v19  ;;  %vm983_vm6 = vweird.f32 %v526_v3  ;;  %v989_v36 = vand.u32 2147483648, %v526_v3 }
  0xa6   : > { %1034 = vst [vmem:[%s1625_s28 + $0xd0] sm:$0xff] %v931_v9  ;;  %v949_v7 = vmul.f32 %v1404_v8, %v524_v50  ;;  %v941_v12 = vsel %vm2201_vm14, %v1398_v46, %v937_v11  ;;  %vm954_vm1 = vweird.f32 %v1404_v8  ;;  %v987_v39 = vand.u32 2147483647, %v526_v3 }
  0xa7   : > { %v946_v21 = vsel %vm943_vm15, %v945_v0, %v941_v12  ;;  %v1406_v26 = vpop.eup %1405  ;;  %vm2209_vm2 = vmor %vm953_vm0, %vm954_vm1  ;;  %v975_v42 = vor.u32 1.1754944e-38, %v974_v34  ;;  %vm973_vm9 = vcmp.eq.f32.partialorder %v972_v28, 8.507059e+37  ;;  %v990_v44 = vor.u32 1.1754944e-38, %v989_v36 }
  0xa8   : > { %v950_v20 = vsub.f32 1.0, %v949_v7  ;;  %1035 = vst [vmem:[%s1625_s28 + $0xd8] sm:$0xff] %v946_v21  ;;  %v964_v31 = vmul.f32 %v1406_v26, %v525_v4  ;;  %vm969_vm5 = vweird.f32 %v1406_v26  ;;  %vm988_vm11 = vcmp.eq.f32.partialorder %v987_v39, 8.507059e+37 }
  0xa9   : > { %v1408_v55 = vpop.eup %1407  ;;  %vm970_vm8 = vmor %vm968_vm3, %vm969_vm5 }
  0xaa   : > { %v951_v15 = vmul.f32 %v1404_v8, %v950_v20  ;;  %v979_v23 = vmul.f32 %v1408_v55, %v526_v3  ;;  %v965_v35 = vsub.f32 1.0, %v964_v31  ;;  %v1410_v37 = vpop.eup %1409  ;;  %vm984_vm7 = vweird.f32 %v1408_v55 }
  0xab   : > { %v527_v5 = vadd.f32 1.0, %v1410_v37  ;;  %vm985_vm10 = vmor %vm983_vm6, %vm984_vm7 }
  0xac   : > { %v952_v32 = vadd.f32 %v1404_v8, %v951_v15  ;;  %v980_v38 = vsub.f32 1.0, %v979_v23  ;;  %v966_v30 = vmul.f32 %v1406_v26, %v965_v35 }
  0xad   : > { %1411 = vrcp.f32 %v527_v5  ;;  %v1004_v46 = vand.u32 2147483648, %v527_v5  ;;  %vm998_vm12 = vweird.f32 %v527_v5  ;;  %v1002_v49 = vand.u32 2147483647, %v527_v5 }
  0xae   : > { %v956_v24 = vsel %vm2209_vm2, %v1404_v8, %v952_v32  ;;  %v981_v43 = vmul.f32 %v1408_v55, %v980_v38  ;;  %v967_v40 = vadd.f32 %v1406_v26, %v966_v30 }
  0xaf   : > { %v961_v41 = vsel %vm2213_vm4, %v960_v22, %v956_v24  ;;  %v1005_v53 = vor.u32 1.1754944e-38, %v1004_v46  ;;  %vm1003_vm15 = vcmp.eq.f32.partialorder %v1002_v49, 8.507059e+37 }
  0xb0   : > { %1036 = vst [vmem:[%s1625_s28 + $0xe0] sm:$0xff] %v961_v41  ;;  %v982_v47 = vadd.f32 %v1408_v55, %v981_v43  ;;  %v971_v33 = vsel %vm970_vm8, %v1406_v26, %v967_v40 }
  0xb1   : > { %v976_v45 = vsel %vm973_vm9, %v975_v42, %v971_v33 }
  0xb2   : > { %v986_v48 = vsel %vm985_vm10, %v1408_v55, %v982_v47  ;;  %1037 = vst [vmem:[%s1625_s28 + $0xe8] sm:$0xff] %v976_v45 }
  0xb3   : > { %v991_v14 = vsel %vm988_vm11, %v990_v44, %v986_v48  ;;  %v1412_v13 = vpop.eup %1411 }
  0xb4   : > { %1038 = vst [vmem:[%s1625_s28 + $0xf0] sm:$0xff] %v991_v14  ;;  %v994_v50 = vmul.f32 %v1412_v13, %v527_v5  ;;  %vm999_vm13 = vweird.f32 %v1412_v13 }
  0xb5   : > { %vm1000_vm14 = vmor %vm998_vm12, %vm999_vm13 }
  0xb6   : > { %v995_v51 = vsub.f32 1.0, %v994_v50 }
  0xb8   : > { %v996_v52 = vmul.f32 %v1412_v13, %v995_v51 }
  0xba   : > { %v997_v54 = vadd.f32 %v1412_v13, %v996_v52 }
  0xbc   : > { %v1001_v56 = vsel %vm1000_vm14, %v1412_v13, %v997_v54 }
  0xbd   : > { %v1006_v57 = vsel %vm1003_vm15, %v1005_v53, %v1001_v56 }
  0xbe   : > { %1039 = vst [vmem:[%s1625_s28 + $0xf8] sm:$0xff] %v1006_v57 }
  0xbf PF: > { %s13_s14 = sadd.s32 1, %s1437_s14   ;;  %s2347_s12 = smov %s1433_s13 }
  0xc0   : > { %p10_p5 = scmp.ge.s32.totalorder %s13_s14, 10   ;;  %s2348_s13 = smov %s2350_s15 }
  0xc2   :  { %12 = sbr.rel (!%p10_p5) target bundleno = 2 (0x2), region = 68 }

</bundles_post_ra>
